<compile_context>
chip_gen: v7x
topology: tpu7x:2x2x1
jax: 0.10.0
libtpu: 0.0.40
codegen_flags: <defaults>
</compile_context>

<pallas_src>
import functools

import jax
import jax.numpy as jnp
from jax import lax
from jax.experimental import pallas as pl
from jax.experimental.pallas import tpu as pltpu

# ----- module hyper-parameters (from the PyTorch source) -----
N_EMBD = 768
NUM_HEADS = 12
HEAD_SIZE = N_EMBD // NUM_HEADS   # 64


# ---------------------------------------------------------------------------
# Fused kernel: one batch element = fused QKV + 12 causal heads + projection.
# ---------------------------------------------------------------------------
def _mha_kernel(x_ref, wqkv_ref, wproj_ref, b_ref, o_ref, cat_ref, *, tq):
    # x_ref    : (1, T, C)           input activations (any float dtype)
    # wqkv_ref : (C, 3*H*D) bf16     query part pre-scaled by D**-0.5
    # wproj_ref: (C, C)     bf16
    # b_ref    : (1, C)     f32
    # o_ref    : (1, T, C)           same dtype as x
    # cat_ref  : (T, C)     bf16     VMEM scratch holding concatenated heads
    T = x_ref.shape[1]
    HD = NUM_HEADS * HEAD_SIZE                     # 768 == N_EMBD
    D = HEAD_SIZE

    x = x_ref[0].astype(jnp.bfloat16)              # (T, C) bf16 for MXU

    # Fused QKV projection for all heads: one big MXU matmul, f32 accumulation,
    # then ONE lane-dense bf16 cast (sliced per head below).
    qkv = jnp.dot(x, wqkv_ref[...], preferred_element_type=jnp.float32)
    qkv_b = qkv.astype(jnp.bfloat16)               # (T, 3*H*D) bf16
    q_all = qkv_b[:, 0 * HD:1 * HD]
    k_all = qkv_b[:, 1 * HD:2 * HD]
    v_all = qkv_b[:, 2 * HD:3 * HD]

    num_q_tiles = T // tq
    for qi in range(num_q_tiles):                  # static unroll: shapes vary
        q_lo = qi * tq
        kv_len = q_lo + tq                         # causal: skip masked KV tiles
        # Causal mask for this (tq, kv_len) tile, hoisted out of the head loop.
        row = lax.broadcasted_iota(jnp.int32, (tq, kv_len), 0) + q_lo
        col = lax.broadcasted_iota(jnp.int32, (tq, kv_len), 1)
        causal = col <= row

        for h in range(NUM_HEADS):
            lo = h * D
            q_h = q_all[q_lo:q_lo + tq, lo:lo + D]     # (tq, D) bf16
            k_h = k_all[:kv_len, lo:lo + D]            # (kv_len, D) bf16
            v_h = v_all[:kv_len, lo:lo + D]            # (kv_len, D) bf16

            # q @ k^T via dot_general contracting the D axes (no transpose
            # temp); 1/sqrt(D) already folded into the query weights.
            scores = lax.dot_general(
                q_h, k_h, (((1,), (1,)), ((), ())),
                preferred_element_type=jnp.float32)    # (tq, kv_len) f32
            scores = jnp.where(causal, scores, -jnp.inf)

            # Numerically-stable softmax in f32; EUP reciprocal for the divide.
            m = jnp.max(scores, axis=-1, keepdims=True)
            p = jnp.exp(scores - m)
            wei = p * pl.reciprocal(jnp.sum(p, axis=-1, keepdims=True),
                                    approx=True)

            pv = jnp.dot(wei.astype(jnp.bfloat16), v_h,
                         preferred_element_type=jnp.float32)   # (tq, D) f32
            # Write straight into the bf16 concat scratch at the head's lanes.
            cat_ref[q_lo:q_lo + tq, lo:lo + D] = pv.astype(jnp.bfloat16)

    # ONE projection matmul over the concatenated heads + bias, lane-dense
    # (T, 768) HBM store.
    out = jnp.dot(cat_ref[...], wproj_ref[...],
                  preferred_element_type=jnp.float32)          # (T, C) f32
    out = out + b_ref[...]
    o_ref[0] = out.astype(o_ref.dtype)


# ---------------------------------------------------------------------------
# Wrapper + one-time parameter preparation.
# ---------------------------------------------------------------------------
def prepare_params(params):
    """One-time weight prep: stack per-head QKV weights into (C, 3*H*D),
    fold the attention scale into Wq, and pre-cast weights to bf16."""
    H, C, D = params["wq"].shape
    scale = D ** -0.5
    wq = (params["wq"] * scale).transpose(1, 0, 2).reshape(C, H * D)
    wk = params["wk"].transpose(1, 0, 2).reshape(C, H * D)
    wv = params["wv"].transpose(1, 0, 2).reshape(C, H * D)
    return {
        "wqkv": jnp.concatenate([wq, wk, wv], axis=-1).astype(jnp.bfloat16),
        "wproj": params["wproj"].astype(jnp.bfloat16),
        "bproj": params["bproj"].astype(jnp.float32),
    }


@functools.partial(jax.jit, static_argnames=("tq",))
def multi_head_attention(x, wqkv, wproj, bproj, *, tq=128):
    B, T, C = x.shape
    K3 = wqkv.shape[1]                       # 3 * H * D
    tq_eff = min(tq, T)
    if T % tq_eff != 0:                      # fallback: single query tile
        tq_eff = T

    # Advisory cost estimate (causal skipping halves the attention portion).
    attn_flops = NUM_HEADS * 2 * (2 * T * T * HEAD_SIZE) // 2
    cost = pl.CostEstimate(
        flops=B * (2 * T * C * K3 + attn_flops + 2 * T * C * C),
        transcendentals=B * NUM_HEADS * T * T // 2,
        bytes_accessed=(wqkv.size * wqkv.dtype.itemsize
                        + wproj.size * wproj.dtype.itemsize
                        + bproj.size * bproj.dtype.itemsize
                        + 2 * B * T * C * x.dtype.itemsize),
    )

    return pl.pallas_call(
        functools.partial(_mha_kernel, tq=tq_eff),
        out_shape=jax.ShapeDtypeStruct((B, T, C), x.dtype),
        grid_spec=pltpu.PrefetchScalarGridSpec(
            num_scalar_prefetch=0,
            grid=(B,),
            in_specs=[
                # per-batch activation block
                pl.BlockSpec((1, T, C), lambda b: (b, 0, 0)),
                # resident weights: constant index_map -> single-buffer them
                pl.BlockSpec((C, K3), lambda b: (0, 0),
                             pipeline_mode=pl.Buffered(1)),
                pl.BlockSpec((C, C), lambda b: (0, 0),
                             pipeline_mode=pl.Buffered(1)),
                pl.BlockSpec((1, C), lambda b: (0, 0)),
            ],
            out_specs=pl.BlockSpec((1, T, C), lambda b: (b, 0, 0)),
            scratch_shapes=[pltpu.VMEM((T, C), jnp.bfloat16)],  # head concat
        ),
        compiler_params=pltpu.CompilerParams(
            dimension_semantics=("parallel",),
            vmem_limit_bytes=40 * 1024 * 1024),
        cost_estimate=cost,
    )(x, wqkv, wproj, bproj)


# ---------------------------------------------------------------------------
# Pure-JAX reference (mirrors the PyTorch forward, dropout in eval mode).
# ---------------------------------------------------------------------------
def reference(x, params):
    B, T, C = x.shape
    H, _, D = params["wq"].shape
    q = jnp.einsum("btc,hcd->bhtd", x, params["wq"])
    k = jnp.einsum("btc,hcd->bhtd", x, params["wk"])
    v = jnp.einsum("btc,hcd->bhtd", x, params["wv"])
    scores = jnp.einsum("bhtd,bhsd->bhts", q, k) * (D ** -0.5)
    mask = jnp.tril(jnp.ones((T, T), dtype=bool))
    scores = jnp.where(mask, scores, -jnp.inf)
    wei = jax.nn.softmax(scores, axis=-1)
    out = jnp.einsum("bhts,bhsd->bhtd", wei, v)
    out = out.transpose(0, 2, 1, 3).reshape(B, T, H * D)
    return out @ params["wproj"] + params["bproj"]


if __name__ == "__main__":
    key = jax.random.PRNGKey(0)
    k_x, k_q, k_k, k_v, k_p, k_b = jax.random.split(key, 6)

    # Deterministic synthetic parameters (shapes match the torch module,
    # pre-transposed so the kernel does x @ W).
    params = {
        "wq": 0.02 * jax.random.normal(k_q, (NUM_HEADS, N_EMBD, HEAD_SIZE), jnp.float32),
        "wk": 0.02 * jax.random.normal(k_k, (NUM_HEADS, N_EMBD, HEAD_SIZE), jnp.float32),
        "wv": 0.02 * jax.random.normal(k_v, (NUM_HEADS, N_EMBD, HEAD_SIZE), jnp.float32),
        "wproj": 0.02 * jax.random.normal(k_p, (N_EMBD, N_EMBD), jnp.float32),
        "bproj": 0.02 * jax.random.normal(k_b, (1, N_EMBD), jnp.float32),
    }
    prep = prepare_params(params)

    # Validate at a small T and at the module's full block_size (T=256).
    x = None
    for (B, T) in [(2, 8), (2, 256)]:
        x = jax.random.normal(jax.random.fold_in(k_x, T), (B, T, N_EMBD), jnp.float32)
        y = jax.block_until_ready(
            multi_head_attention(x, prep["wqkv"], prep["wproj"], prep["bproj"]))
        y_ref = reference(x, params)
        assert y.shape == (B, T, N_EMBD)
        # bf16 MXU operands with f32 accumulation -> loosened tolerance.
        max_err = float(jnp.max(jnp.abs(y - y_ref)))
        assert jnp.allclose(y, y_ref, atol=2e-2, rtol=2e-2), (
            f"mismatch vs reference at T={T}: max abs err {max_err:.3e}")

    # Smoke-test bf16 activation I/O (halves HBM traffic on v6e/v5e).
    x_bf = x.astype(jnp.bfloat16)
    y_bf = jax.block_until_ready(
        multi_head_attention(x_bf, prep["wqkv"], prep["wproj"], prep["bproj"]))
    assert y_bf.shape == x.shape and y_bf.dtype == jnp.bfloat16
    assert bool(jnp.isfinite(y_bf.astype(jnp.float32)).all())

    print("KERNEL_OK")
</pallas_src>

<mosaic_0001>
module attributes {stable_mosaic.version = 11 : i64} {
  func.func @_mha_kernel(%arg0: i32, %arg1: memref<1x8x768xf32, #tpu.memory_space<vmem>>, %arg2: memref<768x2304xbf16, #tpu.memory_space<vmem>>, %arg3: memref<768x768xbf16, #tpu.memory_space<vmem>>, %arg4: memref<1x768xf32, #tpu.memory_space<vmem>>, %arg5: memref<1x8x768xf32, #tpu.memory_space<vmem>>, %arg6: memref<8x768xbf16, #tpu.memory_space<vmem>>) attributes {dimension_semantics = [#tpu.dimension_semantics<parallel>], iteration_bounds = array<i64: 2>, scalar_prefetch = 0 : i64, scratch_operands = 1 : i64, tpu.core_type = #tpu.core_type<tc>, window_params = [{transform_indices = @transform_0, window_bounds = array<i64: 1, 8, 768>}, {pipeline_mode = #tpu.pipeline_mode<synchronous>, transform_indices = @transform_1, window_bounds = array<i64: 768, 2304>}, {pipeline_mode = #tpu.pipeline_mode<synchronous>, transform_indices = @transform_2, window_bounds = array<i64: 768, 768>}, {pipeline_mode = #tpu.pipeline_mode<synchronous>, transform_indices = @transform_3, window_bounds = array<i64: 1, 768>}, {transform_indices = @transform_4, window_bounds = array<i64: 1, 8, 768>}]} {
    %c0 = arith.constant 0 : index
    %c0_0 = arith.constant 0 : index
    %c0_1 = arith.constant 0 : index
    %0 = vector.load %arg1[%c0, %c0_0, %c0_1] : memref<1x8x768xf32, #tpu.memory_space<vmem>>, vector<1x8x768xf32>
    %1 = vector.shape_cast %0 : vector<1x8x768xf32> to vector<8x768xf32>
    %2 = arith.truncf %1 : vector<8x768xf32> to vector<8x768xbf16>
    %c0_2 = arith.constant 0 : index
    %c0_3 = arith.constant 0 : index
    %3 = vector.load %arg2[%c0_2, %c0_3] : memref<768x2304xbf16, #tpu.memory_space<vmem>>, vector<768x2304xbf16>
    %cst = arith.constant dense<0.000000e+00> : vector<8x2304xf32>
    %4 = tpu.matmul %2, %3, %cst {dimension_numbers = #tpu.dot_dimension_numbers<[1], [0], [0], [1], [0, 0, 1, 1], [], []>} : vector<8x768xbf16>, vector<768x2304xbf16>, vector<8x2304xf32> -> vector<8x2304xf32>
    %5 = arith.truncf %4 : vector<8x2304xf32> to vector<8x2304xbf16>
    %6 = vector.extract_strided_slice %5 {offsets = [0, 0], sizes = [8, 768], strides = [1, 1]} : vector<8x2304xbf16> to vector<8x768xbf16>
    %7 = vector.extract_strided_slice %5 {offsets = [0, 768], sizes = [8, 768], strides = [1, 1]} : vector<8x2304xbf16> to vector<8x768xbf16>
    %8 = vector.extract_strided_slice %5 {offsets = [0, 1536], sizes = [8, 768], strides = [1, 1]} : vector<8x2304xbf16> to vector<8x768xbf16>
    %9 = tpu.iota {dimensions = array<i32: 0>} : vector<8x8xi32>
    %c0_i32 = arith.constant 0 : i32
    %10 = vector.broadcast %c0_i32 : i32 to vector<8x8xi32>
    %11 = arith.addi %9, %10 : vector<8x8xi32>
    %12 = tpu.iota {dimensions = array<i32: 1>} : vector<8x8xi32>
    %13 = arith.cmpi sle, %12, %11 : vector<8x8xi32>
    %14 = vector.extract_strided_slice %6 {offsets = [0, 0], sizes = [8, 64], strides = [1, 1]} : vector<8x768xbf16> to vector<8x64xbf16>
    %15 = vector.extract_strided_slice %7 {offsets = [0, 0], sizes = [8, 64], strides = [1, 1]} : vector<8x768xbf16> to vector<8x64xbf16>
    %16 = vector.extract_strided_slice %8 {offsets = [0, 0], sizes = [8, 64], strides = [1, 1]} : vector<8x768xbf16> to vector<8x64xbf16>
    %cst_4 = arith.constant dense<0.000000e+00> : vector<8x8xf32>
    %17 = tpu.matmul %14, %15, %cst_4 {dimension_numbers = #tpu.dot_dimension_numbers<[1], [1], [0], [0], [0, 0, 1, 0], [], []>} : vector<8x64xbf16>, vector<8x64xbf16>, vector<8x8xf32> -> vector<8x8xf32>
    %cst_5 = arith.constant 0xFF800000 : f32
    %18 = vector.broadcast %cst_5 : f32 to vector<8x8xf32>
    %19 = arith.select %13, %17, %18 : vector<8x8xi1>, vector<8x8xf32>
    %cst_6 = arith.constant dense<0xFF800000> : vector<8xf32>
    %20 = vector.multi_reduction <maximumf>, %19, %cst_6 [1] : vector<8x8xf32> to vector<8xf32>
    %21 = vector.shape_cast %20 : vector<8xf32> to vector<8x1xf32>
    %22 = vector.broadcast %21 : vector<8x1xf32> to vector<8x8xf32>
    %23 = arith.subf %19, %22 : vector<8x8xf32>
    %24 = math.exp %23 : vector<8x8xf32>
    %cst_7 = arith.constant dense<0.000000e+00> : vector<8xf32>
    %25 = vector.multi_reduction <add>, %24, %cst_7 [1] : vector<8x8xf32> to vector<8xf32>
    %26 = vector.shape_cast %25 : vector<8xf32> to vector<8x1xf32>
    %27 = tpu.reciprocal %26 {approx = true} : vector<8x1xf32> -> vector<8x1xf32>
    %28 = vector.broadcast %27 : vector<8x1xf32> to vector<8x8xf32>
    %29 = arith.mulf %24, %28 : vector<8x8xf32>
    %30 = arith.truncf %29 : vector<8x8xf32> to vector<8x8xbf16>
    %cst_8 = arith.constant dense<0.000000e+00> : vector<8x64xf32>
    %31 = tpu.matmul %30, %16, %cst_8 {dimension_numbers = #tpu.dot_dimension_numbers<[1], [0], [0], [1], [0, 0, 1, 1], [], []>} : vector<8x8xbf16>, vector<8x64xbf16>, vector<8x64xf32> -> vector<8x64xf32>
    %32 = arith.truncf %31 : vector<8x64xf32> to vector<8x64xbf16>
    %c0_9 = arith.constant 0 : index
    %c0_10 = arith.constant 0 : index
    %33 = vector.load %arg6[%c0_9, %c0_10] : memref<8x768xbf16, #tpu.memory_space<vmem>>, vector<8x64xbf16>
    tpu.vector_store %arg6[%c0_9, %c0_10], %32 {strides = array<i32>} : memref<8x768xbf16, #tpu.memory_space<vmem>>, vector<8x64xbf16>,
    %34 = vector.extract_strided_slice %6 {offsets = [0, 64], sizes = [8, 64], strides = [1, 1]} : vector<8x768xbf16> to vector<8x64xbf16>
    %35 = vector.extract_strided_slice %7 {offsets = [0, 64], sizes = [8, 64], strides = [1, 1]} : vector<8x768xbf16> to vector<8x64xbf16>
    %36 = vector.extract_strided_slice %8 {offsets = [0, 64], sizes = [8, 64], strides = [1, 1]} : vector<8x768xbf16> to vector<8x64xbf16>
    %cst_11 = arith.constant dense<0.000000e+00> : vector<8x8xf32>
    %37 = tpu.matmul %34, %35, %cst_11 {dimension_numbers = #tpu.dot_dimension_numbers<[1], [1], [0], [0], [0, 0, 1, 0], [], []>} : vector<8x64xbf16>, vector<8x64xbf16>, vector<8x8xf32> -> vector<8x8xf32>
    %cst_12 = arith.constant 0xFF800000 : f32
    %38 = vector.broadcast %cst_12 : f32 to vector<8x8xf32>
    %39 = arith.select %13, %37, %38 : vector<8x8xi1>, vector<8x8xf32>
    %cst_13 = arith.constant dense<0xFF800000> : vector<8xf32>
    %40 = vector.multi_reduction <maximumf>, %39, %cst_13 [1] : vector<8x8xf32> to vector<8xf32>
    %41 = vector.shape_cast %40 : vector<8xf32> to vector<8x1xf32>
    %42 = vector.broadcast %41 : vector<8x1xf32> to vector<8x8xf32>
    %43 = arith.subf %39, %42 : vector<8x8xf32>
    %44 = math.exp %43 : vector<8x8xf32>
    %cst_14 = arith.constant dense<0.000000e+00> : vector<8xf32>
    %45 = vector.multi_reduction <add>, %44, %cst_14 [1] : vector<8x8xf32> to vector<8xf32>
    %46 = vector.shape_cast %45 : vector<8xf32> to vector<8x1xf32>
    %47 = tpu.reciprocal %46 {approx = true} : vector<8x1xf32> -> vector<8x1xf32>
    %48 = vector.broadcast %47 : vector<8x1xf32> to vector<8x8xf32>
    %49 = arith.mulf %44, %48 : vector<8x8xf32>
    %50 = arith.truncf %49 : vector<8x8xf32> to vector<8x8xbf16>
    %cst_15 = arith.constant dense<0.000000e+00> : vector<8x64xf32>
    %51 = tpu.matmul %50, %36, %cst_15 {dimension_numbers = #tpu.dot_dimension_numbers<[1], [0], [0], [1], [0, 0, 1, 1], [], []>} : vector<8x8xbf16>, vector<8x64xbf16>, vector<8x64xf32> -> vector<8x64xf32>
    %52 = arith.truncf %51 : vector<8x64xf32> to vector<8x64xbf16>
    %c0_16 = arith.constant 0 : index
    %c64 = arith.constant 64 : index
    %53 = vector.load %arg6[%c0_16, %c64] : memref<8x768xbf16, #tpu.memory_space<vmem>>, vector<8x64xbf16>
    tpu.vector_store %arg6[%c0_16, %c64], %52 {strides = array<i32>} : memref<8x768xbf16, #tpu.memory_space<vmem>>, vector<8x64xbf16>,
    %54 = vector.extract_strided_slice %6 {offsets = [0, 128], sizes = [8, 64], strides = [1, 1]} : vector<8x768xbf16> to vector<8x64xbf16>
    %55 = vector.extract_strided_slice %7 {offsets = [0, 128], sizes = [8, 64], strides = [1, 1]} : vector<8x768xbf16> to vector<8x64xbf16>
    %56 = vector.extract_strided_slice %8 {offsets = [0, 128], sizes = [8, 64], strides = [1, 1]} : vector<8x768xbf16> to vector<8x64xbf16>
    %cst_17 = arith.constant dense<0.000000e+00> : vector<8x8xf32>
    %57 = tpu.matmul %54, %55, %cst_17 {dimension_numbers = #tpu.dot_dimension_numbers<[1], [1], [0], [0], [0, 0, 1, 0], [], []>} : vector<8x64xbf16>, vector<8x64xbf16>, vector<8x8xf32> -> vector<8x8xf32>
    %cst_18 = arith.constant 0xFF800000 : f32
    %58 = vector.broadcast %cst_18 : f32 to vector<8x8xf32>
    %59 = arith.select %13, %57, %58 : vector<8x8xi1>, vector<8x8xf32>
    %cst_19 = arith.constant dense<0xFF800000> : vector<8xf32>
    %60 = vector.multi_reduction <maximumf>, %59, %cst_19 [1] : vector<8x8xf32> to vector<8xf32>
    %61 = vector.shape_cast %60 : vector<8xf32> to vector<8x1xf32>
    %62 = vector.broadcast %61 : vector<8x1xf32> to vector<8x8xf32>
    %63 = arith.subf %59, %62 : vector<8x8xf32>
    %64 = math.exp %63 : vector<8x8xf32>
    %cst_20 = arith.constant dense<0.000000e+00> : vector<8xf32>
    %65 = vector.multi_reduction <add>, %64, %cst_20 [1] : vector<8x8xf32> to vector<8xf32>
    %66 = vector.shape_cast %65 : vector<8xf32> to vector<8x1xf32>
    %67 = tpu.reciprocal %66 {approx = true} : vector<8x1xf32> -> vector<8x1xf32>
    %68 = vector.broadcast %67 : vector<8x1xf32> to vector<8x8xf32>
    %69 = arith.mulf %64, %68 : vector<8x8xf32>
    %70 = arith.truncf %69 : vector<8x8xf32> to vector<8x8xbf16>
    %cst_21 = arith.constant dense<0.000000e+00> : vector<8x64xf32>
    %71 = tpu.matmul %70, %56, %cst_21 {dimension_numbers = #tpu.dot_dimension_numbers<[1], [0], [0], [1], [0, 0, 1, 1], [], []>} : vector<8x8xbf16>, vector<8x64xbf16>, vector<8x64xf32> -> vector<8x64xf32>
    %72 = arith.truncf %71 : vector<8x64xf32> to vector<8x64xbf16>
    %c0_22 = arith.constant 0 : index
    %c128 = arith.constant 128 : index
    %73 = vector.load %arg6[%c0_22, %c128] : memref<8x768xbf16, #tpu.memory_space<vmem>>, vector<8x64xbf16>
    tpu.vector_store %arg6[%c0_22, %c128], %72 {strides = array<i32>} : memref<8x768xbf16, #tpu.memory_space<vmem>>, vector<8x64xbf16>,
    %74 = vector.extract_strided_slice %6 {offsets = [0, 192], sizes = [8, 64], strides = [1, 1]} : vector<8x768xbf16> to vector<8x64xbf16>
    %75 = vector.extract_strided_slice %7 {offsets = [0, 192], sizes = [8, 64], strides = [1, 1]} : vector<8x768xbf16> to vector<8x64xbf16>
    %76 = vector.extract_strided_slice %8 {offsets = [0, 192], sizes = [8, 64], strides = [1, 1]} : vector<8x768xbf16> to vector<8x64xbf16>
    %cst_23 = arith.constant dense<0.000000e+00> : vector<8x8xf32>
    %77 = tpu.matmul %74, %75, %cst_23 {dimension_numbers = #tpu.dot_dimension_numbers<[1], [1], [0], [0], [0, 0, 1, 0], [], []>} : vector<8x64xbf16>, vector<8x64xbf16>, vector<8x8xf32> -> vector<8x8xf32>
    %cst_24 = arith.constant 0xFF800000 : f32
    %78 = vector.broadcast %cst_24 : f32 to vector<8x8xf32>
    %79 = arith.select %13, %77, %78 : vector<8x8xi1>, vector<8x8xf32>
    %cst_25 = arith.constant dense<0xFF800000> : vector<8xf32>
    %80 = vector.multi_reduction <maximumf>, %79, %cst_25 [1] : vector<8x8xf32> to vector<8xf32>
    %81 = vector.shape_cast %80 : vector<8xf32> to vector<8x1xf32>
    %82 = vector.broadcast %81 : vector<8x1xf32> to vector<8x8xf32>
    %83 = arith.subf %79, %82 : vector<8x8xf32>
    %84 = math.exp %83 : vector<8x8xf32>
    %cst_26 = arith.constant dense<0.000000e+00> : vector<8xf32>
    %85 = vector.multi_reduction <add>, %84, %cst_26 [1] : vector<8x8xf32> to vector<8xf32>
    %86 = vector.shape_cast %85 : vector<8xf32> to vector<8x1xf32>
    %87 = tpu.reciprocal %86 {approx = true} : vector<8x1xf32> -> vector<8x1xf32>
    %88 = vector.broadcast %87 : vector<8x1xf32> to vector<8x8xf32>
    %89 = arith.mulf %84, %88 : vector<8x8xf32>
    %90 = arith.truncf %89 : vector<8x8xf32> to vector<8x8xbf16>
    %cst_27 = arith.constant dense<0.000000e+00> : vector<8x64xf32>
    %91 = tpu.matmul %90, %76, %cst_27 {dimension_numbers = #tpu.dot_dimension_numbers<[1], [0], [0], [1], [0, 0, 1, 1], [], []>} : vector<8x8xbf16>, vector<8x64xbf16>, vector<8x64xf32> -> vector<8x64xf32>
    %92 = arith.truncf %91 : vector<8x64xf32> to vector<8x64xbf16>
    %c0_28 = arith.constant 0 : index
    %c192 = arith.constant 192 : index
    %93 = vector.load %arg6[%c0_28, %c192] : memref<8x768xbf16, #tpu.memory_space<vmem>>, vector<8x64xbf16>
    tpu.vector_store %arg6[%c0_28, %c192], %92 {strides = array<i32>} : memref<8x768xbf16, #tpu.memory_space<vmem>>, vector<8x64xbf16>,
    %94 = vector.extract_strided_slice %6 {offsets = [0, 256], sizes = [8, 64], strides = [1, 1]} : vector<8x768xbf16> to vector<8x64xbf16>
    %95 = vector.extract_strided_slice %7 {offsets = [0, 256], sizes = [8, 64], strides = [1, 1]} : vector<8x768xbf16> to vector<8x64xbf16>
    %96 = vector.extract_strided_slice %8 {offsets = [0, 256], sizes = [8, 64], strides = [1, 1]} : vector<8x768xbf16> to vector<8x64xbf16>
    %cst_29 = arith.constant dense<0.000000e+00> : vector<8x8xf32>
    %97 = tpu.matmul %94, %95, %cst_29 {dimension_numbers = #tpu.dot_dimension_numbers<[1], [1], [0], [0], [0, 0, 1, 0], [], []>} : vector<8x64xbf16>, vector<8x64xbf16>, vector<8x8xf32> -> vector<8x8xf32>
    %cst_30 = arith.constant 0xFF800000 : f32
    %98 = vector.broadcast %cst_30 : f32 to vector<8x8xf32>
    %99 = arith.select %13, %97, %98 : vector<8x8xi1>, vector<8x8xf32>
    %cst_31 = arith.constant dense<0xFF800000> : vector<8xf32>
    %100 = vector.multi_reduction <maximumf>, %99, %cst_31 [1] : vector<8x8xf32> to vector<8xf32>
    %101 = vector.shape_cast %100 : vector<8xf32> to vector<8x1xf32>
    %102 = vector.broadcast %101 : vector<8x1xf32> to vector<8x8xf32>
    %103 = arith.subf %99, %102 : vector<8x8xf32>
    %104 = math.exp %103 : vector<8x8xf32>
    %cst_32 = arith.constant dense<0.000000e+00> : vector<8xf32>
    %105 = vector.multi_reduction <add>, %104, %cst_32 [1] : vector<8x8xf32> to vector<8xf32>
    %106 = vector.shape_cast %105 : vector<8xf32> to vector<8x1xf32>
    %107 = tpu.reciprocal %106 {approx = true} : vector<8x1xf32> -> vector<8x1xf32>
    %108 = vector.broadcast %107 : vector<8x1xf32> to vector<8x8xf32>
    %109 = arith.mulf %104, %108 : vector<8x8xf32>
    %110 = arith.truncf %109 : vector<8x8xf32> to vector<8x8xbf16>
    %cst_33 = arith.constant dense<0.000000e+00> : vector<8x64xf32>
    %111 = tpu.matmul %110, %96, %cst_33 {dimension_numbers = #tpu.dot_dimension_numbers<[1], [0], [0], [1], [0, 0, 1, 1], [], []>} : vector<8x8xbf16>, vector<8x64xbf16>, vector<8x64xf32> -> vector<8x64xf32>
    %112 = arith.truncf %111 : vector<8x64xf32> to vector<8x64xbf16>
    %c0_34 = arith.constant 0 : index
    %c256 = arith.constant 256 : index
    %113 = vector.load %arg6[%c0_34, %c256] : memref<8x768xbf16, #tpu.memory_space<vmem>>, vector<8x64xbf16>
    tpu.vector_store %arg6[%c0_34, %c256], %112 {strides = array<i32>} : memref<8x768xbf16, #tpu.memory_space<vmem>>, vector<8x64xbf16>,
    %114 = vector.extract_strided_slice %6 {offsets = [0, 320], sizes = [8, 64], strides = [1, 1]} : vector<8x768xbf16> to vector<8x64xbf16>
    %115 = vector.extract_strided_slice %7 {offsets = [0, 320], sizes = [8, 64], strides = [1, 1]} : vector<8x768xbf16> to vector<8x64xbf16>
    %116 = vector.extract_strided_slice %8 {offsets = [0, 320], sizes = [8, 64], strides = [1, 1]} : vector<8x768xbf16> to vector<8x64xbf16>
    %cst_35 = arith.constant dense<0.000000e+00> : vector<8x8xf32>
    %117 = tpu.matmul %114, %115, %cst_35 {dimension_numbers = #tpu.dot_dimension_numbers<[1], [1], [0], [0], [0, 0, 1, 0], [], []>} : vector<8x64xbf16>, vector<8x64xbf16>, vector<8x8xf32> -> vector<8x8xf32>
    %cst_36 = arith.constant 0xFF800000 : f32
    %118 = vector.broadcast %cst_36 : f32 to vector<8x8xf32>
    %119 = arith.select %13, %117, %118 : vector<8x8xi1>, vector<8x8xf32>
    %cst_37 = arith.constant dense<0xFF800000> : vector<8xf32>
    %120 = vector.multi_reduction <maximumf>, %119, %cst_37 [1] : vector<8x8xf32> to vector<8xf32>
    %121 = vector.shape_cast %120 : vector<8xf32> to vector<8x1xf32>
    %122 = vector.broadcast %121 : vector<8x1xf32> to vector<8x8xf32>
    %123 = arith.subf %119, %122 : vector<8x8xf32>
    %124 = math.exp %123 : vector<8x8xf32>
    %cst_38 = arith.constant dense<0.000000e+00> : vector<8xf32>
    %125 = vector.multi_reduction <add>, %124, %cst_38 [1] : vector<8x8xf32> to vector<8xf32>
    %126 = vector.shape_cast %125 : vector<8xf32> to vector<8x1xf32>
    %127 = tpu.reciprocal %126 {approx = true} : vector<8x1xf32> -> vector<8x1xf32>
    %128 = vector.broadcast %127 : vector<8x1xf32> to vector<8x8xf32>
    %129 = arith.mulf %124, %128 : vector<8x8xf32>
    %130 = arith.truncf %129 : vector<8x8xf32> to vector<8x8xbf16>
    %cst_39 = arith.constant dense<0.000000e+00> : vector<8x64xf32>
    %131 = tpu.matmul %130, %116, %cst_39 {dimension_numbers = #tpu.dot_dimension_numbers<[1], [0], [0], [1], [0, 0, 1, 1], [], []>} : vector<8x8xbf16>, vector<8x64xbf16>, vector<8x64xf32> -> vector<8x64xf32>
    %132 = arith.truncf %131 : vector<8x64xf32> to vector<8x64xbf16>
    %c0_40 = arith.constant 0 : index
    %c320 = arith.constant 320 : index
    %133 = vector.load %arg6[%c0_40, %c320] : memref<8x768xbf16, #tpu.memory_space<vmem>>, vector<8x64xbf16>
    tpu.vector_store %arg6[%c0_40, %c320], %132 {strides = array<i32>} : memref<8x768xbf16, #tpu.memory_space<vmem>>, vector<8x64xbf16>,
    %134 = vector.extract_strided_slice %6 {offsets = [0, 384], sizes = [8, 64], strides = [1, 1]} : vector<8x768xbf16> to vector<8x64xbf16>
    %135 = vector.extract_strided_slice %7 {offsets = [0, 384], sizes = [8, 64], strides = [1, 1]} : vector<8x768xbf16> to vector<8x64xbf16>
    %136 = vector.extract_strided_slice %8 {offsets = [0, 384], sizes = [8, 64], strides = [1, 1]} : vector<8x768xbf16> to vector<8x64xbf16>
    %cst_41 = arith.constant dense<0.000000e+00> : vector<8x8xf32>
    %137 = tpu.matmul %134, %135, %cst_41 {dimension_numbers = #tpu.dot_dimension_numbers<[1], [1], [0], [0], [0, 0, 1, 0], [], []>} : vector<8x64xbf16>, vector<8x64xbf16>, vector<8x8xf32> -> vector<8x8xf32>
    %cst_42 = arith.constant 0xFF800000 : f32
    %138 = vector.broadcast %cst_42 : f32 to vector<8x8xf32>
    %139 = arith.select %13, %137, %138 : vector<8x8xi1>, vector<8x8xf32>
    %cst_43 = arith.constant dense<0xFF800000> : vector<8xf32>
    %140 = vector.multi_reduction <maximumf>, %139, %cst_43 [1] : vector<8x8xf32> to vector<8xf32>
    %141 = vector.shape_cast %140 : vector<8xf32> to vector<8x1xf32>
    %142 = vector.broadcast %141 : vector<8x1xf32> to vector<8x8xf32>
    %143 = arith.subf %139, %142 : vector<8x8xf32>
    %144 = math.exp %143 : vector<8x8xf32>
    %cst_44 = arith.constant dense<0.000000e+00> : vector<8xf32>
    %145 = vector.multi_reduction <add>, %144, %cst_44 [1] : vector<8x8xf32> to vector<8xf32>
    %146 = vector.shape_cast %145 : vector<8xf32> to vector<8x1xf32>
    %147 = tpu.reciprocal %146 {approx = true} : vector<8x1xf32> -> vector<8x1xf32>
    %148 = vector.broadcast %147 : vector<8x1xf32> to vector<8x8xf32>
    %149 = arith.mulf %144, %148 : vector<8x8xf32>
    %150 = arith.truncf %149 : vector<8x8xf32> to vector<8x8xbf16>
    %cst_45 = arith.constant dense<0.000000e+00> : vector<8x64xf32>
    %151 = tpu.matmul %150, %136, %cst_45 {dimension_numbers = #tpu.dot_dimension_numbers<[1], [0], [0], [1], [0, 0, 1, 1], [], []>} : vector<8x8xbf16>, vector<8x64xbf16>, vector<8x64xf32> -> vector<8x64xf32>
    %152 = arith.truncf %151 : vector<8x64xf32> to vector<8x64xbf16>
    %c0_46 = arith.constant 0 : index
    %c384 = arith.constant 384 : index
    %153 = vector.load %arg6[%c0_46, %c384] : memref<8x768xbf16, #tpu.memory_space<vmem>>, vector<8x64xbf16>
    tpu.vector_store %arg6[%c0_46, %c384], %152 {strides = array<i32>} : memref<8x768xbf16, #tpu.memory_space<vmem>>, vector<8x64xbf16>,
    %154 = vector.extract_strided_slice %6 {offsets = [0, 448], sizes = [8, 64], strides = [1, 1]} : vector<8x768xbf16> to vector<8x64xbf16>
    %155 = vector.extract_strided_slice %7 {offsets = [0, 448], sizes = [8, 64], strides = [1, 1]} : vector<8x768xbf16> to vector<8x64xbf16>
    %156 = vector.extract_strided_slice %8 {offsets = [0, 448], sizes = [8, 64], strides = [1, 1]} : vector<8x768xbf16> to vector<8x64xbf16>
    %cst_47 = arith.constant dense<0.000000e+00> : vector<8x8xf32>
    %157 = tpu.matmul %154, %155, %cst_47 {dimension_numbers = #tpu.dot_dimension_numbers<[1], [1], [0], [0], [0, 0, 1, 0], [], []>} : vector<8x64xbf16>, vector<8x64xbf16>, vector<8x8xf32> -> vector<8x8xf32>
    %cst_48 = arith.constant 0xFF800000 : f32
    %158 = vector.broadcast %cst_48 : f32 to vector<8x8xf32>
    %159 = arith.select %13, %157, %158 : vector<8x8xi1>, vector<8x8xf32>
    %cst_49 = arith.constant dense<0xFF800000> : vector<8xf32>
    %160 = vector.multi_reduction <maximumf>, %159, %cst_49 [1] : vector<8x8xf32> to vector<8xf32>
    %161 = vector.shape_cast %160 : vector<8xf32> to vector<8x1xf32>
    %162 = vector.broadcast %161 : vector<8x1xf32> to vector<8x8xf32>
    %163 = arith.subf %159, %162 : vector<8x8xf32>
    %164 = math.exp %163 : vector<8x8xf32>
    %cst_50 = arith.constant dense<0.000000e+00> : vector<8xf32>
    %165 = vector.multi_reduction <add>, %164, %cst_50 [1] : vector<8x8xf32> to vector<8xf32>
    %166 = vector.shape_cast %165 : vector<8xf32> to vector<8x1xf32>
    %167 = tpu.reciprocal %166 {approx = true} : vector<8x1xf32> -> vector<8x1xf32>
    %168 = vector.broadcast %167 : vector<8x1xf32> to vector<8x8xf32>
    %169 = arith.mulf %164, %168 : vector<8x8xf32>
    %170 = arith.truncf %169 : vector<8x8xf32> to vector<8x8xbf16>
    %cst_51 = arith.constant dense<0.000000e+00> : vector<8x64xf32>
    %171 = tpu.matmul %170, %156, %cst_51 {dimension_numbers = #tpu.dot_dimension_numbers<[1], [0], [0], [1], [0, 0, 1, 1], [], []>} : vector<8x8xbf16>, vector<8x64xbf16>, vector<8x64xf32> -> vector<8x64xf32>
    %172 = arith.truncf %171 : vector<8x64xf32> to vector<8x64xbf16>
    %c0_52 = arith.constant 0 : index
    %c448 = arith.constant 448 : index
    %173 = vector.load %arg6[%c0_52, %c448] : memref<8x768xbf16, #tpu.memory_space<vmem>>, vector<8x64xbf16>
    tpu.vector_store %arg6[%c0_52, %c448], %172 {strides = array<i32>} : memref<8x768xbf16, #tpu.memory_space<vmem>>, vector<8x64xbf16>,
    %174 = vector.extract_strided_slice %6 {offsets = [0, 512], sizes = [8, 64], strides = [1, 1]} : vector<8x768xbf16> to vector<8x64xbf16>
    %175 = vector.extract_strided_slice %7 {offsets = [0, 512], sizes = [8, 64], strides = [1, 1]} : vector<8x768xbf16> to vector<8x64xbf16>
    %176 = vector.extract_strided_slice %8 {offsets = [0, 512], sizes = [8, 64], strides = [1, 1]} : vector<8x768xbf16> to vector<8x64xbf16>
    %cst_53 = arith.constant dense<0.000000e+00> : vector<8x8xf32>
    %177 = tpu.matmul %174, %175, %cst_53 {dimension_numbers = #tpu.dot_dimension_numbers<[1], [1], [0], [0], [0, 0, 1, 0], [], []>} : vector<8x64xbf16>, vector<8x64xbf16>, vector<8x8xf32> -> vector<8x8xf32>
    %cst_54 = arith.constant 0xFF800000 : f32
    %178 = vector.broadcast %cst_54 : f32 to vector<8x8xf32>
    %179 = arith.select %13, %177, %178 : vector<8x8xi1>, vector<8x8xf32>
    %cst_55 = arith.constant dense<0xFF800000> : vector<8xf32>
    %180 = vector.multi_reduction <maximumf>, %179, %cst_55 [1] : vector<8x8xf32> to vector<8xf32>
    %181 = vector.shape_cast %180 : vector<8xf32> to vector<8x1xf32>
    %182 = vector.broadcast %181 : vector<8x1xf32> to vector<8x8xf32>
    %183 = arith.subf %179, %182 : vector<8x8xf32>
    %184 = math.exp %183 : vector<8x8xf32>
    %cst_56 = arith.constant dense<0.000000e+00> : vector<8xf32>
    %185 = vector.multi_reduction <add>, %184, %cst_56 [1] : vector<8x8xf32> to vector<8xf32>
    %186 = vector.shape_cast %185 : vector<8xf32> to vector<8x1xf32>
    %187 = tpu.reciprocal %186 {approx = true} : vector<8x1xf32> -> vector<8x1xf32>
    %188 = vector.broadcast %187 : vector<8x1xf32> to vector<8x8xf32>
    %189 = arith.mulf %184, %188 : vector<8x8xf32>
    %190 = arith.truncf %189 : vector<8x8xf32> to vector<8x8xbf16>
    %cst_57 = arith.constant dense<0.000000e+00> : vector<8x64xf32>
    %191 = tpu.matmul %190, %176, %cst_57 {dimension_numbers = #tpu.dot_dimension_numbers<[1], [0], [0], [1], [0, 0, 1, 1], [], []>} : vector<8x8xbf16>, vector<8x64xbf16>, vector<8x64xf32> -> vector<8x64xf32>
    %192 = arith.truncf %191 : vector<8x64xf32> to vector<8x64xbf16>
    %c0_58 = arith.constant 0 : index
    %c512 = arith.constant 512 : index
    %193 = vector.load %arg6[%c0_58, %c512] : memref<8x768xbf16, #tpu.memory_space<vmem>>, vector<8x64xbf16>
    tpu.vector_store %arg6[%c0_58, %c512], %192 {strides = array<i32>} : memref<8x768xbf16, #tpu.memory_space<vmem>>, vector<8x64xbf16>,
    %194 = vector.extract_strided_slice %6 {offsets = [0, 576], sizes = [8, 64], strides = [1, 1]} : vector<8x768xbf16> to vector<8x64xbf16>
    %195 = vector.extract_strided_slice %7 {offsets = [0, 576], sizes = [8, 64], strides = [1, 1]} : vector<8x768xbf16> to vector<8x64xbf16>
    %196 = vector.extract_strided_slice %8 {offsets = [0, 576], sizes = [8, 64], strides = [1, 1]} : vector<8x768xbf16> to vector<8x64xbf16>
    %cst_59 = arith.constant dense<0.000000e+00> : vector<8x8xf32>
    %197 = tpu.matmul %194, %195, %cst_59 {dimension_numbers = #tpu.dot_dimension_numbers<[1], [1], [0], [0], [0, 0, 1, 0], [], []>} : vector<8x64xbf16>, vector<8x64xbf16>, vector<8x8xf32> -> vector<8x8xf32>
    %cst_60 = arith.constant 0xFF800000 : f32
    %198 = vector.broadcast %cst_60 : f32 to vector<8x8xf32>
    %199 = arith.select %13, %197, %198 : vector<8x8xi1>, vector<8x8xf32>
    %cst_61 = arith.constant dense<0xFF800000> : vector<8xf32>
    %200 = vector.multi_reduction <maximumf>, %199, %cst_61 [1] : vector<8x8xf32> to vector<8xf32>
    %201 = vector.shape_cast %200 : vector<8xf32> to vector<8x1xf32>
    %202 = vector.broadcast %201 : vector<8x1xf32> to vector<8x8xf32>
    %203 = arith.subf %199, %202 : vector<8x8xf32>
    %204 = math.exp %203 : vector<8x8xf32>
    %cst_62 = arith.constant dense<0.000000e+00> : vector<8xf32>
    %205 = vector.multi_reduction <add>, %204, %cst_62 [1] : vector<8x8xf32> to vector<8xf32>
    %206 = vector.shape_cast %205 : vector<8xf32> to vector<8x1xf32>
    %207 = tpu.reciprocal %206 {approx = true} : vector<8x1xf32> -> vector<8x1xf32>
    %208 = vector.broadcast %207 : vector<8x1xf32> to vector<8x8xf32>
    %209 = arith.mulf %204, %208 : vector<8x8xf32>
    %210 = arith.truncf %209 : vector<8x8xf32> to vector<8x8xbf16>
    %cst_63 = arith.constant dense<0.000000e+00> : vector<8x64xf32>
    %211 = tpu.matmul %210, %196, %cst_63 {dimension_numbers = #tpu.dot_dimension_numbers<[1], [0], [0], [1], [0, 0, 1, 1], [], []>} : vector<8x8xbf16>, vector<8x64xbf16>, vector<8x64xf32> -> vector<8x64xf32>
    %212 = arith.truncf %211 : vector<8x64xf32> to vector<8x64xbf16>
    %c0_64 = arith.constant 0 : index
    %c576 = arith.constant 576 : index
    %213 = vector.load %arg6[%c0_64, %c576] : memref<8x768xbf16, #tpu.memory_space<vmem>>, vector<8x64xbf16>
    tpu.vector_store %arg6[%c0_64, %c576], %212 {strides = array<i32>} : memref<8x768xbf16, #tpu.memory_space<vmem>>, vector<8x64xbf16>,
    %214 = vector.extract_strided_slice %6 {offsets = [0, 640], sizes = [8, 64], strides = [1, 1]} : vector<8x768xbf16> to vector<8x64xbf16>
    %215 = vector.extract_strided_slice %7 {offsets = [0, 640], sizes = [8, 64], strides = [1, 1]} : vector<8x768xbf16> to vector<8x64xbf16>
    %216 = vector.extract_strided_slice %8 {offsets = [0, 640], sizes = [8, 64], strides = [1, 1]} : vector<8x768xbf16> to vector<8x64xbf16>
    %cst_65 = arith.constant dense<0.000000e+00> : vector<8x8xf32>
    %217 = tpu.matmul %214, %215, %cst_65 {dimension_numbers = #tpu.dot_dimension_numbers<[1], [1], [0], [0], [0, 0, 1, 0], [], []>} : vector<8x64xbf16>, vector<8x64xbf16>, vector<8x8xf32> -> vector<8x8xf32>
    %cst_66 = arith.constant 0xFF800000 : f32
    %218 = vector.broadcast %cst_66 : f32 to vector<8x8xf32>
    %219 = arith.select %13, %217, %218 : vector<8x8xi1>, vector<8x8xf32>
    %cst_67 = arith.constant dense<0xFF800000> : vector<8xf32>
    %220 = vector.multi_reduction <maximumf>, %219, %cst_67 [1] : vector<8x8xf32> to vector<8xf32>
    %221 = vector.shape_cast %220 : vector<8xf32> to vector<8x1xf32>
    %222 = vector.broadcast %221 : vector<8x1xf32> to vector<8x8xf32>
    %223 = arith.subf %219, %222 : vector<8x8xf32>
    %224 = math.exp %223 : vector<8x8xf32>
    %cst_68 = arith.constant dense<0.000000e+00> : vector<8xf32>
    %225 = vector.multi_reduction <add>, %224, %cst_68 [1] : vector<8x8xf32> to vector<8xf32>
    %226 = vector.shape_cast %225 : vector<8xf32> to vector<8x1xf32>
    %227 = tpu.reciprocal %226 {approx = true} : vector<8x1xf32> -> vector<8x1xf32>
    %228 = vector.broadcast %227 : vector<8x1xf32> to vector<8x8xf32>
    %229 = arith.mulf %224, %228 : vector<8x8xf32>
    %230 = arith.truncf %229 : vector<8x8xf32> to vector<8x8xbf16>
    %cst_69 = arith.constant dense<0.000000e+00> : vector<8x64xf32>
    %231 = tpu.matmul %230, %216, %cst_69 {dimension_numbers = #tpu.dot_dimension_numbers<[1], [0], [0], [1], [0, 0, 1, 1], [], []>} : vector<8x8xbf16>, vector<8x64xbf16>, vector<8x64xf32> -> vector<8x64xf32>
    %232 = arith.truncf %231 : vector<8x64xf32> to vector<8x64xbf16>
    %c0_70 = arith.constant 0 : index
    %c640 = arith.constant 640 : index
    %233 = vector.load %arg6[%c0_70, %c640] : memref<8x768xbf16, #tpu.memory_space<vmem>>, vector<8x64xbf16>
    tpu.vector_store %arg6[%c0_70, %c640], %232 {strides = array<i32>} : memref<8x768xbf16, #tpu.memory_space<vmem>>, vector<8x64xbf16>,
    %234 = vector.extract_strided_slice %6 {offsets = [0, 704], sizes = [8, 64], strides = [1, 1]} : vector<8x768xbf16> to vector<8x64xbf16>
    %235 = vector.extract_strided_slice %7 {offsets = [0, 704], sizes = [8, 64], strides = [1, 1]} : vector<8x768xbf16> to vector<8x64xbf16>
    %236 = vector.extract_strided_slice %8 {offsets = [0, 704], sizes = [8, 64], strides = [1, 1]} : vector<8x768xbf16> to vector<8x64xbf16>
    %cst_71 = arith.constant dense<0.000000e+00> : vector<8x8xf32>
    %237 = tpu.matmul %234, %235, %cst_71 {dimension_numbers = #tpu.dot_dimension_numbers<[1], [1], [0], [0], [0, 0, 1, 0], [], []>} : vector<8x64xbf16>, vector<8x64xbf16>, vector<8x8xf32> -> vector<8x8xf32>
    %cst_72 = arith.constant 0xFF800000 : f32
    %238 = vector.broadcast %cst_72 : f32 to vector<8x8xf32>
    %239 = arith.select %13, %237, %238 : vector<8x8xi1>, vector<8x8xf32>
    %cst_73 = arith.constant dense<0xFF800000> : vector<8xf32>
    %240 = vector.multi_reduction <maximumf>, %239, %cst_73 [1] : vector<8x8xf32> to vector<8xf32>
    %241 = vector.shape_cast %240 : vector<8xf32> to vector<8x1xf32>
    %242 = vector.broadcast %241 : vector<8x1xf32> to vector<8x8xf32>
    %243 = arith.subf %239, %242 : vector<8x8xf32>
    %244 = math.exp %243 : vector<8x8xf32>
    %cst_74 = arith.constant dense<0.000000e+00> : vector<8xf32>
    %245 = vector.multi_reduction <add>, %244, %cst_74 [1] : vector<8x8xf32> to vector<8xf32>
    %246 = vector.shape_cast %245 : vector<8xf32> to vector<8x1xf32>
    %247 = tpu.reciprocal %246 {approx = true} : vector<8x1xf32> -> vector<8x1xf32>
    %248 = vector.broadcast %247 : vector<8x1xf32> to vector<8x8xf32>
    %249 = arith.mulf %244, %248 : vector<8x8xf32>
    %250 = arith.truncf %249 : vector<8x8xf32> to vector<8x8xbf16>
    %cst_75 = arith.constant dense<0.000000e+00> : vector<8x64xf32>
    %251 = tpu.matmul %250, %236, %cst_75 {dimension_numbers = #tpu.dot_dimension_numbers<[1], [0], [0], [1], [0, 0, 1, 1], [], []>} : vector<8x8xbf16>, vector<8x64xbf16>, vector<8x64xf32> -> vector<8x64xf32>
    %252 = arith.truncf %251 : vector<8x64xf32> to vector<8x64xbf16>
    %c0_76 = arith.constant 0 : index
    %c704 = arith.constant 704 : index
    %253 = vector.load %arg6[%c0_76, %c704] : memref<8x768xbf16, #tpu.memory_space<vmem>>, vector<8x64xbf16>
    tpu.vector_store %arg6[%c0_76, %c704], %252 {strides = array<i32>} : memref<8x768xbf16, #tpu.memory_space<vmem>>, vector<8x64xbf16>,
    %c0_77 = arith.constant 0 : index
    %c0_78 = arith.constant 0 : index
    %254 = vector.load %arg6[%c0_77, %c0_78] : memref<8x768xbf16, #tpu.memory_space<vmem>>, vector<8x768xbf16>
    %c0_79 = arith.constant 0 : index
    %c0_80 = arith.constant 0 : index
    %255 = vector.load %arg3[%c0_79, %c0_80] : memref<768x768xbf16, #tpu.memory_space<vmem>>, vector<768x768xbf16>
    %cst_81 = arith.constant dense<0.000000e+00> : vector<8x768xf32>
    %256 = tpu.matmul %254, %255, %cst_81 {dimension_numbers = #tpu.dot_dimension_numbers<[1], [0], [0], [1], [0, 0, 1, 1], [], []>} : vector<8x768xbf16>, vector<768x768xbf16>, vector<8x768xf32> -> vector<8x768xf32>
    %c0_82 = arith.constant 0 : index
    %c0_83 = arith.constant 0 : index
    %257 = vector.load %arg4[%c0_82, %c0_83] : memref<1x768xf32, #tpu.memory_space<vmem>>, vector<1x768xf32>
    %258 = vector.broadcast %257 : vector<1x768xf32> to vector<8x768xf32>
    %259 = arith.addf %256, %258 : vector<8x768xf32>
    %c0_84 = arith.constant 0 : index
    %c0_85 = arith.constant 0 : index
    %c0_86 = arith.constant 0 : index
    %260 = vector.load %arg5[%c0_84, %c0_85, %c0_86] : memref<1x8x768xf32, #tpu.memory_space<vmem>>, vector<1x8x768xf32>
    %261 = vector.shape_cast %260 : vector<1x8x768xf32> to vector<8x768xf32>
    %262 = vector.shape_cast %259 : vector<8x768xf32> to vector<1x8x768xf32>
    tpu.vector_store %arg5[%c0_84, %c0_85, %c0_86], %262 {strides = array<i32>} : memref<1x8x768xf32, #tpu.memory_space<vmem>>, vector<1x8x768xf32>,
    return
  }
  func.func @transform_0(%arg0: i32) -> (i32, i32, i32) {
    %c0_i32 = arith.constant 0 : i32
    %c0_i32_0 = arith.constant 0 : i32
    %c0_i32_1 = arith.constant 0 : i32
    return %arg0, %c0_i32, %c0_i32_0 : i32, i32, i32
  }
  func.func @transform_1(%arg0: i32) -> (i32, i32) {
    %c0_i32 = arith.constant 0 : i32
    %c0_i32_0 = arith.constant 0 : i32
    %c0_i32_1 = arith.constant 0 : i32
    return %c0_i32, %c0_i32_0 : i32, i32
  }
  func.func @transform_2(%arg0: i32) -> (i32, i32) {
    %c0_i32 = arith.constant 0 : i32
    %c0_i32_0 = arith.constant 0 : i32
    %c0_i32_1 = arith.constant 0 : i32
    return %c0_i32, %c0_i32_0 : i32, i32
  }
  func.func @transform_3(%arg0: i32) -> (i32, i32) {
    %c0_i32 = arith.constant 0 : i32
    %c0_i32_0 = arith.constant 0 : i32
    %c0_i32_1 = arith.constant 0 : i32
    return %c0_i32, %c0_i32_0 : i32, i32
  }
  func.func @transform_4(%arg0: i32) -> (i32, i32, i32) {
    %c0_i32 = arith.constant 0 : i32
    %c0_i32_0 = arith.constant 0 : i32
    %c0_i32_1 = arith.constant 0 : i32
    return %arg0, %c0_i32, %c0_i32_0 : i32, i32, i32
  }
}

</mosaic_0001>

<bundles_post_ra>
// kernel: multi_head_attention.1
= control target key start
LH: loop header
LB: loop body
LE: loop exit
PB: predicated region body
PF: predicated region fallthrough
CT: control target
= control target key end

     0   :  { %9 = vsyncpa [#allocation4], 0  ;;  %s14520_s0 = inlined_call_operand.hbm [shape: f32[2,8,768], index: 0, kind: input, shape index: {}]   ;;  %s14521_s1 = inlined_call_operand.hbm [shape: bf16[768,2304], index: 1, kind: input, shape index: {}]   ;;  %s14522_s2 = inlined_call_operand.hbm [shape: bf16[768,768], index: 2, kind: input, shape index: {}]   ;;  %s14523_s3 = inlined_call_operand.hbm [shape: f32[1,768], index: 3, kind: input, shape index: {}]   ;;  %s14524_s4 = inlined_call_operand.hbm [shape: f32[2,8,768], index: 4, kind: output, shape index: {}]  }
   0x1   :  { %11 = vsyncpa [#allocation4 + $0x1], 0 }
   0x2   :  { %12 = vsyncpa [#allocation7], 0 }
   0x3   :  { %13 = vsyncpa [#allocation10], 0 }
   0x4   :  { %14 = vsyncpa [#allocation5], 0 }
   0x5   :  { %16 = vsyncpa [#allocation5 + $0x1], 0  ;;  %s13832_s15 = smov 0   ;;  %s13834_s16 = smov 0  }
   0x6   :  { %s13836_s17 = smov 0   ;;  %s13838_s18 = smov 0  }
   0x7 LB: > { %s13853_s19 = sadd.s32 4294967295, %s13793_s18   ;;  %s10235_s20 = sadd.s32 4294967294, %s13793_s18   ;;  %s13793_s18 = sphi %s13838_s18, %s14549_s18   ;;  %s13789_s17 = sphi %s13836_s17, %s14548_s17   ;;  %s13785_s16 = sphi %s13834_s16, %s14547_s16   ;;  %s13781_s15 = sphi %s13832_s15, %s14546_s15  }
   0x8   : > { %p42_p0 = scmp.ne.s32.totalorder %s13785_s16, %s13781_s15  ;;  %p14525_p1 = scmp.eq.s32.totalorder %s13853_s19, 0 }
   0x9   : > { %p135_p3 = scmp.eq.s32.totalorder %s10235_s20, 1  ;;  %p10236_p5 = scmp.ge.s32.totalorder %s13793_s18, 1 }
   0xa   : > { %p13862_p4 = por %p14525_p1, %p42_p0  ;;  %p142_p7 = scmp.lt.s32.totalorder %s13793_s18, 3 }
   0xb   : > { %p13867_p6 = por %p135_p3, %p42_p0  ;;  %s13795_s24 = smov [#allocation6]  }
   0xc   : > { %s14528_s21 = scalar_select %p13862_p4, 1, 0 }
   0xd   : > { %s14529_s22 = scalar_select %p13867_p6, 1, 0 }
   0xe   : > { %p13872_p8 = pnand %p10236_p5, %p142_p7  ;;  %s154_s25 = sshll.u32 %s13795_s24, 4  ;;  %s13876_s25 = int_to_ptr.vmem [resolvable:$true] %s154_s25 }
   0xf   : > { %s13796_s27 = smov [#allocation8]   ;;  %s13605_s5 = scalar_lea.hbm %s14521_s1, 110592 }
  0x10   : > { %s14530_s23 = scalar_select %p13872_p8, 1, 0 }
  0x11   : > { %p11755_p9 = pneg %p13872_p8  ;;  %s167_s28 = sshll.u32 %s13796_s27, 4  ;;  %s13887_s28 = int_to_ptr.vmem [resolvable:$true] %s167_s28 }
  0x12   : > { %p13606_p12 = scmp.ne.s32.totalorder %s14521_s1, %s13605_s5  ;;  %p13612_p5 = scmp.lt.u32.totalorder %s13605_s5, %s14521_s1 }
  0x13   : > { %p13883_p11 = pnand %p11755_p9, %p14525_p1 }
  0x15   : > { %p13897_p13 = pneg %p13883_p11 }
  0x17   : > { %p13608_p0 = pnand %p13897_p13, %p13606_p12 }
  0x19   : > { %p13609_p3 = pneg %p13608_p0 }
  0x1b   : > { %p13614_p7 = pnand %p13612_p5, %p13609_p3 }
  0x1d   : > { %13617 = shalt.err (!%p13614_p7)
}
  0x1e   : > { %s13618_s11 = scalar_lea.vmem %s13876_s25, 110592  ;;  %p13626_p2 = scmp.lt.s32.totalorder %s13876_s25, %s13876_s25 }
  0x1f   : > { %p13619_p9 = scmp.ne.s32.totalorder %s13876_s25, %s13618_s11  ;;  %p13627_p6 = scmp.lt.s32.totalorder %s13618_s11, %s13618_s11 }
  0x21   : > { %p13621_p10 = pnand %p13619_p9, %p13897_p13  ;;  %p13628_p12 = por %p13627_p6, %p13626_p2 }
  0x23   : > { %p13622_p1 = pneg %p13621_p10 }
  0x25   : > { %p13629_p0 = pnand %p13628_p12, %p13622_p1 }
  0x27   : > { %13632 = shalt.err (!%p13629_p0)
}
  0x28   : > { %s13797_s12 = smov 1152   ;;  %s13798_s13 = smov 72  }
  0x29   : > { %11758 = dma.hbm_to_vmem [thread:$0]  (!%p13883_p11), %s14521_s1, 110592, %s13876_s25, [#allocation7], %s13797_s12, %s13797_s12, %s13798_s13  }
  0x2a   : > { %s13633_s29 = scalar_lea.hbm %s14522_s2, 36864 }
  0x2b   : > { %p13634_p2 = scmp.ne.s32.totalorder %s14522_s2, %s13633_s29  ;;  %p13640_p10 = scmp.lt.u32.totalorder %s13633_s29, %s14522_s2 }
  0x2d   : > { %p13636_p1 = pnand %p13634_p2, %p13897_p13 }
  0x2f   : > { %p13637_p6 = pneg %p13636_p1 }
  0x31   : > { %p13642_p3 = pnand %p13640_p10, %p13637_p6 }
  0x33   : > { %13645 = shalt.err (!%p13642_p3)
}
  0x34   : > { %s13646_s25 = scalar_lea.vmem %s13887_s28, 36864  ;;  %p13654_p12 = scmp.lt.s32.totalorder %s13887_s28, %s13887_s28 }
  0x35   : > { %p13647_p5 = scmp.ne.s32.totalorder %s13887_s28, %s13646_s25  ;;  %p13655_p0 = scmp.lt.s32.totalorder %s13646_s25, %s13646_s25 }
  0x37   : > { %p13649_p7 = pnand %p13647_p5, %p13897_p13  ;;  %p13656_p2 = por %p13655_p0, %p13654_p12 }
  0x39   : > { %p13650_p9 = pneg %p13649_p7 }
  0x3b   : > { %p13657_p1 = pnand %p13656_p2, %p13650_p9 }
  0x3d   : > { %13660 = shalt.err (!%p13657_p1)
}
  0x3e   : > { %s13799_s9 = smov 384   ;;  %s13800_s10 = smov 24  }
  0x3f   : > { %11761 = dma.hbm_to_vmem [thread:$0]  (!%p13883_p11), %s14522_s2, 36864, %s13887_s28, [#allocation7], %s13799_s9, %s13799_s9, %s13800_s10  }
  0x40   : > { %s13801_s13 = smov [#allocation9]   ;;  %s13942_s20 = sadd.s32 1, %s13793_s18  }
  0x41   : > { %s181_s14 = sshll.u32 %s13801_s13, 4  ;;  %s13661_s29 = scalar_lea.hbm %s14523_s3, 96  ;;  %s182_s14 = int_to_ptr.vmem [resolvable:$true] %s181_s14 }
  0x42   : > { %p13662_p6 = scmp.ne.s32.totalorder %s14523_s3, %s13661_s29  ;;  %p13668_p5 = scmp.lt.u32.totalorder %s13661_s29, %s14523_s3 }
  0x44   : > { %p13664_p10 = pnand %p13662_p6, %p13897_p13 }
  0x46   : > { %p13665_p3 = pneg %p13664_p10 }
  0x48   : > { %p13670_p7 = pnand %p13668_p5, %p13665_p3 }
  0x4a   : > { %13673 = shalt.err (!%p13670_p7)
}
  0x4b   : > { %s13674_s28 = scalar_lea.vmem %s182_s14, 96  ;;  %p13682_p2 = scmp.lt.s32.totalorder %s182_s14, %s182_s14 }
  0x4c   : > { %p13675_p9 = scmp.ne.s32.totalorder %s182_s14, %s13674_s28  ;;  %p13683_p1 = scmp.lt.s32.totalorder %s13674_s28, %s13674_s28 }
  0x4e   : > { %p13677_p12 = pnand %p13675_p9, %p13897_p13  ;;  %p13684_p4 = por %p13683_p1, %p13682_p2 }
  0x50   : > { %p13678_p0 = pneg %p13677_p12 }
  0x52   : > { %p13685_p8 = pnand %p13684_p4, %p13678_p0 }
  0x54   : > { %13688 = shalt.err (!%p13685_p8)
}
  0x55   : > { %11764 = dma.hbm_to_vmem [thread:$0]  (!%p13883_p11), %s14523_s3, 96, %s182_s14, [#allocation10]  }
  0x56   : > { %s26_s8 = ssub.s32 %s13793_s18, %s13942_s20  ;;  %s29_s10 = sadd.s32 1, %s13789_s17 }
  0x57   : > { %p27_p4 = scmp.eq.s32.totalorder %s26_s8, 0  ;;  %p36_p8 = scmp.ne.s32.totalorder %s13789_s17, %s13785_s16 }
  0x58   : > { %p37_p13 = scmp.eq.s32.totalorder %s13793_s18, 0  ;;  %p11776_p6 = scmp.lt.s32.totalorder %s13793_s18, 2 }
  0x59   : > { %s13970_s26 = scalar_select %p27_p4, %s13789_s17, %s29_s10  }
  0x5a   : > { %p38_p10 = por %p37_p13, %p36_p8  ;;  %p14533_p3 = scmp.eq.s32.totalorder %s13853_s19, 1 }
  0x5b   : > { %s192_s12 = sand.u32 1, %s13789_s17   ;;  %s11736_s13 = smul.u32 768, %s13793_s18 }
  0x5c   : > { %p13974_p5 = por %p14533_p3, %p36_p8  ;;  %s11735_s24 = smul.u32 48, %s192_s12 }
  0x5d   : > { %p13980_p7 = pnand %p11776_p6, %p38_p10  ;;  %s13987_s30 = scalar_lea.hbm %s14520_s0, %s11736_s13 }
  0x5e   : > { %s196_s5 = scalar_lea.vmem [#allocation3], %s11735_s24  ;;  %s193_s7 = scalar_lea.sflag [#allocation4], %s192_s12 }
  0x5f   : > { %s204_s6 = sshll.u32 %s196_s5, 4  ;;  %s13689_s28 = scalar_lea.hbm %s13987_s30, 768  ;;  %s13989_s6 = int_to_ptr.vmem [resolvable:$true] %s204_s6 }
  0x60   : > { %p13690_p11 = scmp.ne.s32.totalorder %s13987_s30, %s13689_s28  ;;  %p13691_p9 = pneg %p13980_p7 }
  0x61   : > { %s13694_s8 = scalar_lea.hbm %s14520_s0, 1536  ;;  %p13695_p2 = scmp.lt.u32.totalorder %s13987_s30, %s14520_s0 }
  0x62   : > { %p13692_p12 = pnand %p13691_p9, %p13690_p11  ;;  %p13696_p1 = scmp.lt.u32.totalorder %s13694_s8, %s13689_s28 }
  0x63   : > { %p13698_p8 = scmp.lt.u32.totalorder %s13689_s28, %s13987_s30 }
  0x64   : > { %p13693_p0 = pneg %p13692_p12  ;;  %p13697_p4 = por %p13696_p1, %p13695_p2 }
  0x66   : > { %p13699_p13 = por %p13698_p8, %p13697_p4 }
  0x68   : > { %p13700_p6 = pnand %p13699_p13, %p13693_p0 }
  0x6a   : > { %13703 = shalt.err (!%p13700_p6)
}
  0x6b   : > { %s13704_s12 = scalar_lea.vmem %s13989_s6, 768  ;;  %s13802_s24 = smov [#allocation3]  }
  0x6c   : > { %p13705_p10 = scmp.ne.s32.totalorder %s13989_s6, %s13704_s12  ;;  %s13709_s14 = sshll.u32 %s13802_s24, 4  ;;  %s13710_s14 = int_to_ptr.vmem [resolvable:$false] %s13709_s14 }
  0x6d   : > { %s13711_s29 = scalar_lea.vmem %s13710_s14, 1536  ;;  %p13712_p12 = scmp.lt.s32.totalorder %s13989_s6, %s13710_s14 }
  0x6e   : > { %p13707_p3 = pnand %p13705_p10, %p13691_p9  ;;  %p13713_p2 = scmp.lt.s32.totalorder %s13711_s29, %s13704_s12 }
  0x70   : > { %p13708_p11 = pneg %p13707_p3  ;;  %p13714_p1 = por %p13713_p2, %p13712_p12 }
  0x72   : > { %p13715_p4 = pnand %p13714_p1, %p13708_p11 }
  0x74   : > { %13718 = shalt.err (!%p13715_p4)
}
  0x75   : > { %11768 = dma.hbm_to_vmem [thread:$0]  (!%p13980_p7), %s13987_s30, 768, %s13989_s6, %s193_s7  }
  0x76   : > { %p14536_p0 = scmp.ne.s32.totalorder %s14530_s23, 0 }
  0x77   : > { %s14019_s5 = sand.u32 (!%p14536_p0), 1, %s13785_s16   ;;  %p14537_p9 = scmp.ne.s32.totalorder (!%p14536_p0), %s14528_s21, 0 }
  0x78   : > { %213 = sbr.rel (%p14536_p0) target bundleno = 8177 (0x1ff1), region = 36  ;;  %s216_s25 = scalar_lea.sflag (!%p14536_p0), [#allocation4], %s14019_s5 }
  0x79   : > { %s11737_s28 = smul.u32 (!%p14536_p0), 48, %s14019_s5 }
  0x7b   : > { %s14025_s9 = scalar_lea.vmem (!%p14536_p0), [#allocation3], %s11737_s28 }
  0x7f   : > { %13764 = dma.done.wait (%p14537_p9), %s216_s25, 768  }
  0x80   : > { %13766 = vsyncadd (%p14537_p9), %s216_s25, 4294966528  ;;  %p14538_p7 = scmp.eq.s32.totalorder %s13853_s19, 0 }
  0x82   : > { %13768 = dma.done.wait (%p14538_p7), [#allocation7], 147456   ;;  %p14539_p8 = pmov %p14538_p7 }
  0x83   : > { %p14540_p13 = pmov %p14538_p7 }
  0x84   : > { %13770 = vsyncadd (%p14539_p8), [#allocation7], 4294819840 }
  0x85   : > { %13772 = dma.done.wait (%p14540_p13), [#allocation10], 96   ;;  %p14541_p6 = pmov %p14538_p7 }
  0x86   : > { %v11823_v0 = vld [vmem:[#allocation6 + $0x4] ss:$72 sps:$4 sm:$0xff]   ;;  %v11827_v2 = vld [vmem:[#allocation6] ss:$72 sps:$4 sm:$0xff]   ;;  %v11829_v4 = vld [vmem:[#allocation6 + $0x94] ss:$72 sps:$4 sm:$0xff]  }
  0x87   : > { %13774 = vsyncadd (%p14541_p6), [#allocation10], 4294967200  ;;  %v11825_v1 = vld [vmem:[#allocation6 + $0x904] ss:$72 sps:$4 sm:$0xff]   ;;  %5453 = vmatprep.subr.bf16.mxu1 %v11823_v0  ;;  %v11828_v3 = vld [vmem:[#allocation6 + $0x900] ss:$72 sps:$4 sm:$0xff]  }
  0x88   : > { %5494 = vmatprep.subr.bf16.mxu0 %v11825_v1  ;;  %5454 = vmatpush1.bf16.msra.mxu1 %v11827_v2  ;;  %v11831_v5 = vld [vmem:[#allocation6 + $0x994] ss:$72 sps:$4 sm:$0xff]   ;;  %v11833_v6 = vld [vmem:[#allocation6 + $0x90] ss:$72 sps:$4 sm:$0xff]   ;;  %v11835_v8 = vld [vmem:[#allocation6 + $0x124] ss:$72 sps:$4 sm:$0xff]  }
  0x89   : > { %5495 = vmatpush1.bf16.msra.mxu0 %v11828_v3  ;;  %5455 = vmatprep.subr.bf16.mxu1 %v11829_v4  ;;  %v11834_v7 = vld [vmem:[#allocation6 + $0x990] ss:$72 sps:$4 sm:$0xff]   ;;  %v11837_v9 = vld [vmem:[#allocation6 + $0xa24] ss:$72 sps:$4 sm:$0xff]   ;;  %v11839_v10 = vld [vmem:[#allocation6 + $0x120] ss:$72 sps:$4 sm:$0xff]  }
  0x8a   : > { %5496 = vmatprep.subr.bf16.mxu0 %v11831_v5  ;;  %v11840_v11 = vld [vmem:[#allocation6 + $0xa20] ss:$72 sps:$4 sm:$0xff]   ;;  %v11841_v12 = vld [vmem:[#allocation6 + $0x1b4] ss:$72 sps:$4 sm:$0xff]   ;;  %v11845_v14 = vld [vmem:[#allocation6 + $0x1b0] ss:$72 sps:$4 sm:$0xff]  }
  0x8b   : > { %v11843_v13 = vld [vmem:[#allocation6 + $0xab4] ss:$72 sps:$4 sm:$0xff]   ;;  %v11846_v15 = vld [vmem:[#allocation6 + $0xab0] ss:$72 sps:$4 sm:$0xff]   ;;  %v11847_v16 = vld [vmem:[#allocation6 + $0x244] ss:$72 sps:$4 sm:$0xff]  }
  0x8c   : > { %5456 = vmatpush1.bf16.msra.mxu1 %v11833_v6  ;;  %v11849_v17 = vld [vmem:[#allocation6 + $0xb44] ss:$72 sps:$4 sm:$0xff]   ;;  %v11851_v18 = vld [vmem:[#allocation6 + $0x240] ss:$72 sps:$4 sm:$0xff]   ;;  %v11853_v20 = vld [vmem:[#allocation6 + $0x2d4] ss:$72 sps:$4 sm:$0xff]  }
  0x8d   : > { %5497 = vmatpush1.bf16.msra.mxu0 %v11834_v7  ;;  %5457 = vmatprep.subr.bf16.mxu1 %v11835_v8  ;;  %v11852_v19 = vld [vmem:[#allocation6 + $0xb40] ss:$72 sps:$4 sm:$0xff]   ;;  %v11855_v21 = vld [vmem:[#allocation6 + $0xbd4] ss:$72 sps:$4 sm:$0xff]   ;;  %v11857_v22 = vld [vmem:[#allocation6 + $0x2d0] ss:$72 sps:$4 sm:$0xff]  }
  0x8e   : > { %5498 = vmatprep.subr.bf16.mxu0 %v11837_v9  ;;  %v11858_v23 = vld [vmem:[#allocation6 + $0xbd0] ss:$72 sps:$4 sm:$0xff]   ;;  %v11859_v24 = vld [vmem:[#allocation6 + $0x364] ss:$72 sps:$4 sm:$0xff]   ;;  %v11863_v26 = vld [vmem:[#allocation6 + $0x360] ss:$72 sps:$4 sm:$0xff]  }
  0x8f   : > { %v11861_v25 = vld [vmem:[#allocation6 + $0xc64] ss:$72 sps:$4 sm:$0xff]   ;;  %v11864_v27 = vld [vmem:[#allocation6 + $0xc60] ss:$72 sps:$4 sm:$0xff]   ;;  %v11865_v28 = vld [vmem:[#allocation6 + $0x3f4] ss:$72 sps:$4 sm:$0xff]  }
  0x90   : > { %5458 = vmatpush1.bf16.msra.mxu1 %v11839_v10  ;;  %v11867_v29 = vld [vmem:[#allocation6 + $0xcf4] ss:$72 sps:$4 sm:$0xff]   ;;  %v11869_v30 = vld [vmem:[#allocation6 + $0x3f0] ss:$72 sps:$4 sm:$0xff]   ;;  %v11871_v32 = vld [vmem:[#allocation6 + $0x484] ss:$72 sps:$4 sm:$0xff]  }
  0x91   : > { %5499 = vmatpush1.bf16.msra.mxu0 %v11840_v11  ;;  %5459 = vmatprep.subr.bf16.mxu1 %v11841_v12  ;;  %v11870_v31 = vld [vmem:[#allocation6 + $0xcf0] ss:$72 sps:$4 sm:$0xff]   ;;  %v11873_v33 = vld [vmem:[#allocation6 + $0xd84] ss:$72 sps:$4 sm:$0xff]   ;;  %v11875_v34 = vld [vmem:[#allocation6 + $0x480] ss:$72 sps:$4 sm:$0xff]  }
  0x92   : > { %5500 = vmatprep.subr.bf16.mxu0 %v11843_v13  ;;  %v11876_v35 = vld [vmem:[#allocation6 + $0xd80] ss:$72 sps:$4 sm:$0xff]   ;;  %v11877_v36 = vld [vmem:[#allocation6 + $0x514] ss:$72 sps:$4 sm:$0xff]   ;;  %v11881_v38 = vld [vmem:[#allocation6 + $0x510] ss:$72 sps:$4 sm:$0xff]  }
  0x93   : > { %v11879_v37 = vld [vmem:[#allocation6 + $0xe14] ss:$72 sps:$4 sm:$0xff]   ;;  %v11882_v39 = vld [vmem:[#allocation6 + $0xe10] ss:$72 sps:$4 sm:$0xff]   ;;  %v11883_v40 = vld [vmem:[#allocation6 + $0x5a4] ss:$72 sps:$4 sm:$0xff]  }
  0x94   : > { %5460 = vmatpush1.bf16.msra.mxu1 %v11845_v14  ;;  %v11885_v41 = vld [vmem:[#allocation6 + $0xea4] ss:$72 sps:$4 sm:$0xff]   ;;  %v11887_v42 = vld [vmem:[#allocation6 + $0x5a0] ss:$72 sps:$4 sm:$0xff]   ;;  %v11889_v44 = vld [vmem:[#allocation6 + $0x634] ss:$72 sps:$4 sm:$0xff]  }
  0x95   : > { %5501 = vmatpush1.bf16.msra.mxu0 %v11846_v15  ;;  %5461 = vmatprep.subr.bf16.mxu1 %v11847_v16  ;;  %v11888_v43 = vld [vmem:[#allocation6 + $0xea0] ss:$72 sps:$4 sm:$0xff]   ;;  %v11891_v45 = vld [vmem:[#allocation6 + $0xf34] ss:$72 sps:$4 sm:$0xff]   ;;  %v11893_v47 = vld [vmem:[#allocation6 + $0x630] ss:$72 sps:$4 sm:$0xff]  }
  0x96   : > { %5502 = vmatprep.subr.bf16.mxu0 %v11849_v17  ;;  %v258_v46 = vld [vmem:[%s14025_s9 + $0x8] sm:$0xff]  ;;  %v260_v49 = vld [vmem:[%s14025_s9 + $0x18] sm:$0xff]  ;;  %v257_v4 = vld [vmem:[%s14025_s9] sm:$0xff]  ;;  %s13803_s21 = smov 64   ;;  %vm13805_vm0 = vmmov 0   ;;  %vm6583_vm1 = vcmask 523264  }
  0x97   : > { %v14040_v48 = vpack.c.bf16 %v258_v46, %v258_v46  ;;  %v11894_v50 = vld [vmem:[#allocation6 + $0xf30] ss:$72 sps:$4 sm:$0xff]   ;;  %v11895_v51 = vld [vmem:[#allocation6 + $0x6c4] ss:$72 sps:$4 sm:$0xff]   ;;  %v14043_v52 = vpack.c.bf16 %v260_v49, %v260_v49  ;;  %v11899_v54 = vld [vmem:[#allocation6 + $0x6c0] ss:$72 sps:$4 sm:$0xff]   ;;  %v14049_v8 = vpack.c.bf16 %v257_v4, %v257_v4 }
  0x98   : > { %5462 = vmatpush1.bf16.msra.mxu1 %v11851_v18  ;;  %v11897_v53 = vld [vmem:[#allocation6 + $0xfc4] ss:$72 sps:$4 sm:$0xff]   ;;  %v11900_v55 = vld [vmem:[#allocation6 + $0xfc0] ss:$72 sps:$4 sm:$0xff]   ;;  %v11901_v56 = vld [vmem:[#allocation6 + $0x754] ss:$72 sps:$4 sm:$0xff]  }
  0x99   : > { %5503 = vmatpush1.bf16.msra.mxu0 %v11852_v19  ;;  %5463 = vmatprep.subr.bf16.mxu1 %v11853_v20  ;;  %v11903_v57 = vld [vmem:[#allocation6 + $0x1054] ss:$72 sps:$4 sm:$0xff]   ;;  %v11905_v58 = vld [vmem:[#allocation6 + $0x750] ss:$72 sps:$4 sm:$0xff]   ;;  %v11907_v60 = vld [vmem:[#allocation6 + $0x7e4] ss:$72 sps:$4 sm:$0xff]  }
  0x9a   : > { %5504 = vmatprep.subr.bf16.mxu0 %v11855_v21  ;;  %5485 = vmatprep.mubr.bf16.mxu1 %v14040_v48  ;;  %v11906_v59 = vld [vmem:[#allocation6 + $0x1050] ss:$72 sps:$4 sm:$0xff]   ;;  %v11909_v61 = vld [vmem:[#allocation6 + $0x10e4] ss:$72 sps:$4 sm:$0xff]   ;;  %v11911_v62 = vld [vmem:[#allocation6 + $0x7e0] ss:$72 sps:$4 sm:$0xff]  }
  0x9b   : > { %5526 = vmatprep.mubr.bf16.mxu0 %v14043_v52  ;;  %v11912_v63 = vld [vmem:[#allocation6 + $0x10e0] ss:$72 sps:$4 sm:$0xff]   ;;  %v11913_v0 = vld [vmem:[#allocation6 + $0x874] ss:$72 sps:$4 sm:$0xff]   ;;  %v11917_v2 = vld [vmem:[#allocation6 + $0x870] ss:$72 sps:$4 sm:$0xff]  }
  0x9c   : > { %5464 = vmatpush1.bf16.msra.mxu1 %v11857_v22  ;;  %v11915_v1 = vld [vmem:[#allocation6 + $0x1174] ss:$72 sps:$4 sm:$0xff]   ;;  %v11918_v3 = vld [vmem:[#allocation6 + $0x1170] ss:$72 sps:$4 sm:$0xff]   ;;  %v11921_v5 = vld [vmem:[#allocation6 + $0x1204] ss:$72 sps:$4 sm:$0xff]  }
  0x9d   : > { %5505 = vmatpush1.bf16.msra.mxu0 %v11858_v23  ;;  %5465 = vmatprep.subr.bf16.mxu1 %v11859_v24  ;;  %v259_v6 = vld [vmem:[%s14025_s9 + $0x10] sm:$0xff]  ;;  %vm6631_vm3 = vcmask 64512   ;;  %vm6647_vm4 = vcmask 1043456   ;;  %vm6692_vm5 = vcmask 519168   ;;  %vm6815_vm6 = vcmask 1043968   ;;  %s255_s23 = scalar_lea.vmem [#allocation11], %s11737_s28 }
  0x9e   : > { %5506 = vmatprep.subr.bf16.mxu0 %v11861_v25  ;;  %v11924_v7 = vld [vmem:[#allocation6 + $0xc] ss:$72 sps:$4 sm:$0xff]   ;;  %v11919_v9 = vld [vmem:[#allocation6 + $0x1200] ss:$72 sps:$4 sm:$0xff]   ;;  %v14051_v11 = vpack.c.bf16 %v259_v6, %v259_v6  ;;  %v11930_v13 = vld [vmem:[#allocation6 + $0x9c] ss:$72 sps:$4 sm:$0xff]  }
  0x9f   : > { %v11922_v10 = vld [vmem:[#allocation6 + $0x8] ss:$72 sps:$4 sm:$0xff]   ;;  %v11927_v12 = vld [vmem:[#allocation6 + $0x1294] ss:$72 sps:$4 sm:$0xff]   ;;  %v11928_v15 = vld [vmem:[#allocation6 + $0x98] ss:$72 sps:$4 sm:$0xff]  }
  0xa0   : > { %5466 = vmatpush1.bf16.msra.mxu1 %v11863_v26  ;;  %v11925_v14 = vld [vmem:[#allocation6 + $0x1290] ss:$72 sps:$4 sm:$0xff]   ;;  %v11933_v16 = vld [vmem:[#allocation6 + $0x1324] ss:$72 sps:$4 sm:$0xff]   ;;  %v11931_v18 = vld [vmem:[#allocation6 + $0x1320] ss:$72 sps:$4 sm:$0xff]  }
  0xa1   : > { %5507 = vmatpush1.bf16.msra.mxu0 %v11864_v27  ;;  %5467 = vmatprep.subr.bf16.mxu1 %v11865_v28  ;;  %v11936_v17 = vld [vmem:[#allocation6 + $0x12c] ss:$72 sps:$4 sm:$0xff]   ;;  %v11934_v19 = vld [vmem:[#allocation6 + $0x128] ss:$72 sps:$4 sm:$0xff]   ;;  %v11942_v21 = vld [vmem:[#allocation6 + $0x1bc] ss:$72 sps:$4 sm:$0xff]  }
  0xa2   : > { %5508 = vmatprep.subr.bf16.mxu0 %v11867_v29  ;;  %v11939_v20 = vld [vmem:[#allocation6 + $0x13b4] ss:$72 sps:$4 sm:$0xff]   ;;  %v11937_v22 = vld [vmem:[#allocation6 + $0x13b0] ss:$72 sps:$4 sm:$0xff]   ;;  %v11945_v24 = vld [vmem:[#allocation6 + $0x1444] ss:$72 sps:$4 sm:$0xff]  }
  0xa3   : > { %v11940_v23 = vld [vmem:[#allocation6 + $0x1b8] ss:$72 sps:$4 sm:$0xff]   ;;  %v11948_v25 = vld [vmem:[#allocation6 + $0x24c] ss:$72 sps:$4 sm:$0xff]   ;;  %v11946_v27 = vld [vmem:[#allocation6 + $0x248] ss:$72 sps:$4 sm:$0xff]  }
  0xa4   : > { %5468 = vmatpush1.bf16.msra.mxu1 %v11869_v30  ;;  %v11943_v26 = vld [vmem:[#allocation6 + $0x1440] ss:$72 sps:$4 sm:$0xff]   ;;  %v11951_v28 = vld [vmem:[#allocation6 + $0x14d4] ss:$72 sps:$4 sm:$0xff]   ;;  %v11949_v30 = vld [vmem:[#allocation6 + $0x14d0] ss:$72 sps:$4 sm:$0xff]  }
  0xa5   : > { %5509 = vmatpush1.bf16.msra.mxu0 %v11870_v31  ;;  %5469 = vmatprep.subr.bf16.mxu1 %v11871_v32  ;;  %v11954_v29 = vld [vmem:[#allocation6 + $0x2dc] ss:$72 sps:$4 sm:$0xff]   ;;  %v11952_v31 = vld [vmem:[#allocation6 + $0x2d8] ss:$72 sps:$4 sm:$0xff]   ;;  %s11738_s27 = smul.u32 768, %s13853_s19  ;;  %s10136_s30 = sshll.u32 %s255_s23, 4  ;;  %s14478_s30 = int_to_ptr.vmem [resolvable:$true] %s10136_s30 }
  0xa6   : > { %5510 = vmatprep.subr.bf16.mxu0 %v11873_v33  ;;  %v11957_v32 = vld [vmem:[#allocation6 + $0x1564] ss:$72 sps:$4 sm:$0xff]   ;;  %v11975_v46 = vld [vmem:[#allocation6 + $0x1714] ss:$72 sps:$4 sm:$0xff]   ;;  %v11973_v49 = vld [vmem:[#allocation6 + $0x1710] ss:$72 sps:$4 sm:$0xff]  }
  0xa7   : > { %v11960_v33 = vld [vmem:[#allocation6 + $0x36c] ss:$72 sps:$4 sm:$0xff]   ;;  %v12003_v6 = vld [vmem:[#allocation6 + $0x19e0] ss:$72 sps:$4 sm:$0xff]   ;;  %s14476_s8 = scalar_lea.hbm %s14524_s4, %s11738_s27  ;;  %s10122_s19 = scalar_lea.sflag [#allocation5], %s14019_s5 }
  0xa8   : > { %5470 = vmatpush1.bf16.msra.mxu1 %v11875_v34  ;;  %v262_v34 = vld [vmem:[%s14025_s9 + $0x28] sm:$0xff]  ;;  %s13719_s10 = scalar_lea.vmem %s14478_s30, 768  ;;  %s13806_s13 = smov [#allocation11]  }
  0xa9   : > { %5511 = vmatpush1.bf16.msra.mxu0 %v11876_v35  ;;  %5471 = vmatprep.subr.bf16.mxu1 %v11877_v36  ;;  %v14057_v35 = vpack.c.bf16 %v262_v34, %v262_v34  ;;  %v11955_v36 = vld [vmem:[#allocation6 + $0x1560] ss:$72 sps:$4 sm:$0xff]   ;;  %v12005_v4 = vld [vmem:[#allocation6 + $0x19e4] ss:$72 sps:$4 sm:$0xff]   ;;  %p13720_p10 = scmp.ne.s32.totalorder %s14478_s30, %s13719_s10  ;;  %s13723_s12 = sshll.u32 %s13806_s13, 4  ;;  %s13724_s12 = int_to_ptr.vmem [resolvable:$false] %s13723_s12 }
  0xaa   : > { %5512 = vmatprep.subr.bf16.mxu0 %v11879_v37  ;;  %v11958_v37 = vld [vmem:[#allocation6 + $0x368] ss:$72 sps:$4 sm:$0xff]   ;;  %v12044_v34 = vld [vmem:[#allocation6 + $0xe1c] ss:$72 sps:$4 sm:$0xff]   ;;  %s13725_s24 = scalar_lea.vmem %s13724_s12, 1536  ;;  %p13726_p12 = scmp.lt.s32.totalorder %s14478_s30, %s13724_s12 }
  0xab   : > { %p13721_p3 = pnand %p13720_p10, %p13974_p5  ;;  %p13727_p2 = scmp.lt.s32.totalorder %s13725_s24, %s13719_s10 }
  0xac   : > { %5472 = vmatpush1.bf16.msra.mxu1 %v11881_v38  ;;  %v11963_v38 = vld [vmem:[#allocation6 + $0x15f4] ss:$72 sps:$4 sm:$0xff]  }
  0xad   : > { %5513 = vmatpush1.bf16.msra.mxu0 %v11882_v39  ;;  %5473 = vmatprep.subr.bf16.mxu1 %v11883_v40  ;;  %v11966_v39 = vld [vmem:[#allocation6 + $0x3fc] ss:$72 sps:$4 sm:$0xff]   ;;  %v11961_v40 = vld [vmem:[#allocation6 + $0x15f0] ss:$72 sps:$4 sm:$0xff]   ;;  %p13722_p11 = pneg %p13721_p3  ;;  %p13728_p1 = por %p13727_p2, %p13726_p12 }
  0xae   : > { %5514 = vmatprep.subr.bf16.mxu0 %v11885_v41  ;;  %v11964_v41 = vld [vmem:[#allocation6 + $0x3f8] ss:$72 sps:$4 sm:$0xff]  }
  0xaf   : > { %p13729_p4 = pnand %p13728_p1, %p13722_p11 }
  0xb0   : > { %5474 = vmatpush1.bf16.msra.mxu1 %v11887_v42  ;;  %v11969_v42 = vld [vmem:[#allocation6 + $0x1684] ss:$72 sps:$4 sm:$0xff]  }
  0xb1   : > { %5515 = vmatpush1.bf16.msra.mxu0 %v11888_v43  ;;  %5475 = vmatprep.subr.bf16.mxu1 %v11889_v44  ;;  %v11972_v43 = vld [vmem:[#allocation6 + $0x48c] ss:$72 sps:$4 sm:$0xff]   ;;  %v11967_v44 = vld [vmem:[#allocation6 + $0x1680] ss:$72 sps:$4 sm:$0xff]  }
  0xb2   : > { %5516 = vmatprep.subr.bf16.mxu0 %v11891_v45  ;;  %v11970_v45 = vld [vmem:[#allocation6 + $0x488] ss:$72 sps:$4 sm:$0xff]  }
  0xb4   : > { %5476 = vmatpush1.bf16.msra.mxu1 %v11893_v47  ;;  %v11978_v47 = vld [vmem:[#allocation6 + $0x51c] ss:$72 sps:$4 sm:$0xff]  }
  0xb5   : > { %5517 = vmatpush1.bf16.msra.mxu0 %v11894_v50  ;;  %5477 = vmatprep.subr.bf16.mxu1 %v11895_v51  ;;  %v11976_v50 = vld [vmem:[#allocation6 + $0x518] ss:$72 sps:$4 sm:$0xff]   ;;  %v11981_v51 = vld [vmem:[#allocation6 + $0x17a4] ss:$72 sps:$4 sm:$0xff]  }
  0xb6   : > { %5518 = vmatprep.subr.bf16.mxu0 %v11897_v53  ;;  %v11984_v53 = vld [vmem:[#allocation6 + $0x5ac] ss:$72 sps:$4 sm:$0xff]  }
  0xb8   : > { %5478 = vmatpush1.bf16.msra.mxu1 %v11899_v54  ;;  %v11979_v54 = vld [vmem:[#allocation6 + $0x17a0] ss:$72 sps:$4 sm:$0xff]  }
  0xb9   : > { %5519 = vmatpush1.bf16.msra.mxu0 %v11900_v55  ;;  %5479 = vmatprep.subr.bf16.mxu1 %v11901_v56  ;;  %v11982_v55 = vld [vmem:[#allocation6 + $0x5a8] ss:$72 sps:$4 sm:$0xff]   ;;  %v11987_v56 = vld [vmem:[#allocation6 + $0x1834] ss:$72 sps:$4 sm:$0xff]  }
  0xba   : > { %5520 = vmatprep.subr.bf16.mxu0 %v11903_v57  ;;  %v11990_v57 = vld [vmem:[#allocation6 + $0x63c] ss:$72 sps:$4 sm:$0xff]  }
  0xbc   : > { %5480 = vmatpush1.bf16.msra.mxu1 %v11905_v58  ;;  %v11985_v58 = vld [vmem:[#allocation6 + $0x1830] ss:$72 sps:$4 sm:$0xff]  }
  0xbd   : > { %5521 = vmatpush1.bf16.msra.mxu0 %v11906_v59  ;;  %5481 = vmatprep.subr.bf16.mxu1 %v11907_v60  ;;  %v11988_v59 = vld [vmem:[#allocation6 + $0x638] ss:$72 sps:$4 sm:$0xff]   ;;  %v11993_v60 = vld [vmem:[#allocation6 + $0x18c4] ss:$72 sps:$4 sm:$0xff]  }
  0xbe   : > { %5522 = vmatprep.subr.bf16.mxu0 %v11909_v61  ;;  %v11996_v61 = vld [vmem:[#allocation6 + $0x6cc] ss:$72 sps:$4 sm:$0xff]  }
  0xc0   : > { %5482 = vmatpush1.bf16.msra.mxu1 %v11911_v62  ;;  %v11991_v62 = vld [vmem:[#allocation6 + $0x18c0] ss:$72 sps:$4 sm:$0xff]  }
  0xc1   : > { %5523 = vmatpush1.bf16.msra.mxu0 %v11912_v63  ;;  %5483 = vmatprep.subr.bf16.mxu1 %v11913_v0  ;;  %v11994_v63 = vld [vmem:[#allocation6 + $0x6c8] ss:$72 sps:$4 sm:$0xff]   ;;  %v11999_v0 = vld [vmem:[#allocation6 + $0x1954] ss:$72 sps:$4 sm:$0xff]  }
  0xc2   : > { %5524 = vmatprep.subr.bf16.mxu0 %v11915_v1  ;;  %v12002_v1 = vld [vmem:[#allocation6 + $0x75c] ss:$72 sps:$4 sm:$0xff]  }
  0xc4   : > { %5484 = vmatpush1.bf16.msra.mxu1 %v11917_v2  ;;  %v11997_v2 = vld [vmem:[#allocation6 + $0x1950] ss:$72 sps:$4 sm:$0xff]  }
  0xc5   : > { %5525 = vmatpush1.bf16.msra.mxu0 %v11918_v3  ;;  %5576 = vmatprep.subr.bf16.mxu1 %v11924_v7  ;;  %v12000_v3 = vld [vmem:[#allocation6 + $0x758] ss:$72 sps:$4 sm:$0xff]   ;;  %v12006_v7 = vld [vmem:[#allocation6 + $0x7e8] ss:$72 sps:$4 sm:$0xff]  }
  0xc6   : > { %5535 = vmatprep.subr.bf16.mxu0 %v11921_v5  ;;  %v12008_v5 = vld [vmem:[#allocation6 + $0x7ec] ss:$72 sps:$4 sm:$0xff]  }
  0xc7   : > { %5486 = vmatmul.mubr.bf16.vlgmr.msra.gmra.mrb[0].mxu1 %v14049_v8 }
  0xc8   : > { %5527 = vmatmul.mubr.bf16.vlgmr.msra.gmra.mrb[0].mxu0 %v14051_v11  ;;  %5577 = vmatpush1.bf16.msra.mxu1 %v11922_v10  ;;  %v12014_v10 = vld [vmem:[#allocation6 + $0x87c] ss:$72 sps:$4 sm:$0xff]  }
  0xc9   : > { %5536 = vmatpush1.bf16.msra.mxu0 %v11919_v9  ;;  %5578 = vmatprep.subr.bf16.mxu1 %v11930_v13  ;;  %v12011_v9 = vld [vmem:[#allocation6 + $0x1a74] ss:$72 sps:$4 sm:$0xff]   ;;  %v12012_v13 = vld [vmem:[#allocation6 + $0x878] ss:$72 sps:$4 sm:$0xff]  }
  0xca   : > { %5537 = vmatprep.subr.bf16.mxu0 %v11927_v12  ;;  %5608 = vmatprep.mubr.bf16.mxu1 %v14040_v48  ;;  %v12009_v12 = vld [vmem:[#allocation6 + $0x1a70] ss:$72 sps:$4 sm:$0xff]  }
  0xcb   : > { %5567 = vmatprep.mubr.bf16.mxu0 %v14057_v35 }
  0xcc   : > { %5579 = vmatpush1.bf16.msra.mxu1 %v11928_v15  ;;  %v12017_v15 = vld [vmem:[#allocation6 + $0x90c] ss:$72 sps:$4 sm:$0xff]  }
  0xcd   : > { %5538 = vmatpush1.bf16.msra.mxu0 %v11925_v14  ;;  %5580 = vmatprep.subr.bf16.mxu1 %v11936_v17  ;;  %v261_v14 = vld [vmem:[%s14025_s9 + $0x20] sm:$0xff] }
  0xce   : > { %5539 = vmatprep.subr.bf16.mxu0 %v11933_v16  ;;  %v14061_v16 = vpack.c.bf16 %v261_v14, %v261_v14  ;;  %v12015_v17 = vld [vmem:[#allocation6 + $0x908] ss:$72 sps:$4 sm:$0xff]  }
  0xcf   : > { %v12099_v14 = vld [vmem:[#allocation6 + $0x18c8] ss:$72 sps:$4 sm:$0xff]  }
  0xd0   : > { %5581 = vmatpush1.bf16.msra.mxu1 %v11934_v19  ;;  %v12018_v19 = vld [vmem:[#allocation6 + $0x998] ss:$72 sps:$4 sm:$0xff]  }
  0xd1   : > { %5540 = vmatpush1.bf16.msra.mxu0 %v11931_v18  ;;  %5582 = vmatprep.subr.bf16.mxu1 %v11942_v21  ;;  %v12020_v18 = vld [vmem:[#allocation6 + $0x99c] ss:$72 sps:$4 sm:$0xff]   ;;  %v12021_v21 = vld [vmem:[#allocation6 + $0xa28] ss:$72 sps:$4 sm:$0xff]  }
  0xd2   : > { %5541 = vmatprep.subr.bf16.mxu0 %v11939_v20  ;;  %v12023_v20 = vld [vmem:[#allocation6 + $0xa2c] ss:$72 sps:$4 sm:$0xff]  }
  0xd4   : > { %5583 = vmatpush1.bf16.msra.mxu1 %v11940_v23  ;;  %v12024_v23 = vld [vmem:[#allocation6 + $0xab8] ss:$72 sps:$4 sm:$0xff]  }
  0xd5   : > { %5542 = vmatpush1.bf16.msra.mxu0 %v11937_v22  ;;  %5584 = vmatprep.subr.bf16.mxu1 %v11948_v25  ;;  %v12026_v22 = vld [vmem:[#allocation6 + $0xabc] ss:$72 sps:$4 sm:$0xff]   ;;  %v12027_v25 = vld [vmem:[#allocation6 + $0xb48] ss:$72 sps:$4 sm:$0xff]  }
  0xd6   : > { %5543 = vmatprep.subr.bf16.mxu0 %v11945_v24  ;;  %v12029_v24 = vld [vmem:[#allocation6 + $0xb4c] ss:$72 sps:$4 sm:$0xff]  }
  0xd8   : > { %5585 = vmatpush1.bf16.msra.mxu1 %v11946_v27  ;;  %v12030_v27 = vld [vmem:[#allocation6 + $0xbd8] ss:$72 sps:$4 sm:$0xff]  }
  0xd9   : > { %5544 = vmatpush1.bf16.msra.mxu0 %v11943_v26  ;;  %5586 = vmatprep.subr.bf16.mxu1 %v11954_v29  ;;  %v12032_v26 = vld [vmem:[#allocation6 + $0xbdc] ss:$72 sps:$4 sm:$0xff]   ;;  %v12033_v29 = vld [vmem:[#allocation6 + $0xc68] ss:$72 sps:$4 sm:$0xff]  }
  0xda   : > { %5545 = vmatprep.subr.bf16.mxu0 %v11951_v28  ;;  %v12035_v28 = vld [vmem:[#allocation6 + $0xc6c] ss:$72 sps:$4 sm:$0xff]  }
  0xdc   : > { %5587 = vmatpush1.bf16.msra.mxu1 %v11952_v31  ;;  %v12036_v31 = vld [vmem:[#allocation6 + $0xcf8] ss:$72 sps:$4 sm:$0xff]  }
  0xdd   : > { %5546 = vmatpush1.bf16.msra.mxu0 %v11949_v30  ;;  %5588 = vmatprep.subr.bf16.mxu1 %v11960_v33  ;;  %v12038_v30 = vld [vmem:[#allocation6 + $0xcfc] ss:$72 sps:$4 sm:$0xff]   ;;  %v12039_v33 = vld [vmem:[#allocation6 + $0xd88] ss:$72 sps:$4 sm:$0xff]  }
  0xde   : > { %5547 = vmatprep.subr.bf16.mxu0 %v11957_v32  ;;  %v12041_v32 = vld [vmem:[#allocation6 + $0xd8c] ss:$72 sps:$4 sm:$0xff]  }
  0xe0   : > { %5589 = vmatpush1.bf16.msra.mxu1 %v11958_v37  ;;  %v12047_v37 = vld [vmem:[#allocation6 + $0xeac] ss:$72 sps:$4 sm:$0xff]  }
  0xe1   : > { %5548 = vmatpush1.bf16.msra.mxu0 %v11955_v36  ;;  %5590 = vmatprep.subr.bf16.mxu1 %v11966_v39  ;;  %v12042_v36 = vld [vmem:[#allocation6 + $0xe18] ss:$72 sps:$4 sm:$0xff]   ;;  %v12050_v39 = vld [vmem:[#allocation6 + $0xf3c] ss:$72 sps:$4 sm:$0xff]  }
  0xe2   : > { %5549 = vmatprep.subr.bf16.mxu0 %v11963_v38  ;;  %v12045_v38 = vld [vmem:[#allocation6 + $0xea8] ss:$72 sps:$4 sm:$0xff]  }
  0xe4   : > { %5591 = vmatpush1.bf16.msra.mxu1 %v11964_v41  ;;  %v12053_v41 = vld [vmem:[#allocation6 + $0xfcc] ss:$72 sps:$4 sm:$0xff]  }
  0xe5   : > { %5550 = vmatpush1.bf16.msra.mxu0 %v11961_v40  ;;  %5592 = vmatprep.subr.bf16.mxu1 %v11972_v43  ;;  %v12048_v40 = vld [vmem:[#allocation6 + $0xf38] ss:$72 sps:$4 sm:$0xff]   ;;  %v12056_v43 = vld [vmem:[#allocation6 + $0x105c] ss:$72 sps:$4 sm:$0xff]  }
  0xe6   : > { %5551 = vmatprep.subr.bf16.mxu0 %v11969_v42  ;;  %v12051_v42 = vld [vmem:[#allocation6 + $0xfc8] ss:$72 sps:$4 sm:$0xff]  }
  0xe8   : > { %5593 = vmatpush1.bf16.msra.mxu1 %v11970_v45  ;;  %v12059_v45 = vld [vmem:[#allocation6 + $0x10ec] ss:$72 sps:$4 sm:$0xff]  }
  0xe9   : > { %5552 = vmatpush1.bf16.msra.mxu0 %v11967_v44  ;;  %5594 = vmatprep.subr.bf16.mxu1 %v11978_v47  ;;  %v12054_v44 = vld [vmem:[#allocation6 + $0x1058] ss:$72 sps:$4 sm:$0xff]   ;;  %v12062_v47 = vld [vmem:[#allocation6 + $0x117c] ss:$72 sps:$4 sm:$0xff]  }
  0xea   : > { %5553 = vmatprep.subr.bf16.mxu0 %v11975_v46  ;;  %v12057_v46 = vld [vmem:[#allocation6 + $0x10e8] ss:$72 sps:$4 sm:$0xff]  }
  0xec   : > { %5595 = vmatpush1.bf16.msra.mxu1 %v11976_v50  ;;  %v12065_v50 = vld [vmem:[#allocation6 + $0x120c] ss:$72 sps:$4 sm:$0xff]  }
  0xed   : > { %5554 = vmatpush1.bf16.msra.mxu0 %v11973_v49  ;;  %5596 = vmatprep.subr.bf16.mxu1 %v11984_v53  ;;  %v12060_v49 = vld [vmem:[#allocation6 + $0x1178] ss:$72 sps:$4 sm:$0xff]   ;;  %v12068_v53 = vld [vmem:[#allocation6 + $0x129c] ss:$72 sps:$4 sm:$0xff]  }
  0xee   : > { %5555 = vmatprep.subr.bf16.mxu0 %v11981_v51  ;;  %v12063_v51 = vld [vmem:[#allocation6 + $0x1208] ss:$72 sps:$4 sm:$0xff]  }
  0xf0   : > { %5597 = vmatpush1.bf16.msra.mxu1 %v11982_v55  ;;  %v12071_v55 = vld [vmem:[#allocation6 + $0x132c] ss:$72 sps:$4 sm:$0xff]  }
  0xf1   : > { %5556 = vmatpush1.bf16.msra.mxu0 %v11979_v54  ;;  %5598 = vmatprep.subr.bf16.mxu1 %v11990_v57  ;;  %v12066_v54 = vld [vmem:[#allocation6 + $0x1298] ss:$72 sps:$4 sm:$0xff]   ;;  %v12074_v57 = vld [vmem:[#allocation6 + $0x13bc] ss:$72 sps:$4 sm:$0xff]  }
  0xf2   : > { %5557 = vmatprep.subr.bf16.mxu0 %v11987_v56  ;;  %v12069_v56 = vld [vmem:[#allocation6 + $0x1328] ss:$72 sps:$4 sm:$0xff]  }
  0xf4   : > { %5599 = vmatpush1.bf16.msra.mxu1 %v11988_v59  ;;  %v12077_v59 = vld [vmem:[#allocation6 + $0x144c] ss:$72 sps:$4 sm:$0xff]  }
  0xf5   : > { %5558 = vmatpush1.bf16.msra.mxu0 %v11985_v58  ;;  %5600 = vmatprep.subr.bf16.mxu1 %v11996_v61  ;;  %v12072_v58 = vld [vmem:[#allocation6 + $0x13b8] ss:$72 sps:$4 sm:$0xff]   ;;  %v12080_v61 = vld [vmem:[#allocation6 + $0x14dc] ss:$72 sps:$4 sm:$0xff]  }
  0xf6   : > { %5559 = vmatprep.subr.bf16.mxu0 %v11993_v60  ;;  %v12075_v60 = vld [vmem:[#allocation6 + $0x1448] ss:$72 sps:$4 sm:$0xff]  }
  0xf8   : > { %5601 = vmatpush1.bf16.msra.mxu1 %v11994_v63  ;;  %v12083_v63 = vld [vmem:[#allocation6 + $0x156c] ss:$72 sps:$4 sm:$0xff]  }
  0xf9   : > { %5560 = vmatpush1.bf16.msra.mxu0 %v11991_v62  ;;  %5602 = vmatprep.subr.bf16.mxu1 %v12002_v1  ;;  %v12078_v62 = vld [vmem:[#allocation6 + $0x14d8] ss:$72 sps:$4 sm:$0xff]   ;;  %v12086_v1 = vld [vmem:[#allocation6 + $0x15fc] ss:$72 sps:$4 sm:$0xff]  }
  0xfa   : > { %5561 = vmatprep.subr.bf16.mxu0 %v11999_v0  ;;  %v12081_v0 = vld [vmem:[#allocation6 + $0x1568] ss:$72 sps:$4 sm:$0xff]  }
  0xfc   : > { %5603 = vmatpush1.bf16.msra.mxu1 %v12000_v3  ;;  %v12089_v3 = vld [vmem:[#allocation6 + $0x168c] ss:$72 sps:$4 sm:$0xff]  }
  0xfd   : > { %5562 = vmatpush1.bf16.msra.mxu0 %v11997_v2  ;;  %5604 = vmatprep.subr.bf16.mxu1 %v12008_v5  ;;  %v12084_v2 = vld [vmem:[#allocation6 + $0x15f8] ss:$72 sps:$4 sm:$0xff]   ;;  %v12092_v5 = vld [vmem:[#allocation6 + $0x171c] ss:$72 sps:$4 sm:$0xff]  }
  0xfe   : > { %5563 = vmatprep.subr.bf16.mxu0 %v12005_v4  ;;  %v12087_v4 = vld [vmem:[#allocation6 + $0x1688] ss:$72 sps:$4 sm:$0xff]  }
 0x100   : > { %5605 = vmatpush1.bf16.msra.mxu1 %v12006_v7  ;;  %v12095_v7 = vld [vmem:[#allocation6 + $0x17ac] ss:$72 sps:$4 sm:$0xff]  }
 0x101   : > { %5564 = vmatpush1.bf16.msra.mxu0 %v12003_v6  ;;  %5606 = vmatprep.subr.bf16.mxu1 %v12014_v10  ;;  %v12090_v6 = vld [vmem:[#allocation6 + $0x1718] ss:$72 sps:$4 sm:$0xff]   ;;  %v12098_v10 = vld [vmem:[#allocation6 + $0x183c] ss:$72 sps:$4 sm:$0xff]  }
 0x102   : > { %5565 = vmatprep.subr.bf16.mxu0 %v12011_v9  ;;  %v12093_v9 = vld [vmem:[#allocation6 + $0x17a8] ss:$72 sps:$4 sm:$0xff]  }
 0x104   : > { %5607 = vmatpush1.bf16.msra.mxu1 %v12012_v13  ;;  %v12101_v13 = vld [vmem:[#allocation6 + $0x18cc] ss:$72 sps:$4 sm:$0xff]  }
 0x105   : > { %5566 = vmatpush1.bf16.msra.mxu0 %v12009_v12  ;;  %5617 = vmatprep.subr.bf16.mxu1 %v12017_v15  ;;  %v12096_v12 = vld [vmem:[#allocation6 + $0x1838] ss:$72 sps:$4 sm:$0xff]   ;;  %v12104_v15 = vld [vmem:[#allocation6 + $0x195c] ss:$72 sps:$4 sm:$0xff]  }
 0x107   : > { %5609 = vmatmul.mubr.bf16.vlgmr.msra.gmra.mrb[4].mxu1 %v14049_v8 }
 0x108   : > { %5568 = vmatmul.mubr.bf16.vlgmr.msra.gmra.mrb[0].mxu0 %v14061_v16  ;;  %5618 = vmatpush1.bf16.msra.mxu1 %v12015_v17  ;;  %v12102_v17 = vld [vmem:[#allocation6 + $0x1958] ss:$72 sps:$4 sm:$0xff]  }
 0x109   : > { %5649 = vmatprep.mubr.bf16.mxu1 %v14043_v52  ;;  %5619 = vmatprep.subr.bf16.mxu1 %v12020_v18  ;;  %v12107_v18 = vld [vmem:[#allocation6 + $0x19ec] ss:$72 sps:$4 sm:$0xff]  }
 0x10a   : > { %5731 = vmatprep.mubr.bf16.mxu0 %v14040_v48 }
 0x10c   : > { %5620 = vmatpush1.bf16.msra.mxu1 %v12018_v19  ;;  %v12105_v19 = vld [vmem:[#allocation6 + $0x19e8] ss:$72 sps:$4 sm:$0xff]  }
 0x10d   : > { %5621 = vmatprep.subr.bf16.mxu1 %v12023_v20  ;;  %v12110_v20 = vld [vmem:[#allocation6 + $0x1a7c] ss:$72 sps:$4 sm:$0xff]  }
 0x110   : > { %5622 = vmatpush1.bf16.msra.mxu1 %v12021_v21  ;;  %v12108_v21 = vld [vmem:[#allocation6 + $0x1a78] ss:$72 sps:$4 sm:$0xff]  }
 0x111   : > { %5623 = vmatprep.subr.bf16.mxu1 %v12026_v22  ;;  %v12113_v22 = vld [vmem:[#allocation6 + $0x1c] ss:$72 sps:$4 sm:$0xff]  }
 0x114   : > { %5624 = vmatpush1.bf16.msra.mxu1 %v12024_v23  ;;  %v12111_v23 = vld [vmem:[#allocation6 + $0x18] ss:$72 sps:$4 sm:$0xff]  }
 0x115   : > { %5625 = vmatprep.subr.bf16.mxu1 %v12029_v24  ;;  %v12116_v24 = vld [vmem:[#allocation6 + $0xac] ss:$72 sps:$4 sm:$0xff]  }
 0x118   : > { %5626 = vmatpush1.bf16.msra.mxu1 %v12027_v25  ;;  %v12114_v25 = vld [vmem:[#allocation6 + $0xa8] ss:$72 sps:$4 sm:$0xff]  }
 0x119   : > { %5627 = vmatprep.subr.bf16.mxu1 %v12032_v26  ;;  %v12119_v26 = vld [vmem:[#allocation6 + $0x13c] ss:$72 sps:$4 sm:$0xff]  }
 0x11c   : > { %5628 = vmatpush1.bf16.msra.mxu1 %v12030_v27  ;;  %v12117_v27 = vld [vmem:[#allocation6 + $0x138] ss:$72 sps:$4 sm:$0xff]  }
 0x11d   : > { %5629 = vmatprep.subr.bf16.mxu1 %v12035_v28  ;;  %v12122_v28 = vld [vmem:[#allocation6 + $0x1cc] ss:$72 sps:$4 sm:$0xff]  }
 0x120   : > { %5630 = vmatpush1.bf16.msra.mxu1 %v12033_v29  ;;  %v12120_v29 = vld [vmem:[#allocation6 + $0x1c8] ss:$72 sps:$4 sm:$0xff]  }
 0x121   : > { %5631 = vmatprep.subr.bf16.mxu1 %v12038_v30  ;;  %v12125_v30 = vld [vmem:[#allocation6 + $0x25c] ss:$72 sps:$4 sm:$0xff]  }
 0x124   : > { %5632 = vmatpush1.bf16.msra.mxu1 %v12036_v31  ;;  %v12123_v31 = vld [vmem:[#allocation6 + $0x258] ss:$72 sps:$4 sm:$0xff]  }
 0x125   : > { %5633 = vmatprep.subr.bf16.mxu1 %v12041_v32  ;;  %v12128_v32 = vld [vmem:[#allocation6 + $0x2ec] ss:$72 sps:$4 sm:$0xff]  }
 0x128   : > { %5634 = vmatpush1.bf16.msra.mxu1 %v12039_v33  ;;  %v12126_v33 = vld [vmem:[#allocation6 + $0x2e8] ss:$72 sps:$4 sm:$0xff]  }
 0x129   : > { %5635 = vmatprep.subr.bf16.mxu1 %v12044_v34  ;;  %v12131_v34 = vld [vmem:[#allocation6 + $0x37c] ss:$72 sps:$4 sm:$0xff]  }
 0x12c   : > { %5636 = vmatpush1.bf16.msra.mxu1 %v12042_v36 }
 0x12d   : > { %5637 = vmatprep.subr.bf16.mxu1 %v12047_v37 }
 0x130   : > { %5638 = vmatpush1.bf16.msra.mxu1 %v12045_v38 }
 0x131   : > { %5639 = vmatprep.subr.bf16.mxu1 %v12050_v39  ;;  %v12129_v39 = vld [vmem:[#allocation6 + $0x378] ss:$72 sps:$4 sm:$0xff]  }
 0x134   : > { %5640 = vmatpush1.bf16.msra.mxu1 %v12048_v40  ;;  %v12134_v40 = vld [vmem:[#allocation6 + $0x40c] ss:$72 sps:$4 sm:$0xff]  }
 0x135   : > { %5641 = vmatprep.subr.bf16.mxu1 %v12053_v41 }
 0x138   : > { %5642 = vmatpush1.bf16.msra.mxu1 %v12051_v42  ;;  %v12132_v42 = vld [vmem:[#allocation6 + $0x408] ss:$72 sps:$4 sm:$0xff]  }
 0x139   : > { %5643 = vmatprep.subr.bf16.mxu1 %v12056_v43  ;;  %v12137_v43 = vld [vmem:[#allocation6 + $0x49c] ss:$72 sps:$4 sm:$0xff]  }
 0x13c   : > { %5644 = vmatpush1.bf16.msra.mxu1 %v12054_v44  ;;  %v12135_v44 = vld [vmem:[#allocation6 + $0x498] ss:$72 sps:$4 sm:$0xff]  }
 0x13d   : > { %5645 = vmatprep.subr.bf16.mxu1 %v12059_v45  ;;  %v12140_v45 = vld [vmem:[#allocation6 + $0x52c] ss:$72 sps:$4 sm:$0xff]  }
 0x140   : > { %5646 = vmatpush1.bf16.msra.mxu1 %v12057_v46  ;;  %v12138_v46 = vld [vmem:[#allocation6 + $0x528] ss:$72 sps:$4 sm:$0xff]  }
 0x141   : > { %5647 = vmatprep.subr.bf16.mxu1 %v12062_v47  ;;  %v12143_v47 = vld [vmem:[#allocation6 + $0x5bc] ss:$72 sps:$4 sm:$0xff]  }
 0x144   : > { %5648 = vmatpush1.bf16.msra.mxu1 %v12060_v49  ;;  %v12141_v49 = vld [vmem:[#allocation6 + $0x5b8] ss:$72 sps:$4 sm:$0xff]  }
 0x145   : > { %5658 = vmatprep.subr.bf16.mxu1 %v12065_v50  ;;  %v12146_v50 = vld [vmem:[#allocation6 + $0x64c] ss:$72 sps:$4 sm:$0xff]  }
 0x147   : > { %5650 = vmatmul.mubr.bf16.vlgmr.msra.gmra.mrb[4].mxu1 %v14051_v11 }
 0x148   : > { %5659 = vmatpush1.bf16.msra.mxu1 %v12063_v51  ;;  %5690 = vmatprep.mubr.bf16.mxu1 %v14057_v35  ;;  %v12144_v51 = vld [vmem:[#allocation6 + $0x648] ss:$72 sps:$4 sm:$0xff]  }
 0x149   : > { %5660 = vmatprep.subr.bf16.mxu1 %v12068_v53  ;;  %v12149_v53 = vld [vmem:[#allocation6 + $0x6dc] ss:$72 sps:$4 sm:$0xff]  }
 0x14c   : > { %5661 = vmatpush1.bf16.msra.mxu1 %v12066_v54  ;;  %v12147_v54 = vld [vmem:[#allocation6 + $0x6d8] ss:$72 sps:$4 sm:$0xff]  }
 0x14d   : > { %5662 = vmatprep.subr.bf16.mxu1 %v12071_v55  ;;  %v12152_v55 = vld [vmem:[#allocation6 + $0x76c] ss:$72 sps:$4 sm:$0xff]  }
 0x150   : > { %5663 = vmatpush1.bf16.msra.mxu1 %v12069_v56  ;;  %v12150_v56 = vld [vmem:[#allocation6 + $0x768] ss:$72 sps:$4 sm:$0xff]  }
 0x151   : > { %5664 = vmatprep.subr.bf16.mxu1 %v12074_v57  ;;  %v12155_v57 = vld [vmem:[#allocation6 + $0x7fc] ss:$72 sps:$4 sm:$0xff]  }
 0x154   : > { %5665 = vmatpush1.bf16.msra.mxu1 %v12072_v58  ;;  %v12153_v58 = vld [vmem:[#allocation6 + $0x7f8] ss:$72 sps:$4 sm:$0xff]  }
 0x155   : > { %5666 = vmatprep.subr.bf16.mxu1 %v12077_v59  ;;  %v12158_v59 = vld [vmem:[#allocation6 + $0x88c] ss:$72 sps:$4 sm:$0xff]  }
 0x158   : > { %5667 = vmatpush1.bf16.msra.mxu1 %v12075_v60  ;;  %v12156_v60 = vld [vmem:[#allocation6 + $0x888] ss:$72 sps:$4 sm:$0xff]  }
 0x159   : > { %5668 = vmatprep.subr.bf16.mxu1 %v12080_v61  ;;  %v12161_v61 = vld [vmem:[#allocation6 + $0x91c] ss:$72 sps:$4 sm:$0xff]  }
 0x15c   : > { %5669 = vmatpush1.bf16.msra.mxu1 %v12078_v62  ;;  %v12255_v62 = vld [vmem:[#allocation6 + $0x10] ss:$72 sps:$4 sm:$0xff]  }
 0x15d   : > { %5670 = vmatprep.subr.bf16.mxu1 %v12083_v63  ;;  %v12257_v63 = vld [vmem:[#allocation6 + $0x14] ss:$72 sps:$4 sm:$0xff]  }
 0x15e   : > { %5699 = vmatprep.subr.bf16.mxu0 %v12257_v63  ;;  %v12335_v63 = vld [vmem:[#allocation6 + $0x764] ss:$72 sps:$4 sm:$0xff]  }
 0x15f   : > { %5700 = vmatpush1.bf16.msra.mxu0 %v12255_v62  ;;  %v12333_v62 = vld [vmem:[#allocation6 + $0x760] ss:$72 sps:$4 sm:$0xff]  }
 0x160   : > { %5671 = vmatpush1.bf16.msra.mxu1 %v12081_v0  ;;  %v12159_v0 = vld [vmem:[#allocation6 + $0x918] ss:$72 sps:$4 sm:$0xff]  }
 0x161   : > { %5672 = vmatprep.subr.bf16.mxu1 %v12086_v1  ;;  %v12164_v1 = vld [vmem:[#allocation6 + $0x9ac] ss:$72 sps:$4 sm:$0xff]  }
 0x164   : > { %5673 = vmatpush1.bf16.msra.mxu1 %v12084_v2  ;;  %v12263_v2 = vld [vmem:[#allocation6 + $0xa4] ss:$72 sps:$4 sm:$0xff]  }
 0x165   : > { %5674 = vmatprep.subr.bf16.mxu1 %v12089_v3  ;;  %v12261_v3 = vld [vmem:[#allocation6 + $0xa0] ss:$72 sps:$4 sm:$0xff]   ;;  %5701 = vmatprep.subr.bf16.mxu0 %v12263_v2  ;;  %v12339_v2 = vld [vmem:[#allocation6 + $0x7f0] ss:$72 sps:$4 sm:$0xff]  }
 0x166   : > { %5702 = vmatpush1.bf16.msra.mxu0 %v12261_v3  ;;  %v12341_v3 = vld [vmem:[#allocation6 + $0x7f4] ss:$72 sps:$4 sm:$0xff]  }
 0x168   : > { %5675 = vmatpush1.bf16.msra.mxu1 %v12087_v4  ;;  %v12162_v4 = vld [vmem:[#allocation6 + $0x9a8] ss:$72 sps:$4 sm:$0xff]  }
 0x169   : > { %5676 = vmatprep.subr.bf16.mxu1 %v12092_v5  ;;  %v12167_v5 = vld [vmem:[#allocation6 + $0xa3c] ss:$72 sps:$4 sm:$0xff]  }
 0x16c   : > { %5677 = vmatpush1.bf16.msra.mxu1 %v12090_v6  ;;  %v12267_v6 = vld [vmem:[#allocation6 + $0x130] ss:$72 sps:$4 sm:$0xff]  }
 0x16d   : > { %5678 = vmatprep.subr.bf16.mxu1 %v12095_v7  ;;  %v12269_v7 = vld [vmem:[#allocation6 + $0x134] ss:$72 sps:$4 sm:$0xff]  }
 0x16e   : > { %5703 = vmatprep.subr.bf16.mxu0 %v12269_v7  ;;  %v12347_v7 = vld [vmem:[#allocation6 + $0x884] ss:$72 sps:$4 sm:$0xff]  }
 0x16f   : > { %5704 = vmatpush1.bf16.msra.mxu0 %v12267_v6  ;;  %v12345_v6 = vld [vmem:[#allocation6 + $0x880] ss:$72 sps:$4 sm:$0xff]  }
 0x170   : > { %5679 = vmatpush1.bf16.msra.mxu1 %v12093_v9  ;;  %v12165_v9 = vld [vmem:[#allocation6 + $0xa38] ss:$72 sps:$4 sm:$0xff]  }
 0x171   : > { %5680 = vmatprep.subr.bf16.mxu1 %v12098_v10  ;;  %v12170_v10 = vld [vmem:[#allocation6 + $0xacc] ss:$72 sps:$4 sm:$0xff]  }
 0x174   : > { %5681 = vmatpush1.bf16.msra.mxu1 %v12096_v12  ;;  %v12273_v12 = vld [vmem:[#allocation6 + $0x1c0] ss:$72 sps:$4 sm:$0xff]  }
 0x175   : > { %5682 = vmatprep.subr.bf16.mxu1 %v12101_v13  ;;  %v12275_v13 = vld [vmem:[#allocation6 + $0x1c4] ss:$72 sps:$4 sm:$0xff]  }
 0x176   : > { %5705 = vmatprep.subr.bf16.mxu0 %v12275_v13  ;;  %v12353_v13 = vld [vmem:[#allocation6 + $0x914] ss:$72 sps:$4 sm:$0xff]  }
 0x177   : > { %5706 = vmatpush1.bf16.msra.mxu0 %v12273_v12  ;;  %v12351_v12 = vld [vmem:[#allocation6 + $0x910] ss:$72 sps:$4 sm:$0xff]  }
 0x178   : > { %5683 = vmatpush1.bf16.msra.mxu1 %v12099_v14  ;;  %v12168_v14 = vld [vmem:[#allocation6 + $0xac8] ss:$72 sps:$4 sm:$0xff]  }
 0x179   : > { %5684 = vmatprep.subr.bf16.mxu1 %v12104_v15  ;;  %v12173_v15 = vld [vmem:[#allocation6 + $0xb5c] ss:$72 sps:$4 sm:$0xff]  }
 0x17c   : > { %5685 = vmatpush1.bf16.msra.mxu1 %v12102_v17  ;;  %v12279_v17 = vld [vmem:[#allocation6 + $0x250] ss:$72 sps:$4 sm:$0xff]  }
 0x17d   : > { %5686 = vmatprep.subr.bf16.mxu1 %v12107_v18  ;;  %v12281_v18 = vld [vmem:[#allocation6 + $0x254] ss:$72 sps:$4 sm:$0xff]  }
 0x17e   : > { %5707 = vmatprep.subr.bf16.mxu0 %v12281_v18  ;;  %v12359_v18 = vld [vmem:[#allocation6 + $0x9a4] ss:$72 sps:$4 sm:$0xff]  }
 0x17f   : > { %5708 = vmatpush1.bf16.msra.mxu0 %v12279_v17  ;;  %v12357_v17 = vld [vmem:[#allocation6 + $0x9a0] ss:$72 sps:$4 sm:$0xff]  }
 0x180   : > { %5687 = vmatpush1.bf16.msra.mxu1 %v12105_v19  ;;  %v12171_v19 = vld [vmem:[#allocation6 + $0xb58] ss:$72 sps:$4 sm:$0xff]  }
 0x181   : > { %5688 = vmatprep.subr.bf16.mxu1 %v12110_v20  ;;  %v12176_v20 = vld [vmem:[#allocation6 + $0xbec] ss:$72 sps:$4 sm:$0xff]  }
 0x184   : > { %5689 = vmatpush1.bf16.msra.mxu1 %v12108_v21  ;;  %v12285_v21 = vld [vmem:[#allocation6 + $0x2e0] ss:$72 sps:$4 sm:$0xff]  }
 0x185   : > { %5822 = vmatprep.subr.bf16.mxu1 %v12113_v22  ;;  %v12287_v22 = vld [vmem:[#allocation6 + $0x2e4] ss:$72 sps:$4 sm:$0xff]  }
 0x186   : > { %5709 = vmatprep.subr.bf16.mxu0 %v12287_v22  ;;  %v12365_v22 = vld [vmem:[#allocation6 + $0xa34] ss:$72 sps:$4 sm:$0xff]  }
 0x187   : > { %5691 = vmatmul.mubr.bf16.vlgmr.msra.gmra.mrb[4].mxu1 %v14061_v16  ;;  %5710 = vmatpush1.bf16.msra.mxu0 %v12285_v21  ;;  %v12363_v21 = vld [vmem:[#allocation6 + $0xa30] ss:$72 sps:$4 sm:$0xff]  }
 0x188   : > { %5823 = vmatpush1.bf16.msra.mxu1 %v12111_v23  ;;  %5854 = vmatprep.mubr.bf16.mxu1 %v14040_v48  ;;  %v12174_v23 = vld [vmem:[#allocation6 + $0xbe8] ss:$72 sps:$4 sm:$0xff]  }
 0x189   : > { %5824 = vmatprep.subr.bf16.mxu1 %v12116_v24  ;;  %v12179_v24 = vld [vmem:[#allocation6 + $0xc7c] ss:$72 sps:$4 sm:$0xff]  }
 0x18c   : > { %5825 = vmatpush1.bf16.msra.mxu1 %v12114_v25 }
 0x18d   : > { %5826 = vmatprep.subr.bf16.mxu1 %v12119_v26  ;;  %v12177_v26 = vld [vmem:[#allocation6 + $0xc78] ss:$72 sps:$4 sm:$0xff]  }
 0x190   : > { %5827 = vmatpush1.bf16.msra.mxu1 %v12117_v27  ;;  %v12293_v27 = vld [vmem:[#allocation6 + $0x374] ss:$72 sps:$4 sm:$0xff]  }
 0x191   : > { %5828 = vmatprep.subr.bf16.mxu1 %v12122_v28  ;;  %5711 = vmatprep.subr.bf16.mxu0 %v12293_v27  ;;  %v12216_v27 = vld [vmem:[#allocation6 + $0x13c8] ss:$72 sps:$4 sm:$0xff]  }
 0x194   : > { %5829 = vmatpush1.bf16.msra.mxu1 %v12120_v29 }
 0x195   : > { %5830 = vmatprep.subr.bf16.mxu1 %v12125_v30  ;;  %v12291_v30 = vld [vmem:[#allocation6 + $0x370] ss:$72 sps:$4 sm:$0xff]  }
 0x196   : > { %5712 = vmatpush1.bf16.msra.mxu0 %v12291_v30  ;;  %v12375_v30 = vld [vmem:[#allocation6 + $0xb50] ss:$72 sps:$4 sm:$0xff]  }
 0x198   : > { %5831 = vmatpush1.bf16.msra.mxu1 %v12123_v31 }
 0x199   : > { %5832 = vmatprep.subr.bf16.mxu1 %v12128_v32 }
 0x19a   : > { %v14071_v36 = vpop.f32.mrb[0].mxu1 }
 0x19b   : > { %v14073_v37 = vpop.f32.mrb[1].mxu1 }
 0x19c   : > { %v5491_v38 = vpop.f32.mrb[2].mxu1  ;;  %5833 = vmatpush1.bf16.msra.mxu1 %v12126_v33  ;;  %v12182_v33 = vld [vmem:[#allocation6 + $0xd0c] ss:$72 sps:$4 sm:$0xff]  }
 0x19d   : > { %v5492_v41 = vpop.f32.mrb[3].mxu1  ;;  %5834 = vmatprep.subr.bf16.mxu1 %v12131_v34  ;;  %v12297_v34 = vld [vmem:[#allocation6 + $0x400] ss:$72 sps:$4 sm:$0xff]   ;;  %v12299_v38 = vld [vmem:[#allocation6 + $0x404] ss:$72 sps:$4 sm:$0xff]  }
 0x19e   : > { %v12185_v41 = vld [vmem:[#allocation6 + $0xd9c] ss:$72 sps:$4 sm:$0xff]   ;;  %5713 = vmatprep.subr.bf16.mxu0 %v12299_v38  ;;  %v12381_v38 = vld [vmem:[#allocation6 + $0xbe0] ss:$72 sps:$4 sm:$0xff]  }
 0x19f   : > { %5714 = vmatpush1.bf16.msra.mxu0 %v12297_v34  ;;  %v12224_v34 = vld [vmem:[#allocation6 + $0x14ec] ss:$72 sps:$4 sm:$0xff]  }
 0x1a0   : > { %5835 = vmatpush1.bf16.msra.mxu1 %v12129_v39 }
 0x1a1   : > { %5836 = vmatprep.subr.bf16.mxu1 %v12134_v40  ;;  %v12180_v40 = vld [vmem:[#allocation6 + $0xd08] ss:$72 sps:$4 sm:$0xff]  }
 0x1a4   : > { %5837 = vmatpush1.bf16.msra.mxu1 %v12132_v42  ;;  %v12305_v42 = vld [vmem:[#allocation6 + $0x494] ss:$72 sps:$4 sm:$0xff]  }
 0x1a5   : > { %5838 = vmatprep.subr.bf16.mxu1 %v12137_v43  ;;  %5715 = vmatprep.subr.bf16.mxu0 %v12305_v42  ;;  %v12188_v43 = vld [vmem:[#allocation6 + $0xe2c] ss:$72 sps:$4 sm:$0xff]  }
 0x1a6   : > { %v12389_v42 = vld [vmem:[#allocation6 + $0xc74] ss:$72 sps:$4 sm:$0xff]  }
 0x1a8   : > { %5839 = vmatpush1.bf16.msra.mxu1 %v12135_v44  ;;  %v12309_v44 = vld [vmem:[#allocation6 + $0x520] ss:$72 sps:$4 sm:$0xff]  }
 0x1a9   : > { %5840 = vmatprep.subr.bf16.mxu1 %v12140_v45  ;;  %v12311_v45 = vld [vmem:[#allocation6 + $0x524] ss:$72 sps:$4 sm:$0xff]  }
 0x1ac   : > { %5841 = vmatpush1.bf16.msra.mxu1 %v12138_v46  ;;  %v12186_v46 = vld [vmem:[#allocation6 + $0xe28] ss:$72 sps:$4 sm:$0xff]  }
 0x1ad   : > { %5842 = vmatprep.subr.bf16.mxu1 %v12143_v47  ;;  %v12191_v47 = vld [vmem:[#allocation6 + $0xebc] ss:$72 sps:$4 sm:$0xff]  }
 0x1b0   : > { %5843 = vmatpush1.bf16.msra.mxu1 %v12141_v49  ;;  %v12315_v49 = vld [vmem:[#allocation6 + $0x5b0] ss:$72 sps:$4 sm:$0xff]  }
 0x1b1   : > { %5844 = vmatprep.subr.bf16.mxu1 %v12146_v50  ;;  %v12317_v50 = vld [vmem:[#allocation6 + $0x5b4] ss:$72 sps:$4 sm:$0xff]  }
 0x1b4   : > { %5845 = vmatpush1.bf16.msra.mxu1 %v12144_v51  ;;  %v12189_v51 = vld [vmem:[#allocation6 + $0xeb8] ss:$72 sps:$4 sm:$0xff]  }
 0x1b5   : > { %5846 = vmatprep.subr.bf16.mxu1 %v12149_v53  ;;  %v12194_v53 = vld [vmem:[#allocation6 + $0xf4c] ss:$72 sps:$4 sm:$0xff]  }
 0x1b8   : > { %5847 = vmatpush1.bf16.msra.mxu1 %v12147_v54  ;;  %v12321_v54 = vld [vmem:[#allocation6 + $0x640] ss:$72 sps:$4 sm:$0xff]  }
 0x1b9   : > { %5848 = vmatprep.subr.bf16.mxu1 %v12152_v55  ;;  %v12323_v55 = vld [vmem:[#allocation6 + $0x644] ss:$72 sps:$4 sm:$0xff]  }
 0x1bc   : > { %5849 = vmatpush1.bf16.msra.mxu1 %v12150_v56  ;;  %v12192_v56 = vld [vmem:[#allocation6 + $0xf48] ss:$72 sps:$4 sm:$0xff]  }
 0x1bd   : > { %5850 = vmatprep.subr.bf16.mxu1 %v12155_v57  ;;  %v12197_v57 = vld [vmem:[#allocation6 + $0xfdc] ss:$72 sps:$4 sm:$0xff]  }
 0x1c0   : > { %5851 = vmatpush1.bf16.msra.mxu1 %v12153_v58  ;;  %v12327_v58 = vld [vmem:[#allocation6 + $0x6d0] ss:$72 sps:$4 sm:$0xff]  }
 0x1c1   : > { %5852 = vmatprep.subr.bf16.mxu1 %v12158_v59  ;;  %v12329_v59 = vld [vmem:[#allocation6 + $0x6d4] ss:$72 sps:$4 sm:$0xff]  }
 0x1c4   : > { %5853 = vmatpush1.bf16.msra.mxu1 %v12156_v60  ;;  %v12195_v60 = vld [vmem:[#allocation6 + $0xfd8] ss:$72 sps:$4 sm:$0xff]  }
 0x1c5   : > { %5863 = vmatprep.subr.bf16.mxu1 %v12161_v61  ;;  %v12200_v61 = vld [vmem:[#allocation6 + $0x106c] ss:$72 sps:$4 sm:$0xff]  }
 0x1c7   : > { %5855 = vmatmul.mubr.bf16.vlgmr.msra.gmra.mrb[8].mxu1 %v14049_v8 }
 0x1c8   : > { %5864 = vmatpush1.bf16.msra.mxu1 %v12159_v0  ;;  %5895 = vmatprep.mubr.bf16.mxu1 %v14043_v52  ;;  %v12198_v0 = vld [vmem:[#allocation6 + $0x1068] ss:$72 sps:$4 sm:$0xff]  }
 0x1c9   : > { %5865 = vmatprep.subr.bf16.mxu1 %v12164_v1  ;;  %v12203_v1 = vld [vmem:[#allocation6 + $0x10fc] ss:$72 sps:$4 sm:$0xff]  }
 0x1cc   : > { %5866 = vmatpush1.bf16.msra.mxu1 %v12162_v4  ;;  %v12201_v4 = vld [vmem:[#allocation6 + $0x10f8] ss:$72 sps:$4 sm:$0xff]  }
 0x1cd   : > { %5867 = vmatprep.subr.bf16.mxu1 %v12167_v5  ;;  %v12206_v5 = vld [vmem:[#allocation6 + $0x118c] ss:$72 sps:$4 sm:$0xff]  }
 0x1d0   : > { %5868 = vmatpush1.bf16.msra.mxu1 %v12165_v9  ;;  %v12204_v9 = vld [vmem:[#allocation6 + $0x1188] ss:$72 sps:$4 sm:$0xff]  }
 0x1d1   : > { %5869 = vmatprep.subr.bf16.mxu1 %v12170_v10  ;;  %v12209_v10 = vld [vmem:[#allocation6 + $0x121c] ss:$72 sps:$4 sm:$0xff]  }
 0x1d4   : > { %5870 = vmatpush1.bf16.msra.mxu1 %v12168_v14  ;;  %v12207_v14 = vld [vmem:[#allocation6 + $0x1218] ss:$72 sps:$4 sm:$0xff]  }
 0x1d5   : > { %5871 = vmatprep.subr.bf16.mxu1 %v12173_v15  ;;  %v12212_v15 = vld [vmem:[#allocation6 + $0x12ac] ss:$72 sps:$4 sm:$0xff]  }
 0x1d8   : > { %5872 = vmatpush1.bf16.msra.mxu1 %v12171_v19  ;;  %v12210_v19 = vld [vmem:[#allocation6 + $0x12a8] ss:$72 sps:$4 sm:$0xff]  }
 0x1d9   : > { %5873 = vmatprep.subr.bf16.mxu1 %v12176_v20  ;;  %v12215_v20 = vld [vmem:[#allocation6 + $0x133c] ss:$72 sps:$4 sm:$0xff]  }
 0x1db   : > { %v5569_v25 = vpop.f32.mrb[0].mxu0 }
 0x1dc   : > { %v14078_v28 = vadd.f32 %v5569_v25, %v14071_v36  ;;  %v5571_v29 = vpop.f32.mrb[1].mxu0  ;;  %5874 = vmatpush1.bf16.msra.mxu1 %v12174_v23  ;;  %v12303_v36 = vld [vmem:[#allocation6 + $0x490] ss:$72 sps:$4 sm:$0xff]   ;;  %v12369_v25 = vld [vmem:[#allocation6 + $0xac0] ss:$72 sps:$4 sm:$0xff]  }
 0x1dd   : > { %v14081_v31 = vadd.f32 %v5571_v29, %v14073_v37  ;;  %v5573_v32 = vpop.f32.mrb[2].mxu0  ;;  %5875 = vmatprep.subr.bf16.mxu1 %v12179_v24  ;;  %v12183_v37 = vld [vmem:[#allocation6 + $0xd98] ss:$72 sps:$4 sm:$0xff]   ;;  %5716 = vmatpush1.bf16.msra.mxu0 %v12303_v36  ;;  %v12218_v24 = vld [vmem:[#allocation6 + $0x13cc] ss:$72 sps:$4 sm:$0xff]  }
 0x1de   : > { %v5574_v39 = vpop.f32.mrb[3].mxu0  ;;  %5717 = vmatprep.subr.bf16.mxu0 %v12311_v45  ;;  %v12213_v23 = vld [vmem:[#allocation6 + $0x1338] ss:$72 sps:$4 sm:$0xff]   ;;  %v12221_v29 = vld [vmem:[#allocation6 + $0x145c] ss:$72 sps:$4 sm:$0xff]  }
 0x1df   : > { %v12377_v32 = vld [vmem:[#allocation6 + $0xb54] ss:$72 sps:$4 sm:$0xff]   ;;  %v12383_v39 = vld [vmem:[#allocation6 + $0xbe4] ss:$72 sps:$4 sm:$0xff]   ;;  %v12387_v36 = vld [vmem:[#allocation6 + $0xc70] ss:$72 sps:$4 sm:$0xff]  }
 0x1e0   : > { %5876 = vmatpush1.bf16.msra.mxu1 %v12177_v26  ;;  %v12371_v26 = vld [vmem:[#allocation6 + $0xac4] ss:$72 sps:$4 sm:$0xff]  }
 0x1e1   : > { %5877 = vmatprep.subr.bf16.mxu1 %v12182_v33  ;;  %5718 = vmatpush1.bf16.msra.mxu0 %v12309_v44  ;;  %v12219_v33 = vld [vmem:[#allocation6 + $0x1458] ss:$72 sps:$4 sm:$0xff]   ;;  %v12395_v45 = vld [vmem:[#allocation6 + $0xd04] ss:$72 sps:$4 sm:$0xff]  }
 0x1e2   : > { %5719 = vmatprep.subr.bf16.mxu0 %v12317_v50  ;;  %v12393_v44 = vld [vmem:[#allocation6 + $0xd00] ss:$72 sps:$4 sm:$0xff]   ;;  %v12401_v50 = vld [vmem:[#allocation6 + $0xd94] ss:$72 sps:$4 sm:$0xff]  }
 0x1e4   : > { %5878 = vmatpush1.bf16.msra.mxu1 %v12180_v40  ;;  %v12222_v40 = vld [vmem:[#allocation6 + $0x14e8] ss:$72 sps:$4 sm:$0xff]  }
 0x1e5   : > { %5879 = vmatprep.subr.bf16.mxu1 %v12185_v41  ;;  %5720 = vmatpush1.bf16.msra.mxu0 %v12315_v49  ;;  %v12227_v41 = vld [vmem:[#allocation6 + $0x157c] ss:$72 sps:$4 sm:$0xff]   ;;  %v12399_v49 = vld [vmem:[#allocation6 + $0xd90] ss:$72 sps:$4 sm:$0xff]  }
 0x1e6   : > { %5721 = vmatprep.subr.bf16.mxu0 %v12323_v55  ;;  %v12407_v55 = vld [vmem:[#allocation6 + $0xe24] ss:$72 sps:$4 sm:$0xff]  }
 0x1e8   : > { %5880 = vmatpush1.bf16.msra.mxu1 %v12183_v37  ;;  %v12225_v37 = vld [vmem:[#allocation6 + $0x1578] ss:$72 sps:$4 sm:$0xff]  }
 0x1e9   : > { %5881 = vmatprep.subr.bf16.mxu1 %v12188_v43  ;;  %5722 = vmatpush1.bf16.msra.mxu0 %v12321_v54  ;;  %v12230_v43 = vld [vmem:[#allocation6 + $0x160c] ss:$72 sps:$4 sm:$0xff]   ;;  %v12405_v54 = vld [vmem:[#allocation6 + $0xe20] ss:$72 sps:$4 sm:$0xff]  }
 0x1ea   : > { %5723 = vmatprep.subr.bf16.mxu0 %v12329_v59  ;;  %v12413_v59 = vld [vmem:[#allocation6 + $0xeb4] ss:$72 sps:$4 sm:$0xff]  }
 0x1ec   : > { %5882 = vmatpush1.bf16.msra.mxu1 %v12186_v46  ;;  %v12228_v46 = vld [vmem:[#allocation6 + $0x1608] ss:$72 sps:$4 sm:$0xff]  }
 0x1ed   : > { %5883 = vmatprep.subr.bf16.mxu1 %v12191_v47  ;;  %5724 = vmatpush1.bf16.msra.mxu0 %v12327_v58  ;;  %v12233_v47 = vld [vmem:[#allocation6 + $0x169c] ss:$72 sps:$4 sm:$0xff]   ;;  %v12411_v58 = vld [vmem:[#allocation6 + $0xeb0] ss:$72 sps:$4 sm:$0xff]  }
 0x1ee   : > { %5725 = vmatprep.subr.bf16.mxu0 %v12335_v63  ;;  %v12419_v63 = vld [vmem:[#allocation6 + $0xf44] ss:$72 sps:$4 sm:$0xff]  }
 0x1f0   : > { %5884 = vmatpush1.bf16.msra.mxu1 %v12189_v51  ;;  %v12231_v51 = vld [vmem:[#allocation6 + $0x1698] ss:$72 sps:$4 sm:$0xff]  }
 0x1f1   : > { %5885 = vmatprep.subr.bf16.mxu1 %v12194_v53  ;;  %5726 = vmatpush1.bf16.msra.mxu0 %v12333_v62  ;;  %v12236_v53 = vld [vmem:[#allocation6 + $0x172c] ss:$72 sps:$4 sm:$0xff]   ;;  %v12417_v62 = vld [vmem:[#allocation6 + $0xf40] ss:$72 sps:$4 sm:$0xff]  }
 0x1f2   : > { %5727 = vmatprep.subr.bf16.mxu0 %v12341_v3  ;;  %v12425_v3 = vld [vmem:[#allocation6 + $0xfd4] ss:$72 sps:$4 sm:$0xff]  }
 0x1f4   : > { %5886 = vmatpush1.bf16.msra.mxu1 %v12192_v56  ;;  %v12234_v56 = vld [vmem:[#allocation6 + $0x1728] ss:$72 sps:$4 sm:$0xff]  }
 0x1f5   : > { %5887 = vmatprep.subr.bf16.mxu1 %v12197_v57  ;;  %5728 = vmatpush1.bf16.msra.mxu0 %v12339_v2  ;;  %v12239_v57 = vld [vmem:[#allocation6 + $0x17bc] ss:$72 sps:$4 sm:$0xff]   ;;  %v12423_v2 = vld [vmem:[#allocation6 + $0xfd0] ss:$72 sps:$4 sm:$0xff]  }
 0x1f6   : > { %5729 = vmatprep.subr.bf16.mxu0 %v12347_v7  ;;  %v12431_v7 = vld [vmem:[#allocation6 + $0x1064] ss:$72 sps:$4 sm:$0xff]  }
 0x1f8   : > { %5888 = vmatpush1.bf16.msra.mxu1 %v12195_v60  ;;  %v12237_v60 = vld [vmem:[#allocation6 + $0x17b8] ss:$72 sps:$4 sm:$0xff]  }
 0x1f9   : > { %5889 = vmatprep.subr.bf16.mxu1 %v12200_v61  ;;  %5730 = vmatpush1.bf16.msra.mxu0 %v12345_v6  ;;  %v12242_v61 = vld [vmem:[#allocation6 + $0x184c] ss:$72 sps:$4 sm:$0xff]   ;;  %v12429_v6 = vld [vmem:[#allocation6 + $0x1060] ss:$72 sps:$4 sm:$0xff]  }
 0x1fa   : > { %5740 = vmatprep.subr.bf16.mxu0 %v12353_v13  ;;  %v12437_v13 = vld [vmem:[#allocation6 + $0x10f4] ss:$72 sps:$4 sm:$0xff]  }
 0x1fc   : > { %5890 = vmatpush1.bf16.msra.mxu1 %v12198_v0  ;;  %5732 = vmatmul.mubr.bf16.vlgmr.msra.gmra.mrb[4].mxu0 %v14049_v8  ;;  %v12240_v0 = vld [vmem:[#allocation6 + $0x1848] ss:$72 sps:$4 sm:$0xff]  }
 0x1fd   : > { %5891 = vmatprep.subr.bf16.mxu1 %v12203_v1  ;;  %5741 = vmatpush1.bf16.msra.mxu0 %v12351_v12  ;;  %v12245_v1 = vld [vmem:[#allocation6 + $0x18dc] ss:$72 sps:$4 sm:$0xff]   ;;  %v12435_v12 = vld [vmem:[#allocation6 + $0x10f0] ss:$72 sps:$4 sm:$0xff]  }
 0x1fe   : > { %5772 = vmatprep.mubr.bf16.mxu0 %v14043_v52  ;;  %5742 = vmatprep.subr.bf16.mxu0 %v12359_v18  ;;  %v12443_v18 = vld [vmem:[#allocation6 + $0x1184] ss:$72 sps:$4 sm:$0xff]  }
 0x200   : > { %5892 = vmatpush1.bf16.msra.mxu1 %v12201_v4  ;;  %v12243_v4 = vld [vmem:[#allocation6 + $0x18d8] ss:$72 sps:$4 sm:$0xff]  }
 0x201   : > { %5893 = vmatprep.subr.bf16.mxu1 %v12206_v5  ;;  %5743 = vmatpush1.bf16.msra.mxu0 %v12357_v17  ;;  %v12248_v5 = vld [vmem:[#allocation6 + $0x196c] ss:$72 sps:$4 sm:$0xff]   ;;  %v12441_v17 = vld [vmem:[#allocation6 + $0x1180] ss:$72 sps:$4 sm:$0xff]  }
 0x202   : > { %5744 = vmatprep.subr.bf16.mxu0 %v12365_v22  ;;  %v12449_v22 = vld [vmem:[#allocation6 + $0x1214] ss:$72 sps:$4 sm:$0xff]  }
 0x204   : > { %5894 = vmatpush1.bf16.msra.mxu1 %v12204_v9  ;;  %v12246_v9 = vld [vmem:[#allocation6 + $0x1968] ss:$72 sps:$4 sm:$0xff]  }
 0x205   : > { %5904 = vmatprep.subr.bf16.mxu1 %v12209_v10  ;;  %5745 = vmatpush1.bf16.msra.mxu0 %v12363_v21  ;;  %v12251_v10 = vld [vmem:[#allocation6 + $0x19fc] ss:$72 sps:$4 sm:$0xff]   ;;  %v12447_v21 = vld [vmem:[#allocation6 + $0x1210] ss:$72 sps:$4 sm:$0xff]  }
 0x206   : > { %5746 = vmatprep.subr.bf16.mxu0 %v12371_v26  ;;  %v12455_v26 = vld [vmem:[#allocation6 + $0x12a4] ss:$72 sps:$4 sm:$0xff]  }
 0x207   : > { %5896 = vmatmul.mubr.bf16.vlgmr.msra.gmra.mrb[8].mxu1 %v14051_v11 }
 0x208   : > { %5905 = vmatpush1.bf16.msra.mxu1 %v12207_v14  ;;  %5936 = vmatprep.mubr.bf16.mxu1 %v14057_v35  ;;  %v12249_v14 = vld [vmem:[#allocation6 + $0x19f8] ss:$72 sps:$4 sm:$0xff]  }
 0x209   : > { %5906 = vmatprep.subr.bf16.mxu1 %v12212_v15  ;;  %5747 = vmatpush1.bf16.msra.mxu0 %v12369_v25  ;;  %v12254_v15 = vld [vmem:[#allocation6 + $0x1a8c] ss:$72 sps:$4 sm:$0xff]   ;;  %v12453_v25 = vld [vmem:[#allocation6 + $0x12a0] ss:$72 sps:$4 sm:$0xff]  }
 0x20a   : > { %5748 = vmatprep.subr.bf16.mxu0 %v12377_v32  ;;  %v12461_v32 = vld [vmem:[#allocation6 + $0x1334] ss:$72 sps:$4 sm:$0xff]  }
 0x20c   : > { %5907 = vmatpush1.bf16.msra.mxu1 %v12210_v19  ;;  %v12252_v19 = vld [vmem:[#allocation6 + $0x1a88] ss:$72 sps:$4 sm:$0xff]  }
 0x20d   : > { %5908 = vmatprep.subr.bf16.mxu1 %v12215_v20  ;;  %5749 = vmatpush1.bf16.msra.mxu0 %v12375_v30  ;;  %v12260_v20 = vld [vmem:[#allocation6 + $0x2c] ss:$72 sps:$4 sm:$0xff]   ;;  %v12459_v30 = vld [vmem:[#allocation6 + $0x1330] ss:$72 sps:$4 sm:$0xff]  }
 0x20e   : > { %5750 = vmatprep.subr.bf16.mxu0 %v12383_v39  ;;  %v12467_v39 = vld [vmem:[#allocation6 + $0x13c4] ss:$72 sps:$4 sm:$0xff]  }
 0x210   : > { %5909 = vmatpush1.bf16.msra.mxu1 %v12213_v23  ;;  %v12258_v23 = vld [vmem:[#allocation6 + $0x28] ss:$72 sps:$4 sm:$0xff]  }
 0x211   : > { %5910 = vmatprep.subr.bf16.mxu1 %v12218_v24  ;;  %5751 = vmatpush1.bf16.msra.mxu0 %v12381_v38  ;;  %v12266_v24 = vld [vmem:[#allocation6 + $0xbc] ss:$72 sps:$4 sm:$0xff]   ;;  %v12465_v38 = vld [vmem:[#allocation6 + $0x13c0] ss:$72 sps:$4 sm:$0xff]  }
 0x212   : > { %5752 = vmatprep.subr.bf16.mxu0 %v12389_v42  ;;  %v12473_v42 = vld [vmem:[#allocation6 + $0x1454] ss:$72 sps:$4 sm:$0xff]  }
 0x214   : > { %5911 = vmatpush1.bf16.msra.mxu1 %v12216_v27  ;;  %v12264_v27 = vld [vmem:[#allocation6 + $0xb8] ss:$72 sps:$4 sm:$0xff]  }
 0x215   : > { %5912 = vmatprep.subr.bf16.mxu1 %v12221_v29  ;;  %5753 = vmatpush1.bf16.msra.mxu0 %v12387_v36  ;;  %v12272_v29 = vld [vmem:[#allocation6 + $0x14c] ss:$72 sps:$4 sm:$0xff]   ;;  %v12471_v36 = vld [vmem:[#allocation6 + $0x1450] ss:$72 sps:$4 sm:$0xff]  }
 0x216   : > { %5754 = vmatprep.subr.bf16.mxu0 %v12395_v45  ;;  %v12479_v45 = vld [vmem:[#allocation6 + $0x14e4] ss:$72 sps:$4 sm:$0xff]  }
 0x218   : > { %5913 = vmatpush1.bf16.msra.mxu1 %v12219_v33  ;;  %v12270_v33 = vld [vmem:[#allocation6 + $0x148] ss:$72 sps:$4 sm:$0xff]  }
 0x219   : > { %5914 = vmatprep.subr.bf16.mxu1 %v12224_v34  ;;  %5755 = vmatpush1.bf16.msra.mxu0 %v12393_v44  ;;  %v12278_v34 = vld [vmem:[#allocation6 + $0x1dc] ss:$72 sps:$4 sm:$0xff]   ;;  %v12477_v44 = vld [vmem:[#allocation6 + $0x14e0] ss:$72 sps:$4 sm:$0xff]  }
 0x21a   : > { %5756 = vmatprep.subr.bf16.mxu0 %v12401_v50  ;;  %v12485_v50 = vld [vmem:[#allocation6 + $0x1574] ss:$72 sps:$4 sm:$0xff]  }
 0x21c   : > { %5915 = vmatpush1.bf16.msra.mxu1 %v12222_v40  ;;  %v12276_v40 = vld [vmem:[#allocation6 + $0x1d8] ss:$72 sps:$4 sm:$0xff]  }
 0x21d   : > { %5916 = vmatprep.subr.bf16.mxu1 %v12227_v41  ;;  %5757 = vmatpush1.bf16.msra.mxu0 %v12399_v49  ;;  %v12284_v41 = vld [vmem:[#allocation6 + $0x26c] ss:$72 sps:$4 sm:$0xff]   ;;  %v12483_v49 = vld [vmem:[#allocation6 + $0x1570] ss:$72 sps:$4 sm:$0xff]  }
 0x21e   : > { %5758 = vmatprep.subr.bf16.mxu0 %v12407_v55  ;;  %v12294_v55 = vld [vmem:[#allocation6 + $0x388] ss:$72 sps:$4 sm:$0xff]  }
 0x220   : > { %5917 = vmatpush1.bf16.msra.mxu1 %v12225_v37  ;;  %v12282_v37 = vld [vmem:[#allocation6 + $0x268] ss:$72 sps:$4 sm:$0xff]  }
 0x221   : > { %5918 = vmatprep.subr.bf16.mxu1 %v12230_v43  ;;  %5759 = vmatpush1.bf16.msra.mxu0 %v12405_v54  ;;  %v12290_v43 = vld [vmem:[#allocation6 + $0x2fc] ss:$72 sps:$4 sm:$0xff]  }
 0x222   : > { %5760 = vmatprep.subr.bf16.mxu0 %v12413_v59  ;;  %v12491_v59 = vld [vmem:[#allocation6 + $0x1604] ss:$72 sps:$4 sm:$0xff]  }
 0x224   : > { %5919 = vmatpush1.bf16.msra.mxu1 %v12228_v46  ;;  %v12288_v46 = vld [vmem:[#allocation6 + $0x2f8] ss:$72 sps:$4 sm:$0xff]  }
 0x225   : > { %5920 = vmatprep.subr.bf16.mxu1 %v12233_v47  ;;  %5761 = vmatpush1.bf16.msra.mxu0 %v12411_v58  ;;  %v12296_v47 = vld [vmem:[#allocation6 + $0x38c] ss:$72 sps:$4 sm:$0xff]   ;;  %v12489_v58 = vld [vmem:[#allocation6 + $0x1600] ss:$72 sps:$4 sm:$0xff]  }
 0x226   : > { %5762 = vmatprep.subr.bf16.mxu0 %v12419_v63  ;;  %v12497_v63 = vld [vmem:[#allocation6 + $0x1694] ss:$72 sps:$4 sm:$0xff]  }
 0x228   : > { %5921 = vmatpush1.bf16.msra.mxu1 %v12231_v51 }
 0x229   : > { %5922 = vmatprep.subr.bf16.mxu1 %v12236_v53  ;;  %5763 = vmatpush1.bf16.msra.mxu0 %v12417_v62  ;;  %v12495_v62 = vld [vmem:[#allocation6 + $0x1690] ss:$72 sps:$4 sm:$0xff]  }
 0x22a   : > { %5764 = vmatprep.subr.bf16.mxu0 %v12425_v3  ;;  %v12503_v3 = vld [vmem:[#allocation6 + $0x1724] ss:$72 sps:$4 sm:$0xff]  }
 0x22c   : > { %5923 = vmatpush1.bf16.msra.mxu1 %v12234_v56  ;;  %v12302_v56 = vld [vmem:[#allocation6 + $0x41c] ss:$72 sps:$4 sm:$0xff]  }
 0x22d   : > { %5924 = vmatprep.subr.bf16.mxu1 %v12239_v57  ;;  %5765 = vmatpush1.bf16.msra.mxu0 %v12423_v2  ;;  %v12501_v2 = vld [vmem:[#allocation6 + $0x1720] ss:$72 sps:$4 sm:$0xff]  }
 0x22e   : > { %5766 = vmatprep.subr.bf16.mxu0 %v12431_v7  ;;  %v12509_v7 = vld [vmem:[#allocation6 + $0x17b4] ss:$72 sps:$4 sm:$0xff]  }
 0x230   : > { %5925 = vmatpush1.bf16.msra.mxu1 %v12237_v60  ;;  %v12300_v60 = vld [vmem:[#allocation6 + $0x418] ss:$72 sps:$4 sm:$0xff]  }
 0x231   : > { %5926 = vmatprep.subr.bf16.mxu1 %v12242_v61  ;;  %5767 = vmatpush1.bf16.msra.mxu0 %v12429_v6  ;;  %v12308_v61 = vld [vmem:[#allocation6 + $0x4ac] ss:$72 sps:$4 sm:$0xff]   ;;  %v12507_v6 = vld [vmem:[#allocation6 + $0x17b0] ss:$72 sps:$4 sm:$0xff]  }
 0x232   : > { %5768 = vmatprep.subr.bf16.mxu0 %v12437_v13  ;;  %v12515_v13 = vld [vmem:[#allocation6 + $0x1844] ss:$72 sps:$4 sm:$0xff]  }
 0x234   : > { %5927 = vmatpush1.bf16.msra.mxu1 %v12240_v0  ;;  %v12306_v0 = vld [vmem:[#allocation6 + $0x4a8] ss:$72 sps:$4 sm:$0xff]  }
 0x235   : > { %5928 = vmatprep.subr.bf16.mxu1 %v12245_v1  ;;  %5769 = vmatpush1.bf16.msra.mxu0 %v12435_v12  ;;  %v12314_v1 = vld [vmem:[#allocation6 + $0x53c] ss:$72 sps:$4 sm:$0xff]   ;;  %v12513_v12 = vld [vmem:[#allocation6 + $0x1840] ss:$72 sps:$4 sm:$0xff]  }
 0x236   : > { %5770 = vmatprep.subr.bf16.mxu0 %v12443_v18  ;;  %v12521_v18 = vld [vmem:[#allocation6 + $0x18d4] ss:$72 sps:$4 sm:$0xff]  }
 0x238   : > { %5929 = vmatpush1.bf16.msra.mxu1 %v12243_v4  ;;  %v12312_v4 = vld [vmem:[#allocation6 + $0x538] ss:$72 sps:$4 sm:$0xff]  }
 0x239   : > { %5930 = vmatprep.subr.bf16.mxu1 %v12248_v5  ;;  %5771 = vmatpush1.bf16.msra.mxu0 %v12441_v17  ;;  %v12320_v5 = vld [vmem:[#allocation6 + $0x5cc] ss:$72 sps:$4 sm:$0xff]   ;;  %v12519_v17 = vld [vmem:[#allocation6 + $0x18d0] ss:$72 sps:$4 sm:$0xff]  }
 0x23a   : > { %5781 = vmatprep.subr.bf16.mxu0 %v12449_v22  ;;  %v12527_v22 = vld [vmem:[#allocation6 + $0x1964] ss:$72 sps:$4 sm:$0xff]  }
 0x23c   : > { %5931 = vmatpush1.bf16.msra.mxu1 %v12246_v9  ;;  %5773 = vmatmul.mubr.bf16.vlgmr.msra.gmra.mrb[4].mxu0 %v14051_v11  ;;  %v12318_v9 = vld [vmem:[#allocation6 + $0x5c8] ss:$72 sps:$4 sm:$0xff]  }
 0x23d   : > { %5932 = vmatprep.subr.bf16.mxu1 %v12251_v10  ;;  %5782 = vmatpush1.bf16.msra.mxu0 %v12447_v21  ;;  %v12326_v10 = vld [vmem:[#allocation6 + $0x65c] ss:$72 sps:$4 sm:$0xff]   ;;  %v12525_v21 = vld [vmem:[#allocation6 + $0x1960] ss:$72 sps:$4 sm:$0xff]  }
 0x23e   : > { %5813 = vmatprep.mubr.bf16.mxu0 %v14057_v35  ;;  %5783 = vmatprep.subr.bf16.mxu0 %v12455_v26  ;;  %v12533_v26 = vld [vmem:[#allocation6 + $0x19f4] ss:$72 sps:$4 sm:$0xff]  }
 0x240   : > { %5933 = vmatpush1.bf16.msra.mxu1 %v12249_v14  ;;  %v12324_v14 = vld [vmem:[#allocation6 + $0x658] ss:$72 sps:$4 sm:$0xff]  }
 0x241   : > { %5934 = vmatprep.subr.bf16.mxu1 %v12254_v15  ;;  %5784 = vmatpush1.bf16.msra.mxu0 %v12453_v25  ;;  %v12332_v15 = vld [vmem:[#allocation6 + $0x6ec] ss:$72 sps:$4 sm:$0xff]   ;;  %v12531_v25 = vld [vmem:[#allocation6 + $0x19f0] ss:$72 sps:$4 sm:$0xff]  }
 0x242   : > { %5785 = vmatprep.subr.bf16.mxu0 %v12461_v32  ;;  %v12539_v32 = vld [vmem:[#allocation6 + $0x1a84] ss:$72 sps:$4 sm:$0xff]  }
 0x244   : > { %5935 = vmatpush1.bf16.msra.mxu1 %v12252_v19  ;;  %v12330_v19 = vld [vmem:[#allocation6 + $0x6e8] ss:$72 sps:$4 sm:$0xff]  }
 0x245   : > { %6068 = vmatprep.subr.bf16.mxu1 %v12260_v20  ;;  %5786 = vmatpush1.bf16.msra.mxu0 %v12459_v30  ;;  %v12338_v20 = vld [vmem:[#allocation6 + $0x77c] ss:$72 sps:$4 sm:$0xff]   ;;  %v12537_v30 = vld [vmem:[#allocation6 + $0x1a80] ss:$72 sps:$4 sm:$0xff]  }
 0x246   : > { %5787 = vmatprep.subr.bf16.mxu0 %v12467_v39  ;;  %v12545_v39 = vld [vmem:[#allocation6 + $0x24] ss:$72 sps:$4 sm:$0xff]  }
 0x247   : > { %5937 = vmatmul.mubr.bf16.vlgmr.msra.gmra.mrb[8].mxu1 %v14061_v16 }
 0x248   : > { %6069 = vmatpush1.bf16.msra.mxu1 %v12258_v23  ;;  %6100 = vmatprep.mubr.bf16.mxu1 %v14040_v48  ;;  %v12336_v23 = vld [vmem:[#allocation6 + $0x778] ss:$72 sps:$4 sm:$0xff]  }
 0x249   : > { %6070 = vmatprep.subr.bf16.mxu1 %v12266_v24  ;;  %5788 = vmatpush1.bf16.msra.mxu0 %v12465_v38  ;;  %v12344_v24 = vld [vmem:[#allocation6 + $0x80c] ss:$72 sps:$4 sm:$0xff]   ;;  %v12543_v38 = vld [vmem:[#allocation6 + $0x20] ss:$72 sps:$4 sm:$0xff]  }
 0x24a   : > { %5789 = vmatprep.subr.bf16.mxu0 %v12473_v42  ;;  %v12549_v42 = vld [vmem:[#allocation6 + $0xb0] ss:$72 sps:$4 sm:$0xff]  }
 0x24c   : > { %6071 = vmatpush1.bf16.msra.mxu1 %v12264_v27  ;;  %v12342_v27 = vld [vmem:[#allocation6 + $0x808] ss:$72 sps:$4 sm:$0xff]  }
 0x24d   : > { %6072 = vmatprep.subr.bf16.mxu1 %v12272_v29  ;;  %5790 = vmatpush1.bf16.msra.mxu0 %v12471_v36  ;;  %v12350_v29 = vld [vmem:[#allocation6 + $0x89c] ss:$72 sps:$4 sm:$0xff]  }
 0x24e   : > { %5791 = vmatprep.subr.bf16.mxu0 %v12479_v45  ;;  %v12551_v36 = vld [vmem:[#allocation6 + $0xb4] ss:$72 sps:$4 sm:$0xff]   ;;  %v12557_v45 = vld [vmem:[#allocation6 + $0x144] ss:$72 sps:$4 sm:$0xff]  }
 0x250   : > { %6073 = vmatpush1.bf16.msra.mxu1 %v12270_v33  ;;  %v12348_v33 = vld [vmem:[#allocation6 + $0x898] ss:$72 sps:$4 sm:$0xff]  }
 0x251   : > { %6074 = vmatprep.subr.bf16.mxu1 %v12278_v34  ;;  %5792 = vmatpush1.bf16.msra.mxu0 %v12477_v44  ;;  %v12356_v34 = vld [vmem:[#allocation6 + $0x92c] ss:$72 sps:$4 sm:$0xff]   ;;  %v12555_v44 = vld [vmem:[#allocation6 + $0x140] ss:$72 sps:$4 sm:$0xff]  }
 0x252   : > { %5793 = vmatprep.subr.bf16.mxu0 %v12485_v50  ;;  %v12563_v50 = vld [vmem:[#allocation6 + $0x1d4] ss:$72 sps:$4 sm:$0xff]  }
 0x254   : > { %6075 = vmatpush1.bf16.msra.mxu1 %v12276_v40  ;;  %v12354_v40 = vld [vmem:[#allocation6 + $0x928] ss:$72 sps:$4 sm:$0xff]  }
 0x255   : > { %6076 = vmatprep.subr.bf16.mxu1 %v12284_v41  ;;  %5794 = vmatpush1.bf16.msra.mxu0 %v12483_v49  ;;  %v12362_v41 = vld [vmem:[#allocation6 + $0x9bc] ss:$72 sps:$4 sm:$0xff]   ;;  %v12561_v49 = vld [vmem:[#allocation6 + $0x1d0] ss:$72 sps:$4 sm:$0xff]  }
 0x256   : > { %5795 = vmatprep.subr.bf16.mxu0 %v12491_v59  ;;  %v12386_v59 = vld [vmem:[#allocation6 + $0xbfc] ss:$72 sps:$4 sm:$0xff]  }
 0x258   : > { %6077 = vmatpush1.bf16.msra.mxu1 %v12282_v37  ;;  %v12360_v37 = vld [vmem:[#allocation6 + $0x9b8] ss:$72 sps:$4 sm:$0xff]  }
 0x259   : > { %6078 = vmatprep.subr.bf16.mxu1 %v12290_v43  ;;  %5796 = vmatpush1.bf16.msra.mxu0 %v12489_v58  ;;  %v12368_v43 = vld [vmem:[#allocation6 + $0xa4c] ss:$72 sps:$4 sm:$0xff]   ;;  %v12378_v58 = vld [vmem:[#allocation6 + $0xb68] ss:$72 sps:$4 sm:$0xff]  }
 0x25a   : > { %v14091_v51 = vpop.f32.mrb[4].mxu1  ;;  %5797 = vmatprep.subr.bf16.mxu0 %v12497_v63  ;;  %v12392_v63 = vld [vmem:[#allocation6 + $0xc8c] ss:$72 sps:$4 sm:$0xff]  }
 0x25b   : > { %v14093_v53 = vpop.f32.mrb[5].mxu1 }
 0x25c   : > { %v5696_v54 = vpop.f32.mrb[6].mxu1  ;;  %6079 = vmatpush1.bf16.msra.mxu1 %v12288_v46  ;;  %v12366_v46 = vld [vmem:[#allocation6 + $0xa48] ss:$72 sps:$4 sm:$0xff]  }
 0x25d   : > { %v5697_v57 = vpop.f32.mrb[7].mxu1  ;;  %6080 = vmatprep.subr.bf16.mxu1 %v12296_v47  ;;  %5798 = vmatpush1.bf16.msra.mxu0 %v12495_v62  ;;  %v12374_v47 = vld [vmem:[#allocation6 + $0xadc] ss:$72 sps:$4 sm:$0xff]   ;;  %v12372_v54 = vld [vmem:[#allocation6 + $0xad8] ss:$72 sps:$4 sm:$0xff]  }
 0x25e   : > { %5799 = vmatprep.subr.bf16.mxu0 %v12503_v3  ;;  %v12569_v57 = vld [vmem:[#allocation6 + $0x264] ss:$72 sps:$4 sm:$0xff]   ;;  %v12384_v62 = vld [vmem:[#allocation6 + $0xbf8] ss:$72 sps:$4 sm:$0xff]  }
 0x25f   : > { %v12398_v3 = vld [vmem:[#allocation6 + $0xd1c] ss:$72 sps:$4 sm:$0xff]  }
 0x260   : > { %6081 = vmatpush1.bf16.msra.mxu1 %v12294_v55  ;;  %v12380_v55 = vld [vmem:[#allocation6 + $0xb6c] ss:$72 sps:$4 sm:$0xff]  }
 0x261   : > { %6082 = vmatprep.subr.bf16.mxu1 %v12302_v56  ;;  %5800 = vmatpush1.bf16.msra.mxu0 %v12501_v2  ;;  %v12567_v56 = vld [vmem:[#allocation6 + $0x260] ss:$72 sps:$4 sm:$0xff]  }
 0x262   : > { %5801 = vmatprep.subr.bf16.mxu0 %v12509_v7  ;;  %v12579_v2 = vld [vmem:[#allocation6 + $0x380] ss:$72 sps:$4 sm:$0xff]   ;;  %v12404_v7 = vld [vmem:[#allocation6 + $0xdac] ss:$72 sps:$4 sm:$0xff]  }
 0x264   : > { %6083 = vmatpush1.bf16.msra.mxu1 %v12300_v60  ;;  %v12573_v60 = vld [vmem:[#allocation6 + $0x2f0] ss:$72 sps:$4 sm:$0xff]  }
 0x265   : > { %6084 = vmatprep.subr.bf16.mxu1 %v12308_v61  ;;  %5802 = vmatpush1.bf16.msra.mxu0 %v12507_v6  ;;  %v12575_v61 = vld [vmem:[#allocation6 + $0x2f4] ss:$72 sps:$4 sm:$0xff]  }
 0x266   : > { %5803 = vmatprep.subr.bf16.mxu0 %v12515_v13  ;;  %v12587_v6 = vld [vmem:[#allocation6 + $0x414] ss:$72 sps:$4 sm:$0xff]  }
 0x267   : > { %v12410_v13 = vld [vmem:[#allocation6 + $0xe3c] ss:$72 sps:$4 sm:$0xff]  }
 0x268   : > { %6085 = vmatpush1.bf16.msra.mxu1 %v12306_v0  ;;  %v12390_v0 = vld [vmem:[#allocation6 + $0xc88] ss:$72 sps:$4 sm:$0xff]  }
 0x269   : > { %6086 = vmatprep.subr.bf16.mxu1 %v12314_v1  ;;  %5804 = vmatpush1.bf16.msra.mxu0 %v12513_v12  ;;  %v12581_v1 = vld [vmem:[#allocation6 + $0x384] ss:$72 sps:$4 sm:$0xff]   ;;  %v12402_v12 = vld [vmem:[#allocation6 + $0xda8] ss:$72 sps:$4 sm:$0xff]  }
 0x26a   : > { %5805 = vmatprep.subr.bf16.mxu0 %v12521_v18  ;;  %v12416_v18 = vld [vmem:[#allocation6 + $0xecc] ss:$72 sps:$4 sm:$0xff]  }
 0x26c   : > { %6087 = vmatpush1.bf16.msra.mxu1 %v12312_v4  ;;  %v12396_v4 = vld [vmem:[#allocation6 + $0xd18] ss:$72 sps:$4 sm:$0xff]  }
 0x26d   : > { %6088 = vmatprep.subr.bf16.mxu1 %v12320_v5  ;;  %5806 = vmatpush1.bf16.msra.mxu0 %v12519_v17  ;;  %v12585_v5 = vld [vmem:[#allocation6 + $0x410] ss:$72 sps:$4 sm:$0xff]  }
 0x26e   : > { %5807 = vmatprep.subr.bf16.mxu0 %v12527_v22  ;;  %v12408_v17 = vld [vmem:[#allocation6 + $0xe38] ss:$72 sps:$4 sm:$0xff]   ;;  %v12422_v22 = vld [vmem:[#allocation6 + $0xf5c] ss:$72 sps:$4 sm:$0xff]  }
 0x270   : > { %6089 = vmatpush1.bf16.msra.mxu1 %v12318_v9  ;;  %v12591_v9 = vld [vmem:[#allocation6 + $0x4a0] ss:$72 sps:$4 sm:$0xff]  }
 0x271   : > { %6090 = vmatprep.subr.bf16.mxu1 %v12326_v10  ;;  %5808 = vmatpush1.bf16.msra.mxu0 %v12525_v21  ;;  %v12593_v10 = vld [vmem:[#allocation6 + $0x4a4] ss:$72 sps:$4 sm:$0xff]   ;;  %v12414_v21 = vld [vmem:[#allocation6 + $0xec8] ss:$72 sps:$4 sm:$0xff]  }
 0x272   : > { %5809 = vmatprep.subr.bf16.mxu0 %v12533_v26  ;;  %v12428_v26 = vld [vmem:[#allocation6 + $0xfec] ss:$72 sps:$4 sm:$0xff]  }
 0x274   : > { %6091 = vmatpush1.bf16.msra.mxu1 %v12324_v14  ;;  %v12597_v14 = vld [vmem:[#allocation6 + $0x530] ss:$72 sps:$4 sm:$0xff]  }
 0x275   : > { %6092 = vmatprep.subr.bf16.mxu1 %v12332_v15  ;;  %5810 = vmatpush1.bf16.msra.mxu0 %v12531_v25  ;;  %v12599_v15 = vld [vmem:[#allocation6 + $0x534] ss:$72 sps:$4 sm:$0xff]   ;;  %v12420_v25 = vld [vmem:[#allocation6 + $0xf58] ss:$72 sps:$4 sm:$0xff]  }
 0x276   : > { %5811 = vmatprep.subr.bf16.mxu0 %v12539_v32  ;;  %v12434_v32 = vld [vmem:[#allocation6 + $0x107c] ss:$72 sps:$4 sm:$0xff]  }
 0x278   : > { %6093 = vmatpush1.bf16.msra.mxu1 %v12330_v19  ;;  %v12603_v19 = vld [vmem:[#allocation6 + $0x5c0] ss:$72 sps:$4 sm:$0xff]  }
 0x279   : > { %6094 = vmatprep.subr.bf16.mxu1 %v12338_v20  ;;  %5812 = vmatpush1.bf16.msra.mxu0 %v12537_v30  ;;  %v12605_v20 = vld [vmem:[#allocation6 + $0x5c4] ss:$72 sps:$4 sm:$0xff]   ;;  %v12426_v30 = vld [vmem:[#allocation6 + $0xfe8] ss:$72 sps:$4 sm:$0xff]  }
 0x27a   : > { %5945 = vmatprep.subr.bf16.mxu0 %v12545_v39  ;;  %v12440_v39 = vld [vmem:[#allocation6 + $0x110c] ss:$72 sps:$4 sm:$0xff]  }
 0x27c   : > { %6095 = vmatpush1.bf16.msra.mxu1 %v12336_v23  ;;  %5814 = vmatmul.mubr.bf16.vlgmr.msra.gmra.mrb[4].mxu0 %v14061_v16  ;;  %v12609_v23 = vld [vmem:[#allocation6 + $0x650] ss:$72 sps:$4 sm:$0xff]  }
 0x27d   : > { %6096 = vmatprep.subr.bf16.mxu1 %v12344_v24  ;;  %5946 = vmatpush1.bf16.msra.mxu0 %v12543_v38  ;;  %v12611_v24 = vld [vmem:[#allocation6 + $0x654] ss:$72 sps:$4 sm:$0xff]   ;;  %v12432_v38 = vld [vmem:[#allocation6 + $0x1078] ss:$72 sps:$4 sm:$0xff]  }
 0x27e   : > { %5977 = vmatprep.mubr.bf16.mxu0 %v14040_v48  ;;  %5947 = vmatprep.subr.bf16.mxu0 %v12551_v36  ;;  %v12438_v36 = vld [vmem:[#allocation6 + $0x1108] ss:$72 sps:$4 sm:$0xff]  }
 0x280   : > { %6097 = vmatpush1.bf16.msra.mxu1 %v12342_v27  ;;  %v12615_v27 = vld [vmem:[#allocation6 + $0x6e0] ss:$72 sps:$4 sm:$0xff]  }
 0x281   : > { %6098 = vmatprep.subr.bf16.mxu1 %v12350_v29  ;;  %5948 = vmatpush1.bf16.msra.mxu0 %v12549_v42  ;;  %v12617_v29 = vld [vmem:[#allocation6 + $0x6e4] ss:$72 sps:$4 sm:$0xff]  }
 0x282   : > { %5949 = vmatprep.subr.bf16.mxu0 %v12557_v45  ;;  %v12446_v42 = vld [vmem:[#allocation6 + $0x119c] ss:$72 sps:$4 sm:$0xff]   ;;  %v12452_v45 = vld [vmem:[#allocation6 + $0x122c] ss:$72 sps:$4 sm:$0xff]  }
 0x284   : > { %6099 = vmatpush1.bf16.msra.mxu1 %v12348_v33  ;;  %v12621_v33 = vld [vmem:[#allocation6 + $0x770] ss:$72 sps:$4 sm:$0xff]  }
 0x285   : > { %6109 = vmatprep.subr.bf16.mxu1 %v12356_v34  ;;  %5950 = vmatpush1.bf16.msra.mxu0 %v12555_v44  ;;  %v12623_v34 = vld [vmem:[#allocation6 + $0x774] ss:$72 sps:$4 sm:$0xff]   ;;  %v12444_v44 = vld [vmem:[#allocation6 + $0x1198] ss:$72 sps:$4 sm:$0xff]  }
 0x286   : > { %5951 = vmatprep.subr.bf16.mxu0 %v12563_v50  ;;  %v12458_v50 = vld [vmem:[#allocation6 + $0x12bc] ss:$72 sps:$4 sm:$0xff]  }
 0x287   : > { %6101 = vmatmul.mubr.bf16.vlgmr.msra.gmra.mrb[12].mxu1 %v14049_v8 }
 0x288   : > { %6110 = vmatpush1.bf16.msra.mxu1 %v12354_v40  ;;  %6141 = vmatprep.mubr.bf16.mxu1 %v14043_v52  ;;  %v12629_v40 = vld [vmem:[#allocation6 + $0x804] ss:$72 sps:$4 sm:$0xff]  }
 0x289   : > { %6111 = vmatprep.subr.bf16.mxu1 %v12362_v41  ;;  %5952 = vmatpush1.bf16.msra.mxu0 %v12561_v49  ;;  %v12627_v41 = vld [vmem:[#allocation6 + $0x800] ss:$72 sps:$4 sm:$0xff]  }
 0x28a   : > { %5953 = vmatprep.subr.bf16.mxu0 %v12569_v57  ;;  %v12450_v49 = vld [vmem:[#allocation6 + $0x1228] ss:$72 sps:$4 sm:$0xff]   ;;  %v12464_v57 = vld [vmem:[#allocation6 + $0x134c] ss:$72 sps:$4 sm:$0xff]  }
 0x28c   : > { %6112 = vmatpush1.bf16.msra.mxu1 %v12360_v37  ;;  %v12635_v37 = vld [vmem:[#allocation6 + $0x894] ss:$72 sps:$4 sm:$0xff]  }
 0x28d   : > { %6113 = vmatprep.subr.bf16.mxu1 %v12368_v43  ;;  %5954 = vmatpush1.bf16.msra.mxu0 %v12567_v56  ;;  %v12633_v43 = vld [vmem:[#allocation6 + $0x890] ss:$72 sps:$4 sm:$0xff]  }
 0x28e   : > { %5955 = vmatprep.subr.bf16.mxu0 %v12575_v61  ;;  %v12456_v56 = vld [vmem:[#allocation6 + $0x12b8] ss:$72 sps:$4 sm:$0xff]   ;;  %v12470_v61 = vld [vmem:[#allocation6 + $0x13dc] ss:$72 sps:$4 sm:$0xff]  }
 0x290   : > { %6114 = vmatpush1.bf16.msra.mxu1 %v12366_v46  ;;  %v12641_v46 = vld [vmem:[#allocation6 + $0x924] ss:$72 sps:$4 sm:$0xff]  }
 0x291   : > { %6115 = vmatprep.subr.bf16.mxu1 %v12374_v47  ;;  %5956 = vmatpush1.bf16.msra.mxu0 %v12573_v60  ;;  %v12639_v47 = vld [vmem:[#allocation6 + $0x920] ss:$72 sps:$4 sm:$0xff]  }
 0x292   : > { %5957 = vmatprep.subr.bf16.mxu0 %v12581_v1  ;;  %v12462_v60 = vld [vmem:[#allocation6 + $0x1348] ss:$72 sps:$4 sm:$0xff]   ;;  %v12476_v1 = vld [vmem:[#allocation6 + $0x146c] ss:$72 sps:$4 sm:$0xff]  }
 0x294   : > { %6116 = vmatpush1.bf16.msra.mxu1 %v12372_v54  ;;  %v12647_v54 = vld [vmem:[#allocation6 + $0x9b4] ss:$72 sps:$4 sm:$0xff]  }
 0x295   : > { %6117 = vmatprep.subr.bf16.mxu1 %v12380_v55  ;;  %5958 = vmatpush1.bf16.msra.mxu0 %v12579_v2  ;;  %v12645_v55 = vld [vmem:[#allocation6 + $0x9b0] ss:$72 sps:$4 sm:$0xff]   ;;  %v12665_v2 = vld [vmem:[#allocation6 + $0xb64] ss:$72 sps:$4 sm:$0xff]  }
 0x296   : > { %5959 = vmatprep.subr.bf16.mxu0 %v12587_v6  ;;  %v12671_v6 = vld [vmem:[#allocation6 + $0xbf4] ss:$72 sps:$4 sm:$0xff]  }
 0x298   : > { %6118 = vmatpush1.bf16.msra.mxu1 %v12378_v58  ;;  %v12653_v58 = vld [vmem:[#allocation6 + $0xa44] ss:$72 sps:$4 sm:$0xff]  }
 0x299   : > { %6119 = vmatprep.subr.bf16.mxu1 %v12386_v59  ;;  %5960 = vmatpush1.bf16.msra.mxu0 %v12585_v5  ;;  %v12651_v59 = vld [vmem:[#allocation6 + $0xa40] ss:$72 sps:$4 sm:$0xff]   ;;  %v12482_v5 = vld [vmem:[#allocation6 + $0x14fc] ss:$72 sps:$4 sm:$0xff]  }
 0x29a   : > { %5961 = vmatprep.subr.bf16.mxu0 %v12593_v10  ;;  %v12488_v10 = vld [vmem:[#allocation6 + $0x158c] ss:$72 sps:$4 sm:$0xff]  }
 0x29c   : > { %6120 = vmatpush1.bf16.msra.mxu1 %v12384_v62  ;;  %v12659_v62 = vld [vmem:[#allocation6 + $0xad4] ss:$72 sps:$4 sm:$0xff]  }
 0x29d   : > { %6121 = vmatprep.subr.bf16.mxu1 %v12392_v63  ;;  %5962 = vmatpush1.bf16.msra.mxu0 %v12591_v9  ;;  %v12657_v63 = vld [vmem:[#allocation6 + $0xad0] ss:$72 sps:$4 sm:$0xff]  }
 0x29e   : > { %5963 = vmatprep.subr.bf16.mxu0 %v12599_v15  ;;  %v12480_v9 = vld [vmem:[#allocation6 + $0x14f8] ss:$72 sps:$4 sm:$0xff]   ;;  %v12494_v15 = vld [vmem:[#allocation6 + $0x161c] ss:$72 sps:$4 sm:$0xff]  }
 0x2a0   : > { %6122 = vmatpush1.bf16.msra.mxu1 %v12390_v0  ;;  %v12468_v0 = vld [vmem:[#allocation6 + $0x13d8] ss:$72 sps:$4 sm:$0xff]  }
 0x2a1   : > { %6123 = vmatprep.subr.bf16.mxu1 %v12398_v3  ;;  %5964 = vmatpush1.bf16.msra.mxu0 %v12597_v14  ;;  %v12663_v3 = vld [vmem:[#allocation6 + $0xb60] ss:$72 sps:$4 sm:$0xff]  }
 0x2a2   : > { %5965 = vmatprep.subr.bf16.mxu0 %v12605_v20  ;;  %v12486_v14 = vld [vmem:[#allocation6 + $0x1588] ss:$72 sps:$4 sm:$0xff]   ;;  %v12500_v20 = vld [vmem:[#allocation6 + $0x16ac] ss:$72 sps:$4 sm:$0xff]  }
 0x2a4   : > { %6124 = vmatpush1.bf16.msra.mxu1 %v12396_v4  ;;  %v12474_v4 = vld [vmem:[#allocation6 + $0x1468] ss:$72 sps:$4 sm:$0xff]  }
 0x2a5   : > { %6125 = vmatprep.subr.bf16.mxu1 %v12404_v7  ;;  %5966 = vmatpush1.bf16.msra.mxu0 %v12603_v19  ;;  %v12669_v7 = vld [vmem:[#allocation6 + $0xbf0] ss:$72 sps:$4 sm:$0xff]  }
 0x2a6   : > { %5967 = vmatprep.subr.bf16.mxu0 %v12611_v24  ;;  %v12492_v19 = vld [vmem:[#allocation6 + $0x1618] ss:$72 sps:$4 sm:$0xff]   ;;  %v12506_v24 = vld [vmem:[#allocation6 + $0x173c] ss:$72 sps:$4 sm:$0xff]  }
 0x2a8   : > { %6126 = vmatpush1.bf16.msra.mxu1 %v12402_v12  ;;  %v12677_v12 = vld [vmem:[#allocation6 + $0xc84] ss:$72 sps:$4 sm:$0xff]  }
 0x2a9   : > { %6127 = vmatprep.subr.bf16.mxu1 %v12410_v13  ;;  %5968 = vmatpush1.bf16.msra.mxu0 %v12609_v23  ;;  %v12675_v13 = vld [vmem:[#allocation6 + $0xc80] ss:$72 sps:$4 sm:$0xff]  }
 0x2aa   : > { %5969 = vmatprep.subr.bf16.mxu0 %v12617_v29  ;;  %v12498_v23 = vld [vmem:[#allocation6 + $0x16a8] ss:$72 sps:$4 sm:$0xff]   ;;  %v12512_v29 = vld [vmem:[#allocation6 + $0x17cc] ss:$72 sps:$4 sm:$0xff]  }
 0x2ac   : > { %6128 = vmatpush1.bf16.msra.mxu1 %v12408_v17  ;;  %v12683_v17 = vld [vmem:[#allocation6 + $0xd14] ss:$72 sps:$4 sm:$0xff]  }
 0x2ad   : > { %6129 = vmatprep.subr.bf16.mxu1 %v12416_v18  ;;  %5970 = vmatpush1.bf16.msra.mxu0 %v12615_v27  ;;  %v12681_v18 = vld [vmem:[#allocation6 + $0xd10] ss:$72 sps:$4 sm:$0xff]  }
 0x2ae   : > { %5971 = vmatprep.subr.bf16.mxu0 %v12623_v34  ;;  %v12504_v27 = vld [vmem:[#allocation6 + $0x1738] ss:$72 sps:$4 sm:$0xff]   ;;  %v12518_v34 = vld [vmem:[#allocation6 + $0x185c] ss:$72 sps:$4 sm:$0xff]  }
 0x2b0   : > { %6130 = vmatpush1.bf16.msra.mxu1 %v12414_v21  ;;  %v12689_v21 = vld [vmem:[#allocation6 + $0xda4] ss:$72 sps:$4 sm:$0xff]  }
 0x2b1   : > { %6131 = vmatprep.subr.bf16.mxu1 %v12422_v22  ;;  %5972 = vmatpush1.bf16.msra.mxu0 %v12621_v33  ;;  %v12687_v22 = vld [vmem:[#allocation6 + $0xda0] ss:$72 sps:$4 sm:$0xff]  }
 0x2b2   : > { %5973 = vmatprep.subr.bf16.mxu0 %v12629_v40  ;;  %v12510_v33 = vld [vmem:[#allocation6 + $0x17c8] ss:$72 sps:$4 sm:$0xff]   ;;  %v12516_v40 = vld [vmem:[#allocation6 + $0x1858] ss:$72 sps:$4 sm:$0xff]  }
 0x2b4   : > { %6132 = vmatpush1.bf16.msra.mxu1 %v12420_v25  ;;  %v12695_v25 = vld [vmem:[#allocation6 + $0xe34] ss:$72 sps:$4 sm:$0xff]  }
 0x2b5   : > { %6133 = vmatprep.subr.bf16.mxu1 %v12428_v26  ;;  %5974 = vmatpush1.bf16.msra.mxu0 %v12627_v41  ;;  %v12693_v26 = vld [vmem:[#allocation6 + $0xe30] ss:$72 sps:$4 sm:$0xff]   ;;  %v12524_v41 = vld [vmem:[#allocation6 + $0x18ec] ss:$72 sps:$4 sm:$0xff]  }
 0x2b6   : > { %5975 = vmatprep.subr.bf16.mxu0 %v12635_v37  ;;  %v12522_v37 = vld [vmem:[#allocation6 + $0x18e8] ss:$72 sps:$4 sm:$0xff]  }
 0x2b8   : > { %6134 = vmatpush1.bf16.msra.mxu1 %v12426_v30  ;;  %v12701_v30 = vld [vmem:[#allocation6 + $0xec4] ss:$72 sps:$4 sm:$0xff]  }
 0x2b9   : > { %6135 = vmatprep.subr.bf16.mxu1 %v12434_v32  ;;  %5976 = vmatpush1.bf16.msra.mxu0 %v12633_v43  ;;  %v12699_v32 = vld [vmem:[#allocation6 + $0xec0] ss:$72 sps:$4 sm:$0xff]   ;;  %v12530_v43 = vld [vmem:[#allocation6 + $0x197c] ss:$72 sps:$4 sm:$0xff]  }
 0x2ba   : > { %5986 = vmatprep.subr.bf16.mxu0 %v12641_v46  ;;  %v12528_v46 = vld [vmem:[#allocation6 + $0x1978] ss:$72 sps:$4 sm:$0xff]  }
 0x2bc   : > { %6136 = vmatpush1.bf16.msra.mxu1 %v12432_v38  ;;  %5978 = vmatmul.mubr.bf16.vlgmr.msra.gmra.mrb[8].mxu0 %v14049_v8  ;;  %v12707_v38 = vld [vmem:[#allocation6 + $0xf54] ss:$72 sps:$4 sm:$0xff]  }
 0x2bd   : > { %6137 = vmatprep.subr.bf16.mxu1 %v12440_v39  ;;  %5987 = vmatpush1.bf16.msra.mxu0 %v12639_v47  ;;  %v12705_v39 = vld [vmem:[#allocation6 + $0xf50] ss:$72 sps:$4 sm:$0xff]   ;;  %v12536_v47 = vld [vmem:[#allocation6 + $0x1a0c] ss:$72 sps:$4 sm:$0xff]  }
 0x2be   : > { %6018 = vmatprep.mubr.bf16.mxu0 %v14043_v52  ;;  %5988 = vmatprep.subr.bf16.mxu0 %v12647_v54  ;;  %v12534_v54 = vld [vmem:[#allocation6 + $0x1a08] ss:$72 sps:$4 sm:$0xff]  }
 0x2c0   : > { %6138 = vmatpush1.bf16.msra.mxu1 %v12438_v36  ;;  %v12713_v36 = vld [vmem:[#allocation6 + $0xfe4] ss:$72 sps:$4 sm:$0xff]  }
 0x2c1   : > { %6139 = vmatprep.subr.bf16.mxu1 %v12446_v42  ;;  %5989 = vmatpush1.bf16.msra.mxu0 %v12645_v55  ;;  %v12711_v42 = vld [vmem:[#allocation6 + $0xfe0] ss:$72 sps:$4 sm:$0xff]   ;;  %v12542_v55 = vld [vmem:[#allocation6 + $0x1a9c] ss:$72 sps:$4 sm:$0xff]  }
 0x2c2   : > { %5990 = vmatprep.subr.bf16.mxu0 %v12653_v58  ;;  %v12540_v58 = vld [vmem:[#allocation6 + $0x1a98] ss:$72 sps:$4 sm:$0xff]  }
 0x2c4   : > { %6140 = vmatpush1.bf16.msra.mxu1 %v12444_v44  ;;  %v12719_v44 = vld [vmem:[#allocation6 + $0x1074] ss:$72 sps:$4 sm:$0xff]  }
 0x2c5   : > { %6150 = vmatprep.subr.bf16.mxu1 %v12452_v45  ;;  %5991 = vmatpush1.bf16.msra.mxu0 %v12651_v59  ;;  %v12717_v45 = vld [vmem:[#allocation6 + $0x1070] ss:$72 sps:$4 sm:$0xff]   ;;  %v12548_v59 = vld [vmem:[#allocation6 + $0x3c] ss:$72 sps:$4 sm:$0xff]  }
 0x2c6   : > { %5992 = vmatprep.subr.bf16.mxu0 %v12659_v62  ;;  %v12546_v62 = vld [vmem:[#allocation6 + $0x38] ss:$72 sps:$4 sm:$0xff]  }
 0x2c7   : > { %6142 = vmatmul.mubr.bf16.vlgmr.msra.gmra.mrb[12].mxu1 %v14051_v11 }
 0x2c8   : > { %6151 = vmatpush1.bf16.msra.mxu1 %v12450_v49  ;;  %6182 = vmatprep.mubr.bf16.mxu1 %v14057_v35  ;;  %v12725_v49 = vld [vmem:[#allocation6 + $0x1104] ss:$72 sps:$4 sm:$0xff]  }
 0x2c9   : > { %6152 = vmatprep.subr.bf16.mxu1 %v12458_v50  ;;  %5993 = vmatpush1.bf16.msra.mxu0 %v12657_v63  ;;  %v12723_v50 = vld [vmem:[#allocation6 + $0x1100] ss:$72 sps:$4 sm:$0xff]   ;;  %v12554_v63 = vld [vmem:[#allocation6 + $0xcc] ss:$72 sps:$4 sm:$0xff]  }
 0x2ca   : > { %5994 = vmatprep.subr.bf16.mxu0 %v12665_v2  ;;  %v12552_v2 = vld [vmem:[#allocation6 + $0xc8] ss:$72 sps:$4 sm:$0xff]  }
 0x2cc   : > { %6153 = vmatpush1.bf16.msra.mxu1 %v12456_v56  ;;  %v12731_v56 = vld [vmem:[#allocation6 + $0x1194] ss:$72 sps:$4 sm:$0xff]  }
 0x2cd   : > { %6154 = vmatprep.subr.bf16.mxu1 %v12464_v57  ;;  %5995 = vmatpush1.bf16.msra.mxu0 %v12663_v3  ;;  %v12729_v57 = vld [vmem:[#allocation6 + $0x1190] ss:$72 sps:$4 sm:$0xff]   ;;  %v12560_v3 = vld [vmem:[#allocation6 + $0x15c] ss:$72 sps:$4 sm:$0xff]  }
 0x2ce   : > { %5996 = vmatprep.subr.bf16.mxu0 %v12671_v6  ;;  %v12558_v6 = vld [vmem:[#allocation6 + $0x158] ss:$72 sps:$4 sm:$0xff]  }
 0x2d0   : > { %6155 = vmatpush1.bf16.msra.mxu1 %v12462_v60  ;;  %v12737_v60 = vld [vmem:[#allocation6 + $0x1224] ss:$72 sps:$4 sm:$0xff]  }
 0x2d1   : > { %6156 = vmatprep.subr.bf16.mxu1 %v12470_v61  ;;  %5997 = vmatpush1.bf16.msra.mxu0 %v12669_v7  ;;  %v12735_v61 = vld [vmem:[#allocation6 + $0x1220] ss:$72 sps:$4 sm:$0xff]   ;;  %v12566_v7 = vld [vmem:[#allocation6 + $0x1ec] ss:$72 sps:$4 sm:$0xff]  }
 0x2d2   : > { %5998 = vmatprep.subr.bf16.mxu0 %v12677_v12  ;;  %v12564_v12 = vld [vmem:[#allocation6 + $0x1e8] ss:$72 sps:$4 sm:$0xff]  }
 0x2d4   : > { %6157 = vmatpush1.bf16.msra.mxu1 %v12468_v0  ;;  %v12743_v0 = vld [vmem:[#allocation6 + $0x12b4] ss:$72 sps:$4 sm:$0xff]  }
 0x2d5   : > { %6158 = vmatprep.subr.bf16.mxu1 %v12476_v1  ;;  %5999 = vmatpush1.bf16.msra.mxu0 %v12675_v13  ;;  %v12741_v1 = vld [vmem:[#allocation6 + $0x12b0] ss:$72 sps:$4 sm:$0xff]   ;;  %v12572_v13 = vld [vmem:[#allocation6 + $0x27c] ss:$72 sps:$4 sm:$0xff]  }
 0x2d6   : > { %6000 = vmatprep.subr.bf16.mxu0 %v12683_v17  ;;  %v12570_v17 = vld [vmem:[#allocation6 + $0x278] ss:$72 sps:$4 sm:$0xff]  }
 0x2d8   : > { %6159 = vmatpush1.bf16.msra.mxu1 %v12474_v4  ;;  %v12749_v4 = vld [vmem:[#allocation6 + $0x1344] ss:$72 sps:$4 sm:$0xff]  }
 0x2d9   : > { %6160 = vmatprep.subr.bf16.mxu1 %v12482_v5  ;;  %6001 = vmatpush1.bf16.msra.mxu0 %v12681_v18  ;;  %v12747_v5 = vld [vmem:[#allocation6 + $0x1340] ss:$72 sps:$4 sm:$0xff]   ;;  %v12578_v18 = vld [vmem:[#allocation6 + $0x30c] ss:$72 sps:$4 sm:$0xff]  }
 0x2da   : > { %6002 = vmatprep.subr.bf16.mxu0 %v12689_v21  ;;  %v12576_v21 = vld [vmem:[#allocation6 + $0x308] ss:$72 sps:$4 sm:$0xff]  }
 0x2dc   : > { %6161 = vmatpush1.bf16.msra.mxu1 %v12480_v9  ;;  %v12755_v9 = vld [vmem:[#allocation6 + $0x13d4] ss:$72 sps:$4 sm:$0xff]  }
 0x2dd   : > { %6162 = vmatprep.subr.bf16.mxu1 %v12488_v10  ;;  %6003 = vmatpush1.bf16.msra.mxu0 %v12687_v22  ;;  %v12753_v10 = vld [vmem:[#allocation6 + $0x13d0] ss:$72 sps:$4 sm:$0xff]   ;;  %v12584_v22 = vld [vmem:[#allocation6 + $0x39c] ss:$72 sps:$4 sm:$0xff]  }
 0x2de   : > { %6004 = vmatprep.subr.bf16.mxu0 %v12695_v25  ;;  %v12771_v25 = vld [vmem:[#allocation6 + $0x1580] ss:$72 sps:$4 sm:$0xff]  }
 0x2e0   : > { %6163 = vmatpush1.bf16.msra.mxu1 %v12486_v14  ;;  %v12761_v14 = vld [vmem:[#allocation6 + $0x1464] ss:$72 sps:$4 sm:$0xff]  }
 0x2e1   : > { %6164 = vmatprep.subr.bf16.mxu1 %v12494_v15  ;;  %6005 = vmatpush1.bf16.msra.mxu0 %v12693_v26  ;;  %v12759_v15 = vld [vmem:[#allocation6 + $0x1460] ss:$72 sps:$4 sm:$0xff]  }
 0x2e2   : > { %6006 = vmatprep.subr.bf16.mxu0 %v12701_v30  ;;  %v12582_v30 = vld [vmem:[#allocation6 + $0x398] ss:$72 sps:$4 sm:$0xff]  }
 0x2e4   : > { %6165 = vmatpush1.bf16.msra.mxu1 %v12492_v19  ;;  %v12767_v19 = vld [vmem:[#allocation6 + $0x14f4] ss:$72 sps:$4 sm:$0xff]  }
 0x2e5   : > { %6166 = vmatprep.subr.bf16.mxu1 %v12500_v20  ;;  %6007 = vmatpush1.bf16.msra.mxu0 %v12699_v32  ;;  %v12765_v20 = vld [vmem:[#allocation6 + $0x14f0] ss:$72 sps:$4 sm:$0xff]  }
 0x2e6   : > { %6008 = vmatprep.subr.bf16.mxu0 %v12707_v38  ;;  %v12777_v38 = vld [vmem:[#allocation6 + $0x1610] ss:$72 sps:$4 sm:$0xff]  }
 0x2e8   : > { %6167 = vmatpush1.bf16.msra.mxu1 %v12498_v23  ;;  %v12773_v23 = vld [vmem:[#allocation6 + $0x1584] ss:$72 sps:$4 sm:$0xff]  }
 0x2e9   : > { %6168 = vmatprep.subr.bf16.mxu1 %v12506_v24  ;;  %6009 = vmatpush1.bf16.msra.mxu0 %v12705_v39  ;;  %v14115_v39 = vpack.c.bf16 %v14078_v28, %v14078_v28  ;;  %v12789_v28 = vld [vmem:[#allocation6 + $0x1730] ss:$72 sps:$4 sm:$0xff]  }
 0x2ea   : > { %6010 = vmatprep.subr.bf16.mxu0 %v12713_v36  ;;  %v12785_v36 = vld [vmem:[#allocation6 + $0x16a4] ss:$72 sps:$4 sm:$0xff]  }
 0x2ec   : > { %6169 = vmatpush1.bf16.msra.mxu1 %v12504_v27 }
 0x2ed   : > { %6170 = vmatprep.subr.bf16.mxu1 %v12512_v29  ;;  %6011 = vmatpush1.bf16.msra.mxu0 %v12711_v42  ;;  %v12783_v42 = vld [vmem:[#allocation6 + $0x16a0] ss:$72 sps:$4 sm:$0xff]  }
 0x2ee   : > { %6012 = vmatprep.subr.bf16.mxu0 %v12719_v44  ;;  %v12791_v44 = vld [vmem:[#allocation6 + $0x1734] ss:$72 sps:$4 sm:$0xff]  }
 0x2f0   : > { %6171 = vmatpush1.bf16.msra.mxu1 %v12510_v33  ;;  %v12590_v33 = vld [vmem:[#allocation6 + $0x42c] ss:$72 sps:$4 sm:$0xff]  }
 0x2f1   : > { %6172 = vmatprep.subr.bf16.mxu1 %v12518_v34  ;;  %6013 = vmatpush1.bf16.msra.mxu0 %v12717_v45  ;;  %v12779_v34 = vld [vmem:[#allocation6 + $0x1614] ss:$72 sps:$4 sm:$0xff]   ;;  %v12600_v45 = vld [vmem:[#allocation6 + $0x548] ss:$72 sps:$4 sm:$0xff]  }
 0x2f2   : > { %6014 = vmatprep.subr.bf16.mxu0 %v12725_v49  ;;  %v12795_v49 = vld [vmem:[#allocation6 + $0x17c0] ss:$72 sps:$4 sm:$0xff]  }
 0x2f4   : > { %6173 = vmatpush1.bf16.msra.mxu1 %v12516_v40  ;;  %v12588_v40 = vld [vmem:[#allocation6 + $0x428] ss:$72 sps:$4 sm:$0xff]  }
 0x2f5   : > { %6174 = vmatprep.subr.bf16.mxu1 %v12524_v41  ;;  %6015 = vmatpush1.bf16.msra.mxu0 %v12723_v50  ;;  %v12596_v41 = vld [vmem:[#allocation6 + $0x4bc] ss:$72 sps:$4 sm:$0xff]   ;;  %v12606_v50 = vld [vmem:[#allocation6 + $0x5d8] ss:$72 sps:$4 sm:$0xff]  }
 0x2f6   : > { %6016 = vmatprep.subr.bf16.mxu0 %v12731_v56  ;;  %v12801_v56 = vld [vmem:[#allocation6 + $0x1850] ss:$72 sps:$4 sm:$0xff]  }
 0x2f8   : > { %6175 = vmatpush1.bf16.msra.mxu1 %v12522_v37  ;;  %v12594_v37 = vld [vmem:[#allocation6 + $0x4b8] ss:$72 sps:$4 sm:$0xff]  }
 0x2f9   : > { %6176 = vmatprep.subr.bf16.mxu1 %v12530_v43  ;;  %6017 = vmatpush1.bf16.msra.mxu0 %v12729_v57  ;;  %v12602_v43 = vld [vmem:[#allocation6 + $0x54c] ss:$72 sps:$4 sm:$0xff]   ;;  %v12612_v57 = vld [vmem:[#allocation6 + $0x668] ss:$72 sps:$4 sm:$0xff]  }
 0x2fa   : > { %6027 = vmatprep.subr.bf16.mxu0 %v12737_v60  ;;  %v12807_v60 = vld [vmem:[#allocation6 + $0x18e0] ss:$72 sps:$4 sm:$0xff]  }
 0x2fc   : > { %6177 = vmatpush1.bf16.msra.mxu1 %v12528_v46  ;;  %6019 = vmatmul.mubr.bf16.vlgmr.msra.gmra.mrb[8].mxu0 %v14051_v11  ;;  %v12608_v46 = vld [vmem:[#allocation6 + $0x5dc] ss:$72 sps:$4 sm:$0xff]  }
 0x2fd   : > { %6178 = vmatprep.subr.bf16.mxu1 %v12536_v47  ;;  %6028 = vmatpush1.bf16.msra.mxu0 %v12735_v61  ;;  %v12797_v47 = vld [vmem:[#allocation6 + $0x17c4] ss:$72 sps:$4 sm:$0xff]   ;;  %v12618_v61 = vld [vmem:[#allocation6 + $0x6f8] ss:$72 sps:$4 sm:$0xff]  }
 0x2fe   : > { %6059 = vmatprep.mubr.bf16.mxu0 %v14057_v35  ;;  %6029 = vmatprep.subr.bf16.mxu0 %v12743_v0  ;;  %v12813_v0 = vld [vmem:[#allocation6 + $0x1970] ss:$72 sps:$4 sm:$0xff]  }
 0x300   : > { %6179 = vmatpush1.bf16.msra.mxu1 %v12534_v54  ;;  %v12614_v54 = vld [vmem:[#allocation6 + $0x66c] ss:$72 sps:$4 sm:$0xff]  }
 0x301   : > { %6180 = vmatprep.subr.bf16.mxu1 %v12542_v55  ;;  %6030 = vmatpush1.bf16.msra.mxu0 %v12741_v1  ;;  %v12803_v55 = vld [vmem:[#allocation6 + $0x1854] ss:$72 sps:$4 sm:$0xff]   ;;  %v12624_v1 = vld [vmem:[#allocation6 + $0x788] ss:$72 sps:$4 sm:$0xff]  }
 0x302   : > { %6031 = vmatprep.subr.bf16.mxu0 %v12749_v4  ;;  %v12819_v4 = vld [vmem:[#allocation6 + $0x1a00] ss:$72 sps:$4 sm:$0xff]  }
 0x304   : > { %6181 = vmatpush1.bf16.msra.mxu1 %v12540_v58  ;;  %v12620_v58 = vld [vmem:[#allocation6 + $0x6fc] ss:$72 sps:$4 sm:$0xff]  }
 0x305   : > { %6314 = vmatprep.subr.bf16.mxu1 %v12548_v59  ;;  %6032 = vmatpush1.bf16.msra.mxu0 %v12747_v5  ;;  %v12809_v59 = vld [vmem:[#allocation6 + $0x18e4] ss:$72 sps:$4 sm:$0xff]   ;;  %v12630_v5 = vld [vmem:[#allocation6 + $0x818] ss:$72 sps:$4 sm:$0xff]  }
 0x306   : > { %6033 = vmatprep.subr.bf16.mxu0 %v12755_v9  ;;  %v12825_v9 = vld [vmem:[#allocation6 + $0x1a90] ss:$72 sps:$4 sm:$0xff]  }
 0x307   : > { %6183 = vmatmul.mubr.bf16.vlgmr.msra.gmra.mrb[12].mxu1 %v14061_v16 }
 0x308   : > { %6315 = vmatpush1.bf16.msra.mxu1 %v12546_v62  ;;  %6346 = vmatprep.mubr.bf16.mxu1 %v14040_v48  ;;  %v12626_v62 = vld [vmem:[#allocation6 + $0x78c] ss:$72 sps:$4 sm:$0xff]  }
 0x309   : > { %6316 = vmatprep.subr.bf16.mxu1 %v12554_v63  ;;  %6034 = vmatpush1.bf16.msra.mxu0 %v12753_v10  ;;  %v12815_v63 = vld [vmem:[#allocation6 + $0x1974] ss:$72 sps:$4 sm:$0xff]   ;;  %v12636_v10 = vld [vmem:[#allocation6 + $0x8a8] ss:$72 sps:$4 sm:$0xff]  }
 0x30a   : > { %6035 = vmatprep.subr.bf16.mxu0 %v12761_v14  ;;  %v12831_v14 = vld [vmem:[#allocation6 + $0x30] ss:$72 sps:$4 sm:$0xff]  }
 0x30c   : > { %6317 = vmatpush1.bf16.msra.mxu1 %v12552_v2  ;;  %v12632_v2 = vld [vmem:[#allocation6 + $0x81c] ss:$72 sps:$4 sm:$0xff]  }
 0x30d   : > { %6318 = vmatprep.subr.bf16.mxu1 %v12560_v3  ;;  %6036 = vmatpush1.bf16.msra.mxu0 %v12759_v15  ;;  %v12821_v3 = vld [vmem:[#allocation6 + $0x1a04] ss:$72 sps:$4 sm:$0xff]   ;;  %v12642_v15 = vld [vmem:[#allocation6 + $0x938] ss:$72 sps:$4 sm:$0xff]  }
 0x30e   : > { %6037 = vmatprep.subr.bf16.mxu0 %v12767_v19  ;;  %v12834_v19 = vld [vmem:[#allocation6 + $0xc0] ss:$72 sps:$4 sm:$0xff]  }
 0x310   : > { %6319 = vmatpush1.bf16.msra.mxu1 %v12558_v6  ;;  %v12638_v6 = vld [vmem:[#allocation6 + $0x8ac] ss:$72 sps:$4 sm:$0xff]  }
 0x311   : > { %6320 = vmatprep.subr.bf16.mxu1 %v12566_v7  ;;  %6038 = vmatpush1.bf16.msra.mxu0 %v12765_v20  ;;  %v12827_v7 = vld [vmem:[#allocation6 + $0x1a94] ss:$72 sps:$4 sm:$0xff]  }
 0x312   : > { %6039 = vmatprep.subr.bf16.mxu0 %v12773_v23  ;;  %v12839_v20 = vld [vmem:[#allocation6 + $0x154] ss:$72 sps:$4 sm:$0xff]   ;;  %v12837_v23 = vld [vmem:[#allocation6 + $0x150] ss:$72 sps:$4 sm:$0xff]  }
 0x314   : > { %6321 = vmatpush1.bf16.msra.mxu1 %v12564_v12  ;;  %v12644_v12 = vld [vmem:[#allocation6 + $0x93c] ss:$72 sps:$4 sm:$0xff]  }
 0x315   : > { %6322 = vmatprep.subr.bf16.mxu1 %v12572_v13  ;;  %6040 = vmatpush1.bf16.msra.mxu0 %v12771_v25  ;;  %v12833_v13 = vld [vmem:[#allocation6 + $0x34] ss:$72 sps:$4 sm:$0xff]  }
 0x316   : > { %6041 = vmatprep.subr.bf16.mxu0 %v12779_v34  ;;  %v12662_v25 = vld [vmem:[#allocation6 + $0xaec] ss:$72 sps:$4 sm:$0xff]   ;;  %v12668_v34 = vld [vmem:[#allocation6 + $0xb7c] ss:$72 sps:$4 sm:$0xff]  }
 0x318   : > { %6323 = vmatpush1.bf16.msra.mxu1 %v12570_v17  ;;  %v12650_v17 = vld [vmem:[#allocation6 + $0x9cc] ss:$72 sps:$4 sm:$0xff]  }
 0x319   : > { %6324 = vmatprep.subr.bf16.mxu1 %v12578_v18  ;;  %6042 = vmatpush1.bf16.msra.mxu0 %v12777_v38  ;;  %v12836_v18 = vld [vmem:[#allocation6 + $0xc4] ss:$72 sps:$4 sm:$0xff]   ;;  %v12843_v38 = vld [vmem:[#allocation6 + $0x270] ss:$72 sps:$4 sm:$0xff]  }
 0x31a   : > { %v5938_v24 = vpop.f32.mrb[8].mxu1  ;;  %6043 = vmatprep.subr.bf16.mxu0 %v12785_v36  ;;  %v12674_v36 = vld [vmem:[#allocation6 + $0xc0c] ss:$72 sps:$4 sm:$0xff]  }
 0x31b   : > { %v14107_v26 = vpack.c.bf16 %v5938_v24, %v5938_v24  ;;  %v14109_v27 = vpop.f32.mrb[9].mxu1  ;;  %v12654_v24 = vld [vmem:[#allocation6 + $0xa58] ss:$72 sps:$4 sm:$0xff]  }
 0x31c   : > { %v5942_v29 = vpop.f32.mrb[10].mxu1  ;;  %6325 = vmatpush1.bf16.msra.mxu1 %v12576_v21  ;;  %v12648_v21 = vld [vmem:[#allocation6 + $0x9c8] ss:$72 sps:$4 sm:$0xff]  }
 0x31d   : > { %6698 = vrot.lane.b32.xlu1 %v14107_v26, %s13803_s21  ;;  %v5943_v32 = vpop.f32.mrb[11].mxu1  ;;  %6326 = vmatprep.subr.bf16.mxu1 %v12584_v22  ;;  %v12656_v22 = vld [vmem:[#allocation6 + $0xa5c] ss:$72 sps:$4 sm:$0xff]  }
 0x31e   : > { %6044 = vmatpush1.bf16.msra.mxu0 %v12783_v42  ;;  %v12842_v29 = vld [vmem:[#allocation6 + $0x1e4] ss:$72 sps:$4 sm:$0xff]   ;;  %v12845_v32 = vld [vmem:[#allocation6 + $0x274] ss:$72 sps:$4 sm:$0xff]   ;;  %v12846_v42 = vld [vmem:[#allocation6 + $0x300] ss:$72 sps:$4 sm:$0xff]  }
 0x31f   : > { %6045 = vmatprep.subr.bf16.mxu0 %v12791_v44  ;;  %v12680_v44 = vld [vmem:[#allocation6 + $0xc9c] ss:$72 sps:$4 sm:$0xff]  }
 0x320   : > { %6327 = vmatpush1.bf16.msra.mxu1 %v12582_v30  ;;  %v12840_v30 = vld [vmem:[#allocation6 + $0x1e0] ss:$72 sps:$4 sm:$0xff]  }
 0x321   : > { %6695 = vrot.lane.b32.xlu1 %v14115_v39, %s13803_s21  ;;  %6328 = vmatprep.subr.bf16.mxu1 %v12590_v33  ;;  %v12660_v33 = vld [vmem:[#allocation6 + $0xae8] ss:$72 sps:$4 sm:$0xff]  }
 0x322   : > { %6046 = vmatpush1.bf16.msra.mxu0 %v12789_v28 }
 0x323   : > { %6047 = vmatprep.subr.bf16.mxu0 %v12797_v47 }
 0x324   : > { %6329 = vmatpush1.bf16.msra.mxu1 %v12588_v40  ;;  %v12666_v40 = vld [vmem:[#allocation6 + $0xb78] ss:$72 sps:$4 sm:$0xff]  }
 0x325   : > { %6330 = vmatprep.subr.bf16.mxu1 %v12596_v41  ;;  %v12848_v41 = vld [vmem:[#allocation6 + $0x304] ss:$72 sps:$4 sm:$0xff]  }
 0x326   : > { %6048 = vmatpush1.bf16.msra.mxu0 %v12795_v49  ;;  %v12849_v49 = vld [vmem:[#allocation6 + $0x390] ss:$72 sps:$4 sm:$0xff]  }
 0x327   : > { %6049 = vmatprep.subr.bf16.mxu0 %v12803_v55  ;;  %v12852_v55 = vld [vmem:[#allocation6 + $0x420] ss:$72 sps:$4 sm:$0xff]  }
 0x328   : > { %6331 = vmatpush1.bf16.msra.mxu1 %v12594_v37  ;;  %v12672_v37 = vld [vmem:[#allocation6 + $0xc08] ss:$72 sps:$4 sm:$0xff]  }
 0x329   : > { %6332 = vmatprep.subr.bf16.mxu1 %v12602_v43 }
 0x32a   : > { %6050 = vmatpush1.bf16.msra.mxu0 %v12801_v56  ;;  %v12854_v56 = vld [vmem:[#allocation6 + $0x424] ss:$72 sps:$4 sm:$0xff]  }
 0x32b   : > { %6051 = vmatprep.subr.bf16.mxu0 %v12809_v59  ;;  %v12692_v59 = vld [vmem:[#allocation6 + $0xdbc] ss:$72 sps:$4 sm:$0xff]  }
 0x32c   : > { %6333 = vmatpush1.bf16.msra.mxu1 %v12600_v45 }
 0x32d   : > { %6334 = vmatprep.subr.bf16.mxu1 %v12608_v46  ;;  %v12851_v46 = vld [vmem:[#allocation6 + $0x394] ss:$72 sps:$4 sm:$0xff]  }
 0x32e   : > { %6052 = vmatpush1.bf16.msra.mxu0 %v12807_v60  ;;  %v12855_v60 = vld [vmem:[#allocation6 + $0x4b0] ss:$72 sps:$4 sm:$0xff]  }
 0x32f   : > { %6053 = vmatprep.subr.bf16.mxu0 %v12815_v63  ;;  %v12698_v63 = vld [vmem:[#allocation6 + $0xe4c] ss:$72 sps:$4 sm:$0xff]  }
 0x330   : > { %6335 = vmatpush1.bf16.msra.mxu1 %v12606_v50  ;;  %v12678_v50 = vld [vmem:[#allocation6 + $0xc98] ss:$72 sps:$4 sm:$0xff]  }
 0x331   : > { %6336 = vmatprep.subr.bf16.mxu1 %v12614_v54  ;;  %v12686_v54 = vld [vmem:[#allocation6 + $0xd2c] ss:$72 sps:$4 sm:$0xff]  }
 0x332   : > { %6054 = vmatpush1.bf16.msra.mxu0 %v12813_v0  ;;  %v12858_v0 = vld [vmem:[#allocation6 + $0x540] ss:$72 sps:$4 sm:$0xff]  }
 0x333   : > { %6055 = vmatprep.subr.bf16.mxu0 %v12821_v3  ;;  %v12704_v3 = vld [vmem:[#allocation6 + $0xedc] ss:$72 sps:$4 sm:$0xff]  }
 0x334   : > { %6337 = vmatpush1.bf16.msra.mxu1 %v12612_v57  ;;  %v12857_v57 = vld [vmem:[#allocation6 + $0x4b4] ss:$72 sps:$4 sm:$0xff]  }
 0x335   : > { %6338 = vmatprep.subr.bf16.mxu1 %v12620_v58  ;;  %v12684_v58 = vld [vmem:[#allocation6 + $0xd28] ss:$72 sps:$4 sm:$0xff]  }
 0x336   : > { %6056 = vmatpush1.bf16.msra.mxu0 %v12819_v4  ;;  %v12861_v4 = vld [vmem:[#allocation6 + $0x5d0] ss:$72 sps:$4 sm:$0xff]  }
 0x337   : > { %6057 = vmatprep.subr.bf16.mxu0 %v12827_v7  ;;  %v12710_v7 = vld [vmem:[#allocation6 + $0xf6c] ss:$72 sps:$4 sm:$0xff]  }
 0x338   : > { %6339 = vmatpush1.bf16.msra.mxu1 %v12618_v61  ;;  %v12860_v61 = vld [vmem:[#allocation6 + $0x544] ss:$72 sps:$4 sm:$0xff]  }
 0x339   : > { %6340 = vmatprep.subr.bf16.mxu1 %v12626_v62  ;;  %v12690_v62 = vld [vmem:[#allocation6 + $0xdb8] ss:$72 sps:$4 sm:$0xff]  }
 0x33a   : > { %6058 = vmatpush1.bf16.msra.mxu0 %v12825_v9  ;;  %v12864_v9 = vld [vmem:[#allocation6 + $0x660] ss:$72 sps:$4 sm:$0xff]  }
 0x33b   : > { %6191 = vmatprep.subr.bf16.mxu0 %v12833_v13  ;;  %v12716_v13 = vld [vmem:[#allocation6 + $0xffc] ss:$72 sps:$4 sm:$0xff]  }
 0x33c   : > { %6341 = vmatpush1.bf16.msra.mxu1 %v12624_v1  ;;  %v12863_v1 = vld [vmem:[#allocation6 + $0x5d4] ss:$72 sps:$4 sm:$0xff]  }
 0x33d   : > { %6342 = vmatprep.subr.bf16.mxu1 %v12632_v2  ;;  %6060 = vmatmul.mubr.bf16.vlgmr.msra.gmra.mrb[8].mxu0 %v14061_v16  ;;  %v12696_v2 = vld [vmem:[#allocation6 + $0xe48] ss:$72 sps:$4 sm:$0xff]  }
 0x33e   : > { %6192 = vmatpush1.bf16.msra.mxu0 %v12831_v14  ;;  %6223 = vmatprep.mubr.bf16.mxu0 %v14040_v48  ;;  %v12867_v14 = vld [vmem:[#allocation6 + $0x6f0] ss:$72 sps:$4 sm:$0xff]  }
 0x33f   : > { %6193 = vmatprep.subr.bf16.mxu0 %v12836_v18  ;;  %v12722_v18 = vld [vmem:[#allocation6 + $0x108c] ss:$72 sps:$4 sm:$0xff]  }
 0x340   : > { %6343 = vmatpush1.bf16.msra.mxu1 %v12630_v5  ;;  %v12866_v5 = vld [vmem:[#allocation6 + $0x664] ss:$72 sps:$4 sm:$0xff]  }
 0x341   : > { %6344 = vmatprep.subr.bf16.mxu1 %v12638_v6  ;;  %v12702_v6 = vld [vmem:[#allocation6 + $0xed8] ss:$72 sps:$4 sm:$0xff]  }
 0x342   : > { %6194 = vmatpush1.bf16.msra.mxu0 %v12834_v19  ;;  %v12870_v19 = vld [vmem:[#allocation6 + $0x780] ss:$72 sps:$4 sm:$0xff]  }
 0x343   : > { %6195 = vmatprep.subr.bf16.mxu0 %v12839_v20  ;;  %v12875_v20 = vld [vmem:[#allocation6 + $0x814] ss:$72 sps:$4 sm:$0xff]  }
 0x344   : > { %6345 = vmatpush1.bf16.msra.mxu1 %v12636_v10  ;;  %v12869_v10 = vld [vmem:[#allocation6 + $0x6f4] ss:$72 sps:$4 sm:$0xff]  }
 0x345   : > { %6355 = vmatprep.subr.bf16.mxu1 %v12644_v12  ;;  %v12708_v12 = vld [vmem:[#allocation6 + $0xf68] ss:$72 sps:$4 sm:$0xff]  }
 0x346   : > { %6196 = vmatpush1.bf16.msra.mxu0 %v12837_v23  ;;  %v12873_v23 = vld [vmem:[#allocation6 + $0x810] ss:$72 sps:$4 sm:$0xff]  }
 0x347   : > { %6347 = vmatmul.mubr.bf16.vlgmr.msra.gmra.mrb[16].mxu1 %v14049_v8  ;;  %6197 = vmatprep.subr.bf16.mxu0 %v12842_v29  ;;  %v12734_v29 = vld [vmem:[#allocation6 + $0x11ac] ss:$72 sps:$4 sm:$0xff]  }
 0x348   : > { %6356 = vmatpush1.bf16.msra.mxu1 %v12642_v15  ;;  %6387 = vmatprep.mubr.bf16.mxu1 %v14043_v52  ;;  %v12872_v15 = vld [vmem:[#allocation6 + $0x784] ss:$72 sps:$4 sm:$0xff]  }
 0x349   : > { %6357 = vmatprep.subr.bf16.mxu1 %v12650_v17  ;;  %v12714_v17 = vld [vmem:[#allocation6 + $0xff8] ss:$72 sps:$4 sm:$0xff]  }
 0x34a   : > { %6198 = vmatpush1.bf16.msra.mxu0 %v12840_v30  ;;  %v12876_v30 = vld [vmem:[#allocation6 + $0x8a0] ss:$72 sps:$4 sm:$0xff]  }
 0x34b   : > { %6199 = vmatprep.subr.bf16.mxu0 %v12845_v32  ;;  %v12881_v32 = vld [vmem:[#allocation6 + $0x934] ss:$72 sps:$4 sm:$0xff]  }
 0x34c   : > { %6358 = vmatpush1.bf16.msra.mxu1 %v12648_v21  ;;  %v12720_v21 = vld [vmem:[#allocation6 + $0x1088] ss:$72 sps:$4 sm:$0xff]  }
 0x34d   : > { %6359 = vmatprep.subr.bf16.mxu1 %v12656_v22  ;;  %v12728_v22 = vld [vmem:[#allocation6 + $0x111c] ss:$72 sps:$4 sm:$0xff]  }
 0x34e   : > { %6200 = vmatpush1.bf16.msra.mxu0 %v12843_v38  ;;  %v12879_v38 = vld [vmem:[#allocation6 + $0x930] ss:$72 sps:$4 sm:$0xff]  }
 0x34f   : > { %6201 = vmatprep.subr.bf16.mxu0 %v12848_v41  ;;  %v14123_v43 = vpop.f32.mrb[4].mxu0  ;;  %v12738_v41 = vld [vmem:[#allocation6 + $0x1238] ss:$72 sps:$4 sm:$0xff]  }
 0x350   : > { %6360 = vmatpush1.bf16.msra.mxu1 %v12654_v24  ;;  %v14125_v28 = vpop.f32.mrb[5].mxu0  ;;  %v12878_v24 = vld [vmem:[#allocation6 + $0x8a4] ss:$72 sps:$4 sm:$0xff]  }
 0x351   : > { %6361 = vmatprep.subr.bf16.mxu1 %v12662_v25  ;;  %v5819_v45 = vpop.f32.mrb[6].mxu0  ;;  %v12726_v25 = vld [vmem:[#allocation6 + $0x1118] ss:$72 sps:$4 sm:$0xff]  }
 0x352   : > { %6202 = vmatpush1.bf16.msra.mxu0 %v12846_v42  ;;  %v5820_v47 = vpop.f32.mrb[7].mxu0  ;;  %v12882_v42 = vld [vmem:[#allocation6 + $0x9c0] ss:$72 sps:$4 sm:$0xff]   ;;  %v12752_v45 = vld [vmem:[#allocation6 + $0x135c] ss:$72 sps:$4 sm:$0xff]  }
 0x353   : > { %6203 = vmatprep.subr.bf16.mxu0 %v12851_v46  ;;  %v12885_v46 = vld [vmem:[#allocation6 + $0xa50] ss:$72 sps:$4 sm:$0xff]   ;;  %v12890_v47 = vld [vmem:[#allocation6 + $0xae4] ss:$72 sps:$4 sm:$0xff]  }
 0x354   : > { %6362 = vmatpush1.bf16.msra.mxu1 %v12660_v33  ;;  %v12732_v33 = vld [vmem:[#allocation6 + $0x11a8] ss:$72 sps:$4 sm:$0xff]  }
 0x355   : > { %6363 = vmatprep.subr.bf16.mxu1 %v12668_v34  ;;  %v12740_v34 = vld [vmem:[#allocation6 + $0x123c] ss:$72 sps:$4 sm:$0xff]  }
 0x356   : > { %6204 = vmatpush1.bf16.msra.mxu0 %v12849_v49  ;;  %v12750_v49 = vld [vmem:[#allocation6 + $0x1358] ss:$72 sps:$4 sm:$0xff]  }
 0x357   : > { %6205 = vmatprep.subr.bf16.mxu0 %v12854_v56  ;;  %v12756_v56 = vld [vmem:[#allocation6 + $0x13e8] ss:$72 sps:$4 sm:$0xff]  }
 0x358   : > { %6364 = vmatpush1.bf16.msra.mxu1 %v12666_v40  ;;  %v12884_v40 = vld [vmem:[#allocation6 + $0x9c4] ss:$72 sps:$4 sm:$0xff]  }
 0x359   : > { %6365 = vmatprep.subr.bf16.mxu1 %v12674_v36  ;;  %v12746_v36 = vld [vmem:[#allocation6 + $0x12cc] ss:$72 sps:$4 sm:$0xff]  }
 0x35a   : > { %6206 = vmatpush1.bf16.msra.mxu0 %v12852_v55  ;;  %v12893_v55 = vld [vmem:[#allocation6 + $0xb74] ss:$72 sps:$4 sm:$0xff]  }
 0x35b   : > { %6207 = vmatprep.subr.bf16.mxu0 %v12857_v57  ;;  %v12764_v57 = vld [vmem:[#allocation6 + $0x147c] ss:$72 sps:$4 sm:$0xff]  }
 0x35c   : > { %6366 = vmatpush1.bf16.msra.mxu1 %v12672_v37  ;;  %v12887_v37 = vld [vmem:[#allocation6 + $0xa54] ss:$72 sps:$4 sm:$0xff]  }
 0x35d   : > { %6367 = vmatprep.subr.bf16.mxu1 %v12680_v44  ;;  %v12744_v44 = vld [vmem:[#allocation6 + $0x12c8] ss:$72 sps:$4 sm:$0xff]  }
 0x35e   : > { %6208 = vmatpush1.bf16.msra.mxu0 %v12855_v60  ;;  %v12762_v60 = vld [vmem:[#allocation6 + $0x1478] ss:$72 sps:$4 sm:$0xff]  }
 0x35f   : > { %6209 = vmatprep.subr.bf16.mxu0 %v12860_v61  ;;  %v12770_v61 = vld [vmem:[#allocation6 + $0x150c] ss:$72 sps:$4 sm:$0xff]  }
 0x360   : > { %6368 = vmatpush1.bf16.msra.mxu1 %v12678_v50  ;;  %v12758_v50 = vld [vmem:[#allocation6 + $0x13ec] ss:$72 sps:$4 sm:$0xff]  }
 0x361   : > { %6369 = vmatprep.subr.bf16.mxu1 %v12686_v54  ;;  %v12888_v54 = vld [vmem:[#allocation6 + $0xae0] ss:$72 sps:$4 sm:$0xff]  }
 0x362   : > { %6210 = vmatpush1.bf16.msra.mxu0 %v12858_v0  ;;  %v12768_v0 = vld [vmem:[#allocation6 + $0x1508] ss:$72 sps:$4 sm:$0xff]  }
 0x363   : > { %6211 = vmatprep.subr.bf16.mxu0 %v12863_v1  ;;  %v12776_v1 = vld [vmem:[#allocation6 + $0x159c] ss:$72 sps:$4 sm:$0xff]  }
 0x364   : > { %6370 = vmatpush1.bf16.msra.mxu1 %v12684_v58  ;;  %v12891_v58 = vld [vmem:[#allocation6 + $0xb70] ss:$72 sps:$4 sm:$0xff]  }
 0x365   : > { %6371 = vmatprep.subr.bf16.mxu1 %v12692_v59  ;;  %v12896_v59 = vld [vmem:[#allocation6 + $0xc04] ss:$72 sps:$4 sm:$0xff]  }
 0x366   : > { %6212 = vmatpush1.bf16.msra.mxu0 %v12861_v4  ;;  %v12774_v4 = vld [vmem:[#allocation6 + $0x1598] ss:$72 sps:$4 sm:$0xff]  }
 0x367   : > { %6213 = vmatprep.subr.bf16.mxu0 %v12866_v5  ;;  %v12782_v5 = vld [vmem:[#allocation6 + $0x162c] ss:$72 sps:$4 sm:$0xff]  }
 0x368   : > { %6372 = vmatpush1.bf16.msra.mxu1 %v12690_v62  ;;  %v12894_v62 = vld [vmem:[#allocation6 + $0xc00] ss:$72 sps:$4 sm:$0xff]  }
 0x369   : > { %6373 = vmatprep.subr.bf16.mxu1 %v12698_v63  ;;  %v12899_v63 = vld [vmem:[#allocation6 + $0xc94] ss:$72 sps:$4 sm:$0xff]  }
 0x36a   : > { %6214 = vmatpush1.bf16.msra.mxu0 %v12864_v9  ;;  %v12780_v9 = vld [vmem:[#allocation6 + $0x1628] ss:$72 sps:$4 sm:$0xff]  }
 0x36b   : > { %6215 = vmatprep.subr.bf16.mxu0 %v12869_v10  ;;  %v12788_v10 = vld [vmem:[#allocation6 + $0x16bc] ss:$72 sps:$4 sm:$0xff]  }
 0x36c   : > { %6374 = vmatpush1.bf16.msra.mxu1 %v12696_v2  ;;  %v12897_v2 = vld [vmem:[#allocation6 + $0xc90] ss:$72 sps:$4 sm:$0xff]  }
 0x36d   : > { %6375 = vmatprep.subr.bf16.mxu1 %v12704_v3  ;;  %v12902_v3 = vld [vmem:[#allocation6 + $0xd24] ss:$72 sps:$4 sm:$0xff]  }
 0x36e   : > { %6216 = vmatpush1.bf16.msra.mxu0 %v12867_v14  ;;  %v12786_v14 = vld [vmem:[#allocation6 + $0x16b8] ss:$72 sps:$4 sm:$0xff]  }
 0x36f   : > { %6217 = vmatprep.subr.bf16.mxu0 %v12872_v15  ;;  %v12794_v15 = vld [vmem:[#allocation6 + $0x174c] ss:$72 sps:$4 sm:$0xff]  }
 0x370   : > { %6376 = vmatpush1.bf16.msra.mxu1 %v12702_v6  ;;  %v12900_v6 = vld [vmem:[#allocation6 + $0xd20] ss:$72 sps:$4 sm:$0xff]  }
 0x371   : > { %6377 = vmatprep.subr.bf16.mxu1 %v12710_v7  ;;  %v12905_v7 = vld [vmem:[#allocation6 + $0xdb4] ss:$72 sps:$4 sm:$0xff]  }
 0x372   : > { %6218 = vmatpush1.bf16.msra.mxu0 %v12870_v19  ;;  %v12792_v19 = vld [vmem:[#allocation6 + $0x1748] ss:$72 sps:$4 sm:$0xff]  }
 0x373   : > { %6219 = vmatprep.subr.bf16.mxu0 %v12875_v20  ;;  %v12800_v20 = vld [vmem:[#allocation6 + $0x17dc] ss:$72 sps:$4 sm:$0xff]  }
 0x374   : > { %6378 = vmatpush1.bf16.msra.mxu1 %v12708_v12  ;;  %v12903_v12 = vld [vmem:[#allocation6 + $0xdb0] ss:$72 sps:$4 sm:$0xff]  }
 0x375   : > { %6379 = vmatprep.subr.bf16.mxu1 %v12716_v13  ;;  %v12908_v13 = vld [vmem:[#allocation6 + $0xe44] ss:$72 sps:$4 sm:$0xff]  }
 0x376   : > { %6220 = vmatpush1.bf16.msra.mxu0 %v12873_v23  ;;  %v12798_v23 = vld [vmem:[#allocation6 + $0x17d8] ss:$72 sps:$4 sm:$0xff]  }
 0x377   : > { %6221 = vmatprep.subr.bf16.mxu0 %v12878_v24  ;;  %v12806_v24 = vld [vmem:[#allocation6 + $0x186c] ss:$72 sps:$4 sm:$0xff]  }
 0x378   : > { %6380 = vmatpush1.bf16.msra.mxu1 %v12714_v17  ;;  %v12906_v17 = vld [vmem:[#allocation6 + $0xe40] ss:$72 sps:$4 sm:$0xff]  }
 0x379   : > { %6381 = vmatprep.subr.bf16.mxu1 %v12722_v18  ;;  %v12911_v18 = vld [vmem:[#allocation6 + $0xed4] ss:$72 sps:$4 sm:$0xff]  }
 0x37a   : > { %6222 = vmatpush1.bf16.msra.mxu0 %v12876_v30  ;;  %v12804_v30 = vld [vmem:[#allocation6 + $0x1868] ss:$72 sps:$4 sm:$0xff]  }
 0x37b   : > { %6232 = vmatprep.subr.bf16.mxu0 %v12881_v32  ;;  %v12812_v32 = vld [vmem:[#allocation6 + $0x18fc] ss:$72 sps:$4 sm:$0xff]  }
 0x37c   : > { %6382 = vmatpush1.bf16.msra.mxu1 %v12720_v21  ;;  %v12909_v21 = vld [vmem:[#allocation6 + $0xed0] ss:$72 sps:$4 sm:$0xff]  }
 0x37d   : > { %6383 = vmatprep.subr.bf16.mxu1 %v12728_v22  ;;  %6224 = vmatmul.mubr.bf16.vlgmr.msra.gmra.mrb[12].mxu0 %v14049_v8  ;;  %v12914_v22 = vld [vmem:[#allocation6 + $0xf64] ss:$72 sps:$4 sm:$0xff]  }
 0x37e   : > { %6233 = vmatpush1.bf16.msra.mxu0 %v12879_v38  ;;  %6264 = vmatprep.mubr.bf16.mxu0 %v14043_v52  ;;  %v12810_v38 = vld [vmem:[#allocation6 + $0x18f8] ss:$72 sps:$4 sm:$0xff]  }
 0x37f   : > { %6234 = vmatprep.subr.bf16.mxu0 %v12884_v40  ;;  %v12818_v40 = vld [vmem:[#allocation6 + $0x198c] ss:$72 sps:$4 sm:$0xff]  }
 0x380   : > { %6384 = vmatpush1.bf16.msra.mxu1 %v12726_v25  ;;  %v12912_v25 = vld [vmem:[#allocation6 + $0xf60] ss:$72 sps:$4 sm:$0xff]  }
 0x381   : > { %6385 = vmatprep.subr.bf16.mxu1 %v12734_v29  ;;  %v12917_v29 = vld [vmem:[#allocation6 + $0xff4] ss:$72 sps:$4 sm:$0xff]  }
 0x382   : > { %6235 = vmatpush1.bf16.msra.mxu0 %v12882_v42  ;;  %v12816_v42 = vld [vmem:[#allocation6 + $0x1988] ss:$72 sps:$4 sm:$0xff]  }
 0x383   : > { %6236 = vmatprep.subr.bf16.mxu0 %v12887_v37  ;;  %v12824_v37 = vld [vmem:[#allocation6 + $0x1a1c] ss:$72 sps:$4 sm:$0xff]  }
 0x384   : > { %6386 = vmatpush1.bf16.msra.mxu1 %v12732_v33  ;;  %v12915_v33 = vld [vmem:[#allocation6 + $0xff0] ss:$72 sps:$4 sm:$0xff]  }
 0x385   : > { %6396 = vmatprep.subr.bf16.mxu1 %v12740_v34  ;;  %v12920_v34 = vld [vmem:[#allocation6 + $0x1084] ss:$72 sps:$4 sm:$0xff]  }
 0x386   : > { %6237 = vmatpush1.bf16.msra.mxu0 %v12885_v46  ;;  %v12822_v46 = vld [vmem:[#allocation6 + $0x1a18] ss:$72 sps:$4 sm:$0xff]  }
 0x387   : > { %6388 = vmatmul.mubr.bf16.vlgmr.msra.gmra.mrb[16].mxu1 %v14051_v11  ;;  %6238 = vmatprep.subr.bf16.mxu0 %v12890_v47  ;;  %v12830_v47 = vld [vmem:[#allocation6 + $0x1aac] ss:$72 sps:$4 sm:$0xff]  }
 0x388   : > { %6397 = vmatpush1.bf16.msra.mxu1 %v12738_v41  ;;  %6428 = vmatprep.mubr.bf16.mxu1 %v14057_v35  ;;  %v12918_v41 = vld [vmem:[#allocation6 + $0x1080] ss:$72 sps:$4 sm:$0xff]  }
 0x389   : > { %6398 = vmatprep.subr.bf16.mxu1 %v12746_v36  ;;  %v12923_v36 = vld [vmem:[#allocation6 + $0x1114] ss:$72 sps:$4 sm:$0xff]  }
 0x38a   : > { %6239 = vmatpush1.bf16.msra.mxu0 %v12888_v54  ;;  %v12828_v54 = vld [vmem:[#allocation6 + $0x1aa8] ss:$72 sps:$4 sm:$0xff]  }
 0x38b   : > { %6240 = vmatprep.subr.bf16.mxu0 %v12893_v55  ;;  %v12927_v55 = vld [vmem:[#allocation6 + $0x1230] ss:$72 sps:$4 sm:$0xff]  }
 0x38c   : > { %6399 = vmatpush1.bf16.msra.mxu1 %v12744_v44  ;;  %v12921_v44 = vld [vmem:[#allocation6 + $0x1110] ss:$72 sps:$4 sm:$0xff]  }
 0x38d   : > { %6400 = vmatprep.subr.bf16.mxu1 %v12752_v45  ;;  %v12926_v45 = vld [vmem:[#allocation6 + $0x11a4] ss:$72 sps:$4 sm:$0xff]  }
 0x38e   : > { %6241 = vmatpush1.bf16.msra.mxu0 %v12891_v58  ;;  %v12930_v58 = vld [vmem:[#allocation6 + $0x12c0] ss:$72 sps:$4 sm:$0xff]  }
 0x38f   : > { %6242 = vmatprep.subr.bf16.mxu0 %v12896_v59  ;;  %v12935_v59 = vld [vmem:[#allocation6 + $0x1354] ss:$72 sps:$4 sm:$0xff]  }
 0x390   : > { %6401 = vmatpush1.bf16.msra.mxu1 %v12750_v49  ;;  %v12924_v49 = vld [vmem:[#allocation6 + $0x11a0] ss:$72 sps:$4 sm:$0xff]  }
 0x391   : > { %6402 = vmatprep.subr.bf16.mxu1 %v12758_v50  ;;  %v12929_v50 = vld [vmem:[#allocation6 + $0x1234] ss:$72 sps:$4 sm:$0xff]  }
 0x392   : > { %6243 = vmatpush1.bf16.msra.mxu0 %v12894_v62  ;;  %v6588_v62 = vsel %vm6583_vm1, %v14107_v26, 0  ;;  %v12947_v26 = vld [vmem:[#allocation6 + $0x1594] ss:$72 sps:$4 sm:$0xff]  }
 0x393   : > { %6244 = vmatprep.subr.bf16.mxu0 %v12899_v63  ;;  %v12936_v63 = vld [vmem:[#allocation6 + $0x13e0] ss:$72 sps:$4 sm:$0xff]  }
 0x394   : > { %6403 = vmatpush1.bf16.msra.mxu1 %v12756_v56  ;;  %v12932_v56 = vld [vmem:[#allocation6 + $0x12c4] ss:$72 sps:$4 sm:$0xff]  }
 0x395   : > { %6404 = vmatprep.subr.bf16.mxu1 %v12764_v57  ;;  %v13804_v57 = vmov 0.0  }
 0x396   : > { %6245 = vmatpush1.bf16.msra.mxu0 %v12897_v2  ;;  %v12944_v2 = vld [vmem:[#allocation6 + $0x1504] ss:$72 sps:$4 sm:$0xff]  }
 0x397   : > { %6246 = vmatprep.subr.bf16.mxu0 %v12902_v3  ;;  %v12942_v3 = vld [vmem:[#allocation6 + $0x1500] ss:$72 sps:$4 sm:$0xff]  }
 0x398   : > { %6405 = vmatpush1.bf16.msra.mxu1 %v12762_v60  ;;  %v12933_v60 = vld [vmem:[#allocation6 + $0x1350] ss:$72 sps:$4 sm:$0xff]  }
 0x399   : > { %6406 = vmatprep.subr.bf16.mxu1 %v12770_v61  ;;  %v12938_v61 = vld [vmem:[#allocation6 + $0x13e4] ss:$72 sps:$4 sm:$0xff]  }
 0x39a   : > { %6247 = vmatpush1.bf16.msra.mxu0 %v12900_v6 }
 0x39b   : > { %6248 = vmatprep.subr.bf16.mxu0 %v12905_v7  ;;  %v12950_v7 = vld [vmem:[#allocation6 + $0x1624] ss:$72 sps:$4 sm:$0xff]  }
 0x39c   : > { %6407 = vmatpush1.bf16.msra.mxu1 %v12768_v0  ;;  %v12941_v0 = vld [vmem:[#allocation6 + $0x1474] ss:$72 sps:$4 sm:$0xff]  }
 0x39d   : > { %6408 = vmatprep.subr.bf16.mxu1 %v12776_v1  ;;  %v12939_v1 = vld [vmem:[#allocation6 + $0x1470] ss:$72 sps:$4 sm:$0xff]  }
 0x39e   : > { %6249 = vmatpush1.bf16.msra.mxu0 %v12903_v12  ;;  %v12948_v12 = vld [vmem:[#allocation6 + $0x1620] ss:$72 sps:$4 sm:$0xff]  }
 0x39f   : > { %6250 = vmatprep.subr.bf16.mxu0 %v12908_v13  ;;  %v12951_v13 = vld [vmem:[#allocation6 + $0x16b0] ss:$72 sps:$4 sm:$0xff]  }
 0x3a0   : > { %6409 = vmatpush1.bf16.msra.mxu1 %v12774_v4 }
 0x3a1   : > { %6410 = vmatprep.subr.bf16.mxu1 %v12782_v5  ;;  %v12945_v5 = vld [vmem:[#allocation6 + $0x1590] ss:$72 sps:$4 sm:$0xff]  }
 0x3a2   : > { %6251 = vmatpush1.bf16.msra.mxu0 %v12906_v17  ;;  %v12959_v17 = vld [vmem:[#allocation6 + $0x17d4] ss:$72 sps:$4 sm:$0xff]  }
 0x3a3   : > { %6252 = vmatprep.subr.bf16.mxu0 %v12911_v18  ;;  %v12957_v18 = vld [vmem:[#allocation6 + $0x17d0] ss:$72 sps:$4 sm:$0xff]  }
 0x3a4   : > { %6411 = vmatpush1.bf16.msra.mxu1 %v12780_v9 }
 0x3a5   : > { %6412 = vmatprep.subr.bf16.mxu1 %v12788_v10 }
 0x3a6   : > { %6253 = vmatpush1.bf16.msra.mxu0 %v12909_v21  ;;  %v12965_v21 = vld [vmem:[#allocation6 + $0x18f4] ss:$72 sps:$4 sm:$0xff]  }
 0x3a7   : > { %6254 = vmatprep.subr.bf16.mxu0 %v12914_v22  ;;  %v12963_v22 = vld [vmem:[#allocation6 + $0x18f0] ss:$72 sps:$4 sm:$0xff]  }
 0x3a8   : > { %6413 = vmatpush1.bf16.msra.mxu1 %v12786_v14  ;;  %v12956_v14 = vld [vmem:[#allocation6 + $0x1744] ss:$72 sps:$4 sm:$0xff]  }
 0x3a9   : > { %6414 = vmatprep.subr.bf16.mxu1 %v12794_v15  ;;  %v12954_v15 = vld [vmem:[#allocation6 + $0x1740] ss:$72 sps:$4 sm:$0xff]  }
 0x3aa   : > { %6255 = vmatpush1.bf16.msra.mxu0 %v12912_v25  ;;  %v12971_v25 = vld [vmem:[#allocation6 + $0x1a14] ss:$72 sps:$4 sm:$0xff]  }
 0x3ab   : > { %6256 = vmatprep.subr.bf16.mxu0 %v12917_v29  ;;  %v12969_v29 = vld [vmem:[#allocation6 + $0x1a10] ss:$72 sps:$4 sm:$0xff]  }
 0x3ac   : > { %6415 = vmatpush1.bf16.msra.mxu1 %v12792_v19  ;;  %v12962_v19 = vld [vmem:[#allocation6 + $0x1864] ss:$72 sps:$4 sm:$0xff]  }
 0x3ad   : > { %6416 = vmatprep.subr.bf16.mxu1 %v12800_v20  ;;  %v12960_v20 = vld [vmem:[#allocation6 + $0x1860] ss:$72 sps:$4 sm:$0xff]  }
 0x3ae   : > { %6257 = vmatpush1.bf16.msra.mxu0 %v12915_v33 }
 0x3af   : > { %6258 = vmatprep.subr.bf16.mxu0 %v12920_v34 }
 0x3b0   : > { %6417 = vmatpush1.bf16.msra.mxu1 %v12798_v23  ;;  %v12968_v23 = vld [vmem:[#allocation6 + $0x1984] ss:$72 sps:$4 sm:$0xff]  }
 0x3b1   : > { %6418 = vmatprep.subr.bf16.mxu1 %v12806_v24  ;;  %v12966_v24 = vld [vmem:[#allocation6 + $0x1980] ss:$72 sps:$4 sm:$0xff]  }
 0x3b2   : > { %6259 = vmatpush1.bf16.msra.mxu0 %v12918_v41 }
 0x3b3   : > { %6260 = vmatprep.subr.bf16.mxu0 %v12923_v36 }
 0x3b4   : > { %6419 = vmatpush1.bf16.msra.mxu1 %v12804_v30  ;;  %v12974_v30 = vld [vmem:[#allocation6 + $0x1aa4] ss:$72 sps:$4 sm:$0xff]  }
 0x3b5   : > { %6420 = vmatprep.subr.bf16.mxu1 %v12812_v32  ;;  %v12972_v32 = vld [vmem:[#allocation6 + $0x1aa0] ss:$72 sps:$4 sm:$0xff]  }
 0x3b6   : > { %6261 = vmatpush1.bf16.msra.mxu0 %v12921_v44  ;;  %v6578_v44 = vlaneseq }
 0x3b7   : > { %6262 = vmatprep.subr.bf16.mxu0 %v12926_v45 }
 0x3b8   : > { %6421 = vmatpush1.bf16.msra.mxu1 %v12810_v38  ;;  %v14158_v45 = vshrl.u32 %v6578_v44, 7 }
 0x3b9   : > { %6422 = vmatprep.subr.bf16.mxu1 %v12818_v40 }
 0x3ba   : > { %6263 = vmatpush1.bf16.msra.mxu0 %v12924_v49 }
 0x3bb   : > { %6273 = vmatprep.subr.bf16.mxu0 %v12929_v50 }
 0x3bc   : > { %6423 = vmatpush1.bf16.msra.mxu1 %v12816_v42 }
 0x3bd   : > { %6424 = vmatprep.subr.bf16.mxu1 %v12824_v37  ;;  %6265 = vmatmul.mubr.bf16.vlgmr.msra.gmra.mrb[12].mxu0 %v14051_v11 }
 0x3be   : > { %6274 = vmatpush1.bf16.msra.mxu0 %v12927_v55  ;;  %6305 = vmatprep.mubr.bf16.mxu0 %v14057_v35 }
 0x3bf   : > { %6275 = vmatprep.subr.bf16.mxu0 %v12932_v56 }
 0x3c0   : > { %6425 = vmatpush1.bf16.msra.mxu1 %v12822_v46  ;;  %v6581_v46 = vand.u32 127, %v6578_v44 }
 0x3c1   : > { %6426 = vmatprep.subr.bf16.mxu1 %v12830_v47 }
 0x3c2   : > { %6276 = vmatpush1.bf16.msra.mxu0 %v12930_v58  ;;  %vm14161_vm2 = vcmp.le.s32.totalorder %v6581_v46, %v14158_v45 }
 0x3c3   : > { %6277 = vmatprep.subr.bf16.mxu0 %v12935_v59 }
 0x3c4   : > { %6427 = vmatpush1.bf16.msra.mxu1 %v12828_v54 }
 0x3c5   : > { %11491 = vmatprep.subr.bf16.mxu1 %v13804_v57 }
 0x3c6   : > { %6278 = vmatpush1.bf16.msra.mxu0 %v12933_v60 }
 0x3c7   : > { %6429 = vmatmul.mubr.bf16.vlgmr.msra.gmra.mrb[16].mxu1 %v14061_v16  ;;  %6279 = vmatprep.subr.bf16.mxu0 %v12938_v61 }
 0x3c8   : > { %11493 = vmatprep.mubr.msk.bf16.mxu1 %vm13805_vm0, %v13804_v57 }
 0x3ca   : > { %6280 = vmatpush1.bf16.msra.mxu0 %v12936_v63 }
 0x3cb   : > { %6281 = vmatprep.subr.bf16.mxu0 %v12941_v0 }
 0x3cd   : > { %11492 = vmatpush3.bf16.xpose.msra.mxu1 %v6588_v62 }
 0x3ce   : > { %11497 = vmatprep.subr.bf16.mxu1 %v13804_v57  ;;  %6282 = vmatpush1.bf16.msra.mxu0 %v12939_v1 }
 0x3cf   : > { %6283 = vmatprep.subr.bf16.mxu0 %v12944_v2 }
 0x3d2   : > { %6284 = vmatpush1.bf16.msra.mxu0 %v12942_v3 }
 0x3d3   : > { %6285 = vmatprep.subr.bf16.mxu0 %v12947_v26 }
 0x3d4   : > { %11494 = vmatmul.mubr.msk.bf16.vlgmr.msra.gmra.mrb[20].mxu1 %vm6583_vm1, %v14115_v39  ;;  %v12953_v39 = vld [vmem:[#allocation6 + $0x16b4] ss:$72 sps:$4 sm:$0xff]  }
 0x3d5   : > { %11499 = vmatprep.mubr.msk.bf16.mxu1 %vm13805_vm0, %v13804_v57 }
 0x3d6   : > { %6286 = vmatpush1.bf16.msra.mxu0 %v12945_v5 }
 0x3d7   : > { %6287 = vmatprep.subr.bf16.mxu0 %v12950_v7 }
 0x3da   : > { %v14144_v4 = vpop.f32.mrb[12].mxu1  ;;  %6288 = vmatpush1.bf16.msra.mxu0 %v12948_v12 }
 0x3db   : > { %v14146_v6 = vpop.f32.mrb[13].mxu1  ;;  %6289 = vmatprep.subr.bf16.mxu0 %v12953_v39 }
 0x3dc   : > { %v6188_v9 = vpop.f32.mrb[14].mxu1 }
 0x3dd   : > { %v6189_v10 = vpop.f32.mrb[15].mxu1 }
 0x3de   : > { %6290 = vmatpush1.bf16.msra.mxu0 %v12951_v13  ;;  %v6699_v10 = vpop.permute.xlu1 %6698 }
 0x3df   : > { %6291 = vmatprep.subr.bf16.mxu0 %v12956_v14  ;;  %v6704_v39 = vsel %vm6583_vm1, %v6699_v10, 0 }
 0x3e2   : > { %6292 = vmatpush1.bf16.msra.mxu0 %v12954_v15  ;;  %v6696_v13 = vpop.permute.xlu1 %6695 }
 0x3e3   : > { %6293 = vmatprep.subr.bf16.mxu0 %v12959_v17 }
 0x3e6   : > { %6294 = vmatpush1.bf16.msra.mxu0 %v12957_v18 }
 0x3e7   : > { %6295 = vmatprep.subr.bf16.mxu0 %v12962_v19 }
 0x3ea   : > { %6296 = vmatpush1.bf16.msra.mxu0 %v12960_v20 }
 0x3eb   : > { %6297 = vmatprep.subr.bf16.mxu0 %v12965_v21 }
 0x3ee   : > { %6298 = vmatpush1.bf16.msra.mxu0 %v12963_v22 }
 0x3ef   : > { %6299 = vmatprep.subr.bf16.mxu0 %v12968_v23 }
 0x3f2   : > { %6300 = vmatpush1.bf16.msra.mxu0 %v12966_v24 }
 0x3f3   : > { %6301 = vmatprep.subr.bf16.mxu0 %v12971_v25 }
 0x3f6   : > { %6302 = vmatpush1.bf16.msra.mxu0 %v12969_v29 }
 0x3f7   : > { %6303 = vmatprep.subr.bf16.mxu0 %v12974_v30 }
 0x3fa   : > { %6304 = vmatpush1.bf16.msra.mxu0 %v12972_v32 }
 0x3fd   : > { %6306 = vmatmul.mubr.bf16.vlgmr.msra.gmra.mrb[12].mxu0 %v14061_v16 }
 0x3fe   : > { %6469 = vmatprep.mubr.bf16.mxu0 %v14040_v48 }
 0x410   : > { %v14150_v33 = vpop.f32.mrb[8].mxu0 }
 0x411   : > { %v14152_v34 = vpop.f32.mrb[9].mxu0 }
 0x412   : > { %v6065_v38 = vpop.f32.mrb[10].mxu0 }
 0x413   : > { %v6066_v40 = vpop.f32.mrb[11].mxu0 }
 0x49a   : > { %v14154_v41 = vpop.f32.mrb[16].mxu1 }
 0x49b   : > { %v14156_v36 = vpop.f32.mrb[17].mxu1 }
 0x49c   : > { %v6434_v42 = vpop.f32.mrb[18].mxu1 }
 0x49d   : > { %v6435_v37 = vpop.f32.mrb[19].mxu1 }
 0x4a7   : > { %v6624_v48 = vpop.f32.mrb[20].mxu1 }
 0x4a8   : > { %v6630_v49 = vsel %vm14161_vm2, %v6624_v48, -inf  ;;  %v11495_v50 = vpop.f32.mrb[21].mxu1  ;;  %v6567_v48 = vpack.c.bf16 %v14109_v27, %v14109_v27 }
 0x4a9   : > { %v6627_v54 = vpop.f32.mrb[22].mxu1  ;;  %v6632_v55 = vsel %vm6631_vm3, %v6630_v49, -inf }
 0x4aa   : > { %6633 = vmax.xlane.f32.xlu0 %v6632_v55  ;;  %v11496_v56 = vpop.f32.mrb[23].mxu1  ;;  %v6821_v54 = vsel %vm6583_vm1, %v6567_v48, 0 }
 0x4ab   : > { %v6561_v56 = vpack.c.bf16 %v14081_v31, %v14081_v31 }
 0x4d0   : > { %v6307_v58 = vpop.f32.mrb[12].mxu0 }
 0x4d1   : > { %v6572_v59 = vpack.c.bf16 %v6307_v58, %v6307_v58  ;;  %v14168_v60 = vpop.f32.mrb[13].mxu0 }
 0x4d2   : > { %v6311_v61 = vpop.f32.mrb[14].mxu0  ;;  %v6573_v55 = vpack.c.bf16 %v14168_v60, %v14168_v60 }
 0x4d3   : > { %v6649_v62 = vsel %vm6647_vm4, %v6572_v59, 0  ;;  %v6312_v63 = vpop.f32.mrb[15].mxu0 }
 0x4d4   : > { %11498 = vmatpush3.bf16.msra.mxu1 %v6649_v62  ;;  %v6880_v27 = vsel %vm6647_vm4, %v6573_v55, 0 }
 0x4d5   : > { %11503 = vmatprep.subr.bf16.mxu1 %v13804_v57 }
 0x537   : > { %v6634_v0 = vpop.xlane.xlu0 %6633 }
 0x538   : > { %v6635_v1 = vsub.f32 %v6630_v49, %v6634_v0 }
 0x53a   : > { %v6636_v2 = vmul.f32 1.442695, %v6635_v1 }
 0x53c   : > { %13557 = vpow2.f32 %v6636_v2 }
 0x546   : > { %v13558_v3 = vpop.eup %13557 }
 0x547   : > { %v6638_v26 = vsel %vm6631_vm3, %v13558_v3, 0.0 }
 0x548   : > { %6639 = vadd.xlane.f32.xlu0 %v6638_v26 }
 0x5d5   : > { %v6640_v5 = vpop.xlane.xlu0 %6639 }
 0x5d6   : > { %13559 = vrcp.f32 %v6640_v5 }
 0x5e0   : > { %v13560_v7 = vpop.eup %13559 }
 0x5e1   : > { %v6642_v9 = vmul.f32 %v13560_v7, %v13558_v3 }
 0x5e3   : > { %v6643_v12 = vpack.c.bf16 %v6642_v9, %v6642_v9 }
 0x5e5   : > { %11500 = vmatmul.mubr.msk.bf16.vlgmr.msra.gmra.mrb[24].mxu1 %vm6631_vm3, %v6643_v12 }
 0x5e6   : > { %11504 = vmatpush3.bf16.xpose.msra.mxu1 %v6704_v39  ;;  %11505 = vmatprep.mubr.msk.bf16.mxu1 %vm13805_vm0, %v13804_v57 }
 0x5e7   : > { %11509 = vmatprep.subr.bf16.mxu1 %v13804_v57 }
 0x5ed   : > { %11506 = vmatmul.mubr.msk.bf16.vlgmr.msra.gmra.mrb[28].mxu1 %vm6583_vm1, %v6696_v13 }
 0x5ee   : > { %11511 = vmatprep.mubr.msk.bf16.mxu1 %vm13805_vm0, %v13804_v57 }
 0x6b8   : > { %v6685_v14 = vpop.f32.mrb[24].mxu1 }
 0x6b9   : > { %v6691_v15 = vpack.c.bf16 %v6685_v14, %v6685_v14  ;;  %v11501_v17 = vpop.f32.mrb[25].mxu1 }
 0x6ba   : > { %v6688_v18 = vpop.f32.mrb[26].mxu1 }
 0x6bb   : > { %6693 = vst.msk [vmem:[#allocation2] sm:$0xf] %vm6692_vm5, %v6691_v15  ;;  %v11502_v19 = vpop.f32.mrb[27].mxu1 }
 0x6c0   : > { %v6740_v20 = vpop.f32.mrb[28].mxu1 }
 0x6c1   : > { %v6746_v21 = vsel %vm14161_vm2, %v6740_v20, -inf  ;;  %v11507_v22 = vpop.f32.mrb[29].mxu1 }
 0x6c2   : > { %v6743_v23 = vpop.f32.mrb[30].mxu1  ;;  %v6747_v24 = vsel %vm6631_vm3, %v6746_v21, -inf }
 0x6c3   : > { %6748 = vmax.xlane.f32.xlu0 %v6747_v24  ;;  %v11508_v25 = vpop.f32.mrb[31].mxu1 }
 0x6d9   : > { %6760 = vrot.lane.b32.xlu0 %v6572_v59, %s13803_s21 }
 0x750   : > { %v6749_v29 = vpop.xlane.xlu0 %6748 }
 0x751   : > { %v6750_v30 = vsub.f32 %v6746_v21, %v6749_v29 }
 0x753   : > { %v6751_v32 = vmul.f32 1.442695, %v6750_v30 }
 0x754   : > { %v6761_v38 = vpop.permute.xlu0 %6760 }
 0x755   : > { %13561 = vpow2.f32 %v6751_v32  ;;  %v6766_v40 = vsel %vm6647_vm4, %v6761_v38, 0 }
 0x756   : > { %11510 = vmatpush3.bf16.msra.mxu1 %v6766_v40 }
 0x757   : > { %11515 = vmatprep.subr.bf16.mxu1 %v13804_v57 }
 0x75f   : > { %v13562_v42 = vpop.eup %13561 }
 0x760   : > { %v6753_v37 = vsel %vm6631_vm3, %v13562_v42, 0.0 }
 0x761   : > { %6754 = vadd.xlane.f32.xlu1 %v6753_v37 }
 0x7ee   : > { %v6755_v44 = vpop.xlane.xlu1 %6754 }
 0x7ef   : > { %13563 = vrcp.f32 %v6755_v44 }
 0x7f9   : > { %v13564_v46 = vpop.eup %13563 }
 0x7fa   : > { %v6757_v49 = vmul.f32 %v13564_v46, %v13562_v42 }
 0x7fc   : > { %v6758_v50 = vpack.c.bf16 %v6757_v49, %v6757_v49 }
 0x7fe   : > { %11512 = vmatmul.mubr.msk.bf16.vlgmr.msra.gmra.mrb[32].mxu1 %vm6631_vm3, %v6758_v50 }
 0x7ff   : > { %11516 = vmatpush3.bf16.xpose.msra.mxu1 %v6821_v54  ;;  %11517 = vmatprep.mubr.msk.bf16.mxu1 %vm13805_vm0, %v13804_v57  ;;  %v6568_v54 = vpack.c.bf16 %v14150_v33, %v14150_v33 }
 0x800   : > { %11521 = vmatprep.subr.bf16.mxu1 %v13804_v57 }
 0x806   : > { %11518 = vmatmul.mubr.msk.bf16.vlgmr.msra.gmra.mrb[36].mxu1 %vm6583_vm1, %v6561_v56 }
 0x807   : > { %11522 = vmatpush3.bf16.msra.mxu1 %v6880_v27  ;;  %11523 = vmatprep.mubr.msk.bf16.mxu1 %vm13805_vm0, %v13804_v57  ;;  %v7050_v27 = vsel %vm6583_vm1, %v6568_v54, 0 }
 0x808   : > { %11527 = vmatprep.subr.bf16.mxu1 %v13804_v57 }
 0x8d1   : > { %v14205_v58 = vpop.f32.mrb[32].mxu1 }
 0x8d2   : > { %v11513_v59 = vpop.f32.mrb[33].mxu1 }
 0x8d3   : > { %v6805_v61 = vpop.f32.mrb[34].mxu1  ;;  %v6574_v59 = vpack.c.bf16 %v14154_v41, %v14154_v41 }
 0x8d4   : > { %v11514_v62 = vpop.f32.mrb[35].mxu1  ;;  %v6562_v61 = vpack.c.bf16 %v14091_v51, %v14091_v51 }
 0x8d5   : > { %v7109_v33 = vsel %vm6647_vm4, %v6574_v59, 0 }
 0x8d9   : > { %v6857_v63 = vpop.f32.mrb[36].mxu1 }
 0x8da   : > { %v6863_v60 = vsel %vm14161_vm2, %v6857_v63, -inf  ;;  %v11519_v31 = vpop.f32.mrb[37].mxu1 }
 0x8db   : > { %v6860_v0 = vpop.f32.mrb[38].mxu1  ;;  %v6864_v1 = vsel %vm6631_vm3, %v6863_v60, -inf }
 0x8dc   : > { %6865 = vmax.xlane.f32.xlu0 %v6864_v1  ;;  %v11520_v2 = vpop.f32.mrb[39].mxu1 }
 0x8f2   : > { %6925 = vrot.lane.b32.xlu0 %v6561_v56, %s13803_s21 }
 0x969   : > { %v6866_v3 = vpop.xlane.xlu0 %6865 }
 0x96a   : > { %v6867_v26 = vsub.f32 %v6863_v60, %v6866_v3 }
 0x96c   : > { %v6868_v5 = vmul.f32 1.442695, %v6867_v26 }
 0x96d   : > { %v6926_v17 = vpop.permute.xlu0 %6925 }
 0x96e   : > { %13565 = vpow2.f32 %v6868_v5 }
 0x978   : > { %v13566_v7 = vpop.eup %13565 }
 0x979   : > { %v6870_v9 = vsel %vm6631_vm3, %v13566_v7, 0.0 }
 0x97a   : > { %6871 = vadd.xlane.f32.xlu1 %v6870_v9 }
 0x98b   : > { %6928 = vrot.lane.b32.xlu1 %v6567_v48, %s13803_s21 }
 0xa07   : > { %v6872_v10 = vpop.xlane.xlu1 %6871 }
 0xa08   : > { %13567 = vrcp.f32 %v6872_v10 }
 0xa0b   : > { %v6929_v13 = vpop.permute.xlu1 %6928 }
 0xa0c   : > { %v6934_v15 = vsel %vm6583_vm1, %v6929_v13, 0 }
 0xa12   : > { %v13568_v12 = vpop.eup %13567 }
 0xa13   : > { %v6874_v39 = vmul.f32 %v13568_v12, %v13566_v7 }
 0xa15   : > { %v6875_v14 = vpack.c.bf16 %v6874_v39, %v6874_v39 }
 0xa17   : > { %11524 = vmatmul.mubr.msk.bf16.vlgmr.msra.gmra.mrb[40].mxu1 %vm6631_vm3, %v6875_v14 }
 0xa18   : > { %11528 = vmatpush3.bf16.xpose.msra.mxu1 %v6934_v15  ;;  %11529 = vmatprep.mubr.msk.bf16.mxu1 %vm13805_vm0, %v13804_v57 }
 0xa19   : > { %11533 = vmatprep.subr.bf16.mxu1 %v13804_v57 }
 0xa1f   : > { %11530 = vmatmul.mubr.msk.bf16.vlgmr.msra.gmra.mrb[44].mxu1 %vm6583_vm1, %v6926_v17 }
 0xa20   : > { %11535 = vmatprep.mubr.msk.bf16.mxu1 %vm13805_vm0, %v13804_v57 }
 0xaea   : > { %v6916_v18 = vpop.f32.mrb[40].mxu1 }
 0xaeb   : > { %v6922_v19 = vpack.c.bf16 %v6916_v18, %v6916_v18  ;;  %v11525_v20 = vpop.f32.mrb[41].mxu1 }
 0xaec   : > { %v6919_v21 = vpop.f32.mrb[42].mxu1 }
 0xaed   : > { %6923 = vst.msk [vmem:[#allocation2 + $0x4] sm:$0xf] %vm6692_vm5, %v6922_v19  ;;  %v11526_v22 = vpop.f32.mrb[43].mxu1 }
 0xaf2   : > { %v6970_v23 = vpop.f32.mrb[44].mxu1 }
 0xaf3   : > { %v6976_v24 = vsel %vm14161_vm2, %v6970_v23, -inf  ;;  %v11531_v25 = vpop.f32.mrb[45].mxu1 }
 0xaf4   : > { %v6973_v29 = vpop.f32.mrb[46].mxu1  ;;  %v6977_v30 = vsel %vm6631_vm3, %v6976_v24, -inf }
 0xaf5   : > { %6978 = vmax.xlane.f32.xlu1 %v6977_v30  ;;  %v11532_v32 = vpop.f32.mrb[47].mxu1 }
 0xb06   : > { %6990 = vrot.lane.b32.xlu1 %v6573_v55, %s13803_s21 }
 0xb82   : > { %v6979_v38 = vpop.xlane.xlu1 %6978 }
 0xb83   : > { %v6980_v40 = vsub.f32 %v6976_v24, %v6979_v38 }
 0xb85   : > { %v6981_v42 = vmul.f32 1.442695, %v6980_v40 }
 0xb86   : > { %v6991_v37 = vpop.permute.xlu1 %6990 }
 0xb87   : > { %13569 = vpow2.f32 %v6981_v42  ;;  %v6996_v44 = vsel %vm6647_vm4, %v6991_v37, 0 }
 0xb88   : > { %11534 = vmatpush3.bf16.msra.mxu1 %v6996_v44 }
 0xb89   : > { %11539 = vmatprep.subr.bf16.mxu1 %v13804_v57 }
 0xb91   : > { %v13570_v46 = vpop.eup %13569 }
 0xb92   : > { %v6983_v48 = vsel %vm6631_vm3, %v13570_v46, 0.0 }
 0xb93   : > { %6984 = vadd.xlane.f32.xlu0 %v6983_v48 }
 0xc20   : > { %v6985_v49 = vpop.xlane.xlu0 %6984 }
 0xc21   : > { %13571 = vrcp.f32 %v6985_v49 }
 0xc2b   : > { %v13572_v50 = vpop.eup %13571 }
 0xc2c   : > { %v6987_v55 = vmul.f32 %v13572_v50, %v13570_v46 }
 0xc2e   : > { %v6988_v56 = vpack.c.bf16 %v6987_v55, %v6987_v55  ;;  %v6569_v55 = vpack.c.bf16 %v14152_v34, %v14152_v34 }
 0xc30   : > { %11536 = vmatmul.mubr.msk.bf16.vlgmr.msra.gmra.mrb[48].mxu1 %vm6631_vm3, %v6988_v56 }
 0xc31   : > { %11540 = vmatpush3.bf16.xpose.msra.mxu1 %v7050_v27  ;;  %11541 = vmatprep.mubr.msk.bf16.mxu1 %vm13805_vm0, %v13804_v57 }
 0xc32   : > { %11545 = vmatprep.subr.bf16.mxu1 %v13804_v57 }
 0xc38   : > { %11542 = vmatmul.mubr.msk.bf16.vlgmr.msra.gmra.mrb[52].mxu1 %vm6583_vm1, %v6562_v61 }
 0xc39   : > { %11546 = vmatpush3.bf16.msra.mxu1 %v7109_v33  ;;  %11547 = vmatprep.mubr.msk.bf16.mxu1 %vm13805_vm0, %v13804_v57  ;;  %v6563_v33 = vpack.c.bf16 %v14093_v53, %v14093_v53 }
 0xc3a   : > { %11551 = vmatprep.subr.bf16.mxu1 %v13804_v57 }
 0xd03   : > { %v14245_v62 = vpop.f32.mrb[48].mxu1 }
 0xd04   : > { %v11537_v63 = vpop.f32.mrb[49].mxu1 }
 0xd05   : > { %v7035_v60 = vpop.f32.mrb[50].mxu1 }
 0xd06   : > { %v11538_v31 = vpop.f32.mrb[51].mxu1 }
 0xd0b   : > { %v7086_v0 = vpop.f32.mrb[52].mxu1 }
 0xd0c   : > { %v7092_v41 = vsel %vm14161_vm2, %v7086_v0, -inf  ;;  %v11543_v51 = vpop.f32.mrb[53].mxu1 }
 0xd0d   : > { %v7089_v1 = vpop.f32.mrb[54].mxu1  ;;  %v7093_v2 = vsel %vm6631_vm3, %v7092_v41, -inf }
 0xd0e   : > { %7094 = vmax.xlane.f32.xlu0 %v7093_v2  ;;  %v11544_v3 = vpop.f32.mrb[55].mxu1 }
 0xd24   : > { %7157 = vrot.lane.b32.xlu0 %v6568_v54, %s13803_s21 }
 0xd28   : > { %7154 = vrot.lane.b32.xlu0 %v6562_v61, %s13803_s21  ;;  %v7279_v61 = vsel %vm6583_vm1, %v6569_v55, 0 }
 0xd9b   : > { %v7095_v26 = vpop.xlane.xlu0 %7094 }
 0xd9c   : > { %v7096_v5 = vsub.f32 %v7092_v41, %v7095_v26 }
 0xd9e   : > { %v7097_v7 = vmul.f32 1.442695, %v7096_v5 }
 0xd9f   : > { %v7158_v14 = vpop.permute.xlu0 %7157 }
 0xda0   : > { %13573 = vpow2.f32 %v7097_v7  ;;  %v7163_v17 = vsel %vm6583_vm1, %v7158_v14, 0 }
 0xda3   : > { %v7155_v18 = vpop.permute.xlu0 %7154 }
 0xdaa   : > { %v13574_v9 = vpop.eup %13573 }
 0xdab   : > { %v7099_v10 = vsel %vm6631_vm3, %v13574_v9, 0.0 }
 0xdac   : > { %7100 = vadd.xlane.f32.xlu1 %v7099_v10 }
 0xe39   : > { %v7101_v12 = vpop.xlane.xlu1 %7100 }
 0xe3a   : > { %13575 = vrcp.f32 %v7101_v12 }
 0xe44   : > { %v13576_v39 = vpop.eup %13575 }
 0xe45   : > { %v7103_v13 = vmul.f32 %v13576_v39, %v13574_v9 }
 0xe47   : > { %v7104_v15 = vpack.c.bf16 %v7103_v13, %v7103_v13 }
 0xe49   : > { %11548 = vmatmul.mubr.msk.bf16.vlgmr.msra.gmra.mrb[56].mxu1 %vm6631_vm3, %v7104_v15 }
 0xe4a   : > { %11552 = vmatpush3.bf16.xpose.msra.mxu1 %v7163_v17  ;;  %11553 = vmatprep.mubr.msk.bf16.mxu1 %vm13805_vm0, %v13804_v57 }
 0xe4b   : > { %11557 = vmatprep.subr.bf16.mxu1 %v13804_v57 }
 0xe51   : > { %11554 = vmatmul.mubr.msk.bf16.vlgmr.msra.gmra.mrb[60].mxu1 %vm6583_vm1, %v7155_v18 }
 0xe52   : > { %11559 = vmatprep.mubr.msk.bf16.mxu1 %vm13805_vm0, %v13804_v57 }
 0xf1c   : > { %v7145_v19 = vpop.f32.mrb[56].mxu1 }
 0xf1d   : > { %v7151_v20 = vpack.c.bf16 %v7145_v19, %v7145_v19  ;;  %v11549_v21 = vpop.f32.mrb[57].mxu1 }
 0xf1e   : > { %v7148_v22 = vpop.f32.mrb[58].mxu1 }
 0xf1f   : > { %7152 = vst.msk [vmem:[#allocation2 + $0x8] sm:$0xf] %vm6692_vm5, %v7151_v20  ;;  %v11550_v23 = vpop.f32.mrb[59].mxu1 }
 0xf24   : > { %v7199_v24 = vpop.f32.mrb[60].mxu1 }
 0xf25   : > { %v7205_v25 = vsel %vm14161_vm2, %v7199_v24, -inf  ;;  %v11555_v29 = vpop.f32.mrb[61].mxu1 }
 0xf26   : > { %v7202_v30 = vpop.f32.mrb[62].mxu1  ;;  %v7206_v32 = vsel %vm6631_vm3, %v7205_v25, -inf }
 0xf27   : > { %7207 = vmax.xlane.f32.xlu0 %v7206_v32  ;;  %v11556_v38 = vpop.f32.mrb[63].mxu1 }
 0xfb4   : > { %v7208_v40 = vpop.xlane.xlu0 %7207 }
 0xfb5   : > { %v7209_v42 = vsub.f32 %v7205_v25, %v7208_v40 }
 0xfb7   : > { %v7210_v37 = vmul.f32 1.442695, %v7209_v42 }
 0xfb9   : > { %13577 = vpow2.f32 %v7210_v37 }
 0xfc3   : > { %v13578_v44 = vpop.eup %13577 }
 0xfc4   : > { %v7212_v46 = vsel %vm6631_vm3, %v13578_v44, 0.0 }
 0xfc5   : > { %7213 = vadd.xlane.f32.xlu1 %v7212_v46  ;;  %v12977_v46 = vld [vmem:[#allocation6 + $0x44] ss:$72 sps:$4 sm:$0xff]  }
 0xfc6   : > { %6437 = vmatprep.subr.bf16.mxu0 %v12977_v46  ;;  %v13052_v46 = vld [vmem:[#allocation6 + $0xe54] ss:$72 sps:$4 sm:$0xff]  }
 0xfd6   : > { %7219 = vrot.lane.b32.xlu1 %v6574_v59, %s13803_s21  ;;  %v6575_v59 = vpack.c.bf16 %v14156_v36, %v14156_v36 }
 0xfd8   : > { %v7338_v34 = vsel %vm6647_vm4, %v6575_v59, 0 }
0x1052   : > { %v7214_v48 = vpop.xlane.xlu1 %7213 }
0x1053   : > { %13579 = vrcp.f32 %v7214_v48  ;;  %v12975_v48 = vld [vmem:[#allocation6 + $0x40] ss:$72 sps:$4 sm:$0xff]  }
0x1054   : > { %6438 = vmatpush1.bf16.msra.mxu0 %v12975_v48  ;;  %v13050_v48 = vld [vmem:[#allocation6 + $0xe50] ss:$72 sps:$4 sm:$0xff]  }
0x1056   : > { %v7220_v49 = vpop.permute.xlu1 %7219 }
0x1057   : > { %v7225_v50 = vsel %vm6647_vm4, %v7220_v49, 0  ;;  %v12980_v49 = vld [vmem:[#allocation6 + $0xd4] ss:$72 sps:$4 sm:$0xff]  }
0x1058   : > { %11558 = vmatpush3.bf16.msra.mxu1 %v7225_v50  ;;  %v12978_v50 = vld [vmem:[#allocation6 + $0xd0] ss:$72 sps:$4 sm:$0xff]   ;;  %6439 = vmatprep.subr.bf16.mxu0 %v12980_v49  ;;  %v13055_v49 = vld [vmem:[#allocation6 + $0xee4] ss:$72 sps:$4 sm:$0xff]  }
0x1059   : > { %11563 = vmatprep.subr.bf16.mxu1 %v13804_v57  ;;  %6440 = vmatpush1.bf16.msra.mxu0 %v12978_v50  ;;  %v13053_v50 = vld [vmem:[#allocation6 + $0xee0] ss:$72 sps:$4 sm:$0xff]  }
0x105d   : > { %v13580_v54 = vpop.eup %13579 }
0x105e   : > { %v7216_v56 = vmul.f32 %v13580_v54, %v13578_v44  ;;  %v12983_v54 = vld [vmem:[#allocation6 + $0x164] ss:$72 sps:$4 sm:$0xff]  }
0x105f   : > { %6441 = vmatprep.subr.bf16.mxu0 %v12983_v54  ;;  %v13058_v54 = vld [vmem:[#allocation6 + $0xf74] ss:$72 sps:$4 sm:$0xff]  }
0x1060   : > { %v7217_v27 = vpack.c.bf16 %v7216_v56, %v7216_v56  ;;  %v12986_v56 = vld [vmem:[#allocation6 + $0x1f4] ss:$72 sps:$4 sm:$0xff]  }
0x1062   : > { %11560 = vmatmul.mubr.msk.bf16.vlgmr.msra.gmra.mrb[64].mxu1 %vm6631_vm3, %v7217_v27  ;;  %v12984_v27 = vld [vmem:[#allocation6 + $0x1f0] ss:$72 sps:$4 sm:$0xff]  }
0x1063   : > { %11564 = vmatpush3.bf16.xpose.msra.mxu1 %v7279_v61  ;;  %11565 = vmatprep.mubr.msk.bf16.mxu1 %vm13805_vm0, %v13804_v57  ;;  %v12989_v61 = vld [vmem:[#allocation6 + $0x284] ss:$72 sps:$4 sm:$0xff]  }
0x1064   : > { %11569 = vmatprep.subr.bf16.mxu1 %v13804_v57 }
0x106a   : > { %11566 = vmatmul.mubr.msk.bf16.vlgmr.msra.gmra.mrb[68].mxu1 %vm6583_vm1, %v6563_v33 }
0x106b   : > { %11570 = vmatpush3.bf16.msra.mxu1 %v7338_v34  ;;  %11571 = vmatprep.mubr.msk.bf16.mxu1 %vm13805_vm0, %v13804_v57  ;;  %v12990_v34 = vld [vmem:[#allocation6 + $0x310] ss:$72 sps:$4 sm:$0xff]  }
0x106c   : > { %11575 = vmatprep.subr.bf16.mxu1 %v13804_v57 }
0x1135   : > { %v14285_v63 = vpop.f32.mrb[64].mxu1 }
0x1136   : > { %v11561_v60 = vpop.f32.mrb[65].mxu1 }
0x1137   : > { %v7264_v31 = vpop.f32.mrb[66].mxu1  ;;  %v12995_v60 = vld [vmem:[#allocation6 + $0x3a4] ss:$72 sps:$4 sm:$0xff]  }
0x1138   : > { %v11562_v0 = vpop.f32.mrb[67].mxu1  ;;  %v12993_v31 = vld [vmem:[#allocation6 + $0x3a0] ss:$72 sps:$4 sm:$0xff]  }
0x1139   : > { %v12998_v0 = vld [vmem:[#allocation6 + $0x434] ss:$72 sps:$4 sm:$0xff]  }
0x113d   : > { %v7315_v41 = vpop.f32.mrb[68].mxu1 }
0x113e   : > { %v7321_v36 = vsel %vm14161_vm2, %v7315_v41, -inf  ;;  %v11567_v53 = vpop.f32.mrb[69].mxu1  ;;  %v12996_v41 = vld [vmem:[#allocation6 + $0x430] ss:$72 sps:$4 sm:$0xff]  }
0x113f   : > { %v7318_v51 = vpop.f32.mrb[70].mxu1  ;;  %v7322_v1 = vsel %vm6631_vm3, %v7321_v36, -inf  ;;  %v12999_v53 = vld [vmem:[#allocation6 + $0x4c0] ss:$72 sps:$4 sm:$0xff]  }
0x1140   : > { %7323 = vmax.xlane.f32.xlu1 %v7322_v1  ;;  %v11568_v2 = vpop.f32.mrb[71].mxu1  ;;  %v13004_v51 = vld [vmem:[#allocation6 + $0x554] ss:$72 sps:$4 sm:$0xff]   ;;  %v13002_v1 = vld [vmem:[#allocation6 + $0x550] ss:$72 sps:$4 sm:$0xff]  }
0x1141   : > { %v13007_v2 = vld [vmem:[#allocation6 + $0x5e4] ss:$72 sps:$4 sm:$0xff]  }
0x11cd   : > { %v7324_v3 = vpop.xlane.xlu1 %7323 }
0x11ce   : > { %v7325_v26 = vsub.f32 %v7321_v36, %v7324_v3  ;;  %v13001_v36 = vld [vmem:[#allocation6 + $0x4c4] ss:$72 sps:$4 sm:$0xff]   ;;  %v13005_v3 = vld [vmem:[#allocation6 + $0x5e0] ss:$72 sps:$4 sm:$0xff]  }
0x11d0   : > { %v7326_v5 = vmul.f32 1.442695, %v7325_v26  ;;  %v13010_v26 = vld [vmem:[#allocation6 + $0x674] ss:$72 sps:$4 sm:$0xff]  }
0x11d2   : > { %13581 = vpow2.f32 %v7326_v5  ;;  %v13008_v5 = vld [vmem:[#allocation6 + $0x670] ss:$72 sps:$4 sm:$0xff]  }
0x11dc   : > { %v13582_v7 = vpop.eup %13581 }
0x11dd   : > { %v7328_v9 = vsel %vm6631_vm3, %v13582_v7, 0.0 }
0x11de   : > { %7329 = vadd.xlane.f32.xlu0 %v7328_v9  ;;  %v13011_v9 = vld [vmem:[#allocation6 + $0x700] ss:$72 sps:$4 sm:$0xff]  }
0x11f4   : > { %7386 = vrot.lane.b32.xlu0 %v6569_v55, %s13803_s21  ;;  %v12981_v55 = vld [vmem:[#allocation6 + $0x160] ss:$72 sps:$4 sm:$0xff]  }
0x11f5   : > { %6442 = vmatpush1.bf16.msra.mxu0 %v12981_v55  ;;  %v13056_v55 = vld [vmem:[#allocation6 + $0xf70] ss:$72 sps:$4 sm:$0xff]  }
0x11f6   : > { %6443 = vmatprep.subr.bf16.mxu0 %v12986_v56  ;;  %v13061_v56 = vld [vmem:[#allocation6 + $0x1004] ss:$72 sps:$4 sm:$0xff]  }
0x11f8   : > { %7383 = vrot.lane.b32.xlu0 %v6563_v33, %s13803_s21  ;;  %v12987_v33 = vld [vmem:[#allocation6 + $0x280] ss:$72 sps:$4 sm:$0xff]  }
0x11f9   : > { %6444 = vmatpush1.bf16.msra.mxu0 %v12984_v27  ;;  %v13059_v27 = vld [vmem:[#allocation6 + $0x1000] ss:$72 sps:$4 sm:$0xff]  }
0x11fa   : > { %6445 = vmatprep.subr.bf16.mxu0 %v12989_v61  ;;  %v13064_v61 = vld [vmem:[#allocation6 + $0x1094] ss:$72 sps:$4 sm:$0xff]  }
0x11fd   : > { %6446 = vmatpush1.bf16.msra.mxu0 %v12987_v33  ;;  %v13062_v33 = vld [vmem:[#allocation6 + $0x1090] ss:$72 sps:$4 sm:$0xff]  }
0x126b   : > { %v7330_v10 = vpop.xlane.xlu0 %7329 }
0x126c   : > { %13583 = vrcp.f32 %v7330_v10  ;;  %v13016_v10 = vld [vmem:[#allocation6 + $0x794] ss:$72 sps:$4 sm:$0xff]  }
0x126f   : > { %v7387_v13 = vpop.permute.xlu0 %7386 }
0x1270   : > { %v7392_v15 = vsel %vm6583_vm1, %v7387_v13, 0  ;;  %v13017_v13 = vld [vmem:[#allocation6 + $0x820] ss:$72 sps:$4 sm:$0xff]  }
0x1273   : > { %v7384_v17 = vpop.permute.xlu0 %7383 }
0x1276   : > { %v13584_v12 = vpop.eup %13583 }
0x1277   : > { %v7332_v39 = vmul.f32 %v13584_v12, %v13582_v7  ;;  %v13013_v7 = vld [vmem:[#allocation6 + $0x704] ss:$72 sps:$4 sm:$0xff]   ;;  %v13014_v12 = vld [vmem:[#allocation6 + $0x790] ss:$72 sps:$4 sm:$0xff]  }
0x1279   : > { %v7333_v14 = vpack.c.bf16 %v7332_v39, %v7332_v39  ;;  %v13019_v39 = vld [vmem:[#allocation6 + $0x824] ss:$72 sps:$4 sm:$0xff]  }
0x127b   : > { %11572 = vmatmul.mubr.msk.bf16.vlgmr.msra.gmra.mrb[72].mxu1 %vm6631_vm3, %v7333_v14  ;;  %v13022_v14 = vld [vmem:[#allocation6 + $0x8b4] ss:$72 sps:$4 sm:$0xff]  }
0x127c   : > { %11576 = vmatpush3.bf16.xpose.msra.mxu1 %v7392_v15  ;;  %11577 = vmatprep.mubr.msk.bf16.mxu1 %vm13805_vm0, %v13804_v57  ;;  %v13020_v15 = vld [vmem:[#allocation6 + $0x8b0] ss:$72 sps:$4 sm:$0xff]  }
0x127d   : > { %11581 = vmatprep.subr.bf16.mxu1 %v13804_v57 }
0x1283   : > { %11578 = vmatmul.mubr.msk.bf16.vlgmr.msra.gmra.mrb[76].mxu1 %vm6583_vm1, %v7384_v17  ;;  %v13025_v17 = vld [vmem:[#allocation6 + $0x944] ss:$72 sps:$4 sm:$0xff]  }
0x1284   : > { %11583 = vmatprep.mubr.msk.bf16.mxu1 %vm13805_vm0, %v13804_v57 }
0x134e   : > { %v7374_v18 = vpop.f32.mrb[72].mxu1 }
0x134f   : > { %v7380_v19 = vpack.c.bf16 %v7374_v18, %v7374_v18  ;;  %v11573_v20 = vpop.f32.mrb[73].mxu1  ;;  %v13023_v18 = vld [vmem:[#allocation6 + $0x940] ss:$72 sps:$4 sm:$0xff]  }
0x1350   : > { %v7377_v21 = vpop.f32.mrb[74].mxu1  ;;  %v13026_v20 = vld [vmem:[#allocation6 + $0x9d0] ss:$72 sps:$4 sm:$0xff]  }
0x1351   : > { %7381 = vst.msk [vmem:[#allocation2 + $0xc] sm:$0xf] %vm6692_vm5, %v7380_v19  ;;  %v11574_v22 = vpop.f32.mrb[75].mxu1  ;;  %v13028_v19 = vld [vmem:[#allocation6 + $0x9d4] ss:$72 sps:$4 sm:$0xff]  }
0x1352   : > { %v13031_v21 = vld [vmem:[#allocation6 + $0xa64] ss:$72 sps:$4 sm:$0xff]   ;;  %v13029_v22 = vld [vmem:[#allocation6 + $0xa60] ss:$72 sps:$4 sm:$0xff]  }
0x1356   : > { %v7428_v23 = vpop.f32.mrb[76].mxu1 }
0x1357   : > { %v7434_v24 = vsel %vm14161_vm2, %v7428_v23, -inf  ;;  %v11579_v25 = vpop.f32.mrb[77].mxu1  ;;  %v13034_v23 = vld [vmem:[#allocation6 + $0xaf4] ss:$72 sps:$4 sm:$0xff]  }
0x1358   : > { %v7431_v29 = vpop.f32.mrb[78].mxu1  ;;  %v7435_v30 = vsel %vm6631_vm3, %v7434_v24, -inf  ;;  %v13037_v25 = vld [vmem:[#allocation6 + $0xb84] ss:$72 sps:$4 sm:$0xff]  }
0x1359   : > { %7436 = vmax.xlane.f32.xlu0 %v7435_v30  ;;  %v11580_v32 = vpop.f32.mrb[79].mxu1  ;;  %v13035_v29 = vld [vmem:[#allocation6 + $0xb80] ss:$72 sps:$4 sm:$0xff]   ;;  %v13040_v30 = vld [vmem:[#allocation6 + $0xc14] ss:$72 sps:$4 sm:$0xff]  }
0x135a   : > { %v13043_v32 = vld [vmem:[#allocation6 + $0xca4] ss:$72 sps:$4 sm:$0xff]  }
0x13e6   : > { %v7437_v38 = vpop.xlane.xlu0 %7436 }
0x13e7   : > { %v7438_v40 = vsub.f32 %v7434_v24, %v7437_v38  ;;  %v13032_v24 = vld [vmem:[#allocation6 + $0xaf0] ss:$72 sps:$4 sm:$0xff]   ;;  %v13046_v38 = vld [vmem:[#allocation6 + $0xd34] ss:$72 sps:$4 sm:$0xff]  }
0x13e9   : > { %v7439_v42 = vmul.f32 1.442695, %v7438_v40  ;;  %v13044_v40 = vld [vmem:[#allocation6 + $0xd30] ss:$72 sps:$4 sm:$0xff]  }
0x13eb   : > { %13585 = vpow2.f32 %v7439_v42  ;;  %v13049_v42 = vld [vmem:[#allocation6 + $0xdc4] ss:$72 sps:$4 sm:$0xff]  }
0x13f5   : > { %v14305_v37 = vpop.eup %13585 }
0x13f6   : > { %v7441_v44 = vsel %vm6631_vm3, %v14305_v37, 0.0 }
0x13f7   : > { %7442 = vadd.xlane.f32.xlu1 %v7441_v44  ;;  %v13047_v44 = vld [vmem:[#allocation6 + $0xdc0] ss:$72 sps:$4 sm:$0xff]  }
0x1408   : > { %7448 = vrot.lane.b32.xlu1 %v6575_v59, %s13803_s21  ;;  %v12992_v59 = vld [vmem:[#allocation6 + $0x314] ss:$72 sps:$4 sm:$0xff]  }
0x1409   : > { %6447 = vmatprep.subr.bf16.mxu0 %v12992_v59  ;;  %v13067_v59 = vld [vmem:[#allocation6 + $0x1124] ss:$72 sps:$4 sm:$0xff]  }
0x140a   : > { %6448 = vmatpush1.bf16.msra.mxu0 %v12990_v34  ;;  %v13065_v34 = vld [vmem:[#allocation6 + $0x1120] ss:$72 sps:$4 sm:$0xff]  }
0x140b   : > { %6449 = vmatprep.subr.bf16.mxu0 %v12995_v60  ;;  %v13070_v60 = vld [vmem:[#allocation6 + $0x11b4] ss:$72 sps:$4 sm:$0xff]  }
0x140e   : > { %6450 = vmatpush1.bf16.msra.mxu0 %v12993_v31 }
0x140f   : > { %6451 = vmatprep.subr.bf16.mxu0 %v12998_v0  ;;  %v13068_v0 = vld [vmem:[#allocation6 + $0x11b0] ss:$72 sps:$4 sm:$0xff]  }
0x1412   : > { %6452 = vmatpush1.bf16.msra.mxu0 %v12996_v41  ;;  %v13073_v41 = vld [vmem:[#allocation6 + $0x1244] ss:$72 sps:$4 sm:$0xff]  }
0x1413   : > { %6453 = vmatprep.subr.bf16.mxu0 %v13001_v36 }
0x1416   : > { %6454 = vmatpush1.bf16.msra.mxu0 %v12999_v53 }
0x1417   : > { %6455 = vmatprep.subr.bf16.mxu0 %v13004_v51  ;;  %v13071_v51 = vld [vmem:[#allocation6 + $0x1240] ss:$72 sps:$4 sm:$0xff]  }
0x141a   : > { %6456 = vmatpush1.bf16.msra.mxu0 %v13002_v1  ;;  %v13076_v1 = vld [vmem:[#allocation6 + $0x12d4] ss:$72 sps:$4 sm:$0xff]  }
0x141b   : > { %6457 = vmatprep.subr.bf16.mxu0 %v13007_v2  ;;  %v13074_v2 = vld [vmem:[#allocation6 + $0x12d0] ss:$72 sps:$4 sm:$0xff]  }
0x141e   : > { %6458 = vmatpush1.bf16.msra.mxu0 %v13005_v3 }
0x141f   : > { %6459 = vmatprep.subr.bf16.mxu0 %v13010_v26  ;;  %v13079_v26 = vld [vmem:[#allocation6 + $0x1364] ss:$72 sps:$4 sm:$0xff]  }
0x1422   : > { %6460 = vmatpush1.bf16.msra.mxu0 %v13008_v5  ;;  %v14318_v5 = vpack.c.bf16 %v14144_v4, %v14144_v4  ;;  %v13085_v4 = vld [vmem:[#allocation6 + $0x1484] ss:$72 sps:$4 sm:$0xff]  }
0x1423   : > { %6461 = vmatprep.subr.bf16.mxu0 %v13013_v7 }
0x1426   : > { %6462 = vmatpush1.bf16.msra.mxu0 %v13011_v9 }
0x1427   : > { %6463 = vmatprep.subr.bf16.mxu0 %v13016_v10  ;;  %v13077_v10 = vld [vmem:[#allocation6 + $0x1360] ss:$72 sps:$4 sm:$0xff]  }
0x142a   : > { %6464 = vmatpush1.bf16.msra.mxu0 %v13014_v12  ;;  %v13082_v12 = vld [vmem:[#allocation6 + $0x13f4] ss:$72 sps:$4 sm:$0xff]  }
0x142b   : > { %6465 = vmatprep.subr.bf16.mxu0 %v13019_v39  ;;  %v13083_v39 = vld [vmem:[#allocation6 + $0x1480] ss:$72 sps:$4 sm:$0xff]  }
0x142e   : > { %6466 = vmatpush1.bf16.msra.mxu0 %v13017_v13  ;;  %v13088_v13 = vld [vmem:[#allocation6 + $0x1514] ss:$72 sps:$4 sm:$0xff]  }
0x142f   : > { %6467 = vmatprep.subr.bf16.mxu0 %v13022_v14  ;;  %v13086_v14 = vld [vmem:[#allocation6 + $0x1510] ss:$72 sps:$4 sm:$0xff]  }
0x1432   : > { %6468 = vmatpush1.bf16.msra.mxu0 %v13020_v15  ;;  %v13091_v15 = vld [vmem:[#allocation6 + $0x15a4] ss:$72 sps:$4 sm:$0xff]  }
0x1433   : > { %6478 = vmatprep.subr.bf16.mxu0 %v13025_v17  ;;  %v13089_v17 = vld [vmem:[#allocation6 + $0x15a0] ss:$72 sps:$4 sm:$0xff]  }
0x1435   : > { %6470 = vmatmul.mubr.bf16.vlgmr.msra.gmra.mrb[16].mxu0 %v14049_v8  ;;  %v13038_v8 = vld [vmem:[#allocation6 + $0xc10] ss:$72 sps:$4 sm:$0xff]  }
0x1436   : > { %6479 = vmatpush1.bf16.msra.mxu0 %v13023_v18  ;;  %6510 = vmatprep.mubr.bf16.mxu0 %v14043_v52  ;;  %v13041_v52 = vld [vmem:[#allocation6 + $0xca0] ss:$72 sps:$4 sm:$0xff]   ;;  %v13094_v18 = vld [vmem:[#allocation6 + $0x1634] ss:$72 sps:$4 sm:$0xff]  }
0x1437   : > { %6480 = vmatprep.subr.bf16.mxu0 %v13028_v19  ;;  %v13097_v19 = vld [vmem:[#allocation6 + $0x16c4] ss:$72 sps:$4 sm:$0xff]  }
0x143a   : > { %6481 = vmatpush1.bf16.msra.mxu0 %v13026_v20  ;;  %v13095_v20 = vld [vmem:[#allocation6 + $0x16c0] ss:$72 sps:$4 sm:$0xff]  }
0x143b   : > { %6482 = vmatprep.subr.bf16.mxu0 %v13031_v21  ;;  %v13100_v21 = vld [vmem:[#allocation6 + $0x1754] ss:$72 sps:$4 sm:$0xff]  }
0x143e   : > { %6483 = vmatpush1.bf16.msra.mxu0 %v13029_v22  ;;  %v13098_v22 = vld [vmem:[#allocation6 + $0x1750] ss:$72 sps:$4 sm:$0xff]  }
0x143f   : > { %6484 = vmatprep.subr.bf16.mxu0 %v13034_v23  ;;  %v13103_v23 = vld [vmem:[#allocation6 + $0x17e4] ss:$72 sps:$4 sm:$0xff]  }
0x1442   : > { %6485 = vmatpush1.bf16.msra.mxu0 %v13032_v24  ;;  %v13101_v24 = vld [vmem:[#allocation6 + $0x17e0] ss:$72 sps:$4 sm:$0xff]  }
0x1443   : > { %6486 = vmatprep.subr.bf16.mxu0 %v13037_v25  ;;  %v13106_v25 = vld [vmem:[#allocation6 + $0x1874] ss:$72 sps:$4 sm:$0xff]  }
0x1446   : > { %6487 = vmatpush1.bf16.msra.mxu0 %v13035_v29  ;;  %v13104_v29 = vld [vmem:[#allocation6 + $0x1870] ss:$72 sps:$4 sm:$0xff]  }
0x1447   : > { %6488 = vmatprep.subr.bf16.mxu0 %v13040_v30  ;;  %v13109_v30 = vld [vmem:[#allocation6 + $0x1904] ss:$72 sps:$4 sm:$0xff]  }
0x144a   : > { %6489 = vmatpush1.bf16.msra.mxu0 %v13038_v8  ;;  %v13107_v8 = vld [vmem:[#allocation6 + $0x1900] ss:$72 sps:$4 sm:$0xff]  }
0x144b   : > { %6490 = vmatprep.subr.bf16.mxu0 %v13043_v32  ;;  %v13112_v32 = vld [vmem:[#allocation6 + $0x1994] ss:$72 sps:$4 sm:$0xff]  }
0x144e   : > { %6491 = vmatpush1.bf16.msra.mxu0 %v13041_v52  ;;  %v13110_v52 = vld [vmem:[#allocation6 + $0x1990] ss:$72 sps:$4 sm:$0xff]  }
0x144f   : > { %6492 = vmatprep.subr.bf16.mxu0 %v13046_v38  ;;  %v13115_v38 = vld [vmem:[#allocation6 + $0x1a24] ss:$72 sps:$4 sm:$0xff]  }
0x1452   : > { %6493 = vmatpush1.bf16.msra.mxu0 %v13044_v40  ;;  %v13113_v40 = vld [vmem:[#allocation6 + $0x1a20] ss:$72 sps:$4 sm:$0xff]  }
0x1453   : > { %6494 = vmatprep.subr.bf16.mxu0 %v13049_v42  ;;  %v13118_v42 = vld [vmem:[#allocation6 + $0x1ab4] ss:$72 sps:$4 sm:$0xff]  }
0x1456   : > { %6495 = vmatpush1.bf16.msra.mxu0 %v13047_v44  ;;  %v13116_v44 = vld [vmem:[#allocation6 + $0x1ab0] ss:$72 sps:$4 sm:$0xff]  }
0x1457   : > { %6496 = vmatprep.subr.bf16.mxu0 %v13052_v46 }
0x145a   : > { %6497 = vmatpush1.bf16.msra.mxu0 %v13050_v48 }
0x145b   : > { %6498 = vmatprep.subr.bf16.mxu0 %v13055_v49 }
0x145e   : > { %6499 = vmatpush1.bf16.msra.mxu0 %v13053_v50 }
0x145f   : > { %6500 = vmatprep.subr.bf16.mxu0 %v13058_v54 }
0x1462   : > { %6501 = vmatpush1.bf16.msra.mxu0 %v13056_v55 }
0x1463   : > { %6502 = vmatprep.subr.bf16.mxu0 %v13061_v56 }
0x1466   : > { %6503 = vmatpush1.bf16.msra.mxu0 %v13059_v27 }
0x1467   : > { %6504 = vmatprep.subr.bf16.mxu0 %v13064_v61 }
0x146a   : > { %6505 = vmatpush1.bf16.msra.mxu0 %v13062_v33 }
0x146b   : > { %6506 = vmatprep.subr.bf16.mxu0 %v13067_v59 }
0x146e   : > { %6507 = vmatpush1.bf16.msra.mxu0 %v13065_v34 }
0x146f   : > { %6508 = vmatprep.subr.bf16.mxu0 %v13070_v60 }
0x1472   : > { %6509 = vmatpush1.bf16.msra.mxu0 %v13068_v0 }
0x1473   : > { %6519 = vmatprep.subr.bf16.mxu0 %v13073_v41 }
0x1475   : > { %6511 = vmatmul.mubr.bf16.vlgmr.msra.gmra.mrb[16].mxu0 %v14051_v11  ;;  %v7508_v11 = vsel %vm6583_vm1, %v14318_v5, 0 }
0x1476   : > { %6520 = vmatpush1.bf16.msra.mxu0 %v13071_v51  ;;  %6551 = vmatprep.mubr.bf16.mxu0 %v14057_v35  ;;  %v13080_v35 = vld [vmem:[#allocation6 + $0x13f0] ss:$72 sps:$4 sm:$0xff]  }
0x1477   : > { %6521 = vmatprep.subr.bf16.mxu0 %v13076_v1 }
0x147a   : > { %6522 = vmatpush1.bf16.msra.mxu0 %v13074_v2 }
0x147b   : > { %6523 = vmatprep.subr.bf16.mxu0 %v13079_v26 }
0x147e   : > { %6524 = vmatpush1.bf16.msra.mxu0 %v13077_v10 }
0x147f   : > { %6525 = vmatprep.subr.bf16.mxu0 %v13082_v12 }
0x1482   : > { %6526 = vmatpush1.bf16.msra.mxu0 %v13080_v35 }
0x1483   : > { %6527 = vmatprep.subr.bf16.mxu0 %v13085_v4 }
0x1484   : > { %v7443_v31 = vpop.xlane.xlu1 %7442 }
0x1485   : > { %13587 = vrcp.f32 %v7443_v31 }
0x1486   : > { %6528 = vmatpush1.bf16.msra.mxu0 %v13083_v39 }
0x1487   : > { %6529 = vmatprep.subr.bf16.mxu0 %v13088_v13 }
0x1488   : > { %v7449_v36 = vpop.permute.xlu1 %7448 }
0x1489   : > { %v7454_v53 = vsel %vm6647_vm4, %v7449_v36, 0 }
0x148a   : > { %11582 = vmatpush3.bf16.msra.mxu1 %v7454_v53  ;;  %6530 = vmatpush1.bf16.msra.mxu0 %v13086_v14 }
0x148b   : > { %11587 = vmatprep.subr.bf16.mxu1 %v13804_v57  ;;  %6531 = vmatprep.subr.bf16.mxu0 %v13091_v15 }
0x148e   : > { %6532 = vmatpush1.bf16.msra.mxu0 %v13089_v17 }
0x148f   : > { %v13588_v3 = vpop.eup %13587  ;;  %6533 = vmatprep.subr.bf16.mxu0 %v13094_v18 }
0x1490   : > { %v7445_v7 = vmul.f32 %v13588_v3, %v14305_v37  ;;  %v14329_v37 = vpack.c.bf16 %v14123_v43, %v14123_v43  ;;  %v13092_v43 = vld [vmem:[#allocation6 + $0x1630] ss:$72 sps:$4 sm:$0xff]  }
0x1492   : > { %v7446_v9 = vpack.c.bf16 %v7445_v7, %v7445_v7  ;;  %6534 = vmatpush1.bf16.msra.mxu0 %v13092_v43 }
0x1493   : > { %6535 = vmatprep.subr.bf16.mxu0 %v13097_v19 }
0x1494   : > { %11584 = vmatmul.mubr.msk.bf16.vlgmr.msra.gmra.mrb[80].mxu1 %vm6631_vm3, %v7446_v9 }
0x1495   : > { %11588 = vmatpush3.bf16.xpose.msra.mxu1 %v7508_v11  ;;  %11589 = vmatprep.mubr.msk.bf16.mxu1 %vm13805_vm0, %v13804_v57 }
0x1496   : > { %11593 = vmatprep.subr.bf16.mxu1 %v13804_v57  ;;  %6536 = vmatpush1.bf16.msra.mxu0 %v13095_v20 }
0x1497   : > { %6537 = vmatprep.subr.bf16.mxu0 %v13100_v21 }
0x149a   : > { %6538 = vmatpush1.bf16.msra.mxu0 %v13098_v22 }
0x149b   : > { %6539 = vmatprep.subr.bf16.mxu0 %v13103_v23 }
0x149c   : > { %11590 = vmatmul.mubr.msk.bf16.vlgmr.msra.gmra.mrb[84].mxu1 %vm6583_vm1, %v14329_v37 }
0x149d   : > { %11595 = vmatprep.mubr.msk.bf16.mxu1 %vm13805_vm0, %v13804_v57 }
0x149e   : > { %6540 = vmatpush1.bf16.msra.mxu0 %v13101_v24 }
0x149f   : > { %6541 = vmatprep.subr.bf16.mxu0 %v13106_v25 }
0x14a2   : > { %6542 = vmatpush1.bf16.msra.mxu0 %v13104_v29 }
0x14a3   : > { %6543 = vmatprep.subr.bf16.mxu0 %v13109_v30  ;;  %v6571_v30 = vpack.c.bf16 %v14146_v6, %v14146_v6 }
0x14a6   : > { %6544 = vmatpush1.bf16.msra.mxu0 %v13107_v8 }
0x14a7   : > { %6545 = vmatprep.subr.bf16.mxu0 %v13112_v32 }
0x14aa   : > { %6546 = vmatpush1.bf16.msra.mxu0 %v13110_v52  ;;  %v7737_v52 = vsel %vm6583_vm1, %v6571_v30, 0 }
0x14ab   : > { %6547 = vmatprep.subr.bf16.mxu0 %v13115_v38 }
0x14ae   : > { %6548 = vmatpush1.bf16.msra.mxu0 %v13113_v40  ;;  %v6565_v40 = vpack.c.bf16 %v14125_v28, %v14125_v28 }
0x14af   : > { %6549 = vmatprep.subr.bf16.mxu0 %v13118_v42 }
0x14b2   : > { %6550 = vmatpush1.bf16.msra.mxu0 %v13116_v44 }
0x14b5   : > { %6552 = vmatmul.mubr.bf16.vlgmr.msra.gmra.mrb[16].mxu0 %v14061_v16 }
0x1567   : > { %v14336_v46 = vpop.f32.mrb[80].mxu1 }
0x1568   : > { %v11585_v48 = vpop.f32.mrb[81].mxu1  ;;  %v11440_v47 = vpack.c.bf16 %v14336_v46, %v14336_v46  ;;  %v13133_v46 = vld [vmem:[#allocation8 + $0xc4] ss:$24 sps:$4 sm:$0xff]  }
0x1569   : > { %v7493_v49 = vpop.f32.mrb[82].mxu1 }
0x156a   : > { %v11586_v50 = vpop.f32.mrb[83].mxu1 }
0x156f   : > { %v7544_v54 = vpop.f32.mrb[84].mxu1 }
0x1570   : > { %v7550_v55 = vsel %vm14161_vm2, %v7544_v54, -inf  ;;  %v11591_v56 = vpop.f32.mrb[85].mxu1 }
0x1571   : > { %v7547_v27 = vpop.f32.mrb[86].mxu1  ;;  %v7551_v61 = vsel %vm6631_vm3, %v7550_v55, -inf }
0x1572   : > { %7552 = vmax.xlane.f32.xlu1 %v7551_v61  ;;  %v11592_v33 = vpop.f32.mrb[87].mxu1 }
0x1588   : > { %v6553_v59 = vpop.f32.mrb[16].mxu0 }
0x1589   : > { %v6576_v34 = vpack.c.bf16 %v6553_v59, %v6553_v59  ;;  %v14341_v60 = vpop.f32.mrb[17].mxu0 }
0x158a   : > { %v6557_v16 = vpop.f32.mrb[18].mxu0  ;;  %v6577_v38 = vpack.c.bf16 %v14341_v60, %v14341_v60 }
0x158b   : > { %v7567_v31 = vsel %vm6647_vm4, %v6576_v34, 0  ;;  %v6558_v0 = vpop.f32.mrb[19].mxu0 }
0x158c   : > { %11594 = vmatpush3.bf16.msra.mxu1 %v7567_v31  ;;  %v7796_v6 = vsel %vm6647_vm4, %v6577_v38, 0 }
0x158d   : > { %11599 = vmatprep.subr.bf16.mxu1 %v13804_v57 }
0x15ff   : > { %v7553_v41 = vpop.xlane.xlu1 %7552 }
0x1600   : > { %v7554_v36 = vsub.f32 %v7550_v55, %v7553_v41 }
0x1602   : > { %v7555_v53 = vmul.f32 1.442695, %v7554_v36 }
0x1604   : > { %13589 = vpow2.f32 %v7555_v53 }
0x160e   : > { %v13590_v51 = vpop.eup %13589 }
0x160f   : > { %v7557_v1 = vsel %vm6631_vm3, %v13590_v51, 0.0 }
0x1610   : > { %7558 = vadd.xlane.f32.xlu0 %v7557_v1 }
0x1626   : > { %7615 = vrot.lane.b32.xlu0 %v14318_v5, %s13803_s21 }
0x162a   : > { %7612 = vrot.lane.b32.xlu0 %v14329_v37, %s13803_s21 }
0x169d   : > { %v7559_v2 = vpop.xlane.xlu0 %7558 }
0x169e   : > { %13591 = vrcp.f32 %v7559_v2 }
0x16a1   : > { %v7616_v7 = vpop.permute.xlu0 %7615 }
0x16a2   : > { %v7621_v10 = vsel %vm6583_vm1, %v7616_v7, 0 }
0x16a5   : > { %v7613_v5 = vpop.permute.xlu0 %7612 }
0x16a8   : > { %v13592_v3 = vpop.eup %13591 }
0x16a9   : > { %v7561_v26 = vmul.f32 %v13592_v3, %v13590_v51 }
0x16ab   : > { %v7562_v9 = vpack.c.bf16 %v7561_v26, %v7561_v26 }
0x16ad   : > { %11596 = vmatmul.mubr.msk.bf16.vlgmr.msra.gmra.mrb[88].mxu1 %vm6631_vm3, %v7562_v9 }
0x16ae   : > { %11600 = vmatpush3.bf16.xpose.msra.mxu1 %v7621_v10  ;;  %11601 = vmatprep.mubr.msk.bf16.mxu1 %vm13805_vm0, %v13804_v57 }
0x16af   : > { %11605 = vmatprep.subr.bf16.mxu1 %v13804_v57 }
0x16b5   : > { %11602 = vmatmul.mubr.msk.bf16.vlgmr.msra.gmra.mrb[92].mxu1 %vm6583_vm1, %v7613_v5 }
0x16b6   : > { %11607 = vmatprep.mubr.msk.bf16.mxu1 %vm13805_vm0, %v13804_v57 }
0x1780   : > { %v7603_v12 = vpop.f32.mrb[88].mxu1 }
0x1781   : > { %v7609_v11 = vpack.c.bf16 %v7603_v12, %v7603_v12  ;;  %v11597_v35 = vpop.f32.mrb[89].mxu1 }
0x1782   : > { %v7606_v4 = vpop.f32.mrb[90].mxu1 }
0x1783   : > { %7610 = vst.msk [vmem:[#allocation2 + $0x10] sm:$0xf] %vm6692_vm5, %v7609_v11  ;;  %v11598_v37 = vpop.f32.mrb[91].mxu1  ;;  %v11439_v4 = vpack.c.bf16 %v14285_v63, %v14285_v63  ;;  %v13125_v63 = vld [vmem:[#allocation8 + $0x60] ss:$24 sps:$4 sm:$0xff]  }
0x1788   : > { %v7657_v39 = vpop.f32.mrb[92].mxu1 }
0x1789   : > { %v7663_v13 = vsel %vm14161_vm2, %v7657_v39, -inf  ;;  %v11603_v14 = vpop.f32.mrb[93].mxu1  ;;  %v13119_v39 = vld [vmem:[#allocation8] ss:$24 sps:$4 sm:$0xff]  }
0x178a   : > { %v7660_v15 = vpop.f32.mrb[94].mxu1  ;;  %v7664_v17 = vsel %vm6631_vm3, %v7663_v13, -inf  ;;  %v13124_v14 = vld [vmem:[#allocation8 + $0x34] ss:$24 sps:$4 sm:$0xff]  }
0x178b   : > { %7665 = vmax.xlane.f32.xlu1 %v7664_v17  ;;  %v11604_v18 = vpop.f32.mrb[95].mxu1  ;;  %v13127_v15 = vld [vmem:[#allocation8 + $0x64] ss:$24 sps:$4 sm:$0xff]   ;;  %v13130_v17 = vld [vmem:[#allocation8 + $0x94] ss:$24 sps:$4 sm:$0xff]  }
0x178c   : > { %v13128_v18 = vld [vmem:[#allocation8 + $0x90] ss:$24 sps:$4 sm:$0xff]  }
0x179c   : > { %7677 = vrot.lane.b32.xlu1 %v6576_v34, %s13803_s21 }
0x1818   : > { %v7666_v43 = vpop.xlane.xlu1 %7665 }
0x1819   : > { %v7667_v19 = vsub.f32 %v7663_v13, %v7666_v43  ;;  %v13121_v13 = vld [vmem:[#allocation8 + $0x4] ss:$24 sps:$4 sm:$0xff]   ;;  %v13131_v43 = vld [vmem:[#allocation8 + $0xc0] ss:$24 sps:$4 sm:$0xff]  }
0x181a   : > { %9746 = vmatprep.subr.bf16.mxu0 %v13121_v13  ;;  %v13183_v13 = vld [vmem:[#allocation8 + $0x360] ss:$24 sps:$4 sm:$0xff]  }
0x181b   : > { %v7668_v20 = vmul.f32 1.442695, %v7667_v19  ;;  %9747 = vmatpush1.bf16.msra.mxu0 %v13119_v39  ;;  %v13136_v19 = vld [vmem:[#allocation8 + $0xf4] ss:$24 sps:$4 sm:$0xff]  }
0x181c   : > { %v7678_v21 = vpop.permute.xlu1 %7677  ;;  %9748 = vmatprep.subr.bf16.mxu0 %v13124_v14  ;;  %v13188_v39 = vld [vmem:[#allocation8 + $0x6c] ss:$24 sps:$4 sm:$0xff]   ;;  %v13186_v14 = vld [vmem:[#allocation8 + $0x68] ss:$24 sps:$4 sm:$0xff]  }
0x181d   : > { %13593 = vpow2.f32 %v7668_v20  ;;  %v7683_v22 = vsel %vm6647_vm4, %v7678_v21, 0  ;;  %v13134_v20 = vld [vmem:[#allocation8 + $0xf0] ss:$24 sps:$4 sm:$0xff]   ;;  %v13139_v21 = vld [vmem:[#allocation8 + $0x124] ss:$24 sps:$4 sm:$0xff]  }
0x181e   : > { %11606 = vmatpush3.bf16.msra.mxu1 %v7683_v22  ;;  %v13137_v22 = vld [vmem:[#allocation8 + $0x120] ss:$24 sps:$4 sm:$0xff]  }
0x181f   : > { %11611 = vmatprep.subr.bf16.mxu1 %v13804_v57 }
0x1827   : > { %v13594_v23 = vpop.eup %13593 }
0x1828   : > { %v7670_v24 = vsel %vm6631_vm3, %v13594_v23, 0.0 }
0x1829   : > { %7671 = vadd.xlane.f32.xlu0 %v7670_v24  ;;  %v13140_v24 = vld [vmem:[#allocation8 + $0x150] ss:$24 sps:$4 sm:$0xff]  }
0x18b6   : > { %v7672_v25 = vpop.xlane.xlu0 %7671 }
0x18b7   : > { %13595 = vrcp.f32 %v7672_v25  ;;  %v13145_v25 = vld [vmem:[#allocation8 + $0x184] ss:$24 sps:$4 sm:$0xff]  }
0x18c1   : > { %v13596_v29 = vpop.eup %13595 }
0x18c2   : > { %v7674_v8 = vmul.f32 %v13596_v29, %v13594_v23  ;;  %v13142_v23 = vld [vmem:[#allocation8 + $0x154] ss:$24 sps:$4 sm:$0xff]   ;;  %v13143_v29 = vld [vmem:[#allocation8 + $0x180] ss:$24 sps:$4 sm:$0xff]  }
0x18c4   : > { %v7675_v32 = vpack.c.bf16 %v7674_v8, %v7674_v8  ;;  %v13146_v8 = vld [vmem:[#allocation8 + $0x1b0] ss:$24 sps:$4 sm:$0xff]  }
0x18c6   : > { %11608 = vmatmul.mubr.msk.bf16.vlgmr.msra.gmra.mrb[96].mxu1 %vm6631_vm3, %v7675_v32  ;;  %v13151_v32 = vld [vmem:[#allocation8 + $0x1e4] ss:$24 sps:$4 sm:$0xff]  }
0x18c7   : > { %11612 = vmatpush3.bf16.xpose.msra.mxu1 %v7737_v52  ;;  %11613 = vmatprep.mubr.msk.bf16.mxu1 %vm13805_vm0, %v13804_v57  ;;  %v13149_v52 = vld [vmem:[#allocation8 + $0x1e0] ss:$24 sps:$4 sm:$0xff]  }
0x18c8   : > { %11617 = vmatprep.subr.bf16.mxu1 %v13804_v57 }
0x18ce   : > { %11614 = vmatmul.mubr.msk.bf16.vlgmr.msra.gmra.mrb[100].mxu1 %vm6583_vm1, %v6565_v40 }
0x18cf   : > { %11618 = vmatpush3.bf16.msra.mxu1 %v7796_v6  ;;  %11619 = vmatprep.mubr.msk.bf16.mxu1 %vm13805_vm0, %v13804_v57  ;;  %v13157_v6 = vld [vmem:[#allocation8 + $0x244] ss:$24 sps:$4 sm:$0xff]  }
0x18d0   : > { %11623 = vmatprep.subr.bf16.mxu1 %v13804_v57 }
0x1999   : > { %v7719_v42 = vpop.f32.mrb[96].mxu1 }
0x199a   : > { %v11609_v44 = vpop.f32.mrb[97].mxu1  ;;  %v11441_v37 = vpack.c.bf16 %v7719_v42, %v7719_v42  ;;  %v13155_v42 = vld [vmem:[#allocation8 + $0x240] ss:$24 sps:$4 sm:$0xff]  }
0x199b   : > { %v7722_v48 = vpop.f32.mrb[98].mxu1 }
0x199c   : > { %v11610_v49 = vpop.f32.mrb[99].mxu1 }
0x19a1   : > { %v7773_v50 = vpop.f32.mrb[100].mxu1 }
0x19a2   : > { %v7779_v54 = vsel %vm14161_vm2, %v7773_v50, -inf  ;;  %v11615_v55 = vpop.f32.mrb[101].mxu1 }
0x19a3   : > { %v7776_v28 = vpop.f32.mrb[102].mxu1  ;;  %v7780_v56 = vsel %vm6631_vm3, %v7779_v54, -inf }
0x19a4   : > { %7781 = vmax.xlane.f32.xlu1 %v7780_v56  ;;  %v11616_v27 = vpop.f32.mrb[103].mxu1 }
0x19b5   : > { %7841 = vrot.lane.b32.xlu1 %v6565_v40, %s13803_s21  ;;  %v13152_v40 = vld [vmem:[#allocation8 + $0x210] ss:$24 sps:$4 sm:$0xff]  }
0x1a31   : > { %v7782_v61 = vpop.xlane.xlu1 %7781 }
0x1a32   : > { %v7783_v33 = vsub.f32 %v7779_v54, %v7782_v61 }
0x1a34   : > { %v7784_v59 = vmul.f32 1.442695, %v7783_v33 }
0x1a35   : > { %v7842_v51 = vpop.permute.xlu1 %7841 }
0x1a36   : > { %13597 = vpow2.f32 %v7784_v59  ;;  %v11437_v59 = vpack.c.bf16 %v14205_v58, %v14205_v58 }
0x1a40   : > { %v13598_v34 = vpop.eup %13597 }
0x1a41   : > { %v7786_v60 = vsel %vm6631_vm3, %v13598_v34, 0.0 }
0x1a42   : > { %7787 = vadd.xlane.f32.xlu0 %v7786_v60  ;;  %v13158_v60 = vld [vmem:[#allocation8 + $0x270] ss:$24 sps:$4 sm:$0xff]  }
0x1a58   : > { %7844 = vrot.lane.b32.xlu0 %v6571_v30, %s13803_s21  ;;  %v13148_v30 = vld [vmem:[#allocation8 + $0x1b4] ss:$24 sps:$4 sm:$0xff]  }
0x1acf   : > { %v7788_v16 = vpop.xlane.xlu0 %7787 }
0x1ad0   : > { %13599 = vrcp.f32 %v7788_v16  ;;  %v13163_v16 = vld [vmem:[#allocation8 + $0x2a4] ss:$24 sps:$4 sm:$0xff]  }
0x1ad3   : > { %v7845_v41 = vpop.permute.xlu0 %7844 }
0x1ad4   : > { %v7850_v53 = vsel %vm6583_vm1, %v7845_v41, 0  ;;  %v13164_v41 = vld [vmem:[#allocation8 + $0x2d0] ss:$24 sps:$4 sm:$0xff]  }
0x1ada   : > { %v13600_v31 = vpop.eup %13599 }
0x1adb   : > { %v7790_v0 = vmul.f32 %v13600_v31, %v13598_v34  ;;  %v13160_v34 = vld [vmem:[#allocation8 + $0x274] ss:$24 sps:$4 sm:$0xff]   ;;  %v13161_v31 = vld [vmem:[#allocation8 + $0x2a0] ss:$24 sps:$4 sm:$0xff]  }
0x1add   : > { %v7791_v36 = vpack.c.bf16 %v7790_v0, %v7790_v0  ;;  %v13166_v0 = vld [vmem:[#allocation8 + $0x2d4] ss:$24 sps:$4 sm:$0xff]  }
0x1adf   : > { %11620 = vmatmul.mubr.msk.bf16.vlgmr.msra.gmra.mrb[104].mxu1 %vm6631_vm3, %v7791_v36  ;;  %v13171_v36 = vld [vmem:[#allocation8 + $0x304] ss:$24 sps:$4 sm:$0xff]  }
0x1ae0   : > { %11624 = vmatpush3.bf16.xpose.msra.mxu1 %v7850_v53  ;;  %11625 = vmatprep.mubr.msk.bf16.mxu1 %vm13805_vm0, %v13804_v57  ;;  %v13174_v53 = vld [vmem:[#allocation8 + $0xc] ss:$24 sps:$4 sm:$0xff]  }
0x1ae1   : > { %11629 = vmatprep.subr.bf16.mxu1 %v13804_v57 }
0x1ae7   : > { %11626 = vmatmul.mubr.msk.bf16.vlgmr.msra.gmra.mrb[108].mxu1 %vm6583_vm1, %v7842_v51 }
0x1ae8   : > { %11631 = vmatprep.mubr.msk.bf16.mxu1 %vm13805_vm0, %v13804_v57  ;;  %v11438_v57 = vpack.c.bf16 %v14245_v62, %v14245_v62  ;;  %v13122_v62 = vld [vmem:[#allocation8 + $0x30] ss:$24 sps:$4 sm:$0xff]  }
0x1ae9   : > { %9749 = vmatpush1.bf16.msra.mxu0 %v13122_v62  ;;  %v13191_v62 = vld [vmem:[#allocation8 + $0x394] ss:$24 sps:$4 sm:$0xff]  }
0x1aea   : > { %9750 = vmatprep.subr.bf16.mxu0 %v13127_v15  ;;  %v13194_v15 = vld [vmem:[#allocation8 + $0x9c] ss:$24 sps:$4 sm:$0xff]  }
0x1aed   : > { %9751 = vmatpush1.bf16.msra.mxu0 %v13125_v63  ;;  %v13189_v63 = vld [vmem:[#allocation8 + $0x390] ss:$24 sps:$4 sm:$0xff]  }
0x1aee   : > { %9752 = vmatprep.subr.bf16.mxu0 %v13130_v17  ;;  %v13192_v17 = vld [vmem:[#allocation8 + $0x98] ss:$24 sps:$4 sm:$0xff]  }
0x1af1   : > { %9753 = vmatpush1.bf16.msra.mxu0 %v13128_v18  ;;  %v13197_v18 = vld [vmem:[#allocation8 + $0x3c4] ss:$24 sps:$4 sm:$0xff]  }
0x1af2   : > { %9754 = vmatprep.subr.bf16.mxu0 %v13133_v46  ;;  %v13200_v46 = vld [vmem:[#allocation8 + $0xcc] ss:$24 sps:$4 sm:$0xff]  }
0x1af5   : > { %9755 = vmatpush1.bf16.msra.mxu0 %v13131_v43  ;;  %v13195_v43 = vld [vmem:[#allocation8 + $0x3c0] ss:$24 sps:$4 sm:$0xff]  }
0x1af6   : > { %9756 = vmatprep.subr.bf16.mxu0 %v13136_v19  ;;  %v13198_v19 = vld [vmem:[#allocation8 + $0xc8] ss:$24 sps:$4 sm:$0xff]  }
0x1af9   : > { %9757 = vmatpush1.bf16.msra.mxu0 %v13134_v20  ;;  %v13203_v20 = vld [vmem:[#allocation8 + $0x3f4] ss:$24 sps:$4 sm:$0xff]  }
0x1afa   : > { %9758 = vmatprep.subr.bf16.mxu0 %v13139_v21  ;;  %v13206_v21 = vld [vmem:[#allocation8 + $0xfc] ss:$24 sps:$4 sm:$0xff]  }
0x1afd   : > { %9759 = vmatpush1.bf16.msra.mxu0 %v13137_v22  ;;  %v13201_v22 = vld [vmem:[#allocation8 + $0x3f0] ss:$24 sps:$4 sm:$0xff]  }
0x1afe   : > { %9760 = vmatprep.subr.bf16.mxu0 %v13142_v23  ;;  %v13204_v23 = vld [vmem:[#allocation8 + $0xf8] ss:$24 sps:$4 sm:$0xff]  }
0x1b01   : > { %9761 = vmatpush1.bf16.msra.mxu0 %v13140_v24  ;;  %v13209_v24 = vld [vmem:[#allocation8 + $0x424] ss:$24 sps:$4 sm:$0xff]  }
0x1b02   : > { %9762 = vmatprep.subr.bf16.mxu0 %v13145_v25  ;;  %v13212_v25 = vld [vmem:[#allocation8 + $0x12c] ss:$24 sps:$4 sm:$0xff]  }
0x1b05   : > { %9763 = vmatpush1.bf16.msra.mxu0 %v13143_v29  ;;  %v13207_v29 = vld [vmem:[#allocation8 + $0x420] ss:$24 sps:$4 sm:$0xff]  }
0x1b06   : > { %9764 = vmatprep.subr.bf16.mxu0 %v13148_v30  ;;  %v13210_v30 = vld [vmem:[#allocation8 + $0x128] ss:$24 sps:$4 sm:$0xff]  }
0x1b09   : > { %9765 = vmatpush1.bf16.msra.mxu0 %v13146_v8  ;;  %v13215_v8 = vld [vmem:[#allocation8 + $0x454] ss:$24 sps:$4 sm:$0xff]  }
0x1b0a   : > { %9766 = vmatprep.subr.bf16.mxu0 %v13151_v32  ;;  %v13218_v32 = vld [vmem:[#allocation8 + $0x15c] ss:$24 sps:$4 sm:$0xff]  }
0x1b0d   : > { %9767 = vmatpush1.bf16.msra.mxu0 %v13149_v52  ;;  %v13213_v52 = vld [vmem:[#allocation8 + $0x450] ss:$24 sps:$4 sm:$0xff]  }
0x1bb2   : > { %v7832_v1 = vpop.f32.mrb[104].mxu1 }
0x1bb3   : > { %v7838_v2 = vpack.c.bf16 %v7832_v1, %v7832_v1  ;;  %v11621_v3 = vpop.f32.mrb[105].mxu1 }
0x1bb4   : > { %v7835_v26 = vpop.f32.mrb[106].mxu1 }
0x1bb5   : > { %7839 = vst.msk [vmem:[#allocation2 + $0x14] sm:$0xf] %vm6692_vm5, %v7838_v2  ;;  %v11622_v7 = vpop.f32.mrb[107].mxu1 }
0x1bba   : > { %v7886_v9 = vpop.f32.mrb[108].mxu1 }
0x1bbb   : > { %v14399_v10 = vsel %vm14161_vm2, %v7886_v9, -inf  ;;  %v11627_v5 = vpop.f32.mrb[109].mxu1  ;;  %v13169_v9 = vld [vmem:[#allocation8 + $0x300] ss:$24 sps:$4 sm:$0xff]  }
0x1bbc   : > { %v7889_v12 = vpop.f32.mrb[110].mxu1  ;;  %v7893_v11 = vsel %vm6631_vm3, %v14399_v10, -inf }
0x1bbd   : > { %7894 = vmax.xlane.f32.xlu0 %v7893_v11  ;;  %v11628_v35 = vpop.f32.mrb[111].mxu1  ;;  %v13179_v11 = vld [vmem:[#allocation8 + $0x334] ss:$24 sps:$4 sm:$0xff]  }
0x1bbe   : > { %v13182_v35 = vld [vmem:[#allocation8 + $0x3c] ss:$24 sps:$4 sm:$0xff]  }
0x1bd3   : > { %7906 = vrot.lane.b32.xlu0 %v6577_v38, %s13803_s21  ;;  %v13154_v38 = vld [vmem:[#allocation8 + $0x214] ss:$24 sps:$4 sm:$0xff]  }
0x1bd4   : > { %9768 = vmatprep.subr.bf16.mxu0 %v13154_v38  ;;  %v13216_v38 = vld [vmem:[#allocation8 + $0x158] ss:$24 sps:$4 sm:$0xff]  }
0x1bd5   : > { %9769 = vmatpush1.bf16.msra.mxu0 %v13152_v40  ;;  %v13221_v40 = vld [vmem:[#allocation8 + $0x484] ss:$24 sps:$4 sm:$0xff]  }
0x1bd6   : > { %9770 = vmatprep.subr.bf16.mxu0 %v13157_v6  ;;  %v13224_v6 = vld [vmem:[#allocation8 + $0x18c] ss:$24 sps:$4 sm:$0xff]  }
0x1bd7   : > { %7042 = vrot.lane.b32.xlu0 %v11438_v57, %s13803_s21 }
0x1bd9   : > { %9771 = vmatpush1.bf16.msra.mxu0 %v13155_v42  ;;  %v13219_v42 = vld [vmem:[#allocation8 + $0x480] ss:$24 sps:$4 sm:$0xff]  }
0x1bda   : > { %9772 = vmatprep.subr.bf16.mxu0 %v13160_v34  ;;  %v13240_v34 = vld [vmem:[#allocation8 + $0x218] ss:$24 sps:$4 sm:$0xff]  }
0x1bdb   : > { %7271 = vrot.lane.b32.xlu0 %v11439_v4, %s13803_s21  ;;  %v13177_v4 = vld [vmem:[#allocation8 + $0x330] ss:$24 sps:$4 sm:$0xff]  }
0x1bdd   : > { %9773 = vmatpush1.bf16.msra.mxu0 %v13158_v60  ;;  %v13245_v60 = vld [vmem:[#allocation8 + $0x544] ss:$24 sps:$4 sm:$0xff]  }
0x1bde   : > { %9774 = vmatprep.subr.bf16.mxu0 %v13163_v16  ;;  %v13248_v16 = vld [vmem:[#allocation8 + $0x24c] ss:$24 sps:$4 sm:$0xff]  }
0x1bdf   : > { %7500 = vrot.lane.b32.xlu0 %v11440_v47, %s13803_s21  ;;  %v13180_v47 = vld [vmem:[#allocation8 + $0x38] ss:$24 sps:$4 sm:$0xff]  }
0x1be1   : > { %9775 = vmatpush1.bf16.msra.mxu0 %v13161_v31  ;;  %v13243_v31 = vld [vmem:[#allocation8 + $0x540] ss:$24 sps:$4 sm:$0xff]  }
0x1be2   : > { %9776 = vmatprep.subr.bf16.mxu0 %v13166_v0  ;;  %v13246_v0 = vld [vmem:[#allocation8 + $0x248] ss:$24 sps:$4 sm:$0xff]  }
0x1be3   : > { %7729 = vrot.lane.b32.xlu0 %v11441_v37, %s13803_s21  ;;  %v13185_v37 = vld [vmem:[#allocation8 + $0x364] ss:$24 sps:$4 sm:$0xff]  }
0x1be5   : > { %9777 = vmatpush1.bf16.msra.mxu0 %v13164_v41  ;;  %v13251_v41 = vld [vmem:[#allocation8 + $0x574] ss:$24 sps:$4 sm:$0xff]  }
0x1be6   : > { %9787 = vmatprep.subr.bf16.mxu0 %v13171_v36  ;;  %v13254_v36 = vld [vmem:[#allocation8 + $0x27c] ss:$24 sps:$4 sm:$0xff]  }
0x1c4a   : > { %v7895_v44 = vpop.xlane.xlu0 %7894 }
0x1c4b   : > { %v7896_v48 = vsub.f32 %v14399_v10, %v7895_v44  ;;  %v13172_v10 = vld [vmem:[#allocation8 + $0x8] ss:$24 sps:$4 sm:$0xff]  }
0x1c4c   : > { %v13222_v44 = vld [vmem:[#allocation8 + $0x188] ss:$24 sps:$4 sm:$0xff]  }
0x1c4d   : > { %v7897_v49 = vmul.f32 1.442695, %v7896_v48  ;;  %v13227_v48 = vld [vmem:[#allocation8 + $0x4b4] ss:$24 sps:$4 sm:$0xff]  }
0x1c4e   : > { %v7907_v50 = vpop.permute.xlu0 %7906 }
0x1c4f   : > { %13601 = vpow2.f32 %v7897_v49  ;;  %v7912_v54 = vsel %vm6647_vm4, %v7907_v50, 0  ;;  %v13230_v49 = vld [vmem:[#allocation8 + $0x1bc] ss:$24 sps:$4 sm:$0xff]   ;;  %v13225_v50 = vld [vmem:[#allocation8 + $0x4b0] ss:$24 sps:$4 sm:$0xff]  }
0x1c50   : > { %11630 = vmatpush3.bf16.msra.mxu1 %v7912_v54  ;;  %v13228_v54 = vld [vmem:[#allocation8 + $0x1b8] ss:$24 sps:$4 sm:$0xff]  }
0x1c51   : > { %9869 = vmatprep.subr.bf16.mxu1 %v13174_v53  ;;  %v13249_v53 = vld [vmem:[#allocation8 + $0x570] ss:$24 sps:$4 sm:$0xff]  }
0x1c52   : > { %v7043_v55 = vpop.permute.xlu0 %7042 }
0x1c53   : > { %7045 = vst.msk [vmem:[#allocation2 + $0x4] sm:$0xf] %vm6815_vm6, %v7043_v55  ;;  %v13233_v55 = vld [vmem:[#allocation8 + $0x4e4] ss:$24 sps:$4 sm:$0xff]  }
0x1c56   : > { %v7272_v28 = vpop.permute.xlu0 %7271 }
0x1c57   : > { %7274 = vst.msk [vmem:[#allocation2 + $0x8] sm:$0xf] %vm6815_vm6, %v7272_v28  ;;  %v13236_v28 = vld [vmem:[#allocation8 + $0x1ec] ss:$24 sps:$4 sm:$0xff]  }
0x1c59   : > { %v13602_v56 = vpop.eup %13601 }
0x1c5a   : > { %v7501_v27 = vpop.permute.xlu0 %7500  ;;  %v7899_v61 = vsel %vm6631_vm3, %v13602_v56, 0.0 }
0x1c5b   : > { %7503 = vst.msk [vmem:[#allocation2 + $0xc] sm:$0xf] %vm6815_vm6, %v7501_v27  ;;  %7900 = vadd.xlane.f32.xlu1 %v7899_v61  ;;  %v13234_v27 = vld [vmem:[#allocation8 + $0x1e8] ss:$24 sps:$4 sm:$0xff]   ;;  %v13239_v61 = vld [vmem:[#allocation8 + $0x514] ss:$24 sps:$4 sm:$0xff]  }
0x1c5e   : > { %v7730_v33 = vpop.permute.xlu0 %7729 }
0x1c5f   : > { %7732 = vst.msk [vmem:[#allocation2 + $0x10] sm:$0xf] %vm6815_vm6, %v7730_v33  ;;  %v13242_v33 = vld [vmem:[#allocation8 + $0x21c] ss:$24 sps:$4 sm:$0xff]  }
0x1c62   : > { %v14429_v5 = vld [vmem:[#allocation2 + $0x8] sm:$0xff] }
0x1c63   : > { %v14436_v57 = vcombine.high %v14429_v5, %v14429_v5 }
0x1c6c   : > { %6812 = vrot.lane.b32.xlu1 %v11437_v59, %s13803_s21  ;;  %v13237_v59 = vld [vmem:[#allocation8 + $0x510] ss:$24 sps:$4 sm:$0xff]  }
0x1ce8   : > { %v7901_v51 = vpop.xlane.xlu1 %7900 }
0x1ce9   : > { %13603 = vrcp.f32 %v7901_v51  ;;  %v13252_v51 = vld [vmem:[#allocation8 + $0x278] ss:$24 sps:$4 sm:$0xff]  }
0x1cec   : > { %v6813_v58 = vpop.permute.xlu1 %6812 }
0x1ced   : > { %6816 = vst.msk [vmem:[#allocation2] sm:$0xf] %vm6815_vm6, %v6813_v58  ;;  %v13257_v58 = vld [vmem:[#allocation8 + $0x5a4] ss:$24 sps:$4 sm:$0xff]  }
0x1cf3   : > { %v13604_v1 = vpop.eup %13603 }
0x1cf4   : > { %v7903_v2 = vmul.f32 %v13604_v1, %v13602_v56  ;;  %v7962_v3 = vld [vmem:[#allocation2] sm:$0xff]  ;;  %v13231_v56 = vld [vmem:[#allocation8 + $0x4e0] ss:$24 sps:$4 sm:$0xff]  }
0x1cf5   : > { %v14425_v26 = vcombine.low %v7962_v3, %v7962_v3  ;;  %v14427_v7 = vcombine.high %v7962_v3, %v7962_v3  ;;  %v13260_v1 = vld [vmem:[#allocation8 + $0x2ac] ss:$24 sps:$4 sm:$0xff]   ;;  %v13258_v3 = vld [vmem:[#allocation8 + $0x2a8] ss:$24 sps:$4 sm:$0xff]  }
0x1cf6   : > { %v7904_v12 = vpack.c.bf16 %v7903_v2, %v7903_v2  ;;  %v13255_v2 = vld [vmem:[#allocation8 + $0x5a0] ss:$24 sps:$4 sm:$0xff]  }
0x1cf7   : > { %9778 = vmatprep.mubr.bf16.mxu0 %v14427_v7 }
0x1cf8   : > { %11632 = vmatmul.mubr.msk.bf16.vlgmr.msra.gmra.mrb[112].mxu1 %vm6631_vm3, %v7904_v12  ;;  %9779 = vmatmul.mubr.bf16.vlgmr.msra.gmra.mrb[20].mxu0 %v14425_v26  ;;  %v13261_v12 = vld [vmem:[#allocation8 + $0x5d0] ss:$24 sps:$4 sm:$0xff]  }
0x1cf9   : > { %9788 = vmatpush1.bf16.msra.mxu0 %v13169_v9  ;;  %9870 = vmatpush1.bf16.msra.mxu1 %v13172_v10  ;;  %v13263_v9 = vld [vmem:[#allocation8 + $0x5d4] ss:$24 sps:$4 sm:$0xff]  }
0x1cfa   : > { %9819 = vmatprep.mubr.bf16.mxu0 %v14436_v57  ;;  %9901 = vmatprep.mubr.bf16.mxu1 %v14427_v7  ;;  %v13266_v10 = vld [vmem:[#allocation8 + $0x2dc] ss:$24 sps:$4 sm:$0xff]  }
0x1cfb   : > { %9789 = vmatprep.subr.bf16.mxu0 %v13179_v11  ;;  %9871 = vmatprep.subr.bf16.mxu1 %v13182_v35  ;;  %v13264_v11 = vld [vmem:[#allocation8 + $0x2d8] ss:$24 sps:$4 sm:$0xff]   ;;  %v13269_v35 = vld [vmem:[#allocation8 + $0x30c] ss:$24 sps:$4 sm:$0xff]  }
0x1cfd   : > { %9790 = vmatpush1.bf16.msra.mxu0 %v13177_v4  ;;  %9872 = vmatpush1.bf16.msra.mxu1 %v13180_v47  ;;  %v13267_v4 = vld [vmem:[#allocation8 + $0x308] ss:$24 sps:$4 sm:$0xff]   ;;  %v14442_v47 = vcombine.low %v14429_v5, %v14429_v5  ;;  %v13281_v5 = vld [vmem:[#allocation8 + $0x3cc] ss:$24 sps:$4 sm:$0xff]  }
0x1cfe   : > { %9791 = vmatprep.subr.bf16.mxu0 %v13185_v37  ;;  %9873 = vmatprep.subr.bf16.mxu1 %v13188_v39  ;;  %v13272_v37 = vld [vmem:[#allocation8 + $0x33c] ss:$24 sps:$4 sm:$0xff]   ;;  %v13270_v39 = vld [vmem:[#allocation8 + $0x338] ss:$24 sps:$4 sm:$0xff]  }
0x1d01   : > { %9792 = vmatpush1.bf16.msra.mxu0 %v13183_v13  ;;  %9874 = vmatpush1.bf16.msra.mxu1 %v13186_v14  ;;  %v13275_v13 = vld [vmem:[#allocation8 + $0x36c] ss:$24 sps:$4 sm:$0xff]   ;;  %v13273_v14 = vld [vmem:[#allocation8 + $0x368] ss:$24 sps:$4 sm:$0xff]  }
0x1d02   : > { %9793 = vmatprep.subr.bf16.mxu0 %v13191_v62  ;;  %9875 = vmatprep.subr.bf16.mxu1 %v13194_v15  ;;  %v13278_v62 = vld [vmem:[#allocation8 + $0x39c] ss:$24 sps:$4 sm:$0xff]   ;;  %v13276_v15 = vld [vmem:[#allocation8 + $0x398] ss:$24 sps:$4 sm:$0xff]  }
0x1d05   : > { %9794 = vmatpush1.bf16.msra.mxu0 %v13189_v63  ;;  %9876 = vmatpush1.bf16.msra.mxu1 %v13192_v17  ;;  %v13279_v63 = vld [vmem:[#allocation8 + $0x3c8] ss:$24 sps:$4 sm:$0xff]   ;;  %v13284_v17 = vld [vmem:[#allocation8 + $0x3fc] ss:$24 sps:$4 sm:$0xff]  }
0x1d06   : > { %9795 = vmatprep.subr.bf16.mxu0 %v13197_v18  ;;  %9877 = vmatprep.subr.bf16.mxu1 %v13200_v46  ;;  %v13282_v18 = vld [vmem:[#allocation8 + $0x3f8] ss:$24 sps:$4 sm:$0xff]   ;;  %v13287_v46 = vld [vmem:[#allocation8 + $0x42c] ss:$24 sps:$4 sm:$0xff]  }
0x1d09   : > { %9796 = vmatpush1.bf16.msra.mxu0 %v13195_v43  ;;  %9878 = vmatpush1.bf16.msra.mxu1 %v13198_v19  ;;  %v13285_v43 = vld [vmem:[#allocation8 + $0x428] ss:$24 sps:$4 sm:$0xff]   ;;  %v13290_v19 = vld [vmem:[#allocation8 + $0x45c] ss:$24 sps:$4 sm:$0xff]  }
0x1d0a   : > { %9797 = vmatprep.subr.bf16.mxu0 %v13203_v20  ;;  %9879 = vmatprep.subr.bf16.mxu1 %v13206_v21  ;;  %v13315_v20 = vld [vmem:[#allocation8 + $0x600] ss:$24 sps:$4 sm:$0xff]   ;;  %v13317_v21 = vld [vmem:[#allocation8 + $0x604] ss:$24 sps:$4 sm:$0xff]  }
0x1d0d   : > { %9798 = vmatpush1.bf16.msra.mxu0 %v13201_v22  ;;  %9880 = vmatpush1.bf16.msra.mxu1 %v13204_v23  ;;  %v13323_v22 = vld [vmem:[#allocation8 + $0x634] ss:$24 sps:$4 sm:$0xff]   ;;  %v13288_v23 = vld [vmem:[#allocation8 + $0x458] ss:$24 sps:$4 sm:$0xff]  }
0x1d0e   : > { %9799 = vmatprep.subr.bf16.mxu0 %v13209_v24  ;;  %9881 = vmatprep.subr.bf16.mxu1 %v13212_v25  ;;  %v13321_v24 = vld [vmem:[#allocation8 + $0x630] ss:$24 sps:$4 sm:$0xff]   ;;  %v13293_v25 = vld [vmem:[#allocation8 + $0x48c] ss:$24 sps:$4 sm:$0xff]  }
0x1d11   : > { %9800 = vmatpush1.bf16.msra.mxu0 %v13207_v29  ;;  %9882 = vmatpush1.bf16.msra.mxu1 %v13210_v30  ;;  %v13329_v29 = vld [vmem:[#allocation8 + $0x664] ss:$24 sps:$4 sm:$0xff]   ;;  %v13291_v30 = vld [vmem:[#allocation8 + $0x488] ss:$24 sps:$4 sm:$0xff]  }
0x1d12   : > { %9801 = vmatprep.subr.bf16.mxu0 %v13215_v8  ;;  %9883 = vmatprep.subr.bf16.mxu1 %v13218_v32  ;;  %v13327_v8 = vld [vmem:[#allocation8 + $0x660] ss:$24 sps:$4 sm:$0xff]   ;;  %v13296_v32 = vld [vmem:[#allocation8 + $0x4bc] ss:$24 sps:$4 sm:$0xff]  }
0x1d15   : > { %9802 = vmatpush1.bf16.msra.mxu0 %v13213_v52  ;;  %9884 = vmatpush1.bf16.msra.mxu1 %v13216_v38  ;;  %v13335_v52 = vld [vmem:[#allocation8 + $0x694] ss:$24 sps:$4 sm:$0xff]   ;;  %v13294_v38 = vld [vmem:[#allocation8 + $0x4b8] ss:$24 sps:$4 sm:$0xff]  }
0x1d16   : > { %9803 = vmatprep.subr.bf16.mxu0 %v13221_v40  ;;  %9885 = vmatprep.subr.bf16.mxu1 %v13224_v6  ;;  %v13333_v40 = vld [vmem:[#allocation8 + $0x690] ss:$24 sps:$4 sm:$0xff]   ;;  %v13299_v6 = vld [vmem:[#allocation8 + $0x4ec] ss:$24 sps:$4 sm:$0xff]  }
0x1d19   : > { %9804 = vmatpush1.bf16.msra.mxu0 %v13219_v42  ;;  %9886 = vmatpush1.bf16.msra.mxu1 %v13222_v44  ;;  %v13341_v42 = vld [vmem:[#allocation8 + $0x6c4] ss:$24 sps:$4 sm:$0xff]   ;;  %v13297_v44 = vld [vmem:[#allocation8 + $0x4e8] ss:$24 sps:$4 sm:$0xff]  }
0x1d1a   : > { %9805 = vmatprep.subr.bf16.mxu0 %v13227_v48  ;;  %9887 = vmatprep.subr.bf16.mxu1 %v13230_v49  ;;  %v13339_v48 = vld [vmem:[#allocation8 + $0x6c0] ss:$24 sps:$4 sm:$0xff]   ;;  %v13302_v49 = vld [vmem:[#allocation8 + $0x51c] ss:$24 sps:$4 sm:$0xff]  }
0x1d1d   : > { %9806 = vmatpush1.bf16.msra.mxu0 %v13225_v50  ;;  %9888 = vmatpush1.bf16.msra.mxu1 %v13228_v54  ;;  %v13347_v50 = vld [vmem:[#allocation8 + $0x6f4] ss:$24 sps:$4 sm:$0xff]   ;;  %v13300_v54 = vld [vmem:[#allocation8 + $0x518] ss:$24 sps:$4 sm:$0xff]  }
0x1d1e   : > { %9807 = vmatprep.subr.bf16.mxu0 %v13233_v55  ;;  %9889 = vmatprep.subr.bf16.mxu1 %v13236_v28  ;;  %v13345_v55 = vld [vmem:[#allocation8 + $0x6f0] ss:$24 sps:$4 sm:$0xff]   ;;  %v13305_v28 = vld [vmem:[#allocation8 + $0x54c] ss:$24 sps:$4 sm:$0xff]  }
0x1d21   : > { %9808 = vmatpush1.bf16.msra.mxu0 %v13231_v56  ;;  %9890 = vmatpush1.bf16.msra.mxu1 %v13234_v27  ;;  %v13353_v56 = vld [vmem:[#allocation8 + $0x724] ss:$24 sps:$4 sm:$0xff]   ;;  %v13303_v27 = vld [vmem:[#allocation8 + $0x548] ss:$24 sps:$4 sm:$0xff]  }
0x1d22   : > { %9809 = vmatprep.subr.bf16.mxu0 %v13239_v61  ;;  %9891 = vmatprep.subr.bf16.mxu1 %v13242_v33  ;;  %v13351_v61 = vld [vmem:[#allocation8 + $0x720] ss:$24 sps:$4 sm:$0xff]   ;;  %v13308_v33 = vld [vmem:[#allocation8 + $0x57c] ss:$24 sps:$4 sm:$0xff]  }
0x1d25   : > { %9810 = vmatpush1.bf16.msra.mxu0 %v13237_v59  ;;  %9892 = vmatpush1.bf16.msra.mxu1 %v13240_v34  ;;  %v13359_v59 = vld [vmem:[#allocation8 + $0x754] ss:$24 sps:$4 sm:$0xff]   ;;  %v13306_v34 = vld [vmem:[#allocation8 + $0x578] ss:$24 sps:$4 sm:$0xff]  }
0x1d26   : > { %9811 = vmatprep.subr.bf16.mxu0 %v13245_v60  ;;  %9893 = vmatprep.subr.bf16.mxu1 %v13248_v16  ;;  %v13357_v60 = vld [vmem:[#allocation8 + $0x750] ss:$24 sps:$4 sm:$0xff]   ;;  %v13311_v16 = vld [vmem:[#allocation8 + $0x5ac] ss:$24 sps:$4 sm:$0xff]  }
0x1d29   : > { %9812 = vmatpush1.bf16.msra.mxu0 %v13243_v31  ;;  %9894 = vmatpush1.bf16.msra.mxu1 %v13246_v0  ;;  %v13365_v31 = vld [vmem:[#allocation8 + $0x784] ss:$24 sps:$4 sm:$0xff]   ;;  %v13309_v0 = vld [vmem:[#allocation8 + $0x5a8] ss:$24 sps:$4 sm:$0xff]  }
0x1d2a   : > { %9813 = vmatprep.subr.bf16.mxu0 %v13251_v41  ;;  %9895 = vmatprep.subr.bf16.mxu1 %v13254_v36  ;;  %v13363_v41 = vld [vmem:[#allocation8 + $0x780] ss:$24 sps:$4 sm:$0xff]   ;;  %v13314_v36 = vld [vmem:[#allocation8 + $0x5dc] ss:$24 sps:$4 sm:$0xff]  }
0x1d2d   : > { %9814 = vmatpush1.bf16.msra.mxu0 %v13249_v53  ;;  %9896 = vmatpush1.bf16.msra.mxu1 %v13252_v51  ;;  %v13371_v53 = vld [vmem:[#allocation8 + $0x7b4] ss:$24 sps:$4 sm:$0xff]   ;;  %v13312_v51 = vld [vmem:[#allocation8 + $0x5d8] ss:$24 sps:$4 sm:$0xff]  }
0x1d2e   : > { %9815 = vmatprep.subr.bf16.mxu0 %v13257_v58  ;;  %9897 = vmatprep.subr.bf16.mxu1 %v13260_v1  ;;  %v13369_v58 = vld [vmem:[#allocation8 + $0x7b0] ss:$24 sps:$4 sm:$0xff]   ;;  %v13320_v1 = vld [vmem:[#allocation8 + $0x60c] ss:$24 sps:$4 sm:$0xff]  }
0x1d31   : > { %9816 = vmatpush1.bf16.msra.mxu0 %v13255_v2  ;;  %9898 = vmatpush1.bf16.msra.mxu1 %v13258_v3  ;;  %v13377_v2 = vld [vmem:[#allocation8 + $0x7e4] ss:$24 sps:$4 sm:$0xff]   ;;  %v13318_v3 = vld [vmem:[#allocation8 + $0x608] ss:$24 sps:$4 sm:$0xff]  }
0x1d32   : > { %9817 = vmatprep.subr.bf16.mxu0 %v13263_v9  ;;  %9899 = vmatprep.subr.bf16.mxu1 %v13266_v10  ;;  %v13375_v9 = vld [vmem:[#allocation8 + $0x7e0] ss:$24 sps:$4 sm:$0xff]   ;;  %v13326_v10 = vld [vmem:[#allocation8 + $0x63c] ss:$24 sps:$4 sm:$0xff]  }
0x1d35   : > { %9818 = vmatpush1.bf16.msra.mxu0 %v13261_v12  ;;  %9900 = vmatpush1.bf16.msra.mxu1 %v13264_v11  ;;  %v13383_v12 = vld [vmem:[#allocation8 + $0x814] ss:$24 sps:$4 sm:$0xff]   ;;  %v13324_v11 = vld [vmem:[#allocation8 + $0x638] ss:$24 sps:$4 sm:$0xff]  }
0x1d36   : > { %9910 = vmatprep.subr.bf16.mxu1 %v13269_v35  ;;  %9828 = vmatprep.subr.bf16.mxu0 %v13317_v21  ;;  %v13381_v35 = vld [vmem:[#allocation8 + $0x810] ss:$24 sps:$4 sm:$0xff]  }
0x1d37   : > { %v13360_v21 = vld [vmem:[#allocation8 + $0x758] ss:$24 sps:$4 sm:$0xff]  }
0x1d38   : > { %9820 = vmatmul.mubr.bf16.vlgmr.msra.gmra.mrb[20].mxu0 %v14442_v47  ;;  %9902 = vmatmul.mubr.bf16.vlgmr.msra.gmra.mrb[116].mxu1 %v14425_v26 }
0x1d39   : > { %9911 = vmatpush1.bf16.msra.mxu1 %v13267_v4  ;;  %9942 = vmatprep.mubr.bf16.mxu1 %v14436_v57  ;;  %v13332_v4 = vld [vmem:[#allocation8 + $0x66c] ss:$24 sps:$4 sm:$0xff]  }
0x1d3a   : > { %9912 = vmatprep.subr.bf16.mxu1 %v13272_v37  ;;  %9829 = vmatpush1.bf16.msra.mxu0 %v13315_v20  ;;  %v13389_v37 = vld [vmem:[#allocation8 + $0x844] ss:$24 sps:$4 sm:$0xff]  }
0x1d3b   : > { %9830 = vmatprep.subr.bf16.mxu0 %v13323_v22  ;;  %v13362_v20 = vld [vmem:[#allocation8 + $0x75c] ss:$24 sps:$4 sm:$0xff]   ;;  %v13368_v22 = vld [vmem:[#allocation8 + $0x78c] ss:$24 sps:$4 sm:$0xff]  }
0x1d3d   : > { %9913 = vmatpush1.bf16.msra.mxu1 %v13270_v39  ;;  %v13330_v39 = vld [vmem:[#allocation8 + $0x668] ss:$24 sps:$4 sm:$0xff]  }
0x1d3e   : > { %9914 = vmatprep.subr.bf16.mxu1 %v13275_v13  ;;  %9831 = vmatpush1.bf16.msra.mxu0 %v13321_v24  ;;  %v13387_v13 = vld [vmem:[#allocation8 + $0x840] ss:$24 sps:$4 sm:$0xff]   ;;  %v13374_v24 = vld [vmem:[#allocation8 + $0x7bc] ss:$24 sps:$4 sm:$0xff]  }
0x1d3f   : > { %9832 = vmatprep.subr.bf16.mxu0 %v13329_v29  ;;  %v13380_v29 = vld [vmem:[#allocation8 + $0x7ec] ss:$24 sps:$4 sm:$0xff]  }
0x1d41   : > { %9915 = vmatpush1.bf16.msra.mxu1 %v13273_v14  ;;  %v13338_v14 = vld [vmem:[#allocation8 + $0x69c] ss:$24 sps:$4 sm:$0xff]  }
0x1d42   : > { %9916 = vmatprep.subr.bf16.mxu1 %v13278_v62  ;;  %9833 = vmatpush1.bf16.msra.mxu0 %v13327_v8  ;;  %v13395_v62 = vld [vmem:[#allocation8 + $0x874] ss:$24 sps:$4 sm:$0xff]  }
0x1d43   : > { %9834 = vmatprep.subr.bf16.mxu0 %v13335_v52  ;;  %v13386_v8 = vld [vmem:[#allocation8 + $0x81c] ss:$24 sps:$4 sm:$0xff]   ;;  %v13392_v52 = vld [vmem:[#allocation8 + $0x84c] ss:$24 sps:$4 sm:$0xff]  }
0x1d45   : > { %9917 = vmatpush1.bf16.msra.mxu1 %v13276_v15  ;;  %v13336_v15 = vld [vmem:[#allocation8 + $0x698] ss:$24 sps:$4 sm:$0xff]  }
0x1d46   : > { %9918 = vmatprep.subr.bf16.mxu1 %v13281_v5  ;;  %9835 = vmatpush1.bf16.msra.mxu0 %v13333_v40  ;;  %v13393_v5 = vld [vmem:[#allocation8 + $0x870] ss:$24 sps:$4 sm:$0xff]   ;;  %v13398_v40 = vld [vmem:[#allocation8 + $0x87c] ss:$24 sps:$4 sm:$0xff]  }
0x1d47   : > { %9836 = vmatprep.subr.bf16.mxu0 %v13341_v42  ;;  %v13399_v42 = vld [vmem:[#allocation8 + $0x8a0] ss:$24 sps:$4 sm:$0xff]  }
0x1d49   : > { %9919 = vmatpush1.bf16.msra.mxu1 %v13279_v63  ;;  %v13344_v63 = vld [vmem:[#allocation8 + $0x6cc] ss:$24 sps:$4 sm:$0xff]  }
0x1d4a   : > { %9920 = vmatprep.subr.bf16.mxu1 %v13284_v17  ;;  %9837 = vmatpush1.bf16.msra.mxu0 %v13339_v48  ;;  %v13342_v17 = vld [vmem:[#allocation8 + $0x6c8] ss:$24 sps:$4 sm:$0xff]  }
0x1d4b   : > { %9838 = vmatprep.subr.bf16.mxu0 %v13347_v50  ;;  %v13402_v48 = vld [vmem:[#allocation8 + $0x8a8] ss:$24 sps:$4 sm:$0xff]   ;;  %v13407_v50 = vld [vmem:[#allocation8 + $0x8d4] ss:$24 sps:$4 sm:$0xff]  }
0x1d4d   : > { %9921 = vmatpush1.bf16.msra.mxu1 %v13282_v18  ;;  %v13350_v18 = vld [vmem:[#allocation8 + $0x6fc] ss:$24 sps:$4 sm:$0xff]  }
0x1d4e   : > { %9922 = vmatprep.subr.bf16.mxu1 %v13287_v46  ;;  %9839 = vmatpush1.bf16.msra.mxu0 %v13345_v55  ;;  %v13348_v46 = vld [vmem:[#allocation8 + $0x6f8] ss:$24 sps:$4 sm:$0xff]  }
0x1d4f   : > { %9840 = vmatprep.subr.bf16.mxu0 %v13353_v56  ;;  %v13405_v55 = vld [vmem:[#allocation8 + $0x8d0] ss:$24 sps:$4 sm:$0xff]   ;;  %v13415_v56 = vld [vmem:[#allocation8 + $0x14] ss:$24 sps:$4 sm:$0xff]  }
0x1d51   : > { %9923 = vmatpush1.bf16.msra.mxu1 %v13285_v43  ;;  %v13356_v43 = vld [vmem:[#allocation8 + $0x72c] ss:$24 sps:$4 sm:$0xff]  }
0x1d52   : > { %9924 = vmatprep.subr.bf16.mxu1 %v13290_v19  ;;  %9841 = vmatpush1.bf16.msra.mxu0 %v13351_v61  ;;  %v13354_v19 = vld [vmem:[#allocation8 + $0x728] ss:$24 sps:$4 sm:$0xff]  }
0x1d53   : > { %9842 = vmatprep.subr.bf16.mxu0 %v13359_v59 }
0x1d55   : > { %9925 = vmatpush1.bf16.msra.mxu1 %v13288_v23  ;;  %v13366_v23 = vld [vmem:[#allocation8 + $0x788] ss:$24 sps:$4 sm:$0xff]  }
0x1d56   : > { %9926 = vmatprep.subr.bf16.mxu1 %v13293_v25  ;;  %9843 = vmatpush1.bf16.msra.mxu0 %v13357_v60  ;;  %v13372_v25 = vld [vmem:[#allocation8 + $0x7b8] ss:$24 sps:$4 sm:$0xff]  }
0x1d57   : > { %9844 = vmatprep.subr.bf16.mxu0 %v13365_v31 }
0x1d59   : > { %9927 = vmatpush1.bf16.msra.mxu1 %v13291_v30  ;;  %v13378_v30 = vld [vmem:[#allocation8 + $0x7e8] ss:$24 sps:$4 sm:$0xff]  }
0x1d5a   : > { %9928 = vmatprep.subr.bf16.mxu1 %v13296_v32  ;;  %9845 = vmatpush1.bf16.msra.mxu0 %v13363_v41  ;;  %v13384_v32 = vld [vmem:[#allocation8 + $0x818] ss:$24 sps:$4 sm:$0xff]  }
0x1d5b   : > { %9846 = vmatprep.subr.bf16.mxu0 %v13371_v53  ;;  %v13413_v41 = vld [vmem:[#allocation8 + $0x10] ss:$24 sps:$4 sm:$0xff]   ;;  %v13416_v53 = vld [vmem:[#allocation8 + $0x40] ss:$24 sps:$4 sm:$0xff]  }
0x1d5d   : > { %9929 = vmatpush1.bf16.msra.mxu1 %v13294_v38  ;;  %v13390_v38 = vld [vmem:[#allocation8 + $0x848] ss:$24 sps:$4 sm:$0xff]  }
0x1d5e   : > { %9930 = vmatprep.subr.bf16.mxu1 %v13299_v6  ;;  %9847 = vmatpush1.bf16.msra.mxu0 %v13369_v58  ;;  %v13396_v6 = vld [vmem:[#allocation8 + $0x878] ss:$24 sps:$4 sm:$0xff]  }
0x1d5f   : > { %9848 = vmatprep.subr.bf16.mxu0 %v13377_v2  ;;  %v13419_v58 = vld [vmem:[#allocation8 + $0x70] ss:$24 sps:$4 sm:$0xff]   ;;  %v13422_v2 = vld [vmem:[#allocation8 + $0xa0] ss:$24 sps:$4 sm:$0xff]  }
0x1d61   : > { %9931 = vmatpush1.bf16.msra.mxu1 %v13297_v44  ;;  %v13401_v44 = vld [vmem:[#allocation8 + $0x8a4] ss:$24 sps:$4 sm:$0xff]  }
0x1d62   : > { %9932 = vmatprep.subr.bf16.mxu1 %v13302_v49  ;;  %9849 = vmatpush1.bf16.msra.mxu0 %v13375_v9  ;;  %v13404_v49 = vld [vmem:[#allocation8 + $0x8ac] ss:$24 sps:$4 sm:$0xff]   ;;  %v13425_v9 = vld [vmem:[#allocation8 + $0xd0] ss:$24 sps:$4 sm:$0xff]  }
0x1d63   : > { %9850 = vmatprep.subr.bf16.mxu0 %v13383_v12  ;;  %v13428_v12 = vld [vmem:[#allocation8 + $0x100] ss:$24 sps:$4 sm:$0xff]  }
0x1d65   : > { %9933 = vmatpush1.bf16.msra.mxu1 %v13300_v54  ;;  %v13410_v54 = vld [vmem:[#allocation8 + $0x8dc] ss:$24 sps:$4 sm:$0xff]  }
0x1d66   : > { %9934 = vmatprep.subr.bf16.mxu1 %v13305_v28  ;;  %9851 = vmatpush1.bf16.msra.mxu0 %v13381_v35  ;;  %v13408_v28 = vld [vmem:[#allocation8 + $0x8d8] ss:$24 sps:$4 sm:$0xff]   ;;  %v13436_v35 = vld [vmem:[#allocation8 + $0x164] ss:$24 sps:$4 sm:$0xff]  }
0x1d67   : > { %9852 = vmatprep.subr.bf16.mxu0 %v13389_v37  ;;  %v13439_v37 = vld [vmem:[#allocation8 + $0x194] ss:$24 sps:$4 sm:$0xff]  }
0x1d69   : > { %9935 = vmatpush1.bf16.msra.mxu1 %v13303_v27 }
0x1d6a   : > { %9936 = vmatprep.subr.bf16.mxu1 %v13308_v33  ;;  %9853 = vmatpush1.bf16.msra.mxu0 %v13387_v13  ;;  %v13442_v13 = vld [vmem:[#allocation8 + $0x1c4] ss:$24 sps:$4 sm:$0xff]  }
0x1d6b   : > { %9854 = vmatprep.subr.bf16.mxu0 %v13395_v62  ;;  %v13445_v62 = vld [vmem:[#allocation8 + $0x1f4] ss:$24 sps:$4 sm:$0xff]  }
0x1d6d   : > { %9937 = vmatpush1.bf16.msra.mxu1 %v13306_v34 }
0x1d6e   : > { %9938 = vmatprep.subr.bf16.mxu1 %v13311_v16  ;;  %9855 = vmatpush1.bf16.msra.mxu0 %v13393_v5  ;;  %v13448_v5 = vld [vmem:[#allocation8 + $0x224] ss:$24 sps:$4 sm:$0xff]  }
0x1d6f   : > { %9856 = vmatprep.subr.bf16.mxu0 %v13401_v44  ;;  %v13484_v44 = vld [vmem:[#allocation8 + $0x464] ss:$24 sps:$4 sm:$0xff]  }
0x1d71   : > { %9939 = vmatpush1.bf16.msra.mxu1 %v13309_v0 }
0x1d72   : > { %9940 = vmatprep.subr.bf16.mxu1 %v13314_v36  ;;  %9857 = vmatpush1.bf16.msra.mxu0 %v13399_v42  ;;  %v13418_v36 = vld [vmem:[#allocation8 + $0x44] ss:$24 sps:$4 sm:$0xff]   ;;  %v13481_v42 = vld [vmem:[#allocation8 + $0x434] ss:$24 sps:$4 sm:$0xff]  }
0x1d73   : > { %9858 = vmatprep.subr.bf16.mxu0 %v13407_v50  ;;  %v13485_v50 = vld [vmem:[#allocation8 + $0x490] ss:$24 sps:$4 sm:$0xff]  }
0x1d75   : > { %9941 = vmatpush1.bf16.msra.mxu1 %v13312_v51  ;;  %v13421_v51 = vld [vmem:[#allocation8 + $0x74] ss:$24 sps:$4 sm:$0xff]  }
0x1d76   : > { %9951 = vmatprep.subr.bf16.mxu1 %v13320_v1  ;;  %9859 = vmatpush1.bf16.msra.mxu0 %v13405_v55  ;;  %v13424_v1 = vld [vmem:[#allocation8 + $0xa4] ss:$24 sps:$4 sm:$0xff]   ;;  %v13488_v55 = vld [vmem:[#allocation8 + $0x4c0] ss:$24 sps:$4 sm:$0xff]  }
0x1d77   : > { %9992 = vmatprep.subr.bf16.mxu0 %v13415_v56  ;;  %v13491_v56 = vld [vmem:[#allocation8 + $0x4f0] ss:$24 sps:$4 sm:$0xff]  }
0x1d78   : > { %9943 = vmatmul.mubr.bf16.vlgmr.msra.gmra.mrb[116].mxu1 %v14442_v47 }
0x1d79   : > { %9952 = vmatpush1.bf16.msra.mxu1 %v13318_v3  ;;  %v13427_v3 = vld [vmem:[#allocation8 + $0xd4] ss:$24 sps:$4 sm:$0xff]  }
0x1d7a   : > { %9953 = vmatprep.subr.bf16.mxu1 %v13326_v10  ;;  %v13430_v10 = vld [vmem:[#allocation8 + $0x104] ss:$24 sps:$4 sm:$0xff]  }
0x1d7d   : > { %9954 = vmatpush1.bf16.msra.mxu1 %v13324_v11  ;;  %v13433_v11 = vld [vmem:[#allocation8 + $0x134] ss:$24 sps:$4 sm:$0xff]  }
0x1d7e   : > { %9955 = vmatprep.subr.bf16.mxu1 %v13332_v4  ;;  %v13434_v4 = vld [vmem:[#allocation8 + $0x160] ss:$24 sps:$4 sm:$0xff]  }
0x1d81   : > { %9956 = vmatpush1.bf16.msra.mxu1 %v13330_v39  ;;  %v13437_v39 = vld [vmem:[#allocation8 + $0x190] ss:$24 sps:$4 sm:$0xff]  }
0x1d82   : > { %9957 = vmatprep.subr.bf16.mxu1 %v13338_v14  ;;  %v13440_v14 = vld [vmem:[#allocation8 + $0x1c0] ss:$24 sps:$4 sm:$0xff]  }
0x1d85   : > { %9958 = vmatpush1.bf16.msra.mxu1 %v13336_v15  ;;  %v13443_v15 = vld [vmem:[#allocation8 + $0x1f0] ss:$24 sps:$4 sm:$0xff]  }
0x1d86   : > { %9959 = vmatprep.subr.bf16.mxu1 %v13344_v63  ;;  %v13446_v63 = vld [vmem:[#allocation8 + $0x220] ss:$24 sps:$4 sm:$0xff]  }
0x1d89   : > { %9960 = vmatpush1.bf16.msra.mxu1 %v13342_v17  ;;  %v13451_v17 = vld [vmem:[#allocation8 + $0x254] ss:$24 sps:$4 sm:$0xff]  }
0x1d8a   : > { %9961 = vmatprep.subr.bf16.mxu1 %v13350_v18  ;;  %v13449_v18 = vld [vmem:[#allocation8 + $0x250] ss:$24 sps:$4 sm:$0xff]  }
0x1d8d   : > { %9962 = vmatpush1.bf16.msra.mxu1 %v13348_v46  ;;  %v13454_v46 = vld [vmem:[#allocation8 + $0x284] ss:$24 sps:$4 sm:$0xff]  }
0x1d8e   : > { %9963 = vmatprep.subr.bf16.mxu1 %v13356_v43  ;;  %v13452_v43 = vld [vmem:[#allocation8 + $0x280] ss:$24 sps:$4 sm:$0xff]  }
0x1d91   : > { %9964 = vmatpush1.bf16.msra.mxu1 %v13354_v19  ;;  %v13457_v19 = vld [vmem:[#allocation8 + $0x2b4] ss:$24 sps:$4 sm:$0xff]  }
0x1d92   : > { %9965 = vmatprep.subr.bf16.mxu1 %v13362_v20  ;;  %v13455_v20 = vld [vmem:[#allocation8 + $0x2b0] ss:$24 sps:$4 sm:$0xff]  }
0x1d95   : > { %9966 = vmatpush1.bf16.msra.mxu1 %v13360_v21  ;;  %v13460_v21 = vld [vmem:[#allocation8 + $0x2e4] ss:$24 sps:$4 sm:$0xff]  }
0x1d96   : > { %9967 = vmatprep.subr.bf16.mxu1 %v13368_v22  ;;  %v13458_v22 = vld [vmem:[#allocation8 + $0x2e0] ss:$24 sps:$4 sm:$0xff]  }
0x1d99   : > { %9968 = vmatpush1.bf16.msra.mxu1 %v13366_v23  ;;  %v13463_v23 = vld [vmem:[#allocation8 + $0x314] ss:$24 sps:$4 sm:$0xff]  }
0x1d9a   : > { %9969 = vmatprep.subr.bf16.mxu1 %v13374_v24  ;;  %v13461_v24 = vld [vmem:[#allocation8 + $0x310] ss:$24 sps:$4 sm:$0xff]  }
0x1d9d   : > { %9970 = vmatpush1.bf16.msra.mxu1 %v13372_v25  ;;  %v13466_v25 = vld [vmem:[#allocation8 + $0x344] ss:$24 sps:$4 sm:$0xff]  }
0x1d9e   : > { %9971 = vmatprep.subr.bf16.mxu1 %v13380_v29  ;;  %v13464_v29 = vld [vmem:[#allocation8 + $0x340] ss:$24 sps:$4 sm:$0xff]  }
0x1da1   : > { %9972 = vmatpush1.bf16.msra.mxu1 %v13378_v30  ;;  %v13469_v30 = vld [vmem:[#allocation8 + $0x374] ss:$24 sps:$4 sm:$0xff]  }
0x1da2   : > { %9973 = vmatprep.subr.bf16.mxu1 %v13386_v8  ;;  %v13467_v8 = vld [vmem:[#allocation8 + $0x370] ss:$24 sps:$4 sm:$0xff]  }
0x1da5   : > { %9974 = vmatpush1.bf16.msra.mxu1 %v13384_v32  ;;  %v13472_v32 = vld [vmem:[#allocation8 + $0x3a4] ss:$24 sps:$4 sm:$0xff]  }
0x1da6   : > { %9975 = vmatprep.subr.bf16.mxu1 %v13392_v52  ;;  %v13470_v52 = vld [vmem:[#allocation8 + $0x3a0] ss:$24 sps:$4 sm:$0xff]  }
0x1da9   : > { %9976 = vmatpush1.bf16.msra.mxu1 %v13390_v38  ;;  %v13475_v38 = vld [vmem:[#allocation8 + $0x3d4] ss:$24 sps:$4 sm:$0xff]  }
0x1daa   : > { %9977 = vmatprep.subr.bf16.mxu1 %v13398_v40  ;;  %v13473_v40 = vld [vmem:[#allocation8 + $0x3d0] ss:$24 sps:$4 sm:$0xff]  }
0x1dad   : > { %9978 = vmatpush1.bf16.msra.mxu1 %v13396_v6  ;;  %v13478_v6 = vld [vmem:[#allocation8 + $0x404] ss:$24 sps:$4 sm:$0xff]  }
0x1dae   : > { %9979 = vmatprep.subr.bf16.mxu1 %v13404_v49  ;;  %v13487_v49 = vld [vmem:[#allocation8 + $0x494] ss:$24 sps:$4 sm:$0xff]  }
0x1db1   : > { %9980 = vmatpush1.bf16.msra.mxu1 %v13402_v48  ;;  %v13482_v48 = vld [vmem:[#allocation8 + $0x460] ss:$24 sps:$4 sm:$0xff]  }
0x1db2   : > { %9981 = vmatprep.subr.bf16.mxu1 %v13410_v54  ;;  %v13490_v54 = vld [vmem:[#allocation8 + $0x4c4] ss:$24 sps:$4 sm:$0xff]  }
0x1db5   : > { %9982 = vmatpush1.bf16.msra.mxu1 %v13408_v28  ;;  %v13493_v28 = vld [vmem:[#allocation8 + $0x4f4] ss:$24 sps:$4 sm:$0xff]  }
0x1dcb   : > { %v7948_v27 = vpop.f32.mrb[112].mxu1 }
0x1dcc   : > { %v11442_v61 = vpack.c.bf16 %v7948_v27, %v7948_v27  ;;  %v11633_v33 = vpop.f32.mrb[113].mxu1  ;;  %v13496_v27 = vld [vmem:[#allocation8 + $0x524] ss:$24 sps:$4 sm:$0xff]  }
0x1dcd   : > { %v7951_v59 = vpop.f32.mrb[114].mxu1  ;;  %v13499_v33 = vld [vmem:[#allocation8 + $0x554] ss:$24 sps:$4 sm:$0xff]  }
0x1dce   : > { %7958 = vrot.lane.b32.xlu1 %v11442_v61, %s13803_s21  ;;  %v11634_v34 = vpop.f32.mrb[115].mxu1  ;;  %v13494_v61 = vld [vmem:[#allocation8 + $0x520] ss:$24 sps:$4 sm:$0xff]   ;;  %v13497_v59 = vld [vmem:[#allocation8 + $0x550] ss:$24 sps:$4 sm:$0xff]  }
0x1dcf   : > { %v13502_v34 = vld [vmem:[#allocation8 + $0x584] ss:$24 sps:$4 sm:$0xff]  }
0x1e40   : > { %v7959_v60 = vpop.permute.xlu1 %7958 }
0x1e41   : > { %7961 = vst.msk [vmem:[#allocation2 + $0x14] sm:$0xf] %vm6815_vm6, %v7959_v60  ;;  %v13500_v60 = vld [vmem:[#allocation8 + $0x580] ss:$24 sps:$4 sm:$0xff]  }
0x1e48   : > { %v7964_v16 = vld [vmem:[#allocation2 + $0x10] sm:$0xff] }
0x1e49   : > { %v14450_v31 = vcombine.low %v7964_v16, %v7964_v16  ;;  %v14452_v0 = vcombine.high %v7964_v16, %v7964_v16  ;;  %v13505_v16 = vld [vmem:[#allocation8 + $0x5b4] ss:$24 sps:$4 sm:$0xff]  }
0x1e4b   : > { %9860 = vmatprep.mubr.bf16.mxu0 %v14452_v0  ;;  %9983 = vmatprep.mubr.bf16.mxu1 %v14452_v0 }
0x1e4c   : > { %9861 = vmatmul.mubr.bf16.vlgmr.msra.gmra.mrb[20].mxu0 %v14450_v31  ;;  %9984 = vmatmul.mubr.bf16.vlgmr.msra.gmra.mrb[116].mxu1 %v14450_v31 }
0x1e4d   : > { %9993 = vmatpush1.bf16.msra.mxu0 %v13413_v41  ;;  %10024 = vmatprep.mubr.bf16.mxu0 %v14427_v7  ;;  %v13431_v7 = vld [vmem:[#allocation8 + $0x130] ss:$24 sps:$4 sm:$0xff]  }
0x1e4e   : > { %9994 = vmatprep.subr.bf16.mxu0 %v13418_v36  ;;  %v13503_v41 = vld [vmem:[#allocation8 + $0x5b0] ss:$24 sps:$4 sm:$0xff]   ;;  %v13508_v36 = vld [vmem:[#allocation8 + $0x5e4] ss:$24 sps:$4 sm:$0xff]  }
0x1e51   : > { %9995 = vmatpush1.bf16.msra.mxu0 %v13416_v53  ;;  %v13506_v53 = vld [vmem:[#allocation8 + $0x5e0] ss:$24 sps:$4 sm:$0xff]  }
0x1e52   : > { %9996 = vmatprep.subr.bf16.mxu0 %v13421_v51  ;;  %v13511_v51 = vld [vmem:[#allocation8 + $0x614] ss:$24 sps:$4 sm:$0xff]  }
0x1e55   : > { %9997 = vmatpush1.bf16.msra.mxu0 %v13419_v58  ;;  %v13509_v58 = vld [vmem:[#allocation8 + $0x610] ss:$24 sps:$4 sm:$0xff]  }
0x1e56   : > { %9998 = vmatprep.subr.bf16.mxu0 %v13424_v1  ;;  %v13514_v1 = vld [vmem:[#allocation8 + $0x644] ss:$24 sps:$4 sm:$0xff]  }
0x1e59   : > { %9999 = vmatpush1.bf16.msra.mxu0 %v13422_v2  ;;  %v13512_v2 = vld [vmem:[#allocation8 + $0x640] ss:$24 sps:$4 sm:$0xff]  }
0x1e5a   : > { %10000 = vmatprep.subr.bf16.mxu0 %v13427_v3  ;;  %v13517_v3 = vld [vmem:[#allocation8 + $0x674] ss:$24 sps:$4 sm:$0xff]  }
0x1e5d   : > { %10001 = vmatpush1.bf16.msra.mxu0 %v13425_v9  ;;  %v13515_v9 = vld [vmem:[#allocation8 + $0x670] ss:$24 sps:$4 sm:$0xff]  }
0x1e5e   : > { %10002 = vmatprep.subr.bf16.mxu0 %v13430_v10  ;;  %v13520_v10 = vld [vmem:[#allocation8 + $0x6a4] ss:$24 sps:$4 sm:$0xff]  }
0x1e61   : > { %10003 = vmatpush1.bf16.msra.mxu0 %v13428_v12  ;;  %v13518_v12 = vld [vmem:[#allocation8 + $0x6a0] ss:$24 sps:$4 sm:$0xff]  }
0x1e62   : > { %10004 = vmatprep.subr.bf16.mxu0 %v13433_v11  ;;  %v13523_v11 = vld [vmem:[#allocation8 + $0x6d4] ss:$24 sps:$4 sm:$0xff]  }
0x1e65   : > { %10005 = vmatpush1.bf16.msra.mxu0 %v13431_v7  ;;  %v13521_v7 = vld [vmem:[#allocation8 + $0x6d0] ss:$24 sps:$4 sm:$0xff]  }
0x1e66   : > { %10006 = vmatprep.subr.bf16.mxu0 %v13436_v35  ;;  %v13526_v35 = vld [vmem:[#allocation8 + $0x704] ss:$24 sps:$4 sm:$0xff]  }
0x1e69   : > { %10007 = vmatpush1.bf16.msra.mxu0 %v13434_v4  ;;  %v13529_v4 = vld [vmem:[#allocation8 + $0x734] ss:$24 sps:$4 sm:$0xff]  }
0x1e6a   : > { %10008 = vmatprep.subr.bf16.mxu0 %v13439_v37  ;;  %v13532_v37 = vld [vmem:[#allocation8 + $0x764] ss:$24 sps:$4 sm:$0xff]  }
0x1e6d   : > { %10009 = vmatpush1.bf16.msra.mxu0 %v13437_v39  ;;  %v13530_v39 = vld [vmem:[#allocation8 + $0x760] ss:$24 sps:$4 sm:$0xff]  }
0x1e6e   : > { %10010 = vmatprep.subr.bf16.mxu0 %v13442_v13  ;;  %v13535_v13 = vld [vmem:[#allocation8 + $0x794] ss:$24 sps:$4 sm:$0xff]  }
0x1e71   : > { %10011 = vmatpush1.bf16.msra.mxu0 %v13440_v14  ;;  %v13533_v14 = vld [vmem:[#allocation8 + $0x790] ss:$24 sps:$4 sm:$0xff]  }
0x1e72   : > { %10012 = vmatprep.subr.bf16.mxu0 %v13445_v62  ;;  %v13538_v62 = vld [vmem:[#allocation8 + $0x7c4] ss:$24 sps:$4 sm:$0xff]  }
0x1e75   : > { %10013 = vmatpush1.bf16.msra.mxu0 %v13443_v15  ;;  %v13536_v15 = vld [vmem:[#allocation8 + $0x7c0] ss:$24 sps:$4 sm:$0xff]  }
0x1e76   : > { %10014 = vmatprep.subr.bf16.mxu0 %v13448_v5  ;;  %v13541_v5 = vld [vmem:[#allocation8 + $0x7f4] ss:$24 sps:$4 sm:$0xff]  }
0x1e79   : > { %10015 = vmatpush1.bf16.msra.mxu0 %v13446_v63  ;;  %v13539_v63 = vld [vmem:[#allocation8 + $0x7f0] ss:$24 sps:$4 sm:$0xff]  }
0x1e7a   : > { %10016 = vmatprep.subr.bf16.mxu0 %v13451_v17  ;;  %v13544_v17 = vld [vmem:[#allocation8 + $0x824] ss:$24 sps:$4 sm:$0xff]  }
0x1e7d   : > { %10017 = vmatpush1.bf16.msra.mxu0 %v13449_v18  ;;  %v13542_v18 = vld [vmem:[#allocation8 + $0x820] ss:$24 sps:$4 sm:$0xff]  }
0x1e7e   : > { %10018 = vmatprep.subr.bf16.mxu0 %v13454_v46  ;;  %v13547_v46 = vld [vmem:[#allocation8 + $0x854] ss:$24 sps:$4 sm:$0xff]  }
0x1e81   : > { %10019 = vmatpush1.bf16.msra.mxu0 %v13452_v43  ;;  %v13545_v43 = vld [vmem:[#allocation8 + $0x850] ss:$24 sps:$4 sm:$0xff]  }
0x1e82   : > { %10020 = vmatprep.subr.bf16.mxu0 %v13457_v19  ;;  %v13550_v19 = vld [vmem:[#allocation8 + $0x884] ss:$24 sps:$4 sm:$0xff]  }
0x1e85   : > { %10021 = vmatpush1.bf16.msra.mxu0 %v13455_v20  ;;  %v13548_v20 = vld [vmem:[#allocation8 + $0x880] ss:$24 sps:$4 sm:$0xff]  }
0x1e86   : > { %10022 = vmatprep.subr.bf16.mxu0 %v13460_v21  ;;  %v13553_v21 = vld [vmem:[#allocation8 + $0x8b4] ss:$24 sps:$4 sm:$0xff]  }
0x1e89   : > { %10023 = vmatpush1.bf16.msra.mxu0 %v13458_v22  ;;  %v13551_v22 = vld [vmem:[#allocation8 + $0x8b0] ss:$24 sps:$4 sm:$0xff]  }
0x1e8a   : > { %10033 = vmatprep.subr.bf16.mxu0 %v13463_v23  ;;  %v13556_v23 = vld [vmem:[#allocation8 + $0x8e4] ss:$24 sps:$4 sm:$0xff]  }
0x1e8c   : > { %10025 = vmatmul.mubr.bf16.vlgmr.msra.gmra.mrb[24].mxu0 %v14425_v26  ;;  %v13476_v26 = vld [vmem:[#allocation8 + $0x400] ss:$24 sps:$4 sm:$0xff]  }
0x1e8d   : > { %10034 = vmatpush1.bf16.msra.mxu0 %v13461_v24  ;;  %10065 = vmatprep.mubr.bf16.mxu0 %v14436_v57  ;;  %v13479_v57 = vld [vmem:[#allocation8 + $0x430] ss:$24 sps:$4 sm:$0xff]   ;;  %v13554_v24 = vld [vmem:[#allocation8 + $0x8e0] ss:$24 sps:$4 sm:$0xff]  }
0x1e8e   : > { %10035 = vmatprep.subr.bf16.mxu0 %v13466_v25  ;;  %v8257_v25 = vsub.s32 0, %v14158_v45 }
0x1e91   : > { %10036 = vmatpush1.bf16.msra.mxu0 %v13464_v29  ;;  %v8265_v29 = vsub.s32 2, %v14158_v45 }
0x1e92   : > { %10037 = vmatprep.subr.bf16.mxu0 %v13469_v30  ;;  %v8253_v30 = vld [vmem:[#allocation9] sm:$0x3f] }
0x1e95   : > { %10038 = vmatpush1.bf16.msra.mxu0 %v13467_v8  ;;  %v8261_v8 = vsub.s32 1, %v14158_v45 }
0x1e96   : > { %10039 = vmatprep.subr.bf16.mxu0 %v13472_v32  ;;  %v8269_v32 = vsub.s32 3, %v14158_v45 }
0x1e99   : > { %10040 = vmatpush1.bf16.msra.mxu0 %v13470_v52  ;;  %v8258_v52 = vrot.slane %v8253_v30, %v8257_v25 }
0x1e9a   : > { %10041 = vmatprep.subr.bf16.mxu0 %v13475_v38  ;;  %v8266_v38 = vrot.slane %v8253_v30, %v8265_v29 }
0x1e9d   : > { %10042 = vmatpush1.bf16.msra.mxu0 %v13473_v40  ;;  %v8262_v40 = vrot.slane %v8253_v30, %v8261_v8 }
0x1e9e   : > { %10043 = vmatprep.subr.bf16.mxu0 %v13478_v6  ;;  %v8270_v6 = vrot.slane %v8253_v30, %v8269_v32 }
0x1ea1   : > { %10044 = vmatpush1.bf16.msra.mxu0 %v13476_v26 }
0x1ea2   : > { %10045 = vmatprep.subr.bf16.mxu0 %v13481_v42 }
0x1ea5   : > { %10046 = vmatpush1.bf16.msra.mxu0 %v13479_v57 }
0x1ea6   : > { %10047 = vmatprep.subr.bf16.mxu0 %v13484_v44 }
0x1ea9   : > { %10048 = vmatpush1.bf16.msra.mxu0 %v13482_v48 }
0x1eaa   : > { %10049 = vmatprep.subr.bf16.mxu0 %v13487_v49 }
0x1ead   : > { %10050 = vmatpush1.bf16.msra.mxu0 %v13485_v50 }
0x1eae   : > { %10051 = vmatprep.subr.bf16.mxu0 %v13490_v54 }
0x1eb1   : > { %10052 = vmatpush1.bf16.msra.mxu0 %v13488_v55 }
0x1eb2   : > { %10053 = vmatprep.subr.bf16.mxu0 %v13493_v28 }
0x1eb5   : > { %10054 = vmatpush1.bf16.msra.mxu0 %v13491_v56 }
0x1eb6   : > { %10055 = vmatprep.subr.bf16.mxu0 %v13496_v27  ;;  %v8273_v27 = vsub.s32 4, %v14158_v45 }
0x1eb9   : > { %10056 = vmatpush1.bf16.msra.mxu0 %v13494_v61  ;;  %v8277_v61 = vsub.s32 5, %v14158_v45 }
0x1eba   : > { %10057 = vmatprep.subr.bf16.mxu0 %v13499_v33  ;;  %v8274_v33 = vrot.slane %v8253_v30, %v8273_v27 }
0x1ebd   : > { %10058 = vmatpush1.bf16.msra.mxu0 %v13497_v59  ;;  %v8278_v59 = vrot.slane %v8253_v30, %v8277_v61 }
0x1ebe   : > { %10059 = vmatprep.subr.bf16.mxu0 %v13502_v34 }
0x1ec1   : > { %10060 = vmatpush1.bf16.msra.mxu0 %v13500_v60 }
0x1ec2   : > { %10061 = vmatprep.subr.bf16.mxu0 %v13505_v16 }
0x1ec5   : > { %10062 = vmatpush1.bf16.msra.mxu0 %v13503_v41 }
0x1ec6   : > { %10063 = vmatprep.subr.bf16.mxu0 %v13508_v36 }
0x1ec9   : > { %10064 = vmatpush1.bf16.msra.mxu0 %v13506_v53 }
0x1eca   : > { %10074 = vmatprep.subr.bf16.mxu0 %v13511_v51 }
0x1ecc   : > { %10066 = vmatmul.mubr.bf16.vlgmr.msra.gmra.mrb[24].mxu0 %v14442_v47  ;;  %v13524_v47 = vld [vmem:[#allocation8 + $0x700] ss:$24 sps:$4 sm:$0xff]  }
0x1ecd   : > { %10075 = vmatpush1.bf16.msra.mxu0 %v13509_v58  ;;  %10106 = vmatprep.mubr.bf16.mxu0 %v14452_v0  ;;  %v13527_v0 = vld [vmem:[#allocation8 + $0x730] ss:$24 sps:$4 sm:$0xff]  }
0x1ece   : > { %10076 = vmatprep.subr.bf16.mxu0 %v13514_v1 }
0x1ed1   : > { %10077 = vmatpush1.bf16.msra.mxu0 %v13512_v2 }
0x1ed2   : > { %10078 = vmatprep.subr.bf16.mxu0 %v13517_v3 }
0x1ed5   : > { %10079 = vmatpush1.bf16.msra.mxu0 %v13515_v9 }
0x1ed6   : > { %10080 = vmatprep.subr.bf16.mxu0 %v13520_v10 }
0x1ed9   : > { %10081 = vmatpush1.bf16.msra.mxu0 %v13518_v12 }
0x1eda   : > { %10082 = vmatprep.subr.bf16.mxu0 %v13523_v11 }
0x1edd   : > { %10083 = vmatpush1.bf16.msra.mxu0 %v13521_v7 }
0x1ede   : > { %10084 = vmatprep.subr.bf16.mxu0 %v13526_v35 }
0x1ee1   : > { %10085 = vmatpush1.bf16.msra.mxu0 %v13524_v47 }
0x1ee2   : > { %10086 = vmatprep.subr.bf16.mxu0 %v13529_v4 }
0x1ee5   : > { %10087 = vmatpush1.bf16.msra.mxu0 %v13527_v0 }
0x1ee6   : > { %10088 = vmatprep.subr.bf16.mxu0 %v13532_v37 }
0x1ee9   : > { %10089 = vmatpush1.bf16.msra.mxu0 %v13530_v39 }
0x1eea   : > { %10090 = vmatprep.subr.bf16.mxu0 %v13535_v13 }
0x1eed   : > { %10091 = vmatpush1.bf16.msra.mxu0 %v13533_v14 }
0x1eee   : > { %10092 = vmatprep.subr.bf16.mxu0 %v13538_v62 }
0x1ef1   : > { %10093 = vmatpush1.bf16.msra.mxu0 %v13536_v15 }
0x1ef2   : > { %10094 = vmatprep.subr.bf16.mxu0 %v13541_v5 }
0x1ef5   : > { %10095 = vmatpush1.bf16.msra.mxu0 %v13539_v63 }
0x1ef6   : > { %10096 = vmatprep.subr.bf16.mxu0 %v13544_v17 }
0x1ef9   : > { %10097 = vmatpush1.bf16.msra.mxu0 %v13542_v18 }
0x1efa   : > { %10098 = vmatprep.subr.bf16.mxu0 %v13547_v46 }
0x1efd   : > { %10099 = vmatpush1.bf16.msra.mxu0 %v13545_v43 }
0x1efe   : > { %10100 = vmatprep.subr.bf16.mxu0 %v13550_v19 }
0x1f01   : > { %10101 = vmatpush1.bf16.msra.mxu0 %v13548_v20 }
0x1f02   : > { %10102 = vmatprep.subr.bf16.mxu0 %v13553_v21 }
0x1f05   : > { %10103 = vmatpush1.bf16.msra.mxu0 %v13551_v22 }
0x1f06   : > { %10104 = vmatprep.subr.bf16.mxu0 %v13556_v23 }
0x1f09   : > { %10105 = vmatpush1.bf16.msra.mxu0 %v13554_v24 }
0x1f0c   : > { %10107 = vmatmul.mubr.bf16.vlgmr.msra.gmra.mrb[24].mxu0 %v14450_v31 }
0x1f1f   : > { %v9862_v26 = vpop.f32.mrb[20].mxu0  ;;  %v9985_v42 = vpop.f32.mrb[116].mxu1 }
0x1f20   : > { %v11637_v57 = vadd.f32 %v9862_v26, %v8258_v52  ;;  %v11639_v44 = vadd.f32 %v9985_v42, %v8266_v38  ;;  %v9864_v48 = vpop.f32.mrb[21].mxu0  ;;  %v9987_v31 = vpop.f32.mrb[117].mxu1 }
0x1f21   : > { %v11638_v49 = vadd.f32 %v9864_v48, %v8262_v40  ;;  %v11640_v50 = vadd.f32 %v9987_v31, %v8270_v6  ;;  %v9866_v54 = vpop.f32.mrb[22].mxu0  ;;  %v9989_v55 = vpop.f32.mrb[118].mxu1 }
0x1f22   : > { %10115 = vst [vmem:[%s255_s23] sm:$0xff] %v11637_v57  ;;  %10117 = vst [vmem:[%s255_s23 + $0x10] sm:$0xff] %v11639_v44  ;;  %v9867_v28 = vpop.f32.mrb[23].mxu0  ;;  %v9990_v56 = vpop.f32.mrb[119].mxu1 }
0x1f23   : > { %10116 = vst [vmem:[%s255_s23 + $0x8] sm:$0xff] %v11638_v49  ;;  %10118 = vst [vmem:[%s255_s23 + $0x18] sm:$0xff] %v11640_v50 }
0x1fdf   : > { %v10108_v34 = vpop.f32.mrb[24].mxu0 }
0x1fe0   : > { %v11641_v60 = vadd.f32 %v10108_v34, %v8274_v33  ;;  %v10110_v16 = vpop.f32.mrb[25].mxu0 }
0x1fe1   : > { %v11642_v41 = vadd.f32 %v10110_v16, %v8278_v59  ;;  %v10112_v36 = vpop.f32.mrb[26].mxu0 }
0x1fe2   : > { %10119 = vst [vmem:[%s255_s23 + $0x20] sm:$0xff] %v11641_v60  ;;  %v10113_v45 = vpop.f32.mrb[27].mxu0 }
0x1fe3   : > { %10120 = vst [vmem:[%s255_s23 + $0x28] sm:$0xff] %v11642_v41 }
0x1fe4   : > { %13732 = shalt.err (!%p13729_p4)
}
0x1fe5   : > { %s13733_s14 = scalar_lea.hbm %s14476_s8, 768  ;;  %s13737_s28 = scalar_lea.hbm %s14524_s4, 1536 }
0x1fe6   : > { %p13734_p0 = scmp.ne.s32.totalorder %s14476_s8, %s13733_s14  ;;  %p13738_p8 = scmp.lt.u32.totalorder %s14476_s8, %s14524_s4 }
0x1fe7   : > { %p13739_p13 = scmp.lt.u32.totalorder %s13737_s28, %s13733_s14  ;;  %p13741_p10 = scmp.lt.u32.totalorder %s13733_s14, %s14476_s8 }
0x1fe8   : > { %p13735_p9 = pnand %p13734_p0, %p13974_p5 }
0x1fe9   : > { %p13740_p6 = por %p13739_p13, %p13738_p8 }
0x1fea   : > { %p13736_p7 = pneg %p13735_p9 }
0x1feb   : > { %p13742_p3 = por %p13741_p10, %p13740_p6 }
0x1fed   : > { %p13743_p11 = pnand %p13742_p3, %p13736_p7 }
0x1fef   : > { %13746 = shalt.err (!%p13743_p11)
}
0x1ff0   : > { %11753 = dma.vmem_to_hbm [thread:$0]  (%p13974_p5), %s14478_s30, 768, %s14476_s8, %s10122_s19  }
0x1ff1 PF: > { %s10148_s21 = sand.u32 1, %s13781_s15   ;;  %p14544_p12 = scmp.ne.s32.totalorder %s14529_s22, 0 }
0x1ff2   : > { %p14545_p2 = scmp.ge.s32.totalorder %s13793_s18, 2  ;;  %s10149_s23 = scalar_lea.sflag [#allocation5], %s10148_s21 }
0x1ff4   : > { %p11770_p1 = pnand %p14545_p2, %p14544_p12 }
0x1ff6   : > { %13776 = dma.done.wait (!%p11770_p1), %s10149_s23, 768  }
0x1ff7   : > { %13778 = vsyncadd (!%p11770_p1), %s10149_s23, 4294966528  ;;  %p19_p4 = scmp.ge.s32.totalorder %s13942_s20, 4   ;;  %s14546_s15 = smov %s13785_s16 }
0x1ff8   : > { %s14547_s16 = smov %s13789_s17  ;;  %s14548_s17 = smov %s13970_s26 }
0x1ff9   : > { %s14549_s18 = smov %s13942_s20  ;;  %21 = sbr.rel (!%p19_p4) target bundleno = 7 (0x7), region = 93 }
0x2000   :  { %10154 = vsyncpa [#allocation4], 1 }
0x2001   :  { %10156 = vsyncpa [#allocation4 + $0x1], 1 }
0x2002   :  { %10157 = vsyncpa [#allocation7], 1 }
0x2003   :  { %10158 = vsyncpa [#allocation10], 1 }
0x2004   :  { %10159 = vsyncpa [#allocation5], 1 }
0x2005   :  { %10161 = vsyncpa [#allocation5 + $0x1], 1 }

</bundles_post_ra>
